<compile_context>
chip_gen: v7x
topology: tpu7x:2x2x1
jax: 0.10.0
libtpu: 0.0.40
codegen_flags: <defaults>
</compile_context>

<pallas_src>
import functools

import jax
import jax.numpy as jnp
from jax.experimental import pallas as pl
from jax.experimental.pallas import tpu as pltpu

RESOLUTION = 48  # target size of layers.interpolate(..., size=(48, 48))


# --------------------------------------------------------------------------
# Host-side helpers (pure jnp, run in the wrapper / constant-folded by XLA)
# --------------------------------------------------------------------------
def _interp_matrix(out_size, in_size):
    """align_corners=True bilinear interpolation matrix (out_size, in_size)."""
    if out_size == 1:
        src = jnp.zeros((1,), jnp.float32)
    else:
        src = jnp.arange(out_size, dtype=jnp.float32) * (in_size - 1) / (out_size - 1)
    i0 = jnp.clip(jnp.floor(src).astype(jnp.int32), 0, in_size - 1)
    i1 = jnp.clip(i0 + 1, 0, in_size - 1)
    w1 = src - i0.astype(jnp.float32)
    w0 = 1.0 - w1
    rows = jnp.arange(out_size)
    m = jnp.zeros((out_size, in_size), jnp.float32)
    m = m.at[rows, i0].add(w0)
    m = m.at[rows, i1].add(w1)
    return m


def _resize_operator(H, W, resol):
    """Pixel-shuffle (k=2,s=2 deconv taps) + bilinear resize folded into one
    linear operator of shape (4*H*W, resol*resol).

    Row index = ab*H*W + (h*W + w) with ab = a*2 + b (deconv tap), column
    index = i*resol + j (output pixel); value = A[i, 2h+a] * B[j, 2w+b].
    """
    A = _interp_matrix(resol, 2 * H)      # (resol, 2H)
    B = _interp_matrix(resol, 2 * W)      # (resol, 2W)
    blocks = []
    for a in (0, 1):
        for b in (0, 1):
            m = jnp.einsum("ih,jw->hwij", A[:, a::2], B[:, b::2])   # (H, W, R, R)
            blocks.append(m.reshape(H * W, resol * resol))
    return jnp.concatenate(blocks, axis=0)                          # (4HW, R*R)


def _edge_masks(resol):
    """Row masks (2, resol*resol) for the 1x3 conv: j>=1 and j<=resol-2."""
    j = jnp.arange(resol * resol, dtype=jnp.int32) % resol
    has_left = (j >= 1).astype(jnp.float32)
    has_right = (j <= resol - 2).astype(jnp.float32)
    return jnp.stack([has_left, has_right], axis=0)


# --------------------------------------------------------------------------
# The fused kernel: one image per grid step, everything in VMEM.
# --------------------------------------------------------------------------
def _predictor_kernel(resol, x_ref, wxy_ref, bxy_ref, wt_ref, bt_ref, m_ref,
                      wcat_ref, bcat_ref, wtap_ref, bdir_ref, mask_ref, o_ref):
    f32 = jnp.float32
    D = wcat_ref.shape[1]

    x = x_ref[0]                                                    # (Cin, S)

    # 1) bo_input_xy : 1x1 conv (channel mix on the MXU)
    h = jnp.dot(wxy_ref[...], x, preferred_element_type=f32) + bxy_ref[...]

    # 2) conv5_bo_xy : ConvTranspose2d(k=2, s=2) channel/tap mixing.
    #    Rows of `t` are (a, b, co); columns are the flattened (h, w) grid.
    t = jnp.dot(wt_ref[...], h, preferred_element_type=f32) + bt_ref[...]   # (4D, S)

    # 3) pixel shuffle + bilinear resize to (48, 48), align_corners=True,
    #    as ONE matmul with the precomputed operator. Stack the four (a, b)
    #    row blocks side by side in lanes -> (D, 4S).
    t_stack = jnp.concatenate(
        [t[0 * D:1 * D], t[1 * D:2 * D], t[2 * D:3 * D], t[3 * D:4 * D]], axis=1)
    r = jnp.dot(t_stack, m_ref[...], preferred_element_type=f32)            # (D, U)

    # 4) bo_input_1_1 / bo_input_2_1 merged into one matmul
    #    (rows 0:D -> x branch, rows D:2D -> y branch).
    xy = jnp.dot(wcat_ref[...], r, preferred_element_type=f32) + bcat_ref[...]  # (2D, U)

    # 5) conv5_bo_x (3x1) / conv5_bo_y (1x3): channel reduction on the MXU via
    #    a block-diagonal tap-weight matrix, then shift-adds along the lane
    #    (flattened spatial) axis. One image row == `resol` lanes.
    taps = jnp.dot(wtap_ref[...], xy, preferred_element_type=f32)           # (6, U)
    U = taps.shape[1]
    msk = mask_ref[...]                                                     # (2, U)
    zrow = jnp.zeros((1, resol), f32)
    zone = jnp.zeros((1, 1), f32)

    # 3x1 conv along H: neighbours are +/- resol lanes away; the zero blocks
    # implement the (1, 0) padding at i == 0 / i == resol-1 exactly.
    out_x = (jnp.concatenate([zrow, taps[0:1, :U - resol]], axis=1)
             + taps[1:2]
             + jnp.concatenate([taps[2:3, resol:], zrow], axis=1))

    # 1x3 conv along W: neighbours are +/- 1 lane away; the masks zero the
    # wrap-around across image rows (padding at j == 0 / j == resol-1).
    out_y = (msk[0:1] * jnp.concatenate([zone, taps[3:4, :U - 1]], axis=1)
             + taps[4:5]
             + msk[1:2] * jnp.concatenate([taps[5:6, 1:], zone], axis=1))

    o_ref[0] = (jnp.concatenate([out_x, out_y], axis=0) + bdir_ref[...]).astype(o_ref.dtype)


# --------------------------------------------------------------------------
# Forward wrapper (NCHW in, NCHW out, matching the PyTorch module)
# --------------------------------------------------------------------------
@jax.jit
def boundary_predictor_forward(ft_nchw, params):
    N, Cin, H, W = ft_nchw.shape
    D = params["bo_input_1_1_w"].shape[0]
    S = H * W
    R = RESOLUTION
    U = R * R
    f32 = jnp.float32

    # --- kernel operands (resize operator / masks depend only on shapes and
    #     are constant-folded; weight rearrangements are tiny) --------------
    wxy = params["bo_input_xy_w"].astype(f32)                          # (Cin, Cin)
    bxy = params["bo_input_xy_b"].reshape(Cin, 1).astype(f32)
    # ConvTranspose2d weight (in, out, kh, kw) -> rows (a, b, co), cols ci
    wt = jnp.transpose(params["conv5_bo_xy_w"], (2, 3, 1, 0)).reshape(4 * D, Cin).astype(f32)
    bt = jnp.tile(params["conv5_bo_xy_b"], 4).reshape(4 * D, 1).astype(f32)
    m_op = _resize_operator(H, W, R).astype(f32)                       # (4S, U)
    wcat = jnp.concatenate([params["bo_input_1_1_w"],
                            params["bo_input_2_1_w"]], axis=0).astype(f32)        # (2D, D)
    bcat = jnp.concatenate([params["bo_input_1_1_b"],
                            params["bo_input_2_1_b"]]).reshape(2 * D, 1).astype(f32)
    wx_t = params["conv5_bo_x_w"][0, :, :, 0].T                        # (3, D)
    wy_t = params["conv5_bo_y_w"][0, :, 0, :].T                        # (3, D)
    zpad = jnp.zeros((3, D), f32)
    wtap = jnp.concatenate([jnp.concatenate([wx_t, zpad], axis=1),
                            jnp.concatenate([zpad, wy_t], axis=1)], axis=0).astype(f32)  # (6, 2D)
    bdir = jnp.stack([params["conv5_bo_x_b"][0],
                      params["conv5_bo_y_b"][0]]).reshape(2, 1).astype(f32)
    masks = _edge_masks(R)                                             # (2, U)

    # NCHW -> (N, Cin, H*W): channels in sublanes, spatial in lanes (no transpose).
    x = ft_nchw.reshape(N, Cin, S).astype(f32)

    out = pl.pallas_call(
        functools.partial(_predictor_kernel, R),
        out_shape=jax.ShapeDtypeStruct((N, 2, U), f32),
        grid_spec=pltpu.PrefetchScalarGridSpec(
            num_scalar_prefetch=0,
            grid=(N,),
            in_specs=[
                pl.BlockSpec((1, Cin, S), lambda n: (n, 0, 0)),
                pl.BlockSpec((Cin, Cin), lambda n: (0, 0)),
                pl.BlockSpec((Cin, 1), lambda n: (0, 0)),
                pl.BlockSpec((4 * D, Cin), lambda n: (0, 0)),
                pl.BlockSpec((4 * D, 1), lambda n: (0, 0)),
                pl.BlockSpec((4 * S, U), lambda n: (0, 0)),
                pl.BlockSpec((2 * D, D), lambda n: (0, 0)),
                pl.BlockSpec((2 * D, 1), lambda n: (0, 0)),
                pl.BlockSpec((6, 2 * D), lambda n: (0, 0)),
                pl.BlockSpec((2, 1), lambda n: (0, 0)),
                pl.BlockSpec((2, U), lambda n: (0, 0)),
            ],
            out_specs=pl.BlockSpec((1, 2, U), lambda n: (n, 0, 0)),
        ),
        compiler_params=pltpu.CompilerParams(
            dimension_semantics=("parallel",),        # v7x: one image per TensorCore
            vmem_limit_bytes=32 * 1024 * 1024,        # resize operator is double-buffered
        ),
    )(x, wxy, bxy, wt, bt, m_op, wcat, bcat, wtap, bdir, masks)

    out = out.reshape(N, 2, R, R)
    return out[:, 0:1], out[:, 1:2]                    # (N,1,48,48), (N,1,48,48)


# --------------------------------------------------------------------------
# Parameter init (PyTorch layouts; kaiming fan_out / zero bias like the module)
# --------------------------------------------------------------------------
def init_params(key, num_inputs, dim_reduced):
    ks = jax.random.split(key, 6)
    p = {}
    std = (2.0 / num_inputs) ** 0.5                               # Conv2d 1x1, fan_out
    p["bo_input_xy_w"] = std * jax.random.normal(ks[0], (num_inputs, num_inputs), jnp.float32)
    p["bo_input_xy_b"] = jnp.zeros((num_inputs,), jnp.float32)
    std = (2.0 / (num_inputs * 4)) ** 0.5                          # ConvTranspose2d 2x2
    p["conv5_bo_xy_w"] = std * jax.random.normal(ks[1], (num_inputs, dim_reduced, 2, 2), jnp.float32)
    p["conv5_bo_xy_b"] = jnp.zeros((dim_reduced,), jnp.float32)
    std = (2.0 / dim_reduced) ** 0.5                               # Conv2d 1x1
    p["bo_input_1_1_w"] = std * jax.random.normal(ks[2], (dim_reduced, dim_reduced), jnp.float32)
    p["bo_input_1_1_b"] = jnp.zeros((dim_reduced,), jnp.float32)
    p["bo_input_2_1_w"] = std * jax.random.normal(ks[3], (dim_reduced, dim_reduced), jnp.float32)
    p["bo_input_2_1_b"] = jnp.zeros((dim_reduced,), jnp.float32)
    std = (2.0 / 3.0) ** 0.5                                       # Conv2d (3,1) / (1,3)
    p["conv5_bo_x_w"] = std * jax.random.normal(ks[4], (1, dim_reduced, 3, 1), jnp.float32)
    p["conv5_bo_x_b"] = jnp.zeros((1,), jnp.float32)
    p["conv5_bo_y_w"] = std * jax.random.normal(ks[5], (1, dim_reduced, 1, 3), jnp.float32)
    p["conv5_bo_y_b"] = jnp.zeros((1,), jnp.float32)
    return p


# --------------------------------------------------------------------------
# Plain-JAX reference of the PyTorch forward (for correctness cross-check)
# --------------------------------------------------------------------------
def _reference_forward(ft, params):
    hp = jax.lax.Precision.HIGHEST
    N, Cin, H, W = ft.shape
    D = params["bo_input_1_1_w"].shape[0]
    R = RESOLUTION
    h = jnp.einsum("oc,nchw->nohw", params["bo_input_xy_w"], ft, precision=hp)
    h = h + params["bo_input_xy_b"][None, :, None, None]
    t = jnp.einsum("nchw,cdab->ndhawb", h, params["conv5_bo_xy_w"], precision=hp)
    t = t.reshape(N, D, 2 * H, 2 * W) + params["conv5_bo_xy_b"][None, :, None, None]
    A = _interp_matrix(R, 2 * H)
    B = _interp_matrix(R, 2 * W)
    ft2 = jnp.einsum("ip,ndpq,jq->ndij", A, t, B, precision=hp)
    xb = jnp.einsum("oc,ncij->noij", params["bo_input_1_1_w"], ft2, precision=hp)
    xb = xb + params["bo_input_1_1_b"][None, :, None, None]
    yb = jnp.einsum("oc,ncij->noij", params["bo_input_2_1_w"], ft2, precision=hp)
    yb = yb + params["bo_input_2_1_b"][None, :, None, None]
    xbp = jnp.pad(xb, ((0, 0), (0, 0), (1, 1), (0, 0)))
    wx = params["conv5_bo_x_w"]
    x_out = sum(jnp.einsum("ncij,c->nij", xbp[:, :, k:k + R, :], wx[0, :, k, 0], precision=hp)
                for k in range(3))
    x_out = x_out[:, None] + params["conv5_bo_x_b"][0]
    ybp = jnp.pad(yb, ((0, 0), (0, 0), (0, 0), (1, 1)))
    wy = params["conv5_bo_y_w"]
    y_out = sum(jnp.einsum("ncij,c->nij", ybp[:, :, :, k:k + R], wy[0, :, 0, k], precision=hp)
                for k in range(3))
    y_out = y_out[:, None] + params["conv5_bo_y_b"][0]
    return x_out, y_out


if __name__ == "__main__":
    key = jax.random.PRNGKey(0)
    k_params, k_x = jax.random.split(key)

    # Small config consistent with the module.
    NUM_INPUTS, DIM_REDUCED = 8, 16
    params = init_params(k_params, NUM_INPUTS, DIM_REDUCED)

    ft = jax.random.normal(k_x, (2, NUM_INPUTS, 16, 16), jnp.float32)  # NCHW

    x_out, y_out = boundary_predictor_forward(ft, params)
    jax.block_until_ready((x_out, y_out))

    assert x_out.shape == (2, 1, RESOLUTION, RESOLUTION), x_out.shape
    assert y_out.shape == (2, 1, RESOLUTION, RESOLUTION), y_out.shape
    assert bool(jnp.all(jnp.isfinite(x_out))) and bool(jnp.all(jnp.isfinite(y_out)))

    # Cross-check the fused kernel against the plain-JAX reference.
    x_ref, y_ref = _reference_forward(ft, params)
    assert bool(jnp.allclose(x_out, x_ref, rtol=2e-2, atol=2e-2)), \
        float(jnp.max(jnp.abs(x_out - x_ref)))
    assert bool(jnp.allclose(y_out, y_ref, rtol=2e-2, atol=2e-2)), \
        float(jnp.max(jnp.abs(y_out - y_ref)))

    print("KERNEL_OK")
</pallas_src>

<mosaic_0001>
module attributes {stable_mosaic.version = 11 : i64} {
  func.func private @main(%arg0: i32) attributes {dimension_semantics = [#tpu.dimension_semantics<core_parallel>], iteration_bounds = array<i64: 2>, tpu.core_type = #tpu.core_type<sc_scalar_subcore>, window_params = []} {
    return
  }
}

module attributes {stable_mosaic.version = 11 : i64} {
  func.func private @main(%arg0: i32) attributes {dimension_semantics = [#tpu.dimension_semantics<core_parallel>], iteration_bounds = array<i64: 2>, tpu.core_type = #tpu.core_type<sc_scalar_subcore>, window_params = []} {
    return
  }
}

module attributes {stable_mosaic.version = 11 : i64} {
  func.func @_predictor_kernel(%arg0: i32, %arg1: memref<1x8x256xf32, #tpu.memory_space<vmem>>, %arg2: memref<8x8xf32, #tpu.memory_space<vmem>>, %arg3: memref<8x1xf32, #tpu.memory_space<vmem>>, %arg4: memref<64x8xf32, #tpu.memory_space<vmem>>, %arg5: memref<64x1xf32, #tpu.memory_space<vmem>>, %arg6: memref<1024x2304xf32, #tpu.memory_space<vmem>>, %arg7: memref<32x16xf32, #tpu.memory_space<vmem>>, %arg8: memref<32x1xf32, #tpu.memory_space<vmem>>, %arg9: memref<6x32xf32, #tpu.memory_space<vmem>>, %arg10: memref<2x1xf32, #tpu.memory_space<vmem>>, %arg11: memref<2x2304xf32, #tpu.memory_space<vmem>>, %arg12: memref<1x2x2304xf32, #tpu.memory_space<vmem>>) attributes {dimension_semantics = [#tpu.dimension_semantics<parallel>], iteration_bounds = array<i64: 2>, scalar_prefetch = 0 : i64, scratch_operands = 0 : i64, tpu.core_type = #tpu.core_type<tc>, window_params = [{transform_indices = @transform_0, window_bounds = array<i64: 1, 8, 256>}, {pipeline_mode = #tpu.pipeline_mode<synchronous>, transform_indices = @transform_1, window_bounds = array<i64: 8, 8>}, {pipeline_mode = #tpu.pipeline_mode<synchronous>, transform_indices = @transform_2, window_bounds = array<i64: 8, 1>}, {pipeline_mode = #tpu.pipeline_mode<synchronous>, transform_indices = @transform_3, window_bounds = array<i64: 64, 8>}, {pipeline_mode = #tpu.pipeline_mode<synchronous>, transform_indices = @transform_4, window_bounds = array<i64: 64, 1>}, {pipeline_mode = #tpu.pipeline_mode<synchronous>, transform_indices = @transform_5, window_bounds = array<i64: 1024, 2304>}, {pipeline_mode = #tpu.pipeline_mode<synchronous>, transform_indices = @transform_6, window_bounds = array<i64: 32, 16>}, {pipeline_mode = #tpu.pipeline_mode<synchronous>, transform_indices = @transform_7, window_bounds = array<i64: 32, 1>}, {pipeline_mode = #tpu.pipeline_mode<synchronous>, transform_indices = @transform_8, window_bounds = array<i64: 6, 32>}, {pipeline_mode = #tpu.pipeline_mode<synchronous>, transform_indices = @transform_9, window_bounds = array<i64: 2, 1>}, {pipeline_mode = #tpu.pipeline_mode<synchronous>, transform_indices = @transform_10, window_bounds = array<i64: 2, 2304>}, {transform_indices = @transform_11, window_bounds = array<i64: 1, 2, 2304>}]} {
    %c0 = arith.constant 0 : index
    %c0_0 = arith.constant 0 : index
    %c0_1 = arith.constant 0 : index
    %0 = vector.load %arg1[%c0, %c0_0, %c0_1] : memref<1x8x256xf32, #tpu.memory_space<vmem>>, vector<1x8x256xf32>
    %1 = vector.shape_cast %0 : vector<1x8x256xf32> to vector<8x256xf32>
    %c0_2 = arith.constant 0 : index
    %c0_3 = arith.constant 0 : index
    %2 = vector.load %arg2[%c0_2, %c0_3] : memref<8x8xf32, #tpu.memory_space<vmem>>, vector<8x8xf32>
    %cst = arith.constant dense<0.000000e+00> : vector<8x256xf32>
    %3 = tpu.matmul %2, %1, %cst {dimension_numbers = #tpu.dot_dimension_numbers<[1], [0], [0], [1], [0, 0, 1, 1], [], []>} : vector<8x8xf32>, vector<8x256xf32>, vector<8x256xf32> -> vector<8x256xf32>
    %c0_4 = arith.constant 0 : index
    %c0_5 = arith.constant 0 : index
    %4 = vector.load %arg3[%c0_4, %c0_5] : memref<8x1xf32, #tpu.memory_space<vmem>>, vector<8x1xf32>
    %5 = vector.broadcast %4 : vector<8x1xf32> to vector<8x256xf32>
    %6 = arith.addf %3, %5 : vector<8x256xf32>
    %c0_6 = arith.constant 0 : index
    %c0_7 = arith.constant 0 : index
    %7 = vector.load %arg4[%c0_6, %c0_7] : memref<64x8xf32, #tpu.memory_space<vmem>>, vector<64x8xf32>
    %cst_8 = arith.constant dense<0.000000e+00> : vector<64x256xf32>
    %8 = tpu.matmul %7, %6, %cst_8 {dimension_numbers = #tpu.dot_dimension_numbers<[1], [0], [0], [1], [0, 0, 1, 1], [], []>} : vector<64x8xf32>, vector<8x256xf32>, vector<64x256xf32> -> vector<64x256xf32>
    %c0_9 = arith.constant 0 : index
    %c0_10 = arith.constant 0 : index
    %9 = vector.load %arg5[%c0_9, %c0_10] : memref<64x1xf32, #tpu.memory_space<vmem>>, vector<64x1xf32>
    %10 = vector.broadcast %9 : vector<64x1xf32> to vector<64x256xf32>
    %11 = arith.addf %8, %10 : vector<64x256xf32>
    %12 = vector.extract_strided_slice %11 {offsets = [0, 0], sizes = [16, 256], strides = [1, 1]} : vector<64x256xf32> to vector<16x256xf32>
    %13 = vector.extract_strided_slice %11 {offsets = [16, 0], sizes = [16, 256], strides = [1, 1]} : vector<64x256xf32> to vector<16x256xf32>
    %14 = vector.extract_strided_slice %11 {offsets = [32, 0], sizes = [16, 256], strides = [1, 1]} : vector<64x256xf32> to vector<16x256xf32>
    %15 = vector.extract_strided_slice %11 {offsets = [48, 0], sizes = [16, 256], strides = [1, 1]} : vector<64x256xf32> to vector<16x256xf32>
    %16 = tpu.concatenate %12, %13, %14, %15 in 1 : vector<16x256xf32>, vector<16x256xf32>, vector<16x256xf32>, vector<16x256xf32> -> vector<16x1024xf32>
    %c0_11 = arith.constant 0 : index
    %c0_12 = arith.constant 0 : index
    %17 = vector.load %arg6[%c0_11, %c0_12] : memref<1024x2304xf32, #tpu.memory_space<vmem>>, vector<1024x2304xf32>
    %cst_13 = arith.constant dense<0.000000e+00> : vector<16x2304xf32>
    %18 = tpu.matmul %16, %17, %cst_13 {dimension_numbers = #tpu.dot_dimension_numbers<[1], [0], [0], [1], [0, 0, 1, 1], [], []>} : vector<16x1024xf32>, vector<1024x2304xf32>, vector<16x2304xf32> -> vector<16x2304xf32>
    %c0_14 = arith.constant 0 : index
    %c0_15 = arith.constant 0 : index
    %19 = vector.load %arg7[%c0_14, %c0_15] : memref<32x16xf32, #tpu.memory_space<vmem>>, vector<32x16xf32>
    %cst_16 = arith.constant dense<0.000000e+00> : vector<32x2304xf32>
    %20 = tpu.matmul %19, %18, %cst_16 {dimension_numbers = #tpu.dot_dimension_numbers<[1], [0], [0], [1], [0, 0, 1, 1], [], []>} : vector<32x16xf32>, vector<16x2304xf32>, vector<32x2304xf32> -> vector<32x2304xf32>
    %c0_17 = arith.constant 0 : index
    %c0_18 = arith.constant 0 : index
    %21 = vector.load %arg8[%c0_17, %c0_18] : memref<32x1xf32, #tpu.memory_space<vmem>>, vector<32x1xf32>
    %22 = vector.broadcast %21 : vector<32x1xf32> to vector<32x2304xf32>
    %23 = arith.addf %20, %22 : vector<32x2304xf32>
    %c0_19 = arith.constant 0 : index
    %c0_20 = arith.constant 0 : index
    %24 = vector.load %arg9[%c0_19, %c0_20] : memref<6x32xf32, #tpu.memory_space<vmem>>, vector<6x32xf32>
    %cst_21 = arith.constant dense<0.000000e+00> : vector<6x2304xf32>
    %25 = tpu.matmul %24, %23, %cst_21 {dimension_numbers = #tpu.dot_dimension_numbers<[1], [0], [0], [1], [0, 0, 1, 1], [], []>} : vector<6x32xf32>, vector<32x2304xf32>, vector<6x2304xf32> -> vector<6x2304xf32>
    %c0_22 = arith.constant 0 : index
    %c0_23 = arith.constant 0 : index
    %26 = vector.load %arg11[%c0_22, %c0_23] : memref<2x2304xf32, #tpu.memory_space<vmem>>, vector<2x2304xf32>
    %cst_24 = arith.constant 0.000000e+00 : f32
    %27 = vector.broadcast %cst_24 : f32 to vector<1x48xf32>
    %cst_25 = arith.constant 0.000000e+00 : f32
    %28 = vector.broadcast %cst_25 : f32 to vector<1x1xf32>
    %29 = vector.extract_strided_slice %25 {offsets = [0, 0], sizes = [1, 2256], strides = [1, 1]} : vector<6x2304xf32> to vector<1x2256xf32>
    %30 = tpu.concatenate %27, %29 in 1 : vector<1x48xf32>, vector<1x2256xf32> -> vector<1x2304xf32>
    %31 = vector.extract_strided_slice %25 {offsets = [1, 0], sizes = [1, 2304], strides = [1, 1]} : vector<6x2304xf32> to vector<1x2304xf32>
    %32 = arith.addf %30, %31 : vector<1x2304xf32>
    %33 = vector.extract_strided_slice %25 {offsets = [2, 48], sizes = [1, 2256], strides = [1, 1]} : vector<6x2304xf32> to vector<1x2256xf32>
    %34 = tpu.concatenate %33, %27 in 1 : vector<1x2256xf32>, vector<1x48xf32> -> vector<1x2304xf32>
    %35 = arith.addf %32, %34 : vector<1x2304xf32>
    %36 = vector.extract_strided_slice %26 {offsets = [0, 0], sizes = [1, 2304], strides = [1, 1]} : vector<2x2304xf32> to vector<1x2304xf32>
    %37 = vector.extract_strided_slice %25 {offsets = [3, 0], sizes = [1, 2303], strides = [1, 1]} : vector<6x2304xf32> to vector<1x2303xf32>
    %38 = tpu.concatenate %28, %37 in 1 : vector<1x1xf32>, vector<1x2303xf32> -> vector<1x2304xf32>
    %39 = arith.mulf %36, %38 : vector<1x2304xf32>
    %40 = vector.extract_strided_slice %25 {offsets = [4, 0], sizes = [1, 2304], strides = [1, 1]} : vector<6x2304xf32> to vector<1x2304xf32>
    %41 = arith.addf %39, %40 : vector<1x2304xf32>
    %42 = vector.extract_strided_slice %26 {offsets = [1, 0], sizes = [1, 2304], strides = [1, 1]} : vector<2x2304xf32> to vector<1x2304xf32>
    %43 = vector.extract_strided_slice %25 {offsets = [5, 1], sizes = [1, 2303], strides = [1, 1]} : vector<6x2304xf32> to vector<1x2303xf32>
    %44 = tpu.concatenate %43, %28 in 1 : vector<1x2303xf32>, vector<1x1xf32> -> vector<1x2304xf32>
    %45 = arith.mulf %42, %44 : vector<1x2304xf32>
    %46 = arith.addf %41, %45 : vector<1x2304xf32>
    %47 = tpu.concatenate %35, %46 in 0 : vector<1x2304xf32>, vector<1x2304xf32> -> vector<2x2304xf32>
    %c0_26 = arith.constant 0 : index
    %c0_27 = arith.constant 0 : index
    %48 = vector.load %arg10[%c0_26, %c0_27] : memref<2x1xf32, #tpu.memory_space<vmem>>, vector<2x1xf32>
    %49 = vector.broadcast %48 : vector<2x1xf32> to vector<2x2304xf32>
    %50 = arith.addf %47, %49 : vector<2x2304xf32>
    %c0_28 = arith.constant 0 : index
    %c0_29 = arith.constant 0 : index
    %c0_30 = arith.constant 0 : index
    %51 = vector.load %arg12[%c0_28, %c0_29, %c0_30] : memref<1x2x2304xf32, #tpu.memory_space<vmem>>, vector<1x2x2304xf32>
    %52 = vector.shape_cast %51 : vector<1x2x2304xf32> to vector<2x2304xf32>
    %53 = vector.shape_cast %50 : vector<2x2304xf32> to vector<1x2x2304xf32>
    tpu.vector_store %arg12[%c0_28, %c0_29, %c0_30], %53 {strides = array<i32>} : memref<1x2x2304xf32, #tpu.memory_space<vmem>>, vector<1x2x2304xf32>,
    return
  }
  func.func @transform_0(%arg0: i32) -> (i32, i32, i32) {
    %c0_i32 = arith.constant 0 : i32
    %c0_i32_0 = arith.constant 0 : i32
    %c0_i32_1 = arith.constant 0 : i32
    return %arg0, %c0_i32, %c0_i32_0 : i32, i32, i32
  }
  func.func @transform_1(%arg0: i32) -> (i32, i32) {
    %c0_i32 = arith.constant 0 : i32
    %c0_i32_0 = arith.constant 0 : i32
    %c0_i32_1 = arith.constant 0 : i32
    return %c0_i32, %c0_i32_0 : i32, i32
  }
  func.func @transform_2(%arg0: i32) -> (i32, i32) {
    %c0_i32 = arith.constant 0 : i32
    %c0_i32_0 = arith.constant 0 : i32
    %c0_i32_1 = arith.constant 0 : i32
    return %c0_i32, %c0_i32_0 : i32, i32
  }
  func.func @transform_3(%arg0: i32) -> (i32, i32) {
    %c0_i32 = arith.constant 0 : i32
    %c0_i32_0 = arith.constant 0 : i32
    %c0_i32_1 = arith.constant 0 : i32
    return %c0_i32, %c0_i32_0 : i32, i32
  }
  func.func @transform_4(%arg0: i32) -> (i32, i32) {
    %c0_i32 = arith.constant 0 : i32
    %c0_i32_0 = arith.constant 0 : i32
    %c0_i32_1 = arith.constant 0 : i32
    return %c0_i32, %c0_i32_0 : i32, i32
  }
  func.func @transform_5(%arg0: i32) -> (i32, i32) {
    %c0_i32 = arith.constant 0 : i32
    %c0_i32_0 = arith.constant 0 : i32
    %c0_i32_1 = arith.constant 0 : i32
    return %c0_i32, %c0_i32_0 : i32, i32
  }
  func.func @transform_6(%arg0: i32) -> (i32, i32) {
    %c0_i32 = arith.constant 0 : i32
    %c0_i32_0 = arith.constant 0 : i32
    %c0_i32_1 = arith.constant 0 : i32
    return %c0_i32, %c0_i32_0 : i32, i32
  }
  func.func @transform_7(%arg0: i32) -> (i32, i32) {
    %c0_i32 = arith.constant 0 : i32
    %c0_i32_0 = arith.constant 0 : i32
    %c0_i32_1 = arith.constant 0 : i32
    return %c0_i32, %c0_i32_0 : i32, i32
  }
  func.func @transform_8(%arg0: i32) -> (i32, i32) {
    %c0_i32 = arith.constant 0 : i32
    %c0_i32_0 = arith.constant 0 : i32
    %c0_i32_1 = arith.constant 0 : i32
    return %c0_i32, %c0_i32_0 : i32, i32
  }
  func.func @transform_9(%arg0: i32) -> (i32, i32) {
    %c0_i32 = arith.constant 0 : i32
    %c0_i32_0 = arith.constant 0 : i32
    %c0_i32_1 = arith.constant 0 : i32
    return %c0_i32, %c0_i32_0 : i32, i32
  }
  func.func @transform_10(%arg0: i32) -> (i32, i32) {
    %c0_i32 = arith.constant 0 : i32
    %c0_i32_0 = arith.constant 0 : i32
    %c0_i32_1 = arith.constant 0 : i32
    return %c0_i32, %c0_i32_0 : i32, i32
  }
  func.func @transform_11(%arg0: i32) -> (i32, i32, i32) {
    %c0_i32 = arith.constant 0 : i32
    %c0_i32_0 = arith.constant 0 : i32
    %c0_i32_1 = arith.constant 0 : i32
    return %arg0, %c0_i32, %c0_i32_0 : i32, i32, i32
  }
}

</mosaic_0001>

<bundles_post_ra>
// kernel: tile.8
= control target key start
LH: loop header
LB: loop body
LE: loop exit
PB: predicated region body
PF: predicated region fallthrough
CT: control target
= control target key end

     0   :  { %2 = vsyncpa [#allocation1], 0  ;;  %s44_s6 = smov [#allocation0]   ;;  %s70_s0 = inlined_call_operand.hbm [shape: f32[16], index: 0, kind: input, shape index: {}]   ;;  %s71_s1 = inlined_call_operand.vmem [shape: f32[4,16], index: 1, kind: output, shape index: {}]  }
   0x1   :  { %s9_s7 = sshll.u32 %s44_s6, 4  ;;  %s20_s10 = scalar_lea.hbm %s70_s0, 16  ;;  %s10_s7 = int_to_ptr.vmem [resolvable:$true] %s9_s7 }
   0x2   :  { %p21_p0 = scmp.ne.s32.totalorder %s70_s0, %s20_s10  ;;  %p24_p1 = scmp.lt.u32.totalorder %s20_s10, %s70_s0 }
   0x4   :  { %p26_p2 = pnand %p24_p1, %p21_p0 }
   0x6   :  { %29 = shalt.err (!%p26_p2)
}
   0x7   :  { %s30_s15 = scalar_lea.vmem %s10_s7, 16  ;;  %s34_s16 = scalar_lea.vmem %s10_s7, 32 }
   0x8   :  { %p31_p3 = scmp.ne.s32.totalorder %s10_s7, %s30_s15  ;;  %p35_p4 = scmp.lt.s32.totalorder %s10_s7, %s10_s7 }
   0x9   :  { %p36_p5 = scmp.lt.s32.totalorder %s34_s16, %s30_s15 }
   0xb   :  { %p37_p6 = por %p36_p5, %p35_p4 }
   0xd   :  { %p38_p7 = pnand %p37_p6, %p31_p3 }
   0xf   :  { %41 = shalt.err (!%p38_p7)
}
  0x10   :  { %12 = dma.hbm_to_vmem [thread:$0]  %s70_s0, 16, %s10_s7, [#allocation1]  }
  0x11   :  { %42 = dma.done.wait [#allocation1], 16  }
  0x12   :  { %43 = vsyncadd [#allocation1], 4294967280  ;;  %v16_v0 = vld [vmem:[#allocation0] ss:$0 sm:$0xff] }
  0x13   :  { %17 = vst [vmem:[%s71_s1] sm:$0xf] %v16_v0 }
  0x14   :  { %18 = vsyncpa [#allocation1], 1 }

// kernel: tile.0
= control target key start
LH: loop header
LB: loop body
LE: loop exit
PB: predicated region body
PF: predicated region fallthrough
CT: control target
= control target key end

     0   :  { %s176_s8 = smov 125   ;;  %s177_s9 = smov 126   ;;  %vm7_vm0 = vcmask 7168   ;;  %s331_s0 = inlined_call_operand.vmem [shape: f32[4,16], index: 0, kind: input, shape index: {}]   ;;  %s332_s1 = inlined_call_operand.vmem [shape: f32[64,1], index: 1, kind: output, shape index: {}]  }
   0x1   :  { %v4_v0 = vld [vmem:[%s331_s0] sm:$0xf]  ;;  %s175_s0 = smov 127   ;;  %s178_s10 = smov 124  }
   0x2   :  { %5 = vst [vmem:[#allocation0] sm:$0xf] %v4_v0  ;;  %s179_s11 = smov 123   ;;  %s180_s12 = smov 122  }
   0x3   :  { %s181_s13 = smov 121   ;;  %s182_s14 = smov 120  }
   0x4   :  { %s183_s19 = smov 119   ;;  %s184_s20 = smov 118  }
   0x5   :  { %s185_s21 = smov 117   ;;  %s186_s22 = smov 116  }
   0x6   :  { %s187_s23 = smov 115   ;;  %s188_s24 = smov 114  }
   0x7   :  { %s189_s25 = smov 113  }
   0x9   :  { %v10_v1 = vld [vmem:[#allocation0] sm:$0xf]  }
   0xa   :  { %v26_v2 = vld [vmem:[#allocation0] sm:$0xf]   ;;  %11 = vrot.lane.b32.xlu0 %v10_v1, %s175_s0 }
   0xb   :  { %27 = vrot.lane.b32.xlu1 %v26_v2, %s176_s8  ;;  %v18_v3 = vld [vmem:[#allocation0] sm:$0xf]  }
   0xc   :  { %v34_v4 = vld [vmem:[#allocation0] sm:$0xf]  }
   0xd   :  { %v42_v5 = vld [vmem:[#allocation0] sm:$0xf]  }
   0xe   :  { %19 = vrot.lane.b32.xlu0 %v18_v3, %s177_s9  ;;  %v50_v6 = vld [vmem:[#allocation0] sm:$0xf]  }
   0xf   :  { %35 = vrot.lane.b32.xlu1 %v34_v4, %s178_s10  ;;  %v58_v7 = vld [vmem:[#allocation0] sm:$0xf]  }
  0x10   :  { %v66_v8 = vld [vmem:[#allocation0] sm:$0xf]  }
  0x11   :  { %v74_v9 = vld [vmem:[#allocation0] sm:$0xf]  }
  0x12   :  { %43 = vrot.lane.b32.xlu0 %v42_v5, %s179_s11  ;;  %v82_v10 = vld [vmem:[#allocation0] sm:$0xf]  }
  0x13   :  { %51 = vrot.lane.b32.xlu1 %v50_v6, %s180_s12  ;;  %v6_v11 = vld [vmem:[#allocation0] sm:$0xf]  }
  0x14   :  { %8 = vst.msk [vmem:[%s332_s1] ss:$16 sm:$0x3] %vm7_vm0, %v6_v11   ;;  %9 = vst.msk [vmem:[%s332_s1] ss:$16 sm:$0xc] %vm7_vm0, %v6_v11  }
  0x15   :  { %v90_v12 = vld [vmem:[#allocation0] sm:$0xf]  }
  0x16   :  { %59 = vrot.lane.b32.xlu0 %v58_v7, %s181_s13  ;;  %v98_v13 = vld [vmem:[#allocation0] sm:$0xf]  }
  0x17   :  { %67 = vrot.lane.b32.xlu1 %v66_v8, %s182_s14  ;;  %v106_v14 = vld [vmem:[#allocation0] sm:$0xf]  }
  0x18   :  { %v114_v15 = vld [vmem:[#allocation0] sm:$0xf]  }
  0x19   :  { %v122_v16 = vld [vmem:[#allocation0] sm:$0xf]  }
  0x1a   :  { %75 = vrot.lane.b32.xlu0 %v74_v9, %s183_s19 }
  0x1b   :  { %83 = vrot.lane.b32.xlu1 %v82_v10, %s184_s20 }
  0x1e   :  { %91 = vrot.lane.b32.xlu0 %v90_v12, %s185_s21 }
  0x1f   :  { %99 = vrot.lane.b32.xlu1 %v98_v13, %s186_s22 }
  0x22   :  { %107 = vrot.lane.b32.xlu0 %v106_v14, %s187_s23 }
  0x23   :  { %115 = vrot.lane.b32.xlu1 %v114_v15, %s188_s24 }
  0x26   :  { %123 = vrot.lane.b32.xlu0 %v122_v16, %s189_s25 }
  0x7c   :  { %v12_v17 = vpop.permute.xlu0 %11  }
  0x7d   :  { %v28_v18 = vpop.permute.xlu1 %27   ;;  %130 = vst.msk [vmem:[%s332_s1 + $0x1] ss:$16 sm:$0x3] %vm7_vm0, %v12_v17   ;;  %131 = vst.msk [vmem:[%s332_s1 + $0x1] ss:$16 sm:$0xc] %vm7_vm0, %v12_v17  }
  0x7e   :  { %134 = vst.msk [vmem:[%s332_s1 + $0x3] ss:$16 sm:$0x3] %vm7_vm0, %v28_v18   ;;  %135 = vst.msk [vmem:[%s332_s1 + $0x3] ss:$16 sm:$0xc] %vm7_vm0, %v28_v18  }
  0x80   :  { %v20_v19 = vpop.permute.xlu0 %19  }
  0x81   :  { %v36_v20 = vpop.permute.xlu1 %35   ;;  %132 = vst.msk [vmem:[%s332_s1 + $0x2] ss:$16 sm:$0x3] %vm7_vm0, %v20_v19   ;;  %133 = vst.msk [vmem:[%s332_s1 + $0x2] ss:$16 sm:$0xc] %vm7_vm0, %v20_v19  }
  0x82   :  { %136 = vst.msk [vmem:[%s332_s1 + $0x4] ss:$16 sm:$0x3] %vm7_vm0, %v36_v20   ;;  %137 = vst.msk [vmem:[%s332_s1 + $0x4] ss:$16 sm:$0xc] %vm7_vm0, %v36_v20  }
  0x84   :  { %v44_v21 = vpop.permute.xlu0 %43  }
  0x85   :  { %v52_v22 = vpop.permute.xlu1 %51   ;;  %138 = vst.msk [vmem:[%s332_s1 + $0x5] ss:$16 sm:$0x3] %vm7_vm0, %v44_v21   ;;  %139 = vst.msk [vmem:[%s332_s1 + $0x5] ss:$16 sm:$0xc] %vm7_vm0, %v44_v21  }
  0x86   :  { %140 = vst.msk [vmem:[%s332_s1 + $0x6] ss:$16 sm:$0x3] %vm7_vm0, %v52_v22   ;;  %141 = vst.msk [vmem:[%s332_s1 + $0x6] ss:$16 sm:$0xc] %vm7_vm0, %v52_v22  }
  0x88   :  { %v60_v23 = vpop.permute.xlu0 %59  }
  0x89   :  { %v68_v24 = vpop.permute.xlu1 %67   ;;  %142 = vst.msk [vmem:[%s332_s1 + $0x7] ss:$16 sm:$0x3] %vm7_vm0, %v60_v23   ;;  %143 = vst.msk [vmem:[%s332_s1 + $0x7] ss:$16 sm:$0xc] %vm7_vm0, %v60_v23  }
  0x8a   :  { %144 = vst.msk [vmem:[%s332_s1 + $0x8] ss:$16 sm:$0x3] %vm7_vm0, %v68_v24   ;;  %145 = vst.msk [vmem:[%s332_s1 + $0x8] ss:$16 sm:$0xc] %vm7_vm0, %v68_v24  }
  0x8c   :  { %v76_v25 = vpop.permute.xlu0 %75  }
  0x8d   :  { %v84_v26 = vpop.permute.xlu1 %83   ;;  %146 = vst.msk [vmem:[%s332_s1 + $0x9] ss:$16 sm:$0x3] %vm7_vm0, %v76_v25   ;;  %147 = vst.msk [vmem:[%s332_s1 + $0x9] ss:$16 sm:$0xc] %vm7_vm0, %v76_v25  }
  0x8e   :  { %148 = vst.msk [vmem:[%s332_s1 + $0xa] ss:$16 sm:$0x3] %vm7_vm0, %v84_v26   ;;  %149 = vst.msk [vmem:[%s332_s1 + $0xa] ss:$16 sm:$0xc] %vm7_vm0, %v84_v26  }
  0x90   :  { %v92_v27 = vpop.permute.xlu0 %91  }
  0x91   :  { %v100_v28 = vpop.permute.xlu1 %99   ;;  %150 = vst.msk [vmem:[%s332_s1 + $0xb] ss:$16 sm:$0x3] %vm7_vm0, %v92_v27   ;;  %151 = vst.msk [vmem:[%s332_s1 + $0xb] ss:$16 sm:$0xc] %vm7_vm0, %v92_v27  }
  0x92   :  { %152 = vst.msk [vmem:[%s332_s1 + $0xc] ss:$16 sm:$0x3] %vm7_vm0, %v100_v28   ;;  %153 = vst.msk [vmem:[%s332_s1 + $0xc] ss:$16 sm:$0xc] %vm7_vm0, %v100_v28  }
  0x94   :  { %v108_v29 = vpop.permute.xlu0 %107  }
  0x95   :  { %v116_v30 = vpop.permute.xlu1 %115   ;;  %154 = vst.msk [vmem:[%s332_s1 + $0xd] ss:$16 sm:$0x3] %vm7_vm0, %v108_v29   ;;  %155 = vst.msk [vmem:[%s332_s1 + $0xd] ss:$16 sm:$0xc] %vm7_vm0, %v108_v29  }
  0x96   :  { %156 = vst.msk [vmem:[%s332_s1 + $0xe] ss:$16 sm:$0x3] %vm7_vm0, %v116_v30   ;;  %157 = vst.msk [vmem:[%s332_s1 + $0xe] ss:$16 sm:$0xc] %vm7_vm0, %v116_v30  }
  0x98   :  { %v124_v31 = vpop.permute.xlu0 %123  }
  0x99   :  { %158 = vst.msk [vmem:[%s332_s1 + $0xf] ss:$16 sm:$0x3] %vm7_vm0, %v124_v31   ;;  %159 = vst.msk [vmem:[%s332_s1 + $0xf] ss:$16 sm:$0xc] %vm7_vm0, %v124_v31  }

// kernel: boundary_predictor_forward.1
= control target key start
LH: loop header
LB: loop body
LE: loop exit
PB: predicated region body
PF: predicated region fallthrough
CT: control target
= control target key end

     0   :  { %s10887_s17 = smov 0   ;;  %s19328_s0 = inlined_call_operand.vmem [shape: f32[2,8,256], index: 0, kind: input, shape index: {}]   ;;  %s19329_s1 = inlined_call_operand.vmem [shape: f32[8,8], index: 1, kind: input, shape index: {}]   ;;  %s19330_s2 = inlined_call_operand.vmem [shape: f32[8,1], index: 2, kind: input, shape index: {}]   ;;  %s19331_s3 = inlined_call_operand.vmem [shape: f32[64,8], index: 3, kind: input, shape index: {}]   ;;  %s19332_s4 = inlined_call_operand.vmem [shape: f32[64,1], index: 4, kind: input, shape index: {}]   ;;  %s19333_s5 = inlined_call_operand.vmem [shape: f32[1024,2304], index: 5, kind: input, shape index: {}]   ;;  %s19334_s6 = inlined_call_operand.vmem [shape: f32[32,16], index: 6, kind: input, shape index: {}]   ;;  %s19335_s7 = inlined_call_operand.vmem [shape: f32[32,1], index: 7, kind: input, shape index: {}]   ;;  %s19336_s8 = inlined_call_operand.vmem [shape: f32[6,32], index: 8, kind: input, shape index: {}]   ;;  %s19337_s9 = inlined_call_operand.vmem [shape: f32[2,1], index: 9, kind: input, shape index: {}]   ;;  %s19338_s10 = inlined_call_operand.vmem [shape: f32[2,2304], index: 10, kind: input, shape index: {}]   ;;  %s19339_s11 = inlined_call_operand.vmem [shape: f32[2,2,2304], index: 11, kind: output, shape index: {}]  }
   0x1 LB: > { %s8199_s18 = sadd.s32 4294967295, %s10818_s17   ;;  %p8203_p0 = scmp.ge.s32.totalorder %s10818_s17, 1  ;;  %s10818_s17 = sphi %s10887_s17, %s21_s17  }
   0x2   : > { %p337_p1 = scmp.lt.s32.totalorder %s10818_s17, 3 }
   0x4   : > { %p338_p2 = pnand %p8203_p0, %p337_p1 }
   0x6   : > { %341 = sbr.rel (%p338_p2) target bundleno = 2496 (0x9c0), region = 64 }
   0xd   : > { %p377_p3 = scmp.lt.s32.totalorder %s8199_s18, 1  ;;  %v390_v0 = vld [vmem:[%s19330_s2] sm:$0xff]  ;;  %v19340_v1 = vmov 0.0   ;;  %v10821_v2 = vmov 0   ;;  %vm396_vm0 = vcmask 64512   ;;  %v482_v7 = vld [vmem:[%s19332_s4 + $0x18] sm:$0xff] }
   0xe   : > { %464 = vmatprep.mubr.f32.mxu1 %v19340_v1  ;;  %10806 = vset.pattern.permute.xlu0 %v10821_v2  ;;  %v479_v3 = vld [vmem:[%s19332_s4] sm:$0xff]  ;;  %v484_v8 = vld [vmem:[%s19332_s4 + $0x28] sm:$0xff]  ;;  %v486_v9 = vld [vmem:[%s19332_s4 + $0x38] sm:$0xff]  ;;  %vm5768_vm1 = vcmask 130048   ;;  %vm6583_vm2 = vcmask 261120   ;;  %s10823_s20 = smov 127  }
   0xf   : > { %s19439_s18 = smov (!%p377_p3, %s8199_s18), 1  ;;  %393 = vperm.xlu0 %10806, %v390_v0   ;;  %10807 = vset.pattern.permute.xlu1 %v10821_v2  ;;  %v389_v6 = vld [vmem:[%s19329_s1] sm:$0xff]  ;;  %v5745_v10 = vld [vmem:[%s19335_s7 + $0x8] sm:$0xff]  ;;  %v5747_v11 = vld [vmem:[%s19335_s7 + $0x18] sm:$0xff]  ;;  %s10824_s21 = smov 48   ;;  %vm7541_vm3 = vcmask 7168  }
  0x10   : > { %s8269_s23 = sshll.u32 %s19439_s18, 4  ;;  %v8016_v12 = vld [vmem:[%s19337_s9] sm:$0x3]  ;;  %v480_v13 = vld [vmem:[%s19332_s4 + $0x8] sm:$0xff]  ;;  %v481_v14 = vld [vmem:[%s19332_s4 + $0x10] sm:$0xff]  ;;  %s10825_s22 = smov 80  }
  0x11   : > { %s381_s26 = scalar_lea.vmem %s19328_s0, %s8269_s23  ;;  %494 = vperm.xlu1 %10807, %v480_v13   ;;  %v665_v15 = vld [vmem:[%s19333_s5 + $0x8] sm:$0xff]  ;;  %v683_v16 = vld [vmem:[%s19333_s5 + $0x98] sm:$0xff]  ;;  %v664_v18 = vld [vmem:[%s19333_s5] sm:$0xff]  ;;  %s10826_s23 = smov 1   ;;  %vm7770_vm4 = vcmask 1039360   ;;  %vm7412_vm5 = vcmask 654336  }
  0x12   : > { %v388_v4 = vld [vmem:[%s381_s26 + $0x8] sm:$0xff]  ;;  %v387_v5 = vld [vmem:[%s381_s26] sm:$0xff]  ;;  %v8270_v17 = vpack.c.bf16 %v683_v16, %v665_v15  ;;  %v682_v19 = vld [vmem:[%s19333_s5 + $0x90] sm:$0xff]  ;;  %vm7285_vm6 = vcmask 392192   ;;  %vm7997_vm7 = vcmask 1040384   ;;  %s10790_s26 = smul.u32 36, %s19439_s18 }
  0x13   : > { %489 = vperm.xlu0 %10806, %v479_v3   ;;  %400 = vmatprep.subr.mxu1 %v388_v4  ;;  %v8272_v20 = vpack.c.bf16 %v682_v19, %v664_v18  ;;  %v701_v21 = vld [vmem:[%s19333_s5 + $0x128] sm:$0xff]  ;;  %v719_v22 = vld [vmem:[%s19333_s5 + $0x1b8] sm:$0xff]  ;;  %v483_v23 = vld [vmem:[%s19332_s4 + $0x20] sm:$0xff] }
  0x14   : > { %401 = vmatpush1.msra.mxu1 %v387_v5  ;;  %8271 = vmatprep.subr.bf16.mxu0 %v8270_v17  ;;  %v8274_v24 = vpack.c.bf16 %v719_v22, %v701_v21  ;;  %v700_v25 = vld [vmem:[%s19333_s5 + $0x120] sm:$0xff]  ;;  %v718_v26 = vld [vmem:[%s19333_s5 + $0x1b0] sm:$0xff]  ;;  %v737_v28 = vld [vmem:[%s19333_s5 + $0x248] sm:$0xff]  ;;  %s19067_s29 = scalar_lea.vmem %s19339_s11, %s10790_s26 }
  0x15   : > { %8207 = vmatmul.mubr.msk.f32.vlgmr.msra.gmra.mrb[0].mxu1 %vm396_vm0, %v389_v6  ;;  %499 = vperm.xlu1 %10807, %v481_v14   ;;  %v8276_v27 = vpack.c.bf16 %v718_v26, %v700_v25  ;;  %v755_v29 = vld [vmem:[%s19333_s5 + $0x2d8] sm:$0xff]  ;;  %v736_v31 = vld [vmem:[%s19333_s5 + $0x240] sm:$0xff]  ;;  %v754_v32 = vld [vmem:[%s19333_s5 + $0x2d0] sm:$0xff] }
  0x16   : > { %615 = vmatprep.mubr.f32.mxu1 %v19340_v1  ;;  %8273 = vmatpush1.bf16.msra.mxu0 %v8272_v20  ;;  %v8278_v30 = vpack.c.bf16 %v755_v29, %v737_v28  ;;  %v485_v33 = vld [vmem:[%s19332_s4 + $0x30] sm:$0xff]  ;;  %v8280_v34 = vpack.c.bf16 %v754_v32, %v736_v31  ;;  %v773_v35 = vld [vmem:[%s19333_s5 + $0x368] sm:$0xff]  ;;  %v791_v36 = vld [vmem:[%s19333_s5 + $0x3f8] sm:$0xff] }
  0x17   : > { %504 = vperm.xlu0 %10806, %v482_v7   ;;  %8275 = vmatprep.subr.bf16.mxu0 %v8274_v24  ;;  %v8282_v37 = vpack.c.bf16 %v791_v36, %v773_v35  ;;  %v772_v38 = vld [vmem:[%s19333_s5 + $0x360] sm:$0xff]  ;;  %v790_v39 = vld [vmem:[%s19333_s5 + $0x3f0] sm:$0xff]  ;;  %v809_v40 = vld [vmem:[%s19333_s5 + $0x488] sm:$0xff] }
  0x18   : > { %v827_v41 = vld [vmem:[%s19333_s5 + $0x518] sm:$0xff]  ;;  %v5744_v42 = vld [vmem:[%s19335_s7] sm:$0xff]  ;;  %v8284_v43 = vpack.c.bf16 %v790_v39, %v772_v38  ;;  %v826_v46 = vld [vmem:[%s19333_s5 + $0x510] sm:$0xff] }
  0x19   : > { %509 = vperm.xlu1 %10807, %v483_v23   ;;  %v8286_v44 = vpack.c.bf16 %v827_v41, %v809_v40  ;;  %v808_v45 = vld [vmem:[%s19333_s5 + $0x480] sm:$0xff]  ;;  %v845_v47 = vld [vmem:[%s19333_s5 + $0x5a8] sm:$0xff]  ;;  %v863_v48 = vld [vmem:[%s19333_s5 + $0x638] sm:$0xff] }
  0x1a   : > { %8277 = vmatpush1.bf16.msra.mxu0 %v8276_v27  ;;  %v5746_v49 = vld [vmem:[%s19335_s7 + $0x10] sm:$0xff]  ;;  %v8288_v50 = vpack.c.bf16 %v826_v46, %v808_v45  ;;  %v8290_v51 = vpack.c.bf16 %v863_v48, %v845_v47  ;;  %v844_v52 = vld [vmem:[%s19333_s5 + $0x5a0] sm:$0xff]  ;;  %v881_v54 = vld [vmem:[%s19333_s5 + $0x6c8] sm:$0xff] }
  0x1b   : > { %514 = vperm.xlu0 %10806, %v484_v8   ;;  %8279 = vmatprep.subr.bf16.mxu0 %v8278_v30  ;;  %v862_v53 = vld [vmem:[%s19333_s5 + $0x630] sm:$0xff]  ;;  %v899_v55 = vld [vmem:[%s19333_s5 + $0x758] sm:$0xff]  ;;  %v880_v58 = vld [vmem:[%s19333_s5 + $0x6c0] sm:$0xff] }
  0x1c   : > { %v8292_v56 = vpack.c.bf16 %v862_v53, %v844_v52  ;;  %v8294_v57 = vpack.c.bf16 %v899_v55, %v881_v54  ;;  %v898_v59 = vld [vmem:[%s19333_s5 + $0x750] sm:$0xff]  ;;  %v917_v60 = vld [vmem:[%s19333_s5 + $0x7e8] sm:$0xff]  ;;  %v935_v61 = vld [vmem:[%s19333_s5 + $0x878] sm:$0xff] }
  0x1d   : > { %519 = vperm.xlu1 %10807, %v485_v33   ;;  %v8296_v62 = vpack.c.bf16 %v898_v59, %v880_v58  ;;  %v8298_v63 = vpack.c.bf16 %v935_v61, %v917_v60  ;;  %v916_v0 = vld [vmem:[%s19333_s5 + $0x7e0] sm:$0xff]  ;;  %v934_v2 = vld [vmem:[%s19333_s5 + $0x870] sm:$0xff]  ;;  %v953_v3 = vld [vmem:[%s19333_s5 + $0x908] sm:$0xff] }
  0x1e   : > { %8281 = vmatpush1.bf16.msra.mxu0 %v8280_v34  ;;  %v971_v4 = vld [vmem:[%s19333_s5 + $0x998] sm:$0xff]  ;;  %v8300_v5 = vpack.c.bf16 %v934_v2, %v916_v0  ;;  %v952_v7 = vld [vmem:[%s19333_s5 + $0x900] sm:$0xff]  ;;  %v970_v8 = vld [vmem:[%s19333_s5 + $0x990] sm:$0xff] }
  0x1f   : > { %524 = vperm.xlu0 %10806, %v486_v9   ;;  %8283 = vmatprep.subr.bf16.mxu0 %v8282_v37  ;;  %v8302_v6 = vpack.c.bf16 %v971_v4, %v953_v3  ;;  %v989_v9 = vld [vmem:[%s19333_s5 + $0xa28] sm:$0xff]  ;;  %v988_v13 = vld [vmem:[%s19333_s5 + $0xa20] sm:$0xff]  ;;  %v1006_v14 = vld [vmem:[%s19333_s5 + $0xab0] sm:$0xff] }
  0x20   : > { %v1025_v15 = vld [vmem:[%s19333_s5 + $0xb48] sm:$0xff]  ;;  %v1043_v16 = vld [vmem:[%s19333_s5 + $0xbd8] sm:$0xff]  ;;  %v8308_v17 = vpack.c.bf16 %v1006_v14, %v988_v13  ;;  %v1024_v19 = vld [vmem:[%s19333_s5 + $0xb40] sm:$0xff] }
  0x21   : > { %5750 = vperm.xlu1 %10807, %v5744_v42   ;;  %v8310_v18 = vpack.c.bf16 %v1043_v16, %v1025_v15  ;;  %v1042_v20 = vld [vmem:[%s19333_s5 + $0xbd0] sm:$0xff]  ;;  %v1061_v21 = vld [vmem:[%s19333_s5 + $0xc68] sm:$0xff]  ;;  %v1079_v22 = vld [vmem:[%s19333_s5 + $0xcf8] sm:$0xff] }
  0x22   : > { %8285 = vmatpush1.bf16.msra.mxu0 %v8284_v43  ;;  %v8312_v23 = vpack.c.bf16 %v1042_v20, %v1024_v19  ;;  %v8314_v24 = vpack.c.bf16 %v1079_v22, %v1061_v21  ;;  %v1060_v25 = vld [vmem:[%s19333_s5 + $0xc60] sm:$0xff]  ;;  %v1078_v26 = vld [vmem:[%s19333_s5 + $0xcf0] sm:$0xff]  ;;  %v1097_v27 = vld [vmem:[%s19333_s5 + $0xd88] sm:$0xff] }
  0x23   : > { %5755 = vperm.xlu0 %10806, %v5745_v10   ;;  %8287 = vmatprep.subr.bf16.mxu0 %v8286_v44  ;;  %v1007_v10 = vld [vmem:[%s19333_s5 + $0xab8] sm:$0xff]  ;;  %v8316_v29 = vpack.c.bf16 %v1078_v26, %v1060_v25  ;;  %v1096_v31 = vld [vmem:[%s19333_s5 + $0xd80] sm:$0xff]  ;;  %v1114_v32 = vld [vmem:[%s19333_s5 + $0xe10] sm:$0xff] }
  0x24   : > { %v1115_v28 = vld [vmem:[%s19333_s5 + $0xe18] sm:$0xff]  ;;  %v1133_v33 = vld [vmem:[%s19333_s5 + $0xea8] sm:$0xff]  ;;  %v8320_v35 = vpack.c.bf16 %v1114_v32, %v1096_v31  ;;  %v1132_v37 = vld [vmem:[%s19333_s5 + $0xea0] sm:$0xff] }
  0x25   : > { %5760 = vperm.xlu1 %10807, %v5746_v49   ;;  %v8318_v30 = vpack.c.bf16 %v1115_v28, %v1097_v27  ;;  %v1151_v34 = vld [vmem:[%s19333_s5 + $0xf38] sm:$0xff]  ;;  %v1150_v38 = vld [vmem:[%s19333_s5 + $0xf30] sm:$0xff]  ;;  %v1169_v39 = vld [vmem:[%s19333_s5 + $0xfc8] sm:$0xff] }
  0x26   : > { %8289 = vmatpush1.bf16.msra.mxu0 %v8288_v50  ;;  %v8322_v36 = vpack.c.bf16 %v1151_v34, %v1133_v33  ;;  %v1187_v40 = vld [vmem:[%s19333_s5 + $0x1058] sm:$0xff]  ;;  %v8324_v41 = vpack.c.bf16 %v1150_v38, %v1132_v37  ;;  %v1168_v43 = vld [vmem:[%s19333_s5 + $0xfc0] sm:$0xff]  ;;  %v1186_v44 = vld [vmem:[%s19333_s5 + $0x1050] sm:$0xff] }
  0x27   : > { %5765 = vperm.xlu0 %10806, %v5747_v11   ;;  %8291 = vmatprep.subr.bf16.mxu0 %v8290_v51  ;;  %v8304_v11 = vpack.c.bf16 %v970_v8, %v952_v7  ;;  %v8326_v42 = vpack.c.bf16 %v1187_v40, %v1169_v39  ;;  %v8328_v45 = vpack.c.bf16 %v1186_v44, %v1168_v43  ;;  %v667_v46 = vld [vmem:[%s19333_s5 + $0x18] sm:$0xff]  ;;  %v685_v47 = vld [vmem:[%s19333_s5 + $0xa8] sm:$0xff]  ;;  %v666_v49 = vld [vmem:[%s19333_s5 + $0x10] sm:$0xff] }
  0x28   : > { %v684_v50 = vld [vmem:[%s19333_s5 + $0xa0] sm:$0xff]  ;;  %v703_v53 = vld [vmem:[%s19333_s5 + $0x138] sm:$0xff]  ;;  %v721_v54 = vld [vmem:[%s19333_s5 + $0x1c8] sm:$0xff] }
  0x29   : > { %v471_v58 = vld [vmem:[%s19331_s3] sm:$0xff]  ;;  %v8528_v59 = vpack.c.bf16 %v684_v50, %v666_v49  ;;  %v8530_v60 = vpack.c.bf16 %v721_v54, %v703_v53  ;;  %v702_v61 = vld [vmem:[%s19333_s5 + $0x130] sm:$0xff]  ;;  %v757_v0 = vld [vmem:[%s19333_s5 + $0x2e8] sm:$0xff] }
  0x2a   : > { %8293 = vmatpush1.bf16.msra.mxu0 %v8292_v56  ;;  %v8526_v56 = vpack.c.bf16 %v685_v47, %v667_v46  ;;  %v472_v2 = vld [vmem:[%s19331_s3 + $0x8] sm:$0xff]  ;;  %v775_v7 = vld [vmem:[%s19333_s5 + $0x378] sm:$0xff]  ;;  %v792_v13 = vld [vmem:[%s19333_s5 + $0x400] sm:$0xff] }
  0x2b   : > { %8019 = vperm.xlu0 %10806, %v8016_v12   ;;  %8295 = vmatprep.subr.bf16.mxu0 %v8294_v57  ;;  %v8306_v12 = vpack.c.bf16 %v1007_v10, %v989_v9  ;;  %v793_v8 = vld [vmem:[%s19333_s5 + $0x408] sm:$0xff]  ;;  %v473_v9 = vld [vmem:[%s19331_s3 + $0x10] sm:$0xff]  ;;  %v811_v14 = vld [vmem:[%s19333_s5 + $0x498] sm:$0xff] }
  0x2c   : > { %v829_v15 = vld [vmem:[%s19333_s5 + $0x528] sm:$0xff]  ;;  %v474_v16 = vld [vmem:[%s19331_s3 + $0x18] sm:$0xff]  ;;  %v810_v19 = vld [vmem:[%s19333_s5 + $0x490] sm:$0xff] }
  0x2d   : > { %v828_v20 = vld [vmem:[%s19333_s5 + $0x520] sm:$0xff]  ;;  %v847_v21 = vld [vmem:[%s19333_s5 + $0x5b8] sm:$0xff]  ;;  %v865_v22 = vld [vmem:[%s19333_s5 + $0x648] sm:$0xff] }
  0x2e   : > { %8297 = vmatpush1.bf16.msra.mxu0 %v8296_v62  ;;  %v720_v62 = vld [vmem:[%s19333_s5 + $0x1c0] sm:$0xff]  ;;  %v8546_v25 = vpack.c.bf16 %v865_v22, %v847_v21  ;;  %v846_v26 = vld [vmem:[%s19333_s5 + $0x5b0] sm:$0xff]  ;;  %v883_v28 = vld [vmem:[%s19333_s5 + $0x6d8] sm:$0xff] }
  0x2f   : > { %8299 = vmatprep.subr.bf16.mxu0 %v8298_v63  ;;  %v739_v63 = vld [vmem:[%s19333_s5 + $0x258] sm:$0xff]  ;;  %v8532_v3 = vpack.c.bf16 %v720_v62, %v702_v61  ;;  %v864_v27 = vld [vmem:[%s19333_s5 + $0x640] sm:$0xff]  ;;  %v882_v33 = vld [vmem:[%s19333_s5 + $0x6d0] sm:$0xff] }
  0x30   : > { %v8534_v4 = vpack.c.bf16 %v757_v0, %v739_v63  ;;  %v8548_v31 = vpack.c.bf16 %v864_v27, %v846_v26  ;;  %v900_v34 = vld [vmem:[%s19333_s5 + $0x760] sm:$0xff]  ;;  %v477_v37 = vld [vmem:[%s19331_s3 + $0x30] sm:$0xff]  ;;  %v973_v43 = vld [vmem:[%s19333_s5 + $0x9a8] sm:$0xff] }
  0x31   : > { %v8552_v38 = vpack.c.bf16 %v900_v34, %v882_v33  ;;  %v918_v40 = vld [vmem:[%s19333_s5 + $0x7f0] sm:$0xff]  ;;  %v478_v44 = vld [vmem:[%s19331_s3 + $0x38] sm:$0xff]  ;;  %v1009_v50 = vld [vmem:[%s19333_s5 + $0xac8] sm:$0xff] }
  0x32   : > { %8301 = vmatpush1.bf16.msra.mxu0 %v8300_v5  ;;  %v738_v5 = vld [vmem:[%s19333_s5 + $0x250] sm:$0xff]  ;;  %v991_v49 = vld [vmem:[%s19333_s5 + $0xa38] sm:$0xff]  ;;  %v1008_v54 = vld [vmem:[%s19333_s5 + $0xac0] sm:$0xff] }
  0x33   : > { %8303 = vmatprep.subr.bf16.mxu0 %v8302_v6  ;;  %v756_v6 = vld [vmem:[%s19333_s5 + $0x2e0] sm:$0xff]  ;;  %v954_v47 = vld [vmem:[%s19333_s5 + $0x910] sm:$0xff]  ;;  %v1063_v61 = vld [vmem:[%s19333_s5 + $0xc78] sm:$0xff] }
  0x34   : > { %v8536_v10 = vpack.c.bf16 %v756_v6, %v738_v5  ;;  %v990_v53 = vld [vmem:[%s19333_s5 + $0xa30] sm:$0xff]  ;;  %v1081_v62 = vld [vmem:[%s19333_s5 + $0xd08] sm:$0xff]  ;;  %v1188_v21 = vld [vmem:[%s19333_s5 + $0x1060] sm:$0xff] }
  0x35   : > { %v8570_v0 = vpack.c.bf16 %v1081_v62, %v1063_v61  ;;  %v1117_v5 = vld [vmem:[%s19333_s5 + $0xe28] sm:$0xff]  ;;  %v1224_v33 = vld [vmem:[%s19333_s5 + $0x1180] sm:$0xff] }
  0x36   : > { %8305 = vmatpush1.bf16.msra.mxu0 %v8304_v11  ;;  %v8538_v11 = vpack.c.bf16 %v793_v8, %v775_v7  ;;  %v1098_v8 = vld [vmem:[%s19333_s5 + $0xd90] sm:$0xff]  ;;  %v1225_v27 = vld [vmem:[%s19333_s5 + $0x1188] sm:$0xff]  ;;  %v1296_v61 = vld [vmem:[%s19333_s5 + $0x13c0] sm:$0xff] }
  0x37   : > { %8307 = vmatprep.subr.bf16.mxu0 %v8306_v12  ;;  %v774_v12 = vld [vmem:[%s19333_s5 + $0x370] sm:$0xff]  ;;  %v1313_v62 = vld [vmem:[%s19333_s5 + $0x1448] sm:$0xff] }
  0x3a   : > { %8309 = vmatpush1.bf16.msra.mxu0 %v8308_v17  ;;  %v8540_v17 = vpack.c.bf16 %v792_v13, %v774_v12 }
  0x3b   : > { %8311 = vmatprep.subr.bf16.mxu0 %v8310_v18  ;;  %v8542_v18 = vpack.c.bf16 %v829_v15, %v811_v14  ;;  %v1134_v14 = vld [vmem:[%s19333_s5 + $0xeb0] sm:$0xff]  ;;  %v1152_v15 = vld [vmem:[%s19333_s5 + $0xf40] sm:$0xff] }
  0x3e   : > { %8313 = vmatpush1.bf16.msra.mxu0 %v8312_v23  ;;  %v475_v23 = vld [vmem:[%s19331_s3 + $0x20] sm:$0xff] }
  0x3f   : > { %8315 = vmatprep.subr.bf16.mxu0 %v8314_v24  ;;  %v8544_v24 = vpack.c.bf16 %v828_v20, %v810_v19  ;;  %v1170_v20 = vld [vmem:[%s19333_s5 + $0xfd0] sm:$0xff] }
  0x40   : > { %v8584_v22 = vpack.c.bf16 %v1188_v21, %v1170_v20  ;;  %v1369_v20 = vld [vmem:[%s19333_s5 + $0x1608] sm:$0xff] }
  0x42   : > { %8317 = vmatpush1.bf16.msra.mxu0 %v8316_v29  ;;  %v901_v29 = vld [vmem:[%s19333_s5 + $0x768] sm:$0xff] }
  0x43   : > { %8319 = vmatprep.subr.bf16.mxu0 %v8318_v30  ;;  %v476_v30 = vld [vmem:[%s19331_s3 + $0x28] sm:$0xff]  ;;  %v8550_v32 = vpack.c.bf16 %v901_v29, %v883_v28  ;;  %v1204_v28 = vld [vmem:[%s19333_s5 + $0x10e0] sm:$0xff]  ;;  %v1222_v29 = vld [vmem:[%s19333_s5 + $0x1170] sm:$0xff] }
  0x46   : > { %8321 = vmatpush1.bf16.msra.mxu0 %v8320_v35  ;;  %v919_v35 = vld [vmem:[%s19333_s5 + $0x7f8] sm:$0xff] }
  0x47   : > { %8323 = vmatprep.subr.bf16.mxu0 %v8322_v36  ;;  %v937_v36 = vld [vmem:[%s19333_s5 + $0x888] sm:$0xff] }
  0x48   : > { %v8554_v39 = vpack.c.bf16 %v937_v36, %v919_v35  ;;  %v1241_v35 = vld [vmem:[%s19333_s5 + $0x1208] sm:$0xff]  ;;  %v1259_v36 = vld [vmem:[%s19333_s5 + $0x1298] sm:$0xff] }
  0x4a   : > { %8325 = vmatpush1.bf16.msra.mxu0 %v8324_v41  ;;  %v936_v41 = vld [vmem:[%s19333_s5 + $0x880] sm:$0xff] }
  0x4b   : > { %8327 = vmatprep.subr.bf16.mxu0 %v8326_v42  ;;  %v955_v42 = vld [vmem:[%s19333_s5 + $0x918] sm:$0xff] }
  0x4c   : > { %v8558_v46 = vpack.c.bf16 %v973_v43, %v955_v42  ;;  %v1258_v42 = vld [vmem:[%s19333_s5 + $0x1290] sm:$0xff] }
  0x4d   : > { %v1242_v43 = vld [vmem:[%s19333_s5 + $0x1210] sm:$0xff] }
  0x4e   : > { %8329 = vmatpush1.bf16.msra.mxu0 %v8328_v45  ;;  %v8556_v45 = vpack.c.bf16 %v936_v41, %v918_v40  ;;  %v1240_v41 = vld [vmem:[%s19333_s5 + $0x1200] sm:$0xff] }
  0x8e   : > { %v394_v51 = vpop.permute.xlu0 %393 }
  0xe8   : > { %v466_v48 = vpop.f32.mrb[0].mxu1 }
  0xe9   : > { %v468_v52 = vpop.f32.mrb[1].mxu1  ;;  %v467_v57 = vadd.f32 %v466_v48, %v394_v51  ;;  %v972_v48 = vld [vmem:[%s19333_s5 + $0x9a0] sm:$0xff] }
  0xea   : > { %v469_v55 = vadd.f32 %v468_v52, %v394_v51  ;;  %v8560_v51 = vpack.c.bf16 %v972_v48, %v954_v47  ;;  %v8562_v52 = vpack.c.bf16 %v1009_v50, %v991_v49  ;;  %v1295_v47 = vld [vmem:[%s19333_s5 + $0x13b8] sm:$0xff]  ;;  %v1297_v49 = vld [vmem:[%s19333_s5 + $0x13c8] sm:$0xff]  ;;  %v490_v50 = vpop.permute.xlu0 %489 }
  0xeb   : > { %v1279_v48 = vld [vmem:[%s19333_s5 + $0x1338] sm:$0xff] }
  0xec   : > { %551 = vmatprep.subr.mxu1 %v469_v55  ;;  %v1027_v55 = vld [vmem:[%s19333_s5 + $0xb58] sm:$0xff] }
  0xed   : > { %552 = vmatpush1.msra.mxu1 %v467_v57  ;;  %v8564_v57 = vpack.c.bf16 %v1008_v54, %v990_v53  ;;  %v8336_v53 = vpack.c.bf16 %v1258_v42, %v1240_v41  ;;  %v1402_v41 = vld [vmem:[%s19333_s5 + $0x1710] sm:$0xff] }
  0xee   : > { %8208 = vmatmul.mubr.msk.f32.vlgmr.msra.gmra.mrb[2].mxu1 %vm396_vm0, %v471_v58  ;;  %8527 = vmatprep.subr.bf16.mxu1 %v8526_v56  ;;  %v1045_v56 = vld [vmem:[%s19333_s5 + $0xbe8] sm:$0xff] }
  0xef   : > { %621 = vmatprep.mubr.f32.mxu1 %v19340_v1  ;;  %8529 = vmatpush1.bf16.msra.mxu1 %v8528_v59  ;;  %v8566_v58 = vpack.c.bf16 %v1045_v56, %v1027_v55  ;;  %v1026_v59 = vld [vmem:[%s19333_s5 + $0xb50] sm:$0xff]  ;;  %v1276_v55 = vld [vmem:[%s19333_s5 + $0x1320] sm:$0xff] }
  0xf0   : > { %8531 = vmatprep.subr.bf16.mxu1 %v8530_v60  ;;  %v1044_v60 = vld [vmem:[%s19333_s5 + $0xbe0] sm:$0xff]  ;;  %v1294_v56 = vld [vmem:[%s19333_s5 + $0x13b0] sm:$0xff] }
  0xf1   : > { %v8568_v63 = vpack.c.bf16 %v1044_v60, %v1026_v59  ;;  %v8594_v59 = vpack.c.bf16 %v1297_v49, %v1279_v48  ;;  %v1278_v60 = vld [vmem:[%s19333_s5 + $0x1330] sm:$0xff]  ;;  %v1439_v48 = vld [vmem:[%s19333_s5 + $0x1838] sm:$0xff] }
  0xf2   : > { %8209 = vmatmul.mubr.msk.f32.gmra.mrb[4].mxu1 %vm396_vm0, %v472_v2  ;;  %v1062_v2 = vld [vmem:[%s19333_s5 + $0xc70] sm:$0xff]  ;;  %v1423_v49 = vld [vmem:[%s19333_s5 + $0x17b8] sm:$0xff] }
  0xf3   : > { %627 = vmatprep.mubr.f32.mxu1 %v19340_v1  ;;  %8533 = vmatpush1.bf16.msra.mxu1 %v8532_v3  ;;  %v1080_v3 = vld [vmem:[%s19333_s5 + $0xd00] sm:$0xff] }
  0xf4   : > { %8535 = vmatprep.subr.bf16.mxu1 %v8534_v4  ;;  %v1099_v4 = vld [vmem:[%s19333_s5 + $0xd98] sm:$0xff]  ;;  %v8572_v6 = vpack.c.bf16 %v1080_v3, %v1062_v2 }
  0xf5   : > { %v8574_v7 = vpack.c.bf16 %v1117_v5, %v1099_v4  ;;  %v1331_v2 = vld [vmem:[%s19333_s5 + $0x14d8] sm:$0xff]  ;;  %v1333_v4 = vld [vmem:[%s19333_s5 + $0x14e8] sm:$0xff] }
  0xf6   : > { %8210 = vmatmul.mubr.msk.f32.gmra.mrb[6].mxu1 %vm396_vm0, %v473_v9  ;;  %v1116_v9 = vld [vmem:[%s19333_s5 + $0xe20] sm:$0xff]  ;;  %v1315_v3 = vld [vmem:[%s19333_s5 + $0x1458] sm:$0xff] }
  0xf7   : > { %633 = vmatprep.mubr.f32.mxu1 %v19340_v1  ;;  %8537 = vmatpush1.bf16.msra.mxu1 %v8536_v10  ;;  %v1135_v10 = vld [vmem:[%s19333_s5 + $0xeb8] sm:$0xff]  ;;  %v8576_v12 = vpack.c.bf16 %v1116_v9, %v1098_v8  ;;  %v8596_v8 = vpack.c.bf16 %v1296_v61, %v1278_v60  ;;  %v1312_v9 = vld [vmem:[%s19333_s5 + $0x1440] sm:$0xff]  ;;  %v1422_v60 = vld [vmem:[%s19333_s5 + $0x17b0] sm:$0xff] }
  0xf8   : > { %8539 = vmatprep.subr.bf16.mxu1 %v8538_v11  ;;  %v1153_v11 = vld [vmem:[%s19333_s5 + $0xf48] sm:$0xff]  ;;  %v1440_v61 = vld [vmem:[%s19333_s5 + $0x1840] sm:$0xff] }
  0xf9   : > { %v8578_v13 = vpack.c.bf16 %v1153_v11, %v1135_v10  ;;  %v1330_v10 = vld [vmem:[%s19333_s5 + $0x14d0] sm:$0xff] }
  0xfa   : > { %8211 = vmatmul.mubr.msk.f32.gmra.mrb[8].mxu1 %vm396_vm0, %v474_v16  ;;  %v1171_v16 = vld [vmem:[%s19333_s5 + $0xfd8] sm:$0xff] }
  0xfb   : > { %639 = vmatprep.mubr.f32.mxu1 %v19340_v1  ;;  %8541 = vmatpush1.bf16.msra.mxu1 %v8540_v17  ;;  %v1189_v17 = vld [vmem:[%s19333_s5 + $0x1068] sm:$0xff] }
  0xfc   : > { %8543 = vmatprep.subr.bf16.mxu1 %v8542_v18  ;;  %v8580_v18 = vpack.c.bf16 %v1152_v15, %v1134_v14  ;;  %v8582_v19 = vpack.c.bf16 %v1189_v17, %v1171_v16  ;;  %v1314_v14 = vld [vmem:[%s19333_s5 + $0x1450] sm:$0xff]  ;;  %v1332_v15 = vld [vmem:[%s19333_s5 + $0x14e0] sm:$0xff]  ;;  %v1349_v16 = vld [vmem:[%s19333_s5 + $0x1568] sm:$0xff] }
  0xfe   : > { %8212 = vmatmul.mubr.msk.f32.gmra.mrb[10].mxu1 %vm396_vm0, %v475_v23  ;;  %v1205_v23 = vld [vmem:[%s19333_s5 + $0x10e8] sm:$0xff] }
  0xff   : > { %645 = vmatprep.mubr.f32.mxu1 %v19340_v1  ;;  %8545 = vmatpush1.bf16.msra.mxu1 %v8544_v24  ;;  %v1223_v24 = vld [vmem:[%s19333_s5 + $0x1178] sm:$0xff] }
 0x100   : > { %8547 = vmatprep.subr.bf16.mxu1 %v8546_v25  ;;  %v1207_v25 = vld [vmem:[%s19333_s5 + $0x10f8] sm:$0xff]  ;;  %v8330_v26 = vpack.c.bf16 %v1223_v24, %v1205_v23  ;;  %v8344_v23 = vpack.c.bf16 %v1330_v10, %v1312_v9  ;;  %v8600_v24 = vpack.c.bf16 %v1332_v15, %v1314_v14  ;;  %v1474_v9 = vld [vmem:[%s19333_s5 + $0x1950] sm:$0xff]  ;;  %v1476_v14 = vld [vmem:[%s19333_s5 + $0x1960] sm:$0xff] }
 0x101   : > { %v1493_v15 = vld [vmem:[%s19333_s5 + $0x19e8] sm:$0xff] }
 0x102   : > { %8213 = vmatmul.mubr.msk.f32.gmra.mrb[12].mxu1 %vm396_vm0, %v476_v30  ;;  %v8586_v30 = vpack.c.bf16 %v1225_v27, %v1207_v25  ;;  %8331 = vmatprep.subr.bf16.mxu0 %v8330_v26  ;;  %v1348_v25 = vld [vmem:[%s19333_s5 + $0x1560] sm:$0xff]  ;;  %v1366_v26 = vld [vmem:[%s19333_s5 + $0x15f0] sm:$0xff] }
 0x103   : > { %651 = vmatprep.mubr.f32.mxu1 %v19340_v1  ;;  %8549 = vmatpush1.bf16.msra.mxu1 %v8548_v31  ;;  %v8332_v31 = vpack.c.bf16 %v1222_v29, %v1204_v28 }
 0x104   : > { %8551 = vmatprep.subr.bf16.mxu1 %v8550_v32  ;;  %v1206_v32 = vld [vmem:[%s19333_s5 + $0x10f0] sm:$0xff] }
 0x105   : > { %v8588_v34 = vpack.c.bf16 %v1224_v33, %v1206_v32  ;;  %8333 = vmatpush1.bf16.msra.mxu0 %v8332_v31  ;;  %v1368_v31 = vld [vmem:[%s19333_s5 + $0x1600] sm:$0xff]  ;;  %v1385_v32 = vld [vmem:[%s19333_s5 + $0x1688] sm:$0xff] }
 0x106   : > { %8214 = vmatmul.mubr.msk.f32.gmra.mrb[14].mxu1 %vm396_vm0, %v477_v37  ;;  %v1243_v37 = vld [vmem:[%s19333_s5 + $0x1218] sm:$0xff] }
 0x107   : > { %657 = vmatprep.mubr.f32.mxu1 %v19340_v1  ;;  %8553 = vmatpush1.bf16.msra.mxu1 %v8552_v38  ;;  %v8334_v38 = vpack.c.bf16 %v1259_v36, %v1241_v35  ;;  %v1387_v35 = vld [vmem:[%s19333_s5 + $0x1698] sm:$0xff]  ;;  %v1405_v36 = vld [vmem:[%s19333_s5 + $0x1728] sm:$0xff] }
 0x108   : > { %8555 = vmatprep.subr.bf16.mxu1 %v8554_v39  ;;  %v1261_v39 = vld [vmem:[%s19333_s5 + $0x12a8] sm:$0xff] }
 0x109   : > { %v8590_v40 = vpack.c.bf16 %v1261_v39, %v1243_v37  ;;  %8335 = vmatprep.subr.bf16.mxu0 %v8334_v38  ;;  %v8348_v38 = vpack.c.bf16 %v1366_v26, %v1348_v25  ;;  %v1492_v25 = vld [vmem:[%s19333_s5 + $0x19e0] sm:$0xff]  ;;  %v1510_v26 = vld [vmem:[%s19333_s5 + $0x1a70] sm:$0xff] }
 0x10a   : > { %8215 = vmatmul.mubr.msk.f32.gmra.mrb[16].mxu1 %vm396_vm0, %v478_v44  ;;  %v1260_v44 = vld [vmem:[%s19333_s5 + $0x12a0] sm:$0xff] }
 0x10b   : > { %8557 = vmatpush1.bf16.msra.mxu1 %v8556_v45  ;;  %v1277_v45 = vld [vmem:[%s19333_s5 + $0x1328] sm:$0xff]  ;;  %v8592_v54 = vpack.c.bf16 %v1260_v44, %v1242_v43  ;;  %v8606_v43 = vpack.c.bf16 %v1405_v36, %v1387_v35  ;;  %v1386_v44 = vld [vmem:[%s19333_s5 + $0x1690] sm:$0xff]  ;;  %v1547_v35 = vld [vmem:[%s19333_s5 + $0x1b98] sm:$0xff] }
 0x10c   : > { %8559 = vmatprep.subr.bf16.mxu1 %v8558_v46  ;;  %v1531_v36 = vld [vmem:[%s19333_s5 + $0x1b18] sm:$0xff] }
 0x10f   : > { %8561 = vmatpush1.bf16.msra.mxu1 %v8560_v51 }
 0x110   : > { %8563 = vmatprep.subr.bf16.mxu1 %v8562_v52 }
 0x113   : > { %8565 = vmatpush1.bf16.msra.mxu1 %v8564_v57 }
 0x114   : > { %8567 = vmatprep.subr.bf16.mxu1 %v8566_v58  ;;  %v8338_v58 = vpack.c.bf16 %v1295_v47, %v1277_v45  ;;  %v1404_v45 = vld [vmem:[%s19333_s5 + $0x1720] sm:$0xff] }
 0x117   : > { %8569 = vmatpush1.bf16.msra.mxu1 %v8568_v63  ;;  %v495_v63 = vpop.permute.xlu1 %494 }
 0x118   : > { %8571 = vmatprep.subr.bf16.mxu1 %v8570_v0 }
 0x11b   : > { %8573 = vmatpush1.bf16.msra.mxu1 %v8572_v6 }
 0x11c   : > { %8575 = vmatprep.subr.bf16.mxu1 %v8574_v7  ;;  %v8340_v7 = vpack.c.bf16 %v1294_v56, %v1276_v55  ;;  %v1420_v55 = vld [vmem:[%s19333_s5 + $0x17a0] sm:$0xff]  ;;  %v1438_v56 = vld [vmem:[%s19333_s5 + $0x1830] sm:$0xff] }
 0x11f   : > { %8577 = vmatpush1.bf16.msra.mxu1 %v8576_v12  ;;  %v8342_v12 = vpack.c.bf16 %v1331_v2, %v1313_v62  ;;  %v1457_v62 = vld [vmem:[%s19333_s5 + $0x18c8] sm:$0xff]  ;;  %v1459_v2 = vld [vmem:[%s19333_s5 + $0x18d8] sm:$0xff] }
 0x120   : > { %8579 = vmatprep.subr.bf16.mxu1 %v8578_v13  ;;  %v8598_v13 = vpack.c.bf16 %v1333_v4, %v1315_v3  ;;  %v1477_v3 = vld [vmem:[%s19333_s5 + $0x1968] sm:$0xff] }
 0x123   : > { %8581 = vmatpush1.bf16.msra.mxu1 %v8580_v18  ;;  %v1367_v18 = vld [vmem:[%s19333_s5 + $0x15f8] sm:$0xff] }
 0x124   : > { %8583 = vmatprep.subr.bf16.mxu1 %v8582_v19  ;;  %v1351_v19 = vld [vmem:[%s19333_s5 + $0x1578] sm:$0xff]  ;;  %v8346_v28 = vpack.c.bf16 %v1367_v18, %v1349_v16 }
 0x125   : > { %v8602_v29 = vpack.c.bf16 %v1369_v20, %v1351_v19  ;;  %v1511_v18 = vld [vmem:[%s19333_s5 + $0x1a78] sm:$0xff]  ;;  %v1513_v20 = vld [vmem:[%s19333_s5 + $0x1a88] sm:$0xff] }
 0x126   : > { %v1495_v19 = vld [vmem:[%s19333_s5 + $0x19f8] sm:$0xff] }
 0x127   : > { %8585 = vmatpush1.bf16.msra.mxu1 %v8584_v22  ;;  %v11472_v22 = vpop.permute.xlu1 %499 }
 0x128   : > { %8587 = vmatprep.subr.bf16.mxu1 %v8586_v30  ;;  %v1350_v30 = vld [vmem:[%s19333_s5 + $0x1570] sm:$0xff] }
 0x129   : > { %v8604_v39 = vpack.c.bf16 %v1368_v31, %v1350_v30  ;;  %v1494_v30 = vld [vmem:[%s19333_s5 + $0x19f0] sm:$0xff]  ;;  %v1512_v31 = vld [vmem:[%s19333_s5 + $0x1a80] sm:$0xff] }
 0x12b   : > { %8589 = vmatpush1.bf16.msra.mxu1 %v8588_v34  ;;  %v1403_v34 = vld [vmem:[%s19333_s5 + $0x1718] sm:$0xff] }
 0x12c   : > { %8591 = vmatprep.subr.bf16.mxu1 %v8590_v40  ;;  %v1384_v40 = vld [vmem:[%s19333_s5 + $0x1680] sm:$0xff]  ;;  %v8350_v42 = vpack.c.bf16 %v1403_v34, %v1385_v32  ;;  %v1529_v32 = vld [vmem:[%s19333_s5 + $0x1b08] sm:$0xff] }
 0x1c1   : > { %v617_v46 = vpop.f32.mrb[2].mxu1 }
 0x1c2   : > { %v619_v51 = vpop.f32.mrb[3].mxu1  ;;  %v11416_v57 = vadd.f32 %v617_v46, %v490_v50  ;;  %v1421_v46 = vld [vmem:[%s19333_s5 + $0x17a8] sm:$0xff] }
 0x1c3   : > { %v11408_v52 = vadd.f32 %v619_v51, %v490_v50  ;;  %v1441_v50 = vld [vmem:[%s19333_s5 + $0x1848] sm:$0xff] }
 0x1c5   : > { %3032 = vmatprep.mubr.f32.mxu0 %v11408_v52  ;;  %3340 = vmatprep.mubr.f32.mxu1 %v11408_v52  ;;  %v623_v0 = vpop.f32.mrb[4].mxu1 }
 0x1c6   : > { %3033 = vmatmul.mubr.f32.vlgmr.msra.gmra.mrb[0].mxu0 %v11416_v57  ;;  %3341 = vmatmul.mubr.f32.vlgmr.msra.gmra.mrb[18].mxu1 %v11416_v57  ;;  %v625_v5 = vpop.f32.mrb[5].mxu1  ;;  %v11440_v6 = vadd.f32 %v623_v0, %v495_v63  ;;  %v1475_v0 = vld [vmem:[%s19333_s5 + $0x1958] sm:$0xff] }
 0x1c7   : > { %8337 = vmatpush1.bf16.msra.mxu0 %v8336_v53  ;;  %8593 = vmatpush1.bf16.msra.mxu1 %v8592_v54  ;;  %v11448_v11 = vadd.f32 %v625_v5, %v495_v63  ;;  %v8352_v53 = vpack.c.bf16 %v1402_v41, %v1384_v40  ;;  %v8608_v54 = vpack.c.bf16 %v1404_v45, %v1386_v44 }
 0x1c8   : > { %8339 = vmatprep.subr.bf16.mxu0 %v8338_v58  ;;  %8595 = vmatprep.subr.bf16.mxu1 %v8594_v59  ;;  %v8354_v58 = vpack.c.bf16 %v1439_v48, %v1421_v46  ;;  %v8610_v59 = vpack.c.bf16 %v1441_v50, %v1423_v49  ;;  %v8356_v5 = vpack.c.bf16 %v1438_v56, %v1420_v55  ;;  %v1530_v46 = vld [vmem:[%s19333_s5 + $0x1b10] sm:$0xff]  ;;  %v1548_v48 = vld [vmem:[%s19333_s5 + $0x1ba0] sm:$0xff]  ;;  %v1565_v49 = vld [vmem:[%s19333_s5 + $0x1c28] sm:$0xff] }
 0x1c9   : > { %v11459_v17 = vpop.f32.mrb[6].mxu1  ;;  %3038 = vmatprep.mubr.f32.mxu0 %v11448_v11  ;;  %3346 = vmatprep.mubr.f32.mxu1 %v11448_v11  ;;  %v8358_v10 = vpack.c.bf16 %v1475_v0, %v1457_v62  ;;  %v8364_v40 = vpack.c.bf16 %v1510_v26, %v1492_v25  ;;  %v8620_v41 = vpack.c.bf16 %v1512_v31, %v1494_v30  ;;  %v1583_v50 = vld [vmem:[%s19333_s5 + $0x1cb8] sm:$0xff]  ;;  %v1566_v62 = vld [vmem:[%s19333_s5 + $0x1c30] sm:$0xff]  ;;  %v1584_v0 = vld [vmem:[%s19333_s5 + $0x1cc0] sm:$0xff] }
 0x1ca   : > { %v631_v21 = vpop.f32.mrb[7].mxu1  ;;  %3039 = vmatmul.mubr.f32.gmra.mrb[2].mxu0 %v11440_v6  ;;  %3347 = vmatmul.mubr.f32.gmra.mrb[20].mxu1 %v11440_v6  ;;  %v8366_v44 = vpack.c.bf16 %v1547_v35, %v1529_v32  ;;  %v8624_v56 = vpack.c.bf16 %v1548_v48, %v1530_v46  ;;  %v1638_v32 = vld [vmem:[%s19333_s5 + $0x1e70] sm:$0xff]  ;;  %v1656_v35 = vld [vmem:[%s19333_s5 + $0x1f00] sm:$0xff] }
 0x1cb   : > { %8341 = vmatpush1.bf16.msra.mxu0 %v8340_v7  ;;  %8597 = vmatpush1.bf16.msra.mxu1 %v8596_v8  ;;  %v11483_v27 = vadd.f32 %v631_v21, %v11472_v22  ;;  %v8612_v7 = vpack.c.bf16 %v1440_v61, %v1422_v60  ;;  %v1456_v8 = vld [vmem:[%s19333_s5 + $0x18c0] sm:$0xff]  ;;  %v8370_v60 = vpack.c.bf16 %v1583_v50, %v1565_v49  ;;  %v1674_v49 = vld [vmem:[%s19333_s5 + $0x1f90] sm:$0xff] }
 0x1cc   : > { %8343 = vmatprep.subr.bf16.mxu0 %v8342_v12  ;;  %8599 = vmatprep.subr.bf16.mxu1 %v8598_v13  ;;  %v8614_v12 = vpack.c.bf16 %v1477_v3, %v1459_v2  ;;  %v1458_v13 = vld [vmem:[%s19333_s5 + $0x18d0] sm:$0xff]  ;;  %v1601_v2 = vld [vmem:[%s19333_s5 + $0x1d48] sm:$0xff]  ;;  %v1619_v3 = vld [vmem:[%s19333_s5 + $0x1dd8] sm:$0xff] }
 0x1cd   : > { %v11494_v33 = vpop.f32.mrb[8].mxu1  ;;  %3109 = vmatprep.mubr.f32.mxu0 %v11483_v27  ;;  %3417 = vmatprep.mubr.f32.mxu1 %v11483_v27  ;;  %v1692_v50 = vld [vmem:[%s19333_s5 + $0x2020] sm:$0xff] }
 0x1ce   : > { %v11507_v37 = vpop.f32.mrb[9].mxu1 }
 0x1cf   : > { %8345 = vmatpush1.bf16.msra.mxu0 %v8344_v23  ;;  %8601 = vmatpush1.bf16.msra.mxu1 %v8600_v24  ;;  %v8360_v23 = vpack.c.bf16 %v1474_v9, %v1456_v8  ;;  %v8616_v24 = vpack.c.bf16 %v1476_v14, %v1458_v13  ;;  %v8628_v9 = vpack.c.bf16 %v1584_v0, %v1566_v62 }
 0x1d0   : > { %8347 = vmatprep.subr.bf16.mxu0 %v8346_v28  ;;  %8603 = vmatprep.subr.bf16.mxu1 %v8602_v29  ;;  %v8362_v28 = vpack.c.bf16 %v1511_v18, %v1493_v15  ;;  %v8618_v29 = vpack.c.bf16 %v1513_v20, %v1495_v19  ;;  %v8374_v13 = vpack.c.bf16 %v1619_v3, %v1601_v2  ;;  %v1602_v15 = vld [vmem:[%s19333_s5 + $0x1d50] sm:$0xff]  ;;  %v1620_v18 = vld [vmem:[%s19333_s5 + $0x1de0] sm:$0xff]  ;;  %v1637_v19 = vld [vmem:[%s19333_s5 + $0x1e68] sm:$0xff] }
 0x1d1   : > { %v11524_v47 = vpop.f32.mrb[10].mxu1  ;;  %v1655_v20 = vld [vmem:[%s19333_s5 + $0x1ef8] sm:$0xff]  ;;  %v8632_v26 = vpack.c.bf16 %v1620_v18, %v1602_v15  ;;  %v1710_v2 = vld [vmem:[%s19333_s5 + $0x20b0] sm:$0xff]  ;;  %v1728_v3 = vld [vmem:[%s19333_s5 + $0x2140] sm:$0xff] }
 0x1d2   : > { %v11535_v51 = vpop.f32.mrb[11].mxu1  ;;  %v8378_v30 = vpack.c.bf16 %v1655_v20, %v1637_v19  ;;  %v1746_v19 = vld [vmem:[%s19333_s5 + $0x21d0] sm:$0xff]  ;;  %v1764_v20 = vld [vmem:[%s19333_s5 + $0x2260] sm:$0xff] }
 0x1d3   : > { %8349 = vmatpush1.bf16.msra.mxu0 %v8348_v38  ;;  %8605 = vmatpush1.bf16.msra.mxu1 %v8604_v39  ;;  %v1549_v38 = vld [vmem:[%s19333_s5 + $0x1ba8] sm:$0xff] }
 0x1d4   : > { %8351 = vmatprep.subr.bf16.mxu0 %v8350_v42  ;;  %8607 = vmatprep.subr.bf16.mxu1 %v8606_v43  ;;  %v1528_v42 = vld [vmem:[%s19333_s5 + $0x1b00] sm:$0xff]  ;;  %v1546_v43 = vld [vmem:[%s19333_s5 + $0x1b90] sm:$0xff]  ;;  %v8622_v45 = vpack.c.bf16 %v1549_v38, %v1531_v36  ;;  %v1673_v36 = vld [vmem:[%s19333_s5 + $0x1f88] sm:$0xff] }
 0x1d5   : > { %v11552_v63 = vpop.f32.mrb[12].mxu1  ;;  %v8368_v55 = vpack.c.bf16 %v1546_v43, %v1528_v42  ;;  %v1691_v38 = vld [vmem:[%s19333_s5 + $0x2018] sm:$0xff]  ;;  %v8636_v43 = vpack.c.bf16 %v1656_v35, %v1638_v32 }
 0x1d6   : > { %v11563_v4 = vpop.f32.mrb[13].mxu1  ;;  %v8382_v46 = vpack.c.bf16 %v1691_v38, %v1673_v36  ;;  %v1782_v36 = vld [vmem:[%s19333_s5 + $0x22f0] sm:$0xff]  ;;  %v1800_v38 = vld [vmem:[%s19333_s5 + $0x2380] sm:$0xff] }
 0x1d7   : > { %8353 = vmatpush1.bf16.msra.mxu0 %v8352_v53  ;;  %8609 = vmatpush1.bf16.msra.mxu1 %v8608_v54  ;;  %v1567_v53 = vld [vmem:[%s19333_s5 + $0x1c38] sm:$0xff]  ;;  %v1585_v54 = vld [vmem:[%s19333_s5 + $0x1cc8] sm:$0xff] }
 0x1d8   : > { %8355 = vmatprep.subr.bf16.mxu0 %v8354_v58  ;;  %8611 = vmatprep.subr.bf16.mxu1 %v8610_v59  ;;  %v1564_v58 = vld [vmem:[%s19333_s5 + $0x1c20] sm:$0xff]  ;;  %v1582_v59 = vld [vmem:[%s19333_s5 + $0x1cb0] sm:$0xff]  ;;  %v8626_v61 = vpack.c.bf16 %v1585_v54, %v1567_v53  ;;  %v1709_v53 = vld [vmem:[%s19333_s5 + $0x20a8] sm:$0xff] }
 0x1d9   : > { %v11580_v16 = vpop.f32.mrb[14].mxu1  ;;  %v8372_v8 = vpack.c.bf16 %v1582_v59, %v1564_v58  ;;  %v1727_v54 = vld [vmem:[%s19333_s5 + $0x2138] sm:$0xff]  ;;  %v8640_v59 = vpack.c.bf16 %v1692_v50, %v1674_v49  ;;  %v1816_v49 = vld [vmem:[%s19333_s5 + $0x2400] sm:$0xff]  ;;  %v1834_v50 = vld [vmem:[%s19333_s5 + $0x2490] sm:$0xff] }
 0x1da   : > { %v11591_v21 = vpop.f32.mrb[15].mxu1  ;;  %v8386_v62 = vpack.c.bf16 %v1727_v54, %v1709_v53  ;;  %v1818_v53 = vld [vmem:[%s19333_s5 + $0x2410] sm:$0xff]  ;;  %v1836_v54 = vld [vmem:[%s19333_s5 + $0x24a0] sm:$0xff] }
 0x1db   : > { %8357 = vmatpush1.bf16.msra.mxu0 %v8356_v5  ;;  %8613 = vmatpush1.bf16.msra.mxu1 %v8612_v7  ;;  %v1603_v5 = vld [vmem:[%s19333_s5 + $0x1d58] sm:$0xff]  ;;  %v1621_v7 = vld [vmem:[%s19333_s5 + $0x1de8] sm:$0xff] }
 0x1dc   : > { %8359 = vmatprep.subr.bf16.mxu0 %v8358_v10  ;;  %8615 = vmatprep.subr.bf16.mxu1 %v8614_v12  ;;  %v1600_v10 = vld [vmem:[%s19333_s5 + $0x1d40] sm:$0xff]  ;;  %v1618_v12 = vld [vmem:[%s19333_s5 + $0x1dd0] sm:$0xff]  ;;  %v8630_v14 = vpack.c.bf16 %v1621_v7, %v1603_v5  ;;  %v1745_v5 = vld [vmem:[%s19333_s5 + $0x21c8] sm:$0xff] }
 0x1dd   : > { %v11608_v34 = vpop.f32.mrb[16].mxu1  ;;  %v8376_v25 = vpack.c.bf16 %v1618_v12, %v1600_v10  ;;  %v1763_v7 = vld [vmem:[%s19333_s5 + $0x2258] sm:$0xff]  ;;  %v8644_v12 = vpack.c.bf16 %v1728_v3, %v1710_v2  ;;  %v1852_v2 = vld [vmem:[%s19333_s5 + $0x2520] sm:$0xff]  ;;  %v1870_v3 = vld [vmem:[%s19333_s5 + $0x25b0] sm:$0xff] }
 0x1de   : > { %v11619_v39 = vpop.f32.mrb[17].mxu1  ;;  %v8390_v15 = vpack.c.bf16 %v1763_v7, %v1745_v5 }
 0x1df   : > { %8361 = vmatpush1.bf16.msra.mxu0 %v8360_v23  ;;  %8617 = vmatpush1.bf16.msra.mxu1 %v8616_v24  ;;  %v1639_v23 = vld [vmem:[%s19333_s5 + $0x1e78] sm:$0xff]  ;;  %v1657_v24 = vld [vmem:[%s19333_s5 + $0x1f08] sm:$0xff] }
 0x1e0   : > { %8363 = vmatprep.subr.bf16.mxu0 %v8362_v28  ;;  %8619 = vmatprep.subr.bf16.mxu1 %v8618_v29  ;;  %v1636_v28 = vld [vmem:[%s19333_s5 + $0x1e60] sm:$0xff]  ;;  %v1654_v29 = vld [vmem:[%s19333_s5 + $0x1ef0] sm:$0xff]  ;;  %v8634_v31 = vpack.c.bf16 %v1657_v24, %v1639_v23  ;;  %v1781_v23 = vld [vmem:[%s19333_s5 + $0x22e8] sm:$0xff] }
 0x1e1   : > { %v8380_v42 = vpack.c.bf16 %v1654_v29, %v1636_v28  ;;  %v1799_v24 = vld [vmem:[%s19333_s5 + $0x2378] sm:$0xff]  ;;  %v8648_v29 = vpack.c.bf16 %v1764_v20, %v1746_v19  ;;  %v1888_v19 = vld [vmem:[%s19333_s5 + $0x2640] sm:$0xff]  ;;  %v1906_v20 = vld [vmem:[%s19333_s5 + $0x26d0] sm:$0xff] }
 0x1e2   : > { %v8394_v32 = vpack.c.bf16 %v1799_v24, %v1781_v23  ;;  %v1890_v23 = vld [vmem:[%s19333_s5 + $0x2650] sm:$0xff] }
 0x1e3   : > { %8365 = vmatpush1.bf16.msra.mxu0 %v8364_v40  ;;  %8621 = vmatpush1.bf16.msra.mxu1 %v8620_v41  ;;  %v1675_v40 = vld [vmem:[%s19333_s5 + $0x1f98] sm:$0xff]  ;;  %v1693_v41 = vld [vmem:[%s19333_s5 + $0x2028] sm:$0xff] }
 0x1e4   : > { %8367 = vmatprep.subr.bf16.mxu0 %v8366_v44  ;;  %8623 = vmatprep.subr.bf16.mxu1 %v8622_v45  ;;  %v1672_v44 = vld [vmem:[%s19333_s5 + $0x1f80] sm:$0xff]  ;;  %v1690_v45 = vld [vmem:[%s19333_s5 + $0x2010] sm:$0xff]  ;;  %v8638_v48 = vpack.c.bf16 %v1693_v41, %v1675_v40  ;;  %v1817_v40 = vld [vmem:[%s19333_s5 + $0x2408] sm:$0xff] }
 0x1e5   : > { %v8384_v58 = vpack.c.bf16 %v1690_v45, %v1672_v44  ;;  %v1835_v41 = vld [vmem:[%s19333_s5 + $0x2498] sm:$0xff]  ;;  %v8652_v45 = vpack.c.bf16 %v1800_v38, %v1782_v36  ;;  %v1924_v36 = vld [vmem:[%s19333_s5 + $0x2760] sm:$0xff]  ;;  %v1942_v38 = vld [vmem:[%s19333_s5 + $0x27f0] sm:$0xff] }
 0x1e7   : > { %8369 = vmatpush1.bf16.msra.mxu0 %v8368_v55  ;;  %8625 = vmatpush1.bf16.msra.mxu1 %v8624_v56  ;;  %v1711_v55 = vld [vmem:[%s19333_s5 + $0x20b8] sm:$0xff]  ;;  %v1729_v56 = vld [vmem:[%s19333_s5 + $0x2148] sm:$0xff] }
 0x1e8   : > { %8371 = vmatprep.subr.bf16.mxu0 %v8370_v60  ;;  %8627 = vmatprep.subr.bf16.mxu1 %v8626_v61  ;;  %v1708_v60 = vld [vmem:[%s19333_s5 + $0x20a0] sm:$0xff]  ;;  %v1726_v61 = vld [vmem:[%s19333_s5 + $0x2130] sm:$0xff]  ;;  %v8642_v0 = vpack.c.bf16 %v1729_v56, %v1711_v55  ;;  %v1853_v55 = vld [vmem:[%s19333_s5 + $0x2528] sm:$0xff] }
 0x1e9   : > { %v8388_v10 = vpack.c.bf16 %v1726_v61, %v1708_v60  ;;  %v1871_v56 = vld [vmem:[%s19333_s5 + $0x25b8] sm:$0xff]  ;;  %v8400_v60 = vpack.c.bf16 %v1834_v50, %v1816_v49  ;;  %v505_v61 = vpop.permute.xlu0 %504 }
 0x1ea   : > { %v11848_v5 = vadd.f32 %v11507_v37, %v505_v61  ;;  %v8402_v7 = vpack.c.bf16 %v1871_v56, %v1853_v55  ;;  %v1907_v37 = vld [vmem:[%s19333_s5 + $0x26d8] sm:$0xff]  ;;  %v1962_v55 = vld [vmem:[%s19333_s5 + $0x2890] sm:$0xff] }
 0x1eb   : > { %8373 = vmatpush1.bf16.msra.mxu0 %v8372_v8  ;;  %8629 = vmatpush1.bf16.msra.mxu1 %v8628_v9  ;;  %v1747_v8 = vld [vmem:[%s19333_s5 + $0x21d8] sm:$0xff]  ;;  %v1765_v9 = vld [vmem:[%s19333_s5 + $0x2268] sm:$0xff] }
 0x1ec   : > { %8375 = vmatprep.subr.bf16.mxu0 %v8374_v13  ;;  %8631 = vmatprep.subr.bf16.mxu1 %v8630_v14  ;;  %v1744_v13 = vld [vmem:[%s19333_s5 + $0x21c0] sm:$0xff]  ;;  %v1762_v14 = vld [vmem:[%s19333_s5 + $0x2250] sm:$0xff]  ;;  %v8646_v18 = vpack.c.bf16 %v1765_v9, %v1747_v8  ;;  %v1889_v9 = vld [vmem:[%s19333_s5 + $0x2648] sm:$0xff] }
 0x1ed   : > { %v8392_v28 = vpack.c.bf16 %v1762_v14, %v1744_v13  ;;  %v8404_v13 = vpack.c.bf16 %v1870_v3, %v1852_v2  ;;  %v11872_v14 = vadd.f32 %v11494_v33, %v505_v61  ;;  %v8406_v24 = vpack.c.bf16 %v1907_v37, %v1889_v9  ;;  %v1999_v61 = vld [vmem:[%s19333_s5 + $0x29b8] sm:$0xff]  ;;  %v2016_v37 = vld [vmem:[%s19333_s5 + $0x2a40] sm:$0xff] }
 0x1ef   : > { %8377 = vmatpush1.bf16.msra.mxu0 %v8376_v25  ;;  %8633 = vmatpush1.bf16.msra.mxu1 %v8632_v26  ;;  %v1783_v25 = vld [vmem:[%s19333_s5 + $0x22f8] sm:$0xff]  ;;  %v1801_v26 = vld [vmem:[%s19333_s5 + $0x2388] sm:$0xff] }
 0x1f0   : > { %8379 = vmatprep.subr.bf16.mxu0 %v8378_v30  ;;  %8635 = vmatprep.subr.bf16.mxu1 %v8634_v31  ;;  %v1780_v30 = vld [vmem:[%s19333_s5 + $0x22e0] sm:$0xff]  ;;  %v1798_v31 = vld [vmem:[%s19333_s5 + $0x2370] sm:$0xff]  ;;  %v8650_v35 = vpack.c.bf16 %v1801_v26, %v1783_v25 }
 0x1f1   : > { %v8396_v44 = vpack.c.bf16 %v1798_v31, %v1780_v30  ;;  %v1908_v26 = vld [vmem:[%s19333_s5 + $0x26e0] sm:$0xff]  ;;  %v1945_v30 = vld [vmem:[%s19333_s5 + $0x2808] sm:$0xff]  ;;  %v8408_v31 = vpack.c.bf16 %v1906_v20, %v1888_v19 }
 0x1f3   : > { %8381 = vmatpush1.bf16.msra.mxu0 %v8380_v42  ;;  %8637 = vmatpush1.bf16.msra.mxu1 %v8636_v43  ;;  %v1819_v42 = vld [vmem:[%s19333_s5 + $0x2418] sm:$0xff]  ;;  %v1837_v43 = vld [vmem:[%s19333_s5 + $0x24a8] sm:$0xff] }
 0x1f4   : > { %8383 = vmatprep.subr.bf16.mxu0 %v8382_v46  ;;  %8639 = vmatprep.subr.bf16.mxu1 %v8638_v48  ;;  %v8398_v46 = vpack.c.bf16 %v1835_v41, %v1817_v40  ;;  %v8654_v48 = vpack.c.bf16 %v1837_v43, %v1819_v42  ;;  %v1926_v40 = vld [vmem:[%s19333_s5 + $0x2770] sm:$0xff]  ;;  %v1944_v42 = vld [vmem:[%s19333_s5 + $0x2800] sm:$0xff]  ;;  %v1961_v43 = vld [vmem:[%s19333_s5 + $0x2888] sm:$0xff] }
 0x1f5   : > { %v8668_v49 = vpack.c.bf16 %v1944_v42, %v1926_v40  ;;  %v2068_v40 = vld [vmem:[%s19333_s5 + $0x2be0] sm:$0xff]  ;;  %v2070_v42 = vld [vmem:[%s19333_s5 + $0x2bf0] sm:$0xff] }
 0x1f7   : > { %8385 = vmatpush1.bf16.msra.mxu0 %v8384_v58  ;;  %8641 = vmatpush1.bf16.msra.mxu1 %v8640_v59  ;;  %v1855_v58 = vld [vmem:[%s19333_s5 + $0x2538] sm:$0xff]  ;;  %v1873_v59 = vld [vmem:[%s19333_s5 + $0x25c8] sm:$0xff] }
 0x1f8   : > { %8387 = vmatprep.subr.bf16.mxu0 %v8386_v62  ;;  %8643 = vmatprep.subr.bf16.mxu1 %v8642_v0  ;;  %v11839_v62 = vadd.f32 %v11459_v17, %v11472_v22  ;;  %v8656_v0 = vpack.c.bf16 %v1836_v54, %v1818_v53  ;;  %v8658_v8 = vpack.c.bf16 %v1873_v59, %v1855_v58  ;;  %v1854_v17 = vld [vmem:[%s19333_s5 + $0x2530] sm:$0xff]  ;;  %v1872_v22 = vld [vmem:[%s19333_s5 + $0x25c0] sm:$0xff]  ;;  %v1997_v59 = vld [vmem:[%s19333_s5 + $0x29a8] sm:$0xff] }
 0x1f9   : > { %v1960_v53 = vld [vmem:[%s19333_s5 + $0x2880] sm:$0xff]  ;;  %v1978_v54 = vld [vmem:[%s19333_s5 + $0x2910] sm:$0xff] }
 0x1fa   : > { %v1980_v58 = vld [vmem:[%s19333_s5 + $0x2920] sm:$0xff]  ;;  %v8416_v2 = vpack.c.bf16 %v1978_v54, %v1960_v53 }
 0x1fb   : > { %8389 = vmatpush1.bf16.msra.mxu0 %v8388_v10  ;;  %8645 = vmatpush1.bf16.msra.mxu1 %v8644_v12  ;;  %v1891_v10 = vld [vmem:[%s19333_s5 + $0x2658] sm:$0xff]  ;;  %v1909_v12 = vld [vmem:[%s19333_s5 + $0x26e8] sm:$0xff]  ;;  %v8672_v3 = vpack.c.bf16 %v1980_v58, %v1962_v55  ;;  %v2104_v55 = vld [vmem:[%s19333_s5 + $0x2d00] sm:$0xff] }
 0x1fc   : > { %8391 = vmatprep.subr.bf16.mxu0 %v8390_v15  ;;  %8647 = vmatprep.subr.bf16.mxu1 %v8646_v18  ;;  %v11874_v15 = vpop.permute.xlu1 %509  ;;  %v8660_v18 = vpack.c.bf16 %v1872_v22, %v1854_v17  ;;  %v8662_v25 = vpack.c.bf16 %v1909_v12, %v1891_v10  ;;  %v2014_v17 = vld [vmem:[%s19333_s5 + $0x2a30] sm:$0xff]  ;;  %v2033_v10 = vld [vmem:[%s19333_s5 + $0x2ac8] sm:$0xff]  ;;  %v2051_v12 = vld [vmem:[%s19333_s5 + $0x2b58] sm:$0xff] }
 0x1fd   : > { %v11888_v33 = vadd.f32 %v11535_v51, %v11874_v15  ;;  %v1927_v51 = vld [vmem:[%s19333_s5 + $0x2778] sm:$0xff]  ;;  %v1998_v22 = vld [vmem:[%s19333_s5 + $0x29b0] sm:$0xff] }
 0x1fe   : > { %v8666_v41 = vpack.c.bf16 %v1945_v30, %v1927_v51  ;;  %v8676_v20 = vpack.c.bf16 %v2016_v37, %v1998_v22  ;;  %v2069_v51 = vld [vmem:[%s19333_s5 + $0x2be8] sm:$0xff]  ;;  %v2087_v30 = vld [vmem:[%s19333_s5 + $0x2c78] sm:$0xff]  ;;  %v2106_v58 = vld [vmem:[%s19333_s5 + $0x2d10] sm:$0xff] }
 0x1ff   : > { %8393 = vmatpush1.bf16.msra.mxu0 %v8392_v28  ;;  %8649 = vmatpush1.bf16.msra.mxu1 %v8648_v29  ;;  %v1925_v28 = vld [vmem:[%s19333_s5 + $0x2768] sm:$0xff]  ;;  %v1943_v29 = vld [vmem:[%s19333_s5 + $0x27f8] sm:$0xff]  ;;  %v2140_v22 = vld [vmem:[%s19333_s5 + $0x2e20] sm:$0xff] }
 0x200   : > { %8395 = vmatprep.subr.bf16.mxu0 %v8394_v32  ;;  %8651 = vmatprep.subr.bf16.mxu1 %v8650_v35  ;;  %v8664_v32 = vpack.c.bf16 %v1908_v26, %v1890_v23  ;;  %v8410_v35 = vpack.c.bf16 %v1943_v29, %v1925_v28  ;;  %v8422_v23 = vpack.c.bf16 %v2051_v12, %v2033_v10  ;;  %v2034_v26 = vld [vmem:[%s19333_s5 + $0x2ad0] sm:$0xff]  ;;  %v2052_v29 = vld [vmem:[%s19333_s5 + $0x2b60] sm:$0xff] }
 0x201   : > { %v2142_v37 = vld [vmem:[%s19333_s5 + $0x2e30] sm:$0xff]  ;;  %v2160_v12 = vld [vmem:[%s19333_s5 + $0x2ec0] sm:$0xff] }
 0x203   : > { %8397 = vmatpush1.bf16.msra.mxu0 %v8396_v44  ;;  %8653 = vmatpush1.bf16.msra.mxu1 %v8652_v45  ;;  %v1979_v44 = vld [vmem:[%s19333_s5 + $0x2918] sm:$0xff] }
 0x204   : > { %8399 = vmatprep.subr.bf16.mxu0 %v8398_v46  ;;  %8655 = vmatprep.subr.bf16.mxu1 %v8654_v48  ;;  %v1963_v45 = vld [vmem:[%s19333_s5 + $0x2898] sm:$0xff]  ;;  %v1981_v46 = vld [vmem:[%s19333_s5 + $0x2928] sm:$0xff]  ;;  %v8412_v48 = vpack.c.bf16 %v1942_v38, %v1924_v36  ;;  %v8414_v50 = vpack.c.bf16 %v1979_v44, %v1961_v43  ;;  %v8680_v36 = vpack.c.bf16 %v2052_v29, %v2034_v26  ;;  %v2088_v44 = vld [vmem:[%s19333_s5 + $0x2c80] sm:$0xff] }
 0x205   : > { %v8670_v56 = vpack.c.bf16 %v1981_v46, %v1963_v45  ;;  %v8426_v38 = vpack.c.bf16 %v2087_v30, %v2069_v51  ;;  %v2105_v45 = vld [vmem:[%s19333_s5 + $0x2d08] sm:$0xff]  ;;  %v2123_v46 = vld [vmem:[%s19333_s5 + $0x2d98] sm:$0xff]  ;;  %v8684_v53 = vpack.c.bf16 %v2088_v44, %v2070_v42  ;;  %v2176_v26 = vld [vmem:[%s19333_s5 + $0x2f40] sm:$0xff] }
 0x206   : > { %3110 = vmatmul.mubr.f32.vlgmr.msra.gmra.mrb[0].mxu0 %v11839_v62  ;;  %3418 = vmatmul.mubr.f32.vlgmr.msra.gmra.mrb[18].mxu1 %v11839_v62  ;;  %v8430_v54 = vpack.c.bf16 %v2123_v46, %v2105_v45  ;;  %v2178_v29 = vld [vmem:[%s19333_s5 + $0x2f50] sm:$0xff]  ;;  %v2196_v30 = vld [vmem:[%s19333_s5 + $0x2fe0] sm:$0xff] }
 0x207   : > { %3115 = vmatprep.mubr.f32.mxu0 %v11848_v5  ;;  %8401 = vmatpush1.bf16.msra.mxu0 %v8400_v60  ;;  %v2015_v60 = vld [vmem:[%s19333_s5 + $0x2a38] sm:$0xff]  ;;  %v2212_v42 = vld [vmem:[%s19333_s5 + $0x3060] sm:$0xff]  ;;  %v2214_v44 = vld [vmem:[%s19333_s5 + $0x3070] sm:$0xff] }
 0x208   : > { %3423 = vmatprep.mubr.f32.mxu1 %v11848_v5  ;;  %8657 = vmatpush1.bf16.msra.mxu1 %v8656_v0  ;;  %v2017_v0 = vld [vmem:[%s19333_s5 + $0x2a48] sm:$0xff]  ;;  %v2232_v46 = vld [vmem:[%s19333_s5 + $0x3100] sm:$0xff] }
 0x209   : > { %8403 = vmatprep.subr.bf16.mxu0 %v8402_v7  ;;  %8659 = vmatprep.subr.bf16.mxu1 %v8658_v8  ;;  %v8418_v7 = vpack.c.bf16 %v2015_v60, %v1997_v59  ;;  %v1996_v8 = vld [vmem:[%s19333_s5 + $0x29a0] sm:$0xff]  ;;  %v8674_v9 = vpack.c.bf16 %v2017_v0, %v1999_v61  ;;  %v2141_v61 = vld [vmem:[%s19333_s5 + $0x2e28] sm:$0xff]  ;;  %v2159_v0 = vld [vmem:[%s19333_s5 + $0x2eb8] sm:$0xff] }
 0x20a   : > { %3116 = vmatmul.mubr.f32.gmra.mrb[2].mxu0 %v11872_v14  ;;  %3424 = vmatmul.mubr.f32.gmra.mrb[20].mxu1 %v11872_v14  ;;  %v8420_v19 = vpack.c.bf16 %v2014_v17, %v1996_v8  ;;  %v2124_v60 = vld [vmem:[%s19333_s5 + $0x2da0] sm:$0xff]  ;;  %v8434_v17 = vpack.c.bf16 %v2159_v0, %v2141_v61 }
 0x20b   : > { %8405 = vmatpush1.bf16.msra.mxu0 %v8404_v13  ;;  %3186 = vmatprep.mubr.f32.mxu0 %v11888_v33  ;;  %v2035_v13 = vld [vmem:[%s19333_s5 + $0x2ad8] sm:$0xff]  ;;  %v8688_v8 = vpack.c.bf16 %v2124_v60, %v2106_v58  ;;  %v2248_v58 = vld [vmem:[%s19333_s5 + $0x3180] sm:$0xff]  ;;  %v2250_v60 = vld [vmem:[%s19333_s5 + $0x3190] sm:$0xff] }
 0x20c   : > { %8661 = vmatpush1.bf16.msra.mxu1 %v8660_v18  ;;  %3494 = vmatprep.mubr.f32.mxu1 %v11888_v33  ;;  %v2053_v18 = vld [vmem:[%s19333_s5 + $0x2b68] sm:$0xff]  ;;  %v2268_v0 = vld [vmem:[%s19333_s5 + $0x3220] sm:$0xff] }
 0x20d   : > { %8407 = vmatprep.subr.bf16.mxu0 %v8406_v24  ;;  %8663 = vmatprep.subr.bf16.mxu1 %v8662_v25  ;;  %v2032_v24 = vld [vmem:[%s19333_s5 + $0x2ac0] sm:$0xff]  ;;  %v2050_v25 = vld [vmem:[%s19333_s5 + $0x2b50] sm:$0xff]  ;;  %v8678_v28 = vpack.c.bf16 %v2053_v18, %v2035_v13  ;;  %v2177_v13 = vld [vmem:[%s19333_s5 + $0x2f48] sm:$0xff] }
 0x20e   : > { %v2195_v18 = vld [vmem:[%s19333_s5 + $0x2fd8] sm:$0xff] }
 0x20f   : > { %8409 = vmatpush1.bf16.msra.mxu0 %v8408_v31  ;;  %v2071_v31 = vld [vmem:[%s19333_s5 + $0x2bf8] sm:$0xff] }
 0x210   : > { %8665 = vmatpush1.bf16.msra.mxu1 %v8664_v32  ;;  %8411 = vmatprep.subr.bf16.mxu0 %v8410_v35  ;;  %v2089_v32 = vld [vmem:[%s19333_s5 + $0x2c88] sm:$0xff]  ;;  %v8424_v35 = vpack.c.bf16 %v2050_v25, %v2032_v24  ;;  %v8692_v24 = vpack.c.bf16 %v2160_v12, %v2142_v37  ;;  %v8438_v25 = vpack.c.bf16 %v2195_v18, %v2177_v13  ;;  %v2284_v37 = vld [vmem:[%s19333_s5 + $0x32a0] sm:$0xff]  ;;  %v2286_v12 = vld [vmem:[%s19333_s5 + $0x32b0] sm:$0xff] }
 0x211   : > { %8667 = vmatprep.subr.bf16.mxu1 %v8666_v41  ;;  %v2086_v41 = vld [vmem:[%s19333_s5 + $0x2c70] sm:$0xff]  ;;  %v8682_v43 = vpack.c.bf16 %v2089_v32, %v2071_v31  ;;  %v2213_v31 = vld [vmem:[%s19333_s5 + $0x3068] sm:$0xff]  ;;  %v2231_v32 = vld [vmem:[%s19333_s5 + $0x30f8] sm:$0xff] }
 0x212   : > { %v2304_v18 = vld [vmem:[%s19333_s5 + $0x3340] sm:$0xff] }
 0x213   : > { %8413 = vmatpush1.bf16.msra.mxu0 %v8412_v48  ;;  %v2107_v48 = vld [vmem:[%s19333_s5 + $0x2d18] sm:$0xff] }
 0x214   : > { %8669 = vmatpush1.bf16.msra.mxu1 %v8668_v49  ;;  %8415 = vmatprep.subr.bf16.mxu0 %v8414_v50  ;;  %v2125_v49 = vld [vmem:[%s19333_s5 + $0x2da8] sm:$0xff]  ;;  %v8428_v50 = vpack.c.bf16 %v2086_v41, %v2068_v40  ;;  %v8696_v40 = vpack.c.bf16 %v2196_v30, %v2178_v29  ;;  %v8442_v41 = vpack.c.bf16 %v2231_v32, %v2213_v31  ;;  %v2320_v29 = vld [vmem:[%s19333_s5 + $0x33c0] sm:$0xff]  ;;  %v2322_v30 = vld [vmem:[%s19333_s5 + $0x33d0] sm:$0xff] }
 0x215   : > { %8671 = vmatprep.subr.bf16.mxu1 %v8670_v56  ;;  %v2122_v56 = vld [vmem:[%s19333_s5 + $0x2d90] sm:$0xff]  ;;  %v8686_v59 = vpack.c.bf16 %v2125_v49, %v2107_v48  ;;  %v2249_v48 = vld [vmem:[%s19333_s5 + $0x3188] sm:$0xff]  ;;  %v2267_v49 = vld [vmem:[%s19333_s5 + $0x3218] sm:$0xff] }
 0x216   : > { %v2340_v32 = vld [vmem:[%s19333_s5 + $0x3460] sm:$0xff] }
 0x217   : > { %8417 = vmatpush1.bf16.msra.mxu0 %v8416_v2  ;;  %v2143_v2 = vld [vmem:[%s19333_s5 + $0x2e38] sm:$0xff] }
 0x218   : > { %8673 = vmatpush1.bf16.msra.mxu1 %v8672_v3  ;;  %8419 = vmatprep.subr.bf16.mxu0 %v8418_v7  ;;  %v2161_v3 = vld [vmem:[%s19333_s5 + $0x2ec8] sm:$0xff]  ;;  %v8432_v7 = vpack.c.bf16 %v2122_v56, %v2104_v55  ;;  %v8700_v55 = vpack.c.bf16 %v2232_v46, %v2214_v44  ;;  %v8446_v56 = vpack.c.bf16 %v2267_v49, %v2249_v48  ;;  %v2356_v44 = vld [vmem:[%s19333_s5 + $0x34e0] sm:$0xff]  ;;  %v2358_v46 = vld [vmem:[%s19333_s5 + $0x34f0] sm:$0xff] }
 0x219   : > { %8675 = vmatprep.subr.bf16.mxu1 %v8674_v9  ;;  %v2158_v9 = vld [vmem:[%s19333_s5 + $0x2eb0] sm:$0xff]  ;;  %v8690_v10 = vpack.c.bf16 %v2161_v3, %v2143_v2  ;;  %v2285_v2 = vld [vmem:[%s19333_s5 + $0x32a8] sm:$0xff]  ;;  %v2303_v3 = vld [vmem:[%s19333_s5 + $0x3338] sm:$0xff] }
 0x21a   : > { %v2376_v49 = vld [vmem:[%s19333_s5 + $0x3580] sm:$0xff] }
 0x21b   : > { %8421 = vmatpush1.bf16.msra.mxu0 %v8420_v19  ;;  %v2179_v19 = vld [vmem:[%s19333_s5 + $0x2f58] sm:$0xff] }
 0x21c   : > { %8677 = vmatpush1.bf16.msra.mxu1 %v8676_v20  ;;  %8423 = vmatprep.subr.bf16.mxu0 %v8422_v23  ;;  %v2197_v20 = vld [vmem:[%s19333_s5 + $0x2fe8] sm:$0xff]  ;;  %v8436_v23 = vpack.c.bf16 %v2158_v9, %v2140_v22  ;;  %v8704_v22 = vpack.c.bf16 %v2268_v0, %v2250_v60  ;;  %v8450_v9 = vpack.c.bf16 %v2303_v3, %v2285_v2  ;;  %v2410_v0 = vld [vmem:[%s19333_s5 + $0x3690] sm:$0xff]  ;;  %v2412_v3 = vld [vmem:[%s19333_s5 + $0x36a0] sm:$0xff] }
 0x21d   : > { %8679 = vmatprep.subr.bf16.mxu1 %v8678_v28  ;;  %v2194_v28 = vld [vmem:[%s19333_s5 + $0x2fd0] sm:$0xff]  ;;  %v8694_v51 = vpack.c.bf16 %v2197_v20, %v2179_v19  ;;  %v2321_v19 = vld [vmem:[%s19333_s5 + $0x33c8] sm:$0xff]  ;;  %v2339_v20 = vld [vmem:[%s19333_s5 + $0x3458] sm:$0xff] }
 0x21e   : > { %v2394_v2 = vld [vmem:[%s19333_s5 + $0x3610] sm:$0xff] }
 0x21f   : > { %8425 = vmatpush1.bf16.msra.mxu0 %v8424_v35  ;;  %v2215_v35 = vld [vmem:[%s19333_s5 + $0x3078] sm:$0xff] }
 0x220   : > { %8681 = vmatpush1.bf16.msra.mxu1 %v8680_v36  ;;  %8427 = vmatprep.subr.bf16.mxu0 %v8426_v38  ;;  %v2233_v36 = vld [vmem:[%s19333_s5 + $0x3108] sm:$0xff]  ;;  %v8440_v38 = vpack.c.bf16 %v2194_v28, %v2176_v26  ;;  %v8708_v26 = vpack.c.bf16 %v2304_v18, %v2286_v12  ;;  %v8454_v28 = vpack.c.bf16 %v2339_v20, %v2321_v19  ;;  %v2428_v19 = vld [vmem:[%s19333_s5 + $0x3720] sm:$0xff]  ;;  %v2446_v20 = vld [vmem:[%s19333_s5 + $0x37b0] sm:$0xff] }
 0x221   : > { %8683 = vmatprep.subr.bf16.mxu1 %v8682_v43  ;;  %v2230_v43 = vld [vmem:[%s19333_s5 + $0x30f0] sm:$0xff]  ;;  %v8698_v45 = vpack.c.bf16 %v2233_v36, %v2215_v35  ;;  %v2357_v35 = vld [vmem:[%s19333_s5 + $0x34e8] sm:$0xff]  ;;  %v2375_v36 = vld [vmem:[%s19333_s5 + $0x3578] sm:$0xff] }
 0x223   : > { %8429 = vmatpush1.bf16.msra.mxu0 %v8428_v50  ;;  %v2251_v50 = vld [vmem:[%s19333_s5 + $0x3198] sm:$0xff] }
 0x224   : > { %8685 = vmatpush1.bf16.msra.mxu1 %v8684_v53  ;;  %8431 = vmatprep.subr.bf16.mxu0 %v8430_v54  ;;  %v2269_v53 = vld [vmem:[%s19333_s5 + $0x3228] sm:$0xff]  ;;  %v8444_v54 = vpack.c.bf16 %v2230_v43, %v2212_v42  ;;  %v8712_v42 = vpack.c.bf16 %v2340_v32, %v2322_v30  ;;  %v8458_v43 = vpack.c.bf16 %v2375_v36, %v2357_v35  ;;  %v2464_v35 = vld [vmem:[%s19333_s5 + $0x3840] sm:$0xff]  ;;  %v2466_v36 = vld [vmem:[%s19333_s5 + $0x3850] sm:$0xff] }
 0x225   : > { %8687 = vmatprep.subr.bf16.mxu1 %v8686_v59  ;;  %v2266_v59 = vld [vmem:[%s19333_s5 + $0x3210] sm:$0xff]  ;;  %v8702_v61 = vpack.c.bf16 %v2269_v53, %v2251_v50  ;;  %v2393_v50 = vld [vmem:[%s19333_s5 + $0x3608] sm:$0xff]  ;;  %v2411_v53 = vld [vmem:[%s19333_s5 + $0x3698] sm:$0xff] }
 0x227   : > { %8433 = vmatpush1.bf16.msra.mxu0 %v8432_v7  ;;  %v2287_v7 = vld [vmem:[%s19333_s5 + $0x32b8] sm:$0xff] }
 0x228   : > { %8689 = vmatpush1.bf16.msra.mxu1 %v8688_v8  ;;  %8435 = vmatprep.subr.bf16.mxu0 %v8434_v17  ;;  %v2305_v8 = vld [vmem:[%s19333_s5 + $0x3348] sm:$0xff]  ;;  %v8448_v17 = vpack.c.bf16 %v2266_v59, %v2248_v58  ;;  %v8716_v58 = vpack.c.bf16 %v2376_v49, %v2358_v46  ;;  %v8462_v59 = vpack.c.bf16 %v2411_v53, %v2393_v50  ;;  %v2518_v49 = vld [vmem:[%s19333_s5 + $0x39f0] sm:$0xff] }
 0x229   : > { %8691 = vmatprep.subr.bf16.mxu1 %v8690_v10  ;;  %v2302_v10 = vld [vmem:[%s19333_s5 + $0x3330] sm:$0xff]  ;;  %v8706_v13 = vpack.c.bf16 %v2305_v8, %v2287_v7  ;;  %v2429_v7 = vld [vmem:[%s19333_s5 + $0x3728] sm:$0xff]  ;;  %v2447_v8 = vld [vmem:[%s19333_s5 + $0x37b8] sm:$0xff] }
 0x22a   : > { %v8466_v18 = vpack.c.bf16 %v2447_v8, %v2429_v7  ;;  %v2502_v50 = vld [vmem:[%s19333_s5 + $0x3970] sm:$0xff] }
 0x22b   : > { %8437 = vmatpush1.bf16.msra.mxu0 %v8436_v23  ;;  %v2323_v23 = vld [vmem:[%s19333_s5 + $0x33d8] sm:$0xff]  ;;  %v2538_v7 = vld [vmem:[%s19333_s5 + $0x3a90] sm:$0xff] }
 0x22c   : > { %8693 = vmatpush1.bf16.msra.mxu1 %v8692_v24  ;;  %8439 = vmatprep.subr.bf16.mxu0 %v8438_v25  ;;  %v2341_v24 = vld [vmem:[%s19333_s5 + $0x3468] sm:$0xff]  ;;  %v8452_v25 = vpack.c.bf16 %v2302_v10, %v2284_v37  ;;  %v12247_v37 = vadd.f32 %v11524_v47, %v11874_v15  ;;  %v2430_v47 = vld [vmem:[%s19333_s5 + $0x3730] sm:$0xff] }
 0x22d   : > { %8695 = vmatprep.subr.bf16.mxu1 %v8694_v51  ;;  %v2338_v51 = vld [vmem:[%s19333_s5 + $0x3450] sm:$0xff]  ;;  %v8710_v31 = vpack.c.bf16 %v2341_v24, %v2323_v23  ;;  %v2465_v23 = vld [vmem:[%s19333_s5 + $0x3848] sm:$0xff]  ;;  %v2483_v24 = vld [vmem:[%s19333_s5 + $0x38d8] sm:$0xff] }
 0x22e   : > { %v8470_v32 = vpack.c.bf16 %v2483_v24, %v2465_v23  ;;  %v2592_v24 = vld [vmem:[%s19333_s5 + $0x3c40] sm:$0xff] }
 0x22f   : > { %8441 = vmatpush1.bf16.msra.mxu0 %v8440_v38  ;;  %v2359_v38 = vld [vmem:[%s19333_s5 + $0x34f8] sm:$0xff] }
 0x230   : > { %8697 = vmatpush1.bf16.msra.mxu1 %v8696_v40  ;;  %8443 = vmatprep.subr.bf16.mxu0 %v8442_v41  ;;  %v2377_v40 = vld [vmem:[%s19333_s5 + $0x3588] sm:$0xff]  ;;  %v8456_v41 = vpack.c.bf16 %v2338_v51, %v2320_v29  ;;  %v12282_v29 = vpop.permute.xlu1 %519  ;;  %v8468_v51 = vpack.c.bf16 %v2446_v20, %v2428_v19 }
 0x231   : > { %8699 = vmatprep.subr.bf16.mxu1 %v8698_v45  ;;  %v2374_v45 = vld [vmem:[%s19333_s5 + $0x3570] sm:$0xff]  ;;  %v8714_v48 = vpack.c.bf16 %v2377_v40, %v2359_v38  ;;  %v12287_v30 = vadd.f32 %v11591_v21, %v12282_v29  ;;  %v2484_v38 = vld [vmem:[%s19333_s5 + $0x38e0] sm:$0xff]  ;;  %v2501_v40 = vld [vmem:[%s19333_s5 + $0x3968] sm:$0xff] }
 0x233   : > { %8445 = vmatpush1.bf16.msra.mxu0 %v8444_v54  ;;  %v2395_v54 = vld [vmem:[%s19333_s5 + $0x3618] sm:$0xff] }
 0x234   : > { %8701 = vmatpush1.bf16.msra.mxu1 %v8700_v55  ;;  %8447 = vmatprep.subr.bf16.mxu0 %v8446_v56  ;;  %v2413_v55 = vld [vmem:[%s19333_s5 + $0x36a8] sm:$0xff]  ;;  %v8460_v56 = vpack.c.bf16 %v2374_v45, %v2356_v44  ;;  %v8728_v45 = vpack.c.bf16 %v2484_v38, %v2466_v36  ;;  %v2608_v36 = vld [vmem:[%s19333_s5 + $0x3cc0] sm:$0xff]  ;;  %v2610_v38 = vld [vmem:[%s19333_s5 + $0x3cd0] sm:$0xff] }
 0x235   : > { %8703 = vmatprep.subr.bf16.mxu1 %v8702_v61  ;;  %v8718_v60 = vpack.c.bf16 %v2413_v55, %v2395_v54  ;;  %v2392_v61 = vld [vmem:[%s19333_s5 + $0x3600] sm:$0xff]  ;;  %v2537_v55 = vld [vmem:[%s19333_s5 + $0x3a88] sm:$0xff] }
 0x236   : > { %v8464_v10 = vpack.c.bf16 %v2410_v0, %v2392_v61  ;;  %v2520_v54 = vld [vmem:[%s19333_s5 + $0x3a00] sm:$0xff] }
 0x237   : > { %8449 = vmatpush1.bf16.msra.mxu0 %v8448_v17  ;;  %v2431_v17 = vld [vmem:[%s19333_s5 + $0x3738] sm:$0xff]  ;;  %v8732_v61 = vpack.c.bf16 %v2520_v54, %v2502_v50  ;;  %v2644_v50 = vld [vmem:[%s19333_s5 + $0x3de0] sm:$0xff]  ;;  %v2646_v54 = vld [vmem:[%s19333_s5 + $0x3df0] sm:$0xff] }
 0x238   : > { %8705 = vmatpush1.bf16.msra.mxu1 %v8704_v22  ;;  %8451 = vmatprep.subr.bf16.mxu0 %v8450_v9  ;;  %v2449_v22 = vld [vmem:[%s19333_s5 + $0x37c8] sm:$0xff]  ;;  %v515_v9 = vpop.permute.xlu0 %514 }
 0x239   : > { %8707 = vmatprep.subr.bf16.mxu1 %v8706_v13  ;;  %v12250_v12 = vadd.f32 %v11563_v4, %v515_v9  ;;  %v8720_v13 = vpack.c.bf16 %v2412_v3, %v2394_v2  ;;  %v8722_v15 = vpack.c.bf16 %v2449_v22, %v2431_v17  ;;  %v2448_v4 = vld [vmem:[%s19333_s5 + $0x37c0] sm:$0xff]  ;;  %v2554_v3 = vld [vmem:[%s19333_s5 + $0x3b10] sm:$0xff]  ;;  %v2573_v22 = vld [vmem:[%s19333_s5 + $0x3ba8] sm:$0xff] }
 0x23a   : > { %v2536_v2 = vld [vmem:[%s19333_s5 + $0x3a80] sm:$0xff] }
 0x23b   : > { %8453 = vmatpush1.bf16.msra.mxu0 %v8452_v25  ;;  %v2467_v25 = vld [vmem:[%s19333_s5 + $0x3858] sm:$0xff]  ;;  %v2556_v17 = vld [vmem:[%s19333_s5 + $0x3b20] sm:$0xff] }
 0x23c   : > { %8709 = vmatpush1.bf16.msra.mxu1 %v8708_v26  ;;  %8455 = vmatprep.subr.bf16.mxu0 %v8454_v28  ;;  %v2485_v26 = vld [vmem:[%s19333_s5 + $0x38e8] sm:$0xff]  ;;  %v12280_v28 = vadd.f32 %v11552_v63, %v515_v9  ;;  %v2482_v63 = vld [vmem:[%s19333_s5 + $0x38d0] sm:$0xff]  ;;  %v2591_v9 = vld [vmem:[%s19333_s5 + $0x3c38] sm:$0xff]  ;;  %v8736_v19 = vpack.c.bf16 %v2556_v17, %v2538_v7 }
 0x23d   : > { %8711 = vmatprep.subr.bf16.mxu1 %v8710_v31  ;;  %v8724_v31 = vpack.c.bf16 %v2448_v4, %v2430_v47  ;;  %v8726_v21 = vpack.c.bf16 %v2485_v26, %v2467_v25  ;;  %v8472_v44 = vpack.c.bf16 %v2482_v63, %v2464_v35  ;;  %v8482_v20 = vpack.c.bf16 %v2591_v9, %v2573_v22  ;;  %v2572_v47 = vld [vmem:[%s19333_s5 + $0x3ba0] sm:$0xff]  ;;  %v2574_v4 = vld [vmem:[%s19333_s5 + $0x3bb0] sm:$0xff]  ;;  %v2609_v25 = vld [vmem:[%s19333_s5 + $0x3cc8] sm:$0xff] }
 0x23e   : > { %v2627_v26 = vld [vmem:[%s19333_s5 + $0x3d58] sm:$0xff]  ;;  %v8740_v35 = vpack.c.bf16 %v2592_v24, %v2574_v4  ;;  %v2680_v7 = vld [vmem:[%s19333_s5 + $0x3f00] sm:$0xff]  ;;  %v2682_v17 = vld [vmem:[%s19333_s5 + $0x3f10] sm:$0xff] }
 0x23f   : > { %8457 = vmatpush1.bf16.msra.mxu0 %v8456_v41  ;;  %v2519_v41 = vld [vmem:[%s19333_s5 + $0x39f8] sm:$0xff]  ;;  %v8486_v63 = vpack.c.bf16 %v2627_v26, %v2609_v25  ;;  %v2700_v9 = vld [vmem:[%s19333_s5 + $0x3fa0] sm:$0xff]  ;;  %v2718_v24 = vld [vmem:[%s19333_s5 + $0x4030] sm:$0xff] }
 0x240   : > { %8713 = vmatpush1.bf16.msra.mxu1 %v8712_v42  ;;  %8459 = vmatprep.subr.bf16.mxu0 %v8458_v43  ;;  %v2503_v42 = vld [vmem:[%s19333_s5 + $0x3978] sm:$0xff]  ;;  %v2521_v43 = vld [vmem:[%s19333_s5 + $0x3a08] sm:$0xff]  ;;  %v8474_v46 = vpack.c.bf16 %v2519_v41, %v2501_v40  ;;  %v2628_v41 = vld [vmem:[%s19333_s5 + $0x3d60] sm:$0xff] }
 0x241   : > { %8715 = vmatprep.subr.bf16.mxu1 %v8714_v48  ;;  %v2500_v48 = vld [vmem:[%s19333_s5 + $0x3960] sm:$0xff]  ;;  %v8730_v53 = vpack.c.bf16 %v2521_v43, %v2503_v42  ;;  %v2645_v42 = vld [vmem:[%s19333_s5 + $0x3de8] sm:$0xff]  ;;  %v2663_v43 = vld [vmem:[%s19333_s5 + $0x3e78] sm:$0xff] }
 0x242   : > { %v2716_v4 = vld [vmem:[%s19333_s5 + $0x4020] sm:$0xff] }
 0x243   : > { %8461 = vmatpush1.bf16.msra.mxu0 %v8460_v56  ;;  %v2555_v56 = vld [vmem:[%s19333_s5 + $0x3b18] sm:$0xff]  ;;  %v2736_v26 = vld [vmem:[%s19333_s5 + $0x40c0] sm:$0xff] }
 0x244   : > { %8717 = vmatpush1.bf16.msra.mxu1 %v8716_v58  ;;  %8463 = vmatprep.subr.bf16.mxu0 %v8462_v59  ;;  %v2539_v58 = vld [vmem:[%s19333_s5 + $0x3a98] sm:$0xff]  ;;  %v2557_v59 = vld [vmem:[%s19333_s5 + $0x3b28] sm:$0xff]  ;;  %v8478_v0 = vpack.c.bf16 %v2555_v56, %v2537_v55  ;;  %v2664_v56 = vld [vmem:[%s19333_s5 + $0x3e80] sm:$0xff] }
 0x245   : > { %8719 = vmatprep.subr.bf16.mxu1 %v8718_v60  ;;  %v8476_v60 = vpack.c.bf16 %v2518_v49, %v2500_v48  ;;  %v8734_v8 = vpack.c.bf16 %v2557_v59, %v2539_v58  ;;  %v8744_v48 = vpack.c.bf16 %v2628_v41, %v2610_v38  ;;  %v8490_v49 = vpack.c.bf16 %v2663_v43, %v2645_v42  ;;  %v2681_v58 = vld [vmem:[%s19333_s5 + $0x3f08] sm:$0xff]  ;;  %v2699_v59 = vld [vmem:[%s19333_s5 + $0x3f98] sm:$0xff]  ;;  %v2752_v38 = vld [vmem:[%s19333_s5 + $0x4140] sm:$0xff] }
 0x246   : > { %3187 = vmatmul.mubr.f32.vlgmr.msra.gmra.mrb[0].mxu0 %v12247_v37  ;;  %v2754_v41 = vld [vmem:[%s19333_s5 + $0x4150] sm:$0xff]  ;;  %v2772_v43 = vld [vmem:[%s19333_s5 + $0x41e0] sm:$0xff] }
 0x247   : > { %3495 = vmatmul.mubr.f32.vlgmr.msra.gmra.mrb[18].mxu1 %v12247_v37  ;;  %3192 = vmatprep.mubr.f32.mxu0 %v12250_v12 }
 0x248   : > { %8465 = vmatpush1.bf16.msra.mxu0 %v8464_v10  ;;  %3500 = vmatprep.mubr.f32.mxu1 %v12250_v12  ;;  %v2575_v10 = vld [vmem:[%s19333_s5 + $0x3bb8] sm:$0xff] }
 0x249   : > { %8721 = vmatpush1.bf16.msra.mxu1 %v8720_v13  ;;  %8467 = vmatprep.subr.bf16.mxu0 %v8466_v18  ;;  %v2593_v13 = vld [vmem:[%s19333_s5 + $0x3c48] sm:$0xff]  ;;  %v8480_v18 = vpack.c.bf16 %v2554_v3, %v2536_v2  ;;  %v8748_v2 = vpack.c.bf16 %v2664_v56, %v2646_v54  ;;  %v8494_v3 = vpack.c.bf16 %v2699_v59, %v2681_v58  ;;  %v2788_v54 = vld [vmem:[%s19333_s5 + $0x4260] sm:$0xff]  ;;  %v2790_v56 = vld [vmem:[%s19333_s5 + $0x4270] sm:$0xff] }
 0x24a   : > { %3193 = vmatmul.mubr.f32.gmra.mrb[2].mxu0 %v12280_v28  ;;  %8723 = vmatprep.subr.bf16.mxu1 %v8722_v15  ;;  %v2590_v15 = vld [vmem:[%s19333_s5 + $0x3c30] sm:$0xff]  ;;  %v8738_v23 = vpack.c.bf16 %v2593_v13, %v2575_v10  ;;  %v2717_v10 = vld [vmem:[%s19333_s5 + $0x4028] sm:$0xff]  ;;  %v2735_v13 = vld [vmem:[%s19333_s5 + $0x40b8] sm:$0xff] }
 0x24b   : > { %3501 = vmatmul.mubr.f32.gmra.mrb[20].mxu1 %v12280_v28  ;;  %3263 = vmatprep.mubr.f32.mxu0 %v12287_v30  ;;  %v2808_v59 = vld [vmem:[%s19333_s5 + $0x4300] sm:$0xff] }
 0x24c   : > { %8469 = vmatpush1.bf16.msra.mxu0 %v8468_v51  ;;  %3571 = vmatprep.mubr.f32.mxu1 %v12287_v30  ;;  %v2611_v51 = vld [vmem:[%s19333_s5 + $0x3cd8] sm:$0xff] }
 0x24d   : > { %8725 = vmatpush1.bf16.msra.mxu1 %v8724_v31  ;;  %8471 = vmatprep.subr.bf16.mxu0 %v8470_v32  ;;  %v2629_v31 = vld [vmem:[%s19333_s5 + $0x3d68] sm:$0xff]  ;;  %v8484_v32 = vpack.c.bf16 %v2590_v15, %v2572_v47  ;;  %v8752_v47 = vpack.c.bf16 %v2700_v9, %v2682_v17  ;;  %v8498_v15 = vpack.c.bf16 %v2735_v13, %v2717_v10  ;;  %v2824_v17 = vld [vmem:[%s19333_s5 + $0x4380] sm:$0xff]  ;;  %v2826_v9 = vld [vmem:[%s19333_s5 + $0x4390] sm:$0xff] }
 0x24e   : > { %8727 = vmatprep.subr.bf16.mxu1 %v8726_v21  ;;  %v2626_v21 = vld [vmem:[%s19333_s5 + $0x3d50] sm:$0xff]  ;;  %v8742_v40 = vpack.c.bf16 %v2629_v31, %v2611_v51  ;;  %v2753_v51 = vld [vmem:[%s19333_s5 + $0x4148] sm:$0xff]  ;;  %v2771_v31 = vld [vmem:[%s19333_s5 + $0x41d8] sm:$0xff] }
 0x24f   : > { %v2844_v13 = vld [vmem:[%s19333_s5 + $0x4420] sm:$0xff] }
 0x250   : > { %8473 = vmatpush1.bf16.msra.mxu0 %v8472_v44  ;;  %v2647_v44 = vld [vmem:[%s19333_s5 + $0x3df8] sm:$0xff] }
 0x251   : > { %8729 = vmatpush1.bf16.msra.mxu1 %v8728_v45  ;;  %8475 = vmatprep.subr.bf16.mxu0 %v8474_v46  ;;  %v2665_v45 = vld [vmem:[%s19333_s5 + $0x3e88] sm:$0xff]  ;;  %v8488_v46 = vpack.c.bf16 %v2626_v21, %v2608_v36  ;;  %v8756_v36 = vpack.c.bf16 %v2736_v26, %v2718_v24  ;;  %v8502_v21 = vpack.c.bf16 %v2771_v31, %v2753_v51  ;;  %v2860_v24 = vld [vmem:[%s19333_s5 + $0x44a0] sm:$0xff]  ;;  %v2862_v26 = vld [vmem:[%s19333_s5 + $0x44b0] sm:$0xff] }
 0x252   : > { %8731 = vmatprep.subr.bf16.mxu1 %v8730_v53  ;;  %v2662_v53 = vld [vmem:[%s19333_s5 + $0x3e70] sm:$0xff]  ;;  %v8746_v55 = vpack.c.bf16 %v2665_v45, %v2647_v44  ;;  %v2789_v44 = vld [vmem:[%s19333_s5 + $0x4268] sm:$0xff]  ;;  %v2807_v45 = vld [vmem:[%s19333_s5 + $0x42f8] sm:$0xff] }
 0x253   : > { %v2880_v31 = vld [vmem:[%s19333_s5 + $0x4540] sm:$0xff] }
 0x254   : > { %8477 = vmatpush1.bf16.msra.mxu0 %v8476_v60  ;;  %v2683_v60 = vld [vmem:[%s19333_s5 + $0x3f18] sm:$0xff] }
 0x255   : > { %8733 = vmatpush1.bf16.msra.mxu1 %v8732_v61  ;;  %8479 = vmatprep.subr.bf16.mxu0 %v8478_v0  ;;  %v2701_v61 = vld [vmem:[%s19333_s5 + $0x3fa8] sm:$0xff]  ;;  %v8492_v0 = vpack.c.bf16 %v2662_v53, %v2644_v50  ;;  %v8760_v50 = vpack.c.bf16 %v2772_v43, %v2754_v41  ;;  %v8506_v53 = vpack.c.bf16 %v2807_v45, %v2789_v44  ;;  %v2896_v41 = vld [vmem:[%s19333_s5 + $0x45c0] sm:$0xff]  ;;  %v2898_v43 = vld [vmem:[%s19333_s5 + $0x45d0] sm:$0xff] }
 0x256   : > { %8735 = vmatprep.subr.bf16.mxu1 %v8734_v8  ;;  %v2698_v8 = vld [vmem:[%s19333_s5 + $0x3f90] sm:$0xff]  ;;  %v8750_v22 = vpack.c.bf16 %v2701_v61, %v2683_v60  ;;  %v2825_v60 = vld [vmem:[%s19333_s5 + $0x4388] sm:$0xff]  ;;  %v2843_v61 = vld [vmem:[%s19333_s5 + $0x4418] sm:$0xff] }
 0x257   : > { %v2916_v45 = vld [vmem:[%s19333_s5 + $0x4660] sm:$0xff] }
 0x258   : > { %8481 = vmatpush1.bf16.msra.mxu0 %v8480_v18  ;;  %v2719_v18 = vld [vmem:[%s19333_s5 + $0x4038] sm:$0xff] }
 0x259   : > { %8737 = vmatpush1.bf16.msra.mxu1 %v8736_v19  ;;  %8483 = vmatprep.subr.bf16.mxu0 %v8482_v20  ;;  %v2737_v19 = vld [vmem:[%s19333_s5 + $0x40c8] sm:$0xff]  ;;  %v8496_v20 = vpack.c.bf16 %v2698_v8, %v2680_v7  ;;  %v8764_v7 = vpack.c.bf16 %v2808_v59, %v2790_v56  ;;  %v8510_v8 = vpack.c.bf16 %v2843_v61, %v2825_v60  ;;  %v2932_v56 = vld [vmem:[%s19333_s5 + $0x46e0] sm:$0xff]  ;;  %v2934_v59 = vld [vmem:[%s19333_s5 + $0x46f0] sm:$0xff] }
 0x25a   : > { %8739 = vmatprep.subr.bf16.mxu1 %v8738_v23  ;;  %v2734_v23 = vld [vmem:[%s19333_s5 + $0x40b0] sm:$0xff]  ;;  %v8754_v25 = vpack.c.bf16 %v2737_v19, %v2719_v18  ;;  %v2861_v18 = vld [vmem:[%s19333_s5 + $0x44a8] sm:$0xff]  ;;  %v2879_v19 = vld [vmem:[%s19333_s5 + $0x4538] sm:$0xff] }
 0x25b   : > { %v2952_v61 = vld [vmem:[%s19333_s5 + $0x4780] sm:$0xff] }
 0x25c   : > { %8485 = vmatpush1.bf16.msra.mxu0 %v8484_v32  ;;  %v2755_v32 = vld [vmem:[%s19333_s5 + $0x4158] sm:$0xff] }
 0x25d   : > { %8741 = vmatpush1.bf16.msra.mxu1 %v8740_v35  ;;  %8487 = vmatprep.subr.bf16.mxu0 %v8486_v63  ;;  %v2773_v35 = vld [vmem:[%s19333_s5 + $0x41e8] sm:$0xff]  ;;  %v8500_v63 = vpack.c.bf16 %v2734_v23, %v2716_v4  ;;  %v8768_v4 = vpack.c.bf16 %v2844_v13, %v2826_v9  ;;  %v8514_v23 = vpack.c.bf16 %v2879_v19, %v2861_v18  ;;  %v686_v13 = vld [vmem:[%s19333_s5 + $0xb0] sm:$0xff]  ;;  %v688_v19 = vld [vmem:[%s19333_s5 + $0xc0] sm:$0xff] }
 0x25e   : > { %8743 = vmatprep.subr.bf16.mxu1 %v8742_v40  ;;  %v2770_v40 = vld [vmem:[%s19333_s5 + $0x41d0] sm:$0xff]  ;;  %v8758_v42 = vpack.c.bf16 %v2773_v35, %v2755_v32  ;;  %v2897_v32 = vld [vmem:[%s19333_s5 + $0x45c8] sm:$0xff]  ;;  %v2915_v35 = vld [vmem:[%s19333_s5 + $0x4658] sm:$0xff] }
 0x25f   : > { %v670_v18 = vld [vmem:[%s19333_s5 + $0x30] sm:$0xff] }
 0x260   : > { %8489 = vmatpush1.bf16.msra.mxu0 %v8488_v46  ;;  %v2791_v46 = vld [vmem:[%s19333_s5 + $0x4278] sm:$0xff] }
 0x261   : > { %8745 = vmatpush1.bf16.msra.mxu1 %v8744_v48  ;;  %8491 = vmatprep.subr.bf16.mxu0 %v8490_v49  ;;  %v2809_v48 = vld [vmem:[%s19333_s5 + $0x4308] sm:$0xff]  ;;  %v8504_v49 = vpack.c.bf16 %v2770_v40, %v2752_v38  ;;  %v8772_v38 = vpack.c.bf16 %v2880_v31, %v2862_v26  ;;  %v8518_v40 = vpack.c.bf16 %v2915_v35, %v2897_v32  ;;  %v704_v32 = vld [vmem:[%s19333_s5 + $0x140] sm:$0xff]  ;;  %v722_v35 = vld [vmem:[%s19333_s5 + $0x1d0] sm:$0xff] }
 0x262   : > { %8747 = vmatprep.subr.bf16.mxu1 %v8746_v55  ;;  %v2806_v55 = vld [vmem:[%s19333_s5 + $0x42f0] sm:$0xff]  ;;  %v8762_v58 = vpack.c.bf16 %v2809_v48, %v2791_v46  ;;  %v2933_v46 = vld [vmem:[%s19333_s5 + $0x46e8] sm:$0xff]  ;;  %v2951_v48 = vld [vmem:[%s19333_s5 + $0x4778] sm:$0xff] }
 0x264   : > { %8493 = vmatpush1.bf16.msra.mxu0 %v8492_v0  ;;  %v2827_v0 = vld [vmem:[%s19333_s5 + $0x4398] sm:$0xff] }
 0x265   : > { %8749 = vmatpush1.bf16.msra.mxu1 %v8748_v2  ;;  %8495 = vmatprep.subr.bf16.mxu0 %v8494_v3  ;;  %v2845_v2 = vld [vmem:[%s19333_s5 + $0x4428] sm:$0xff]  ;;  %v8508_v3 = vpack.c.bf16 %v2806_v55, %v2788_v54  ;;  %v8776_v54 = vpack.c.bf16 %v2916_v45, %v2898_v43  ;;  %v8522_v55 = vpack.c.bf16 %v2951_v48, %v2933_v46  ;;  %v758_v45 = vld [vmem:[%s19333_s5 + $0x2f0] sm:$0xff]  ;;  %v760_v48 = vld [vmem:[%s19333_s5 + $0x300] sm:$0xff] }
 0x266   : > { %8751 = vmatprep.subr.bf16.mxu1 %v8750_v22  ;;  %v2842_v22 = vld [vmem:[%s19333_s5 + $0x4410] sm:$0xff]  ;;  %v8766_v10 = vpack.c.bf16 %v2845_v2, %v2827_v0  ;;  %v669_v0 = vld [vmem:[%s19333_s5 + $0x28] sm:$0xff]  ;;  %v687_v2 = vld [vmem:[%s19333_s5 + $0xb8] sm:$0xff] }
 0x268   : > { %8497 = vmatpush1.bf16.msra.mxu0 %v8496_v20  ;;  %v2863_v20 = vld [vmem:[%s19333_s5 + $0x44b8] sm:$0xff] }
 0x269   : > { %8753 = vmatpush1.bf16.msra.mxu1 %v8752_v47  ;;  %8499 = vmatprep.subr.bf16.mxu0 %v8498_v15  ;;  %v2881_v47 = vld [vmem:[%s19333_s5 + $0x4548] sm:$0xff]  ;;  %v8512_v15 = vpack.c.bf16 %v2842_v22, %v2824_v17  ;;  %v8780_v17 = vpack.c.bf16 %v2952_v61, %v2934_v59  ;;  %v8782_v22 = vpack.c.bf16 %v687_v2, %v669_v0  ;;  %v776_v59 = vld [vmem:[%s19333_s5 + $0x380] sm:$0xff]  ;;  %v778_v61 = vld [vmem:[%s19333_s5 + $0x390] sm:$0xff] }
 0x26a   : > { %8755 = vmatprep.subr.bf16.mxu1 %v8754_v25  ;;  %v2878_v25 = vld [vmem:[%s19333_s5 + $0x4530] sm:$0xff]  ;;  %v8770_v51 = vpack.c.bf16 %v2881_v47, %v2863_v20  ;;  %v705_v20 = vld [vmem:[%s19333_s5 + $0x148] sm:$0xff]  ;;  %v723_v47 = vld [vmem:[%s19333_s5 + $0x1d8] sm:$0xff] }
 0x26b   : > { %v8786_v31 = vpack.c.bf16 %v723_v47, %v705_v20  ;;  %v796_v2 = vld [vmem:[%s19333_s5 + $0x420] sm:$0xff] }
 0x26c   : > { %8501 = vmatpush1.bf16.msra.mxu0 %v8500_v63  ;;  %v2899_v63 = vld [vmem:[%s19333_s5 + $0x45d8] sm:$0xff]  ;;  %v832_v47 = vld [vmem:[%s19333_s5 + $0x540] sm:$0xff] }
 0x26d   : > { %8757 = vmatpush1.bf16.msra.mxu1 %v8756_v36  ;;  %8503 = vmatprep.subr.bf16.mxu0 %v8502_v21  ;;  %v2917_v36 = vld [vmem:[%s19333_s5 + $0x4668] sm:$0xff]  ;;  %v8516_v21 = vpack.c.bf16 %v2878_v25, %v2860_v24  ;;  %v12655_v24 = vadd.f32 %v11580_v16, %v12282_v29  ;;  %v706_v16 = vld [vmem:[%s19333_s5 + $0x150] sm:$0xff] }
 0x26e   : > { %8759 = vmatprep.subr.bf16.mxu1 %v8758_v42  ;;  %v2914_v42 = vld [vmem:[%s19333_s5 + $0x4650] sm:$0xff]  ;;  %v8774_v44 = vpack.c.bf16 %v2917_v36, %v2899_v63  ;;  %v741_v63 = vld [vmem:[%s19333_s5 + $0x268] sm:$0xff]  ;;  %v759_v36 = vld [vmem:[%s19333_s5 + $0x2f8] sm:$0xff] }
 0x26f   : > { %v8790_v43 = vpack.c.bf16 %v759_v36, %v741_v63  ;;  %v868_v63 = vld [vmem:[%s19333_s5 + $0x660] sm:$0xff]  ;;  %v885_v36 = vld [vmem:[%s19333_s5 + $0x6e8] sm:$0xff] }
 0x270   : > { %8505 = vmatpush1.bf16.msra.mxu0 %v8504_v49  ;;  %v2935_v49 = vld [vmem:[%s19333_s5 + $0x46f8] sm:$0xff] }
 0x271   : > { %8761 = vmatpush1.bf16.msra.mxu1 %v8760_v50  ;;  %8507 = vmatprep.subr.bf16.mxu0 %v8506_v53  ;;  %v2953_v50 = vld [vmem:[%s19333_s5 + $0x4788] sm:$0xff]  ;;  %v8520_v53 = vpack.c.bf16 %v2914_v42, %v2896_v41  ;;  %v8788_v41 = vpack.c.bf16 %v722_v35, %v704_v32  ;;  %v848_v35 = vld [vmem:[%s19333_s5 + $0x5c0] sm:$0xff] }
 0x272   : > { %8763 = vmatprep.subr.bf16.mxu1 %v8762_v58  ;;  %v2950_v58 = vld [vmem:[%s19333_s5 + $0x4770] sm:$0xff]  ;;  %v8778_v60 = vpack.c.bf16 %v2953_v50, %v2935_v49  ;;  %v777_v49 = vld [vmem:[%s19333_s5 + $0x388] sm:$0xff]  ;;  %v795_v50 = vld [vmem:[%s19333_s5 + $0x418] sm:$0xff] }
 0x274   : > { %8509 = vmatpush1.bf16.msra.mxu0 %v8508_v3  ;;  %v671_v3 = vld [vmem:[%s19333_s5 + $0x38] sm:$0xff] }
 0x275   : > { %8765 = vmatpush1.bf16.msra.mxu1 %v8764_v7  ;;  %8511 = vmatprep.subr.bf16.mxu0 %v8510_v8  ;;  %v689_v7 = vld [vmem:[%s19333_s5 + $0xc8] sm:$0xff]  ;;  %v8524_v8 = vpack.c.bf16 %v2950_v58, %v2932_v56  ;;  %v8794_v58 = vpack.c.bf16 %v795_v50, %v777_v49  ;;  %v904_v49 = vld [vmem:[%s19333_s5 + $0x780] sm:$0xff] }
 0x276   : > { %8767 = vmatprep.subr.bf16.mxu1 %v8766_v10  ;;  %v9038_v9 = vpack.c.bf16 %v689_v7, %v671_v3  ;;  %v668_v10 = vld [vmem:[%s19333_s5 + $0x20] sm:$0xff]  ;;  %v813_v3 = vld [vmem:[%s19333_s5 + $0x4a8] sm:$0xff]  ;;  %v831_v7 = vld [vmem:[%s19333_s5 + $0x538] sm:$0xff] }
 0x277   : > { %v8784_v25 = vpack.c.bf16 %v686_v13, %v668_v10  ;;  %v8798_v10 = vpack.c.bf16 %v831_v7, %v813_v3  ;;  %v812_v13 = vld [vmem:[%s19333_s5 + $0x4a0] sm:$0xff]  ;;  %v921_v50 = vld [vmem:[%s19333_s5 + $0x808] sm:$0xff] }
 0x278   : > { %8513 = vmatpush1.bf16.msra.mxu0 %v8512_v15  ;;  %v707_v15 = vld [vmem:[%s19333_s5 + $0x158] sm:$0xff]  ;;  %v940_v3 = vld [vmem:[%s19333_s5 + $0x8a0] sm:$0xff]  ;;  %v957_v7 = vld [vmem:[%s19333_s5 + $0x928] sm:$0xff] }
 0x279   : > { %8769 = vmatpush1.bf16.msra.mxu1 %v8768_v4  ;;  %8515 = vmatprep.subr.bf16.mxu0 %v8514_v23  ;;  %v725_v4 = vld [vmem:[%s19333_s5 + $0x1e8] sm:$0xff]  ;;  %v525_v23 = vpop.permute.xlu0 %524 }
 0x27a   : > { %8771 = vmatprep.subr.bf16.mxu1 %v8770_v51  ;;  %v12658_v26 = vadd.f32 %v11619_v39, %v525_v23  ;;  %v9040_v51 = vpack.c.bf16 %v688_v19, %v670_v18  ;;  %v9042_v29 = vpack.c.bf16 %v725_v4, %v707_v15  ;;  %v724_v39 = vld [vmem:[%s19333_s5 + $0x1e0] sm:$0xff]  ;;  %v830_v18 = vld [vmem:[%s19333_s5 + $0x530] sm:$0xff]  ;;  %v849_v15 = vld [vmem:[%s19333_s5 + $0x5c8] sm:$0xff] }
 0x27b   : > { %v9044_v42 = vpack.c.bf16 %v724_v39, %v706_v16  ;;  %v814_v19 = vld [vmem:[%s19333_s5 + $0x4b0] sm:$0xff]  ;;  %v867_v4 = vld [vmem:[%s19333_s5 + $0x658] sm:$0xff] }
 0x27c   : > { %8517 = vmatpush1.bf16.msra.mxu0 %v8516_v21  ;;  %v743_v21 = vld [vmem:[%s19333_s5 + $0x278] sm:$0xff]  ;;  %v8802_v32 = vpack.c.bf16 %v867_v4, %v849_v15  ;;  %v866_v16 = vld [vmem:[%s19333_s5 + $0x650] sm:$0xff]  ;;  %v976_v15 = vld [vmem:[%s19333_s5 + $0x9c0] sm:$0xff] }
 0x27d   : > { %8773 = vmatpush1.bf16.msra.mxu1 %v8772_v38  ;;  %8519 = vmatprep.subr.bf16.mxu0 %v8518_v40  ;;  %v761_v38 = vld [vmem:[%s19333_s5 + $0x308] sm:$0xff]  ;;  %v12688_v40 = vadd.f32 %v11608_v34, %v525_v23  ;;  %v742_v34 = vld [vmem:[%s19333_s5 + $0x270] sm:$0xff]  ;;  %v851_v23 = vld [vmem:[%s19333_s5 + $0x5d8] sm:$0xff] }
 0x27e   : > { %8775 = vmatprep.subr.bf16.mxu1 %v8774_v44  ;;  %v740_v44 = vld [vmem:[%s19333_s5 + $0x260] sm:$0xff]  ;;  %v9046_v46 = vpack.c.bf16 %v761_v38, %v743_v21  ;;  %v9048_v56 = vpack.c.bf16 %v760_v48, %v742_v34  ;;  %v903_v21 = vld [vmem:[%s19333_s5 + $0x778] sm:$0xff]  ;;  %v902_v34 = vld [vmem:[%s19333_s5 + $0x770] sm:$0xff] }
 0x27f   : > { %v887_v38 = vld [vmem:[%s19333_s5 + $0x6f8] sm:$0xff]  ;;  %v993_v4 = vld [vmem:[%s19333_s5 + $0xa48] sm:$0xff] }
 0x280   : > { %8521 = vmatpush1.bf16.msra.mxu0 %v8520_v53  ;;  %v779_v53 = vld [vmem:[%s19333_s5 + $0x398] sm:$0xff] }
 0x281   : > { %8777 = vmatpush1.bf16.msra.mxu1 %v8776_v54  ;;  %8523 = vmatprep.subr.bf16.mxu0 %v8522_v55  ;;  %v797_v54 = vld [vmem:[%s19333_s5 + $0x428] sm:$0xff]  ;;  %v8792_v55 = vpack.c.bf16 %v758_v45, %v740_v44  ;;  %v8806_v44 = vpack.c.bf16 %v903_v21, %v885_v36  ;;  %v884_v45 = vld [vmem:[%s19333_s5 + $0x6e0] sm:$0xff] }
 0x282   : > { %8779 = vmatprep.subr.bf16.mxu1 %v8778_v60  ;;  %v794_v60 = vld [vmem:[%s19333_s5 + $0x410] sm:$0xff]  ;;  %v9050_v0 = vpack.c.bf16 %v797_v54, %v779_v53  ;;  %v939_v53 = vld [vmem:[%s19333_s5 + $0x898] sm:$0xff]  ;;  %v1012_v36 = vld [vmem:[%s19333_s5 + $0xae0] sm:$0xff] }
 0x283   : > { %v923_v54 = vld [vmem:[%s19333_s5 + $0x818] sm:$0xff]  ;;  %v1029_v21 = vld [vmem:[%s19333_s5 + $0xb68] sm:$0xff] }
 0x284   : > { %8525 = vmatpush1.bf16.msra.mxu0 %v8524_v8  ;;  %v815_v8 = vld [vmem:[%s19333_s5 + $0x4b8] sm:$0xff] }
 0x285   : > { %8781 = vmatpush1.bf16.msra.mxu1 %v8780_v17  ;;  %8783 = vmatprep.subr.bf16.mxu0 %v8782_v22  ;;  %v833_v17 = vld [vmem:[%s19333_s5 + $0x548] sm:$0xff]  ;;  %v8796_v22 = vpack.c.bf16 %v794_v60, %v776_v59  ;;  %v8810_v59 = vpack.c.bf16 %v939_v53, %v921_v50  ;;  %v920_v60 = vld [vmem:[%s19333_s5 + $0x800] sm:$0xff] }
 0x286   : > { %9039 = vmatprep.subr.bf16.mxu1 %v9038_v9  ;;  %v9052_v9 = vpack.c.bf16 %v796_v2, %v778_v61  ;;  %v9054_v20 = vpack.c.bf16 %v833_v17, %v815_v8  ;;  %v938_v61 = vld [vmem:[%s19333_s5 + $0x890] sm:$0xff]  ;;  %v975_v8 = vld [vmem:[%s19333_s5 + $0x9b8] sm:$0xff]  ;;  %v1048_v50 = vld [vmem:[%s19333_s5 + $0xc00] sm:$0xff] }
 0x287   : > { %3264 = vmatmul.mubr.f32.vlgmr.msra.gmra.mrb[0].mxu0 %v12655_v24  ;;  %v959_v17 = vld [vmem:[%s19333_s5 + $0x938] sm:$0xff]  ;;  %v1065_v53 = vld [vmem:[%s19333_s5 + $0xc88] sm:$0xff] }
 0x288   : > { %3572 = vmatmul.mubr.f32.vlgmr.msra.gmra.mrb[18].mxu1 %v12655_v24  ;;  %3269 = vmatprep.mubr.f32.mxu0 %v12658_v26 }
 0x289   : > { %3577 = vmatprep.mubr.f32.mxu1 %v12658_v26  ;;  %8785 = vmatpush1.bf16.msra.mxu0 %v8784_v25  ;;  %v869_v25 = vld [vmem:[%s19333_s5 + $0x668] sm:$0xff] }
 0x28a   : > { %9041 = vmatpush1.bf16.msra.mxu1 %v9040_v51  ;;  %8787 = vmatprep.subr.bf16.mxu0 %v8786_v31  ;;  %v8800_v51 = vpack.c.bf16 %v830_v18, %v812_v13  ;;  %v9056_v31 = vpack.c.bf16 %v832_v47, %v814_v19  ;;  %v9058_v39 = vpack.c.bf16 %v869_v25, %v851_v23  ;;  %v956_v18 = vld [vmem:[%s19333_s5 + $0x920] sm:$0xff]  ;;  %v974_v19 = vld [vmem:[%s19333_s5 + $0x9b0] sm:$0xff]  ;;  %v1011_v23 = vld [vmem:[%s19333_s5 + $0xad8] sm:$0xff] }
 0x28b   : > { %3270 = vmatmul.mubr.f32.gmra.mrb[2].mxu0 %v12688_v40  ;;  %9043 = vmatprep.subr.bf16.mxu1 %v9042_v29  ;;  %v850_v29 = vld [vmem:[%s19333_s5 + $0x5d0] sm:$0xff]  ;;  %v8814_v13 = vpack.c.bf16 %v975_v8, %v957_v7  ;;  %v995_v25 = vld [vmem:[%s19333_s5 + $0xa58] sm:$0xff]  ;;  %v1084_v7 = vld [vmem:[%s19333_s5 + $0xd20] sm:$0xff] }
 0x28c   : > { %3578 = vmatmul.mubr.f32.gmra.mrb[20].mxu1 %v12688_v40  ;;  %3648 = vmatprep.mubr.f32.mxu0 %v11408_v52  ;;  %v1101_v8 = vld [vmem:[%s19333_s5 + $0xda8] sm:$0xff] }
 0x28d   : > { %8789 = vmatpush1.bf16.msra.mxu0 %v8788_v41  ;;  %3956 = vmatprep.mubr.f32.mxu1 %v11408_v52  ;;  %v905_v41 = vld [vmem:[%s19333_s5 + $0x788] sm:$0xff] }
 0x28e   : > { %9045 = vmatpush1.bf16.msra.mxu1 %v9044_v42  ;;  %8791 = vmatprep.subr.bf16.mxu0 %v8790_v43  ;;  %v8804_v42 = vpack.c.bf16 %v866_v16, %v848_v35  ;;  %v9060_v43 = vpack.c.bf16 %v868_v63, %v850_v29  ;;  %v9062_v48 = vpack.c.bf16 %v905_v41, %v887_v38  ;;  %v992_v16 = vld [vmem:[%s19333_s5 + $0xa40] sm:$0xff]  ;;  %v1010_v29 = vld [vmem:[%s19333_s5 + $0xad0] sm:$0xff]  ;;  %v1047_v38 = vld [vmem:[%s19333_s5 + $0xbf8] sm:$0xff] }
 0x28f   : > { %9047 = vmatprep.subr.bf16.mxu1 %v9046_v46  ;;  %v886_v46 = vld [vmem:[%s19333_s5 + $0x6f0] sm:$0xff]  ;;  %v8818_v35 = vpack.c.bf16 %v1011_v23, %v993_v4  ;;  %v1031_v41 = vld [vmem:[%s19333_s5 + $0xb78] sm:$0xff]  ;;  %v1120_v4 = vld [vmem:[%s19333_s5 + $0xe40] sm:$0xff] }
 0x290   : > { %v1137_v23 = vld [vmem:[%s19333_s5 + $0xec8] sm:$0xff] }
 0x291   : > { %8793 = vmatpush1.bf16.msra.mxu0 %v8792_v55  ;;  %v941_v55 = vld [vmem:[%s19333_s5 + $0x8a8] sm:$0xff] }
 0x292   : > { %9049 = vmatpush1.bf16.msra.mxu1 %v9048_v56  ;;  %8795 = vmatprep.subr.bf16.mxu0 %v8794_v58  ;;  %v8808_v56 = vpack.c.bf16 %v902_v34, %v884_v45  ;;  %v9064_v58 = vpack.c.bf16 %v904_v49, %v886_v46  ;;  %v9066_v2 = vpack.c.bf16 %v941_v55, %v923_v54  ;;  %v1028_v34 = vld [vmem:[%s19333_s5 + $0xb60] sm:$0xff]  ;;  %v1046_v46 = vld [vmem:[%s19333_s5 + $0xbf0] sm:$0xff]  ;;  %v1083_v54 = vld [vmem:[%s19333_s5 + $0xd18] sm:$0xff] }
 0x293   : > { %9051 = vmatprep.subr.bf16.mxu1 %v9050_v0  ;;  %v922_v0 = vld [vmem:[%s19333_s5 + $0x810] sm:$0xff]  ;;  %v8822_v45 = vpack.c.bf16 %v1047_v38, %v1029_v21  ;;  %v1067_v55 = vld [vmem:[%s19333_s5 + $0xc98] sm:$0xff]  ;;  %v1156_v21 = vld [vmem:[%s19333_s5 + $0xf60] sm:$0xff] }
 0x294   : > { %v1173_v38 = vld [vmem:[%s19333_s5 + $0xfe8] sm:$0xff] }
 0x295   : > { %8797 = vmatpush1.bf16.msra.mxu0 %v8796_v22  ;;  %v977_v22 = vld [vmem:[%s19333_s5 + $0x9c8] sm:$0xff] }
 0x296   : > { %9053 = vmatpush1.bf16.msra.mxu1 %v9052_v9  ;;  %8799 = vmatprep.subr.bf16.mxu0 %v8798_v10  ;;  %v8812_v9 = vpack.c.bf16 %v938_v61, %v920_v60  ;;  %v9068_v10 = vpack.c.bf16 %v940_v3, %v922_v0  ;;  %v9070_v47 = vpack.c.bf16 %v977_v22, %v959_v17  ;;  %v1064_v61 = vld [vmem:[%s19333_s5 + $0xc80] sm:$0xff]  ;;  %v1082_v0 = vld [vmem:[%s19333_s5 + $0xd10] sm:$0xff]  ;;  %v1119_v17 = vld [vmem:[%s19333_s5 + $0xe38] sm:$0xff] }
 0x297   : > { %9055 = vmatprep.subr.bf16.mxu1 %v9054_v20  ;;  %v958_v20 = vld [vmem:[%s19333_s5 + $0x930] sm:$0xff]  ;;  %v8826_v60 = vpack.c.bf16 %v1083_v54, %v1065_v53  ;;  %v1103_v22 = vld [vmem:[%s19333_s5 + $0xdb8] sm:$0xff]  ;;  %v1192_v53 = vld [vmem:[%s19333_s5 + $0x1080] sm:$0xff] }
 0x298   : > { %v1209_v54 = vld [vmem:[%s19333_s5 + $0x1108] sm:$0xff] }
 0x299   : > { %8801 = vmatpush1.bf16.msra.mxu0 %v8800_v51  ;;  %v1013_v51 = vld [vmem:[%s19333_s5 + $0xae8] sm:$0xff] }
 0x29a   : > { %9057 = vmatpush1.bf16.msra.mxu1 %v9056_v31  ;;  %8803 = vmatprep.subr.bf16.mxu0 %v8802_v32  ;;  %v8816_v31 = vpack.c.bf16 %v974_v19, %v956_v18  ;;  %v9072_v32 = vpack.c.bf16 %v976_v15, %v958_v20  ;;  %v9074_v63 = vpack.c.bf16 %v1013_v51, %v995_v25  ;;  %v1100_v19 = vld [vmem:[%s19333_s5 + $0xda0] sm:$0xff]  ;;  %v1118_v20 = vld [vmem:[%s19333_s5 + $0xe30] sm:$0xff]  ;;  %v1155_v25 = vld [vmem:[%s19333_s5 + $0xf58] sm:$0xff] }
 0x29b   : > { %9059 = vmatprep.subr.bf16.mxu1 %v9058_v39  ;;  %v994_v39 = vld [vmem:[%s19333_s5 + $0xa50] sm:$0xff]  ;;  %v8830_v18 = vpack.c.bf16 %v1119_v17, %v1101_v8  ;;  %v1139_v51 = vld [vmem:[%s19333_s5 + $0xed8] sm:$0xff]  ;;  %v1228_v8 = vld [vmem:[%s19333_s5 + $0x11a0] sm:$0xff] }
 0x29c   : > { %v1245_v17 = vld [vmem:[%s19333_s5 + $0x1228] sm:$0xff] }
 0x29d   : > { %8805 = vmatpush1.bf16.msra.mxu0 %v8804_v42  ;;  %v1049_v42 = vld [vmem:[%s19333_s5 + $0xc08] sm:$0xff] }
 0x29e   : > { %9061 = vmatpush1.bf16.msra.mxu1 %v9060_v43  ;;  %8807 = vmatprep.subr.bf16.mxu0 %v8806_v44  ;;  %v8820_v43 = vpack.c.bf16 %v1010_v29, %v992_v16  ;;  %v9076_v44 = vpack.c.bf16 %v1012_v36, %v994_v39  ;;  %v9078_v49 = vpack.c.bf16 %v1049_v42, %v1031_v41  ;;  %v1136_v29 = vld [vmem:[%s19333_s5 + $0xec0] sm:$0xff]  ;;  %v1154_v39 = vld [vmem:[%s19333_s5 + $0xf50] sm:$0xff]  ;;  %v1191_v41 = vld [vmem:[%s19333_s5 + $0x1078] sm:$0xff] }
 0x29f   : > { %9063 = vmatprep.subr.bf16.mxu1 %v9062_v48  ;;  %v1030_v48 = vld [vmem:[%s19333_s5 + $0xb70] sm:$0xff]  ;;  %v8834_v16 = vpack.c.bf16 %v1155_v25, %v1137_v23  ;;  %v1175_v42 = vld [vmem:[%s19333_s5 + $0xff8] sm:$0xff]  ;;  %v1264_v23 = vld [vmem:[%s19333_s5 + $0x12c0] sm:$0xff] }
 0x2a0   : > { %v1281_v25 = vld [vmem:[%s19333_s5 + $0x1348] sm:$0xff] }
 0x2a1   : > { %8809 = vmatpush1.bf16.msra.mxu0 %v8808_v56  ;;  %v1085_v56 = vld [vmem:[%s19333_s5 + $0xd28] sm:$0xff] }
 0x2a2   : > { %9065 = vmatpush1.bf16.msra.mxu1 %v9064_v58  ;;  %8811 = vmatprep.subr.bf16.mxu0 %v8810_v59  ;;  %v8824_v58 = vpack.c.bf16 %v1046_v46, %v1028_v34  ;;  %v9080_v59 = vpack.c.bf16 %v1048_v50, %v1030_v48  ;;  %v9082_v3 = vpack.c.bf16 %v1085_v56, %v1067_v55  ;;  %v1172_v46 = vld [vmem:[%s19333_s5 + $0xfe0] sm:$0xff]  ;;  %v1190_v48 = vld [vmem:[%s19333_s5 + $0x1070] sm:$0xff]  ;;  %v1227_v55 = vld [vmem:[%s19333_s5 + $0x1198] sm:$0xff] }
 0x2a3   : > { %9067 = vmatprep.subr.bf16.mxu1 %v9066_v2  ;;  %v1066_v2 = vld [vmem:[%s19333_s5 + $0xc90] sm:$0xff]  ;;  %v8838_v34 = vpack.c.bf16 %v1191_v41, %v1173_v38  ;;  %v1211_v56 = vld [vmem:[%s19333_s5 + $0x1118] sm:$0xff]  ;;  %v1300_v38 = vld [vmem:[%s19333_s5 + $0x13e0] sm:$0xff] }
 0x2a4   : > { %v1317_v41 = vld [vmem:[%s19333_s5 + $0x1468] sm:$0xff] }
 0x2a5   : > { %8813 = vmatpush1.bf16.msra.mxu0 %v8812_v9  ;;  %v1121_v9 = vld [vmem:[%s19333_s5 + $0xe48] sm:$0xff] }
 0x2a6   : > { %9069 = vmatpush1.bf16.msra.mxu1 %v9068_v10  ;;  %8815 = vmatprep.subr.bf16.mxu0 %v8814_v13  ;;  %v8828_v10 = vpack.c.bf16 %v1082_v0, %v1064_v61  ;;  %v9084_v13 = vpack.c.bf16 %v1084_v7, %v1066_v2  ;;  %v9086_v15 = vpack.c.bf16 %v1121_v9, %v1103_v22  ;;  %v1208_v0 = vld [vmem:[%s19333_s5 + $0x1100] sm:$0xff]  ;;  %v1226_v2 = vld [vmem:[%s19333_s5 + $0x1190] sm:$0xff]  ;;  %v1263_v22 = vld [vmem:[%s19333_s5 + $0x12b8] sm:$0xff] }
 0x2a7   : > { %9071 = vmatprep.subr.bf16.mxu1 %v9070_v47  ;;  %v1102_v47 = vld [vmem:[%s19333_s5 + $0xdb0] sm:$0xff]  ;;  %v8842_v61 = vpack.c.bf16 %v1227_v55, %v1209_v54  ;;  %v1247_v9 = vld [vmem:[%s19333_s5 + $0x1238] sm:$0xff]  ;;  %v1336_v54 = vld [vmem:[%s19333_s5 + $0x1500] sm:$0xff] }
 0x2a8   : > { %v1353_v55 = vld [vmem:[%s19333_s5 + $0x1588] sm:$0xff] }
 0x2a9   : > { %8817 = vmatpush1.bf16.msra.mxu0 %v8816_v31  ;;  %v1157_v31 = vld [vmem:[%s19333_s5 + $0xf68] sm:$0xff] }
 0x2aa   : > { %9073 = vmatpush1.bf16.msra.mxu1 %v9072_v32  ;;  %8819 = vmatprep.subr.bf16.mxu0 %v8818_v35  ;;  %v8832_v32 = vpack.c.bf16 %v1118_v20, %v1100_v19  ;;  %v9088_v35 = vpack.c.bf16 %v1120_v4, %v1102_v47  ;;  %v9090_v36 = vpack.c.bf16 %v1157_v31, %v1139_v51  ;;  %v1244_v47 = vld [vmem:[%s19333_s5 + $0x1220] sm:$0xff]  ;;  %v1246_v4 = vld [vmem:[%s19333_s5 + $0x1230] sm:$0xff]  ;;  %v1299_v51 = vld [vmem:[%s19333_s5 + $0x13d8] sm:$0xff] }
 0x2ab   : > { %9075 = vmatprep.subr.bf16.mxu1 %v9074_v63  ;;  %v1138_v63 = vld [vmem:[%s19333_s5 + $0xed0] sm:$0xff]  ;;  %v8846_v19 = vpack.c.bf16 %v1263_v22, %v1245_v17  ;;  %v1283_v31 = vld [vmem:[%s19333_s5 + $0x1358] sm:$0xff]  ;;  %v1372_v17 = vld [vmem:[%s19333_s5 + $0x1620] sm:$0xff] }
 0x2ac   : > { %v1389_v22 = vld [vmem:[%s19333_s5 + $0x16a8] sm:$0xff] }
 0x2ad   : > { %8821 = vmatpush1.bf16.msra.mxu0 %v8820_v43  ;;  %v1193_v43 = vld [vmem:[%s19333_s5 + $0x1088] sm:$0xff] }
 0x2ae   : > { %9077 = vmatpush1.bf16.msra.mxu1 %v9076_v44  ;;  %8823 = vmatprep.subr.bf16.mxu0 %v8822_v45  ;;  %v8836_v44 = vpack.c.bf16 %v1154_v39, %v1136_v29  ;;  %v9092_v45 = vpack.c.bf16 %v1156_v21, %v1138_v63  ;;  %v9094_v50 = vpack.c.bf16 %v1193_v43, %v1175_v42  ;;  %v1280_v39 = vld [vmem:[%s19333_s5 + $0x1340] sm:$0xff]  ;;  %v1298_v63 = vld [vmem:[%s19333_s5 + $0x13d0] sm:$0xff]  ;;  %v1335_v42 = vld [vmem:[%s19333_s5 + $0x14f8] sm:$0xff] }
 0x2af   : > { %9079 = vmatprep.subr.bf16.mxu1 %v9078_v49  ;;  %v1174_v49 = vld [vmem:[%s19333_s5 + $0xff0] sm:$0xff]  ;;  %v8850_v29 = vpack.c.bf16 %v1299_v51, %v1281_v25  ;;  %v1319_v43 = vld [vmem:[%s19333_s5 + $0x1478] sm:$0xff]  ;;  %v1408_v25 = vld [vmem:[%s19333_s5 + $0x1740] sm:$0xff] }
 0x2b0   : > { %v1425_v51 = vld [vmem:[%s19333_s5 + $0x17c8] sm:$0xff] }
 0x2b1   : > { %8825 = vmatpush1.bf16.msra.mxu0 %v8824_v58  ;;  %v1229_v58 = vld [vmem:[%s19333_s5 + $0x11a8] sm:$0xff] }
 0x2b2   : > { %9081 = vmatpush1.bf16.msra.mxu1 %v9080_v59  ;;  %8827 = vmatprep.subr.bf16.mxu0 %v8826_v60  ;;  %v8840_v59 = vpack.c.bf16 %v1190_v48, %v1172_v46  ;;  %v9096_v60 = vpack.c.bf16 %v1192_v53, %v1174_v49  ;;  %v9098_v7 = vpack.c.bf16 %v1229_v58, %v1211_v56  ;;  %v1316_v48 = vld [vmem:[%s19333_s5 + $0x1460] sm:$0xff]  ;;  %v1334_v49 = vld [vmem:[%s19333_s5 + $0x14f0] sm:$0xff]  ;;  %v1371_v56 = vld [vmem:[%s19333_s5 + $0x1618] sm:$0xff] }
 0x2b3   : > { %9083 = vmatprep.subr.bf16.mxu1 %v9082_v3  ;;  %v1210_v3 = vld [vmem:[%s19333_s5 + $0x1110] sm:$0xff]  ;;  %v8854_v46 = vpack.c.bf16 %v1335_v42, %v1317_v41  ;;  %v1355_v58 = vld [vmem:[%s19333_s5 + $0x1598] sm:$0xff]  ;;  %v1444_v41 = vld [vmem:[%s19333_s5 + $0x1860] sm:$0xff] }
 0x2b4   : > { %v1461_v42 = vld [vmem:[%s19333_s5 + $0x18e8] sm:$0xff] }
 0x2b5   : > { %8829 = vmatpush1.bf16.msra.mxu0 %v8828_v10  ;;  %v1265_v10 = vld [vmem:[%s19333_s5 + $0x12c8] sm:$0xff] }
 0x2b6   : > { %9085 = vmatpush1.bf16.msra.mxu1 %v9084_v13  ;;  %8831 = vmatprep.subr.bf16.mxu0 %v8830_v18  ;;  %v8844_v13 = vpack.c.bf16 %v1226_v2, %v1208_v0  ;;  %v9100_v18 = vpack.c.bf16 %v1228_v8, %v1210_v3  ;;  %v9102_v20 = vpack.c.bf16 %v1265_v10, %v1247_v9  ;;  %v1352_v2 = vld [vmem:[%s19333_s5 + $0x1580] sm:$0xff]  ;;  %v1370_v3 = vld [vmem:[%s19333_s5 + $0x1610] sm:$0xff]  ;;  %v1407_v9 = vld [vmem:[%s19333_s5 + $0x1738] sm:$0xff] }
 0x2b7   : > { %9087 = vmatprep.subr.bf16.mxu1 %v9086_v15  ;;  %v1262_v15 = vld [vmem:[%s19333_s5 + $0x12b0] sm:$0xff]  ;;  %v8858_v0 = vpack.c.bf16 %v1371_v56, %v1353_v55  ;;  %v1391_v10 = vld [vmem:[%s19333_s5 + $0x16b8] sm:$0xff]  ;;  %v1480_v55 = vld [vmem:[%s19333_s5 + $0x1980] sm:$0xff] }
 0x2b8   : > { %v1497_v56 = vld [vmem:[%s19333_s5 + $0x1a08] sm:$0xff] }
 0x2b9   : > { %8833 = vmatpush1.bf16.msra.mxu0 %v8832_v32  ;;  %v1301_v32 = vld [vmem:[%s19333_s5 + $0x13e8] sm:$0xff] }
 0x2ba   : > { %9089 = vmatpush1.bf16.msra.mxu1 %v9088_v35  ;;  %8835 = vmatprep.subr.bf16.mxu0 %v8834_v16  ;;  %v8848_v35 = vpack.c.bf16 %v1262_v15, %v1244_v47  ;;  %v9104_v16 = vpack.c.bf16 %v1264_v23, %v1246_v4  ;;  %v9106_v21 = vpack.c.bf16 %v1301_v32, %v1283_v31  ;;  %v1388_v47 = vld [vmem:[%s19333_s5 + $0x16a0] sm:$0xff]  ;;  %v1406_v15 = vld [vmem:[%s19333_s5 + $0x1730] sm:$0xff]  ;;  %v1443_v31 = vld [vmem:[%s19333_s5 + $0x1858] sm:$0xff] }
 0x2bb   : > { %9091 = vmatprep.subr.bf16.mxu1 %v9090_v36  ;;  %v1282_v36 = vld [vmem:[%s19333_s5 + $0x1350] sm:$0xff]  ;;  %v1427_v32 = vld [vmem:[%s19333_s5 + $0x17d8] sm:$0xff] }
 0x2bc   : > { %v1390_v4 = vld [vmem:[%s19333_s5 + $0x16b0] sm:$0xff] }
 0x2bd   : > { %8837 = vmatpush1.bf16.msra.mxu0 %v8836_v44  ;;  %v1337_v44 = vld [vmem:[%s19333_s5 + $0x1508] sm:$0xff] }
 0x2be   : > { %9093 = vmatpush1.bf16.msra.mxu1 %v9092_v45  ;;  %8839 = vmatprep.subr.bf16.mxu0 %v8838_v34  ;;  %v8852_v45 = vpack.c.bf16 %v1298_v63, %v1280_v39  ;;  %v9108_v34 = vpack.c.bf16 %v1300_v38, %v1282_v36  ;;  %v9110_v53 = vpack.c.bf16 %v1337_v44, %v1319_v43  ;;  %v1424_v63 = vld [vmem:[%s19333_s5 + $0x17c0] sm:$0xff]  ;;  %v1442_v36 = vld [vmem:[%s19333_s5 + $0x1850] sm:$0xff]  ;;  %v1479_v43 = vld [vmem:[%s19333_s5 + $0x1978] sm:$0xff] }
 0x2bf   : > { %9095 = vmatprep.subr.bf16.mxu1 %v9094_v50  ;;  %v1318_v50 = vld [vmem:[%s19333_s5 + $0x1470] sm:$0xff]  ;;  %v8866_v39 = vpack.c.bf16 %v1443_v31, %v1425_v51  ;;  %v1463_v44 = vld [vmem:[%s19333_s5 + $0x18f8] sm:$0xff]  ;;  %v1552_v51 = vld [vmem:[%s19333_s5 + $0x1bc0] sm:$0xff] }
 0x2c0   : > { %v1569_v31 = vld [vmem:[%s19333_s5 + $0x1c48] sm:$0xff] }
 0x2c1   : > { %8841 = vmatpush1.bf16.msra.mxu0 %v8840_v59  ;;  %v1373_v59 = vld [vmem:[%s19333_s5 + $0x1628] sm:$0xff] }
 0x2c2   : > { %9097 = vmatpush1.bf16.msra.mxu1 %v9096_v60  ;;  %8843 = vmatprep.subr.bf16.mxu0 %v8842_v61  ;;  %v8856_v60 = vpack.c.bf16 %v1334_v49, %v1316_v48  ;;  %v9112_v61 = vpack.c.bf16 %v1336_v54, %v1318_v50  ;;  %v9114_v8 = vpack.c.bf16 %v1373_v59, %v1355_v58  ;;  %v1460_v49 = vld [vmem:[%s19333_s5 + $0x18e0] sm:$0xff]  ;;  %v1478_v50 = vld [vmem:[%s19333_s5 + $0x1970] sm:$0xff]  ;;  %v1515_v58 = vld [vmem:[%s19333_s5 + $0x1a98] sm:$0xff] }
 0x2c3   : > { %9099 = vmatprep.subr.bf16.mxu1 %v9098_v7  ;;  %v1354_v7 = vld [vmem:[%s19333_s5 + $0x1590] sm:$0xff]  ;;  %v8870_v48 = vpack.c.bf16 %v1479_v43, %v1461_v42  ;;  %v1499_v59 = vld [vmem:[%s19333_s5 + $0x1a18] sm:$0xff]  ;;  %v1588_v42 = vld [vmem:[%s19333_s5 + $0x1ce0] sm:$0xff] }
 0x2c4   : > { %v1605_v43 = vld [vmem:[%s19333_s5 + $0x1d68] sm:$0xff] }
 0x2c5   : > { %8845 = vmatpush1.bf16.msra.mxu0 %v8844_v13  ;;  %v1409_v13 = vld [vmem:[%s19333_s5 + $0x1748] sm:$0xff] }
 0x2c6   : > { %9101 = vmatpush1.bf16.msra.mxu1 %v9100_v18  ;;  %8847 = vmatprep.subr.bf16.mxu0 %v8846_v19  ;;  %v8860_v18 = vpack.c.bf16 %v1370_v3, %v1352_v2  ;;  %v9116_v19 = vpack.c.bf16 %v1372_v17, %v1354_v7  ;;  %v9118_v23 = vpack.c.bf16 %v1409_v13, %v1391_v10  ;;  %v1496_v3 = vld [vmem:[%s19333_s5 + $0x1a00] sm:$0xff]  ;;  %v1514_v7 = vld [vmem:[%s19333_s5 + $0x1a90] sm:$0xff]  ;;  %v1551_v10 = vld [vmem:[%s19333_s5 + $0x1bb8] sm:$0xff] }
 0x2c7   : > { %9103 = vmatprep.subr.bf16.mxu1 %v9102_v20  ;;  %v8862_v20 = vpack.c.bf16 %v1407_v9, %v1389_v22  ;;  %v8874_v2 = vpack.c.bf16 %v1515_v58, %v1497_v56  ;;  %v1516_v22 = vld [vmem:[%s19333_s5 + $0x1aa0] sm:$0xff]  ;;  %v1533_v9 = vld [vmem:[%s19333_s5 + $0x1b28] sm:$0xff]  ;;  %v1535_v13 = vld [vmem:[%s19333_s5 + $0x1b38] sm:$0xff] }
 0x2c8   : > { %3649 = vmatmul.mubr.f32.vlgmr.msra.gmra.mrb[4].mxu0 %v11416_v57  ;;  %v1624_v56 = vld [vmem:[%s19333_s5 + $0x1e00] sm:$0xff]  ;;  %v1641_v58 = vld [vmem:[%s19333_s5 + $0x1e88] sm:$0xff] }
 0x2c9   : > { %3957 = vmatmul.mubr.f32.vlgmr.msra.gmra.mrb[22].mxu1 %v11416_v57  ;;  %3654 = vmatprep.mubr.f32.mxu0 %v11448_v11 }
 0x2ca   : > { %8849 = vmatpush1.bf16.msra.mxu0 %v8848_v35  ;;  %3962 = vmatprep.mubr.f32.mxu1 %v11448_v11  ;;  %v1445_v35 = vld [vmem:[%s19333_s5 + $0x1868] sm:$0xff] }
 0x2cb   : > { %9105 = vmatpush1.bf16.msra.mxu1 %v9104_v16  ;;  %8851 = vmatprep.subr.bf16.mxu0 %v8850_v29  ;;  %v8864_v16 = vpack.c.bf16 %v1406_v15, %v1388_v47  ;;  %v9120_v29 = vpack.c.bf16 %v1408_v25, %v1390_v4  ;;  %v9122_v38 = vpack.c.bf16 %v1445_v35, %v1427_v32  ;;  %v1532_v15 = vld [vmem:[%s19333_s5 + $0x1b20] sm:$0xff]  ;;  %v1550_v4 = vld [vmem:[%s19333_s5 + $0x1bb0] sm:$0xff]  ;;  %v1587_v32 = vld [vmem:[%s19333_s5 + $0x1cd8] sm:$0xff] }
 0x2cc   : > { %3655 = vmatmul.mubr.f32.gmra.mrb[6].mxu0 %v11440_v6  ;;  %9107 = vmatprep.subr.bf16.mxu1 %v9106_v21  ;;  %v1426_v21 = vld [vmem:[%s19333_s5 + $0x17d0] sm:$0xff]  ;;  %v8878_v47 = vpack.c.bf16 %v1551_v10, %v1533_v9  ;;  %v1571_v35 = vld [vmem:[%s19333_s5 + $0x1c58] sm:$0xff]  ;;  %v1660_v9 = vld [vmem:[%s19333_s5 + $0x1f20] sm:$0xff] }
 0x2cd   : > { %3963 = vmatmul.mubr.f32.gmra.mrb[24].mxu1 %v11440_v6  ;;  %3725 = vmatprep.mubr.f32.mxu0 %v11483_v27  ;;  %v1677_v10 = vld [vmem:[%s19333_s5 + $0x1fa8] sm:$0xff] }
 0x2ce   : > { %8853 = vmatpush1.bf16.msra.mxu0 %v8852_v45  ;;  %4033 = vmatprep.mubr.f32.mxu1 %v11483_v27  ;;  %v1481_v45 = vld [vmem:[%s19333_s5 + $0x1988] sm:$0xff] }
 0x2cf   : > { %9109 = vmatpush1.bf16.msra.mxu1 %v9108_v34  ;;  %8855 = vmatprep.subr.bf16.mxu0 %v8854_v46  ;;  %v8868_v34 = vpack.c.bf16 %v1442_v36, %v1424_v63  ;;  %v9124_v46 = vpack.c.bf16 %v1444_v41, %v1426_v21  ;;  %v9126_v54 = vpack.c.bf16 %v1481_v45, %v1463_v44  ;;  %v1568_v36 = vld [vmem:[%s19333_s5 + $0x1c40] sm:$0xff]  ;;  %v1586_v21 = vld [vmem:[%s19333_s5 + $0x1cd0] sm:$0xff]  ;;  %v1623_v44 = vld [vmem:[%s19333_s5 + $0x1df8] sm:$0xff] }
 0x2d0   : > { %9111 = vmatprep.subr.bf16.mxu1 %v9110_v53  ;;  %v1462_v53 = vld [vmem:[%s19333_s5 + $0x18f0] sm:$0xff]  ;;  %v8882_v63 = vpack.c.bf16 %v1587_v32, %v1569_v31  ;;  %v1607_v45 = vld [vmem:[%s19333_s5 + $0x1d78] sm:$0xff]  ;;  %v1696_v31 = vld [vmem:[%s19333_s5 + $0x2040] sm:$0xff] }
 0x2d1   : > { %v1713_v32 = vld [vmem:[%s19333_s5 + $0x20c8] sm:$0xff] }
 0x2d2   : > { %8857 = vmatpush1.bf16.msra.mxu0 %v8856_v60  ;;  %v1517_v60 = vld [vmem:[%s19333_s5 + $0x1aa8] sm:$0xff] }
 0x2d3   : > { %9113 = vmatpush1.bf16.msra.mxu1 %v9112_v61  ;;  %8859 = vmatprep.subr.bf16.mxu0 %v8858_v0  ;;  %v8872_v61 = vpack.c.bf16 %v1478_v50, %v1460_v49  ;;  %v9128_v0 = vpack.c.bf16 %v1480_v55, %v1462_v53  ;;  %v9130_v17 = vpack.c.bf16 %v1517_v60, %v1499_v59  ;;  %v1604_v50 = vld [vmem:[%s19333_s5 + $0x1d60] sm:$0xff]  ;;  %v1622_v53 = vld [vmem:[%s19333_s5 + $0x1df0] sm:$0xff]  ;;  %v1659_v59 = vld [vmem:[%s19333_s5 + $0x1f18] sm:$0xff] }
 0x2d4   : > { %9115 = vmatprep.subr.bf16.mxu1 %v9114_v8  ;;  %v1498_v8 = vld [vmem:[%s19333_s5 + $0x1a10] sm:$0xff]  ;;  %v8886_v49 = vpack.c.bf16 %v1623_v44, %v1605_v43  ;;  %v1643_v60 = vld [vmem:[%s19333_s5 + $0x1e98] sm:$0xff]  ;;  %v1732_v43 = vld [vmem:[%s19333_s5 + $0x2160] sm:$0xff] }
 0x2d5   : > { %v1749_v44 = vld [vmem:[%s19333_s5 + $0x21e8] sm:$0xff] }
 0x2d6   : > { %8861 = vmatpush1.bf16.msra.mxu0 %v8860_v18  ;;  %v1553_v18 = vld [vmem:[%s19333_s5 + $0x1bc8] sm:$0xff] }
 0x2d7   : > { %9117 = vmatpush1.bf16.msra.mxu1 %v9116_v19  ;;  %8863 = vmatprep.subr.bf16.mxu0 %v8862_v20  ;;  %v8876_v19 = vpack.c.bf16 %v1514_v7, %v1496_v3  ;;  %v9132_v20 = vpack.c.bf16 %v1516_v22, %v1498_v8  ;;  %v9134_v25 = vpack.c.bf16 %v1553_v18, %v1535_v13  ;;  %v1640_v7 = vld [vmem:[%s19333_s5 + $0x1e80] sm:$0xff]  ;;  %v1658_v8 = vld [vmem:[%s19333_s5 + $0x1f10] sm:$0xff]  ;;  %v1695_v13 = vld [vmem:[%s19333_s5 + $0x2038] sm:$0xff] }
 0x2d8   : > { %9119 = vmatprep.subr.bf16.mxu1 %v9118_v23  ;;  %v1534_v23 = vld [vmem:[%s19333_s5 + $0x1b30] sm:$0xff]  ;;  %v8890_v3 = vpack.c.bf16 %v1659_v59, %v1641_v58  ;;  %v1679_v18 = vld [vmem:[%s19333_s5 + $0x1fb8] sm:$0xff]  ;;  %v1768_v58 = vld [vmem:[%s19333_s5 + $0x2280] sm:$0xff] }
 0x2d9   : > { %v1785_v59 = vld [vmem:[%s19333_s5 + $0x2308] sm:$0xff] }
 0x2da   : > { %8865 = vmatpush1.bf16.msra.mxu0 %v8864_v16  ;;  %v1589_v16 = vld [vmem:[%s19333_s5 + $0x1ce8] sm:$0xff] }
 0x2db   : > { %9121 = vmatpush1.bf16.msra.mxu1 %v9120_v29  ;;  %8867 = vmatprep.subr.bf16.mxu0 %v8866_v39  ;;  %v8880_v29 = vpack.c.bf16 %v1550_v4, %v1532_v15  ;;  %v9136_v39 = vpack.c.bf16 %v1552_v51, %v1534_v23  ;;  %v9138_v41 = vpack.c.bf16 %v1589_v16, %v1571_v35  ;;  %v1676_v4 = vld [vmem:[%s19333_s5 + $0x1fa0] sm:$0xff]  ;;  %v1694_v23 = vld [vmem:[%s19333_s5 + $0x2030] sm:$0xff]  ;;  %v1731_v35 = vld [vmem:[%s19333_s5 + $0x2158] sm:$0xff] }
 0x2dc   : > { %9123 = vmatprep.subr.bf16.mxu1 %v9122_v38  ;;  %v1570_v38 = vld [vmem:[%s19333_s5 + $0x1c50] sm:$0xff]  ;;  %v8894_v15 = vpack.c.bf16 %v1695_v13, %v1677_v10  ;;  %v1715_v16 = vld [vmem:[%s19333_s5 + $0x20d8] sm:$0xff]  ;;  %v1804_v10 = vld [vmem:[%s19333_s5 + $0x23a0] sm:$0xff] }
 0x2dd   : > { %v1821_v13 = vld [vmem:[%s19333_s5 + $0x2428] sm:$0xff] }
 0x2de   : > { %8869 = vmatpush1.bf16.msra.mxu0 %v8868_v34  ;;  %v1625_v34 = vld [vmem:[%s19333_s5 + $0x1e08] sm:$0xff] }
 0x2df   : > { %9125 = vmatpush1.bf16.msra.mxu1 %v9124_v46  ;;  %8871 = vmatprep.subr.bf16.mxu0 %v8870_v48  ;;  %v8884_v46 = vpack.c.bf16 %v1586_v21, %v1568_v36  ;;  %v9140_v48 = vpack.c.bf16 %v1588_v42, %v1570_v38  ;;  %v9142_v55 = vpack.c.bf16 %v1625_v34, %v1607_v45  ;;  %v1712_v21 = vld [vmem:[%s19333_s5 + $0x20c0] sm:$0xff]  ;;  %v1730_v38 = vld [vmem:[%s19333_s5 + $0x2150] sm:$0xff]  ;;  %v1767_v45 = vld [vmem:[%s19333_s5 + $0x2278] sm:$0xff] }
 0x2e0   : > { %9127 = vmatprep.subr.bf16.mxu1 %v9126_v54  ;;  %v1606_v54 = vld [vmem:[%s19333_s5 + $0x1d70] sm:$0xff]  ;;  %v8898_v36 = vpack.c.bf16 %v1731_v35, %v1713_v32  ;;  %v1751_v34 = vld [vmem:[%s19333_s5 + $0x21f8] sm:$0xff]  ;;  %v1840_v32 = vld [vmem:[%s19333_s5 + $0x24c0] sm:$0xff] }
 0x2e1   : > { %v1857_v35 = vld [vmem:[%s19333_s5 + $0x2548] sm:$0xff] }
 0x2e2   : > { %8873 = vmatpush1.bf16.msra.mxu0 %v8872_v61  ;;  %v1661_v61 = vld [vmem:[%s19333_s5 + $0x1f28] sm:$0xff] }
 0x2e3   : > { %9129 = vmatpush1.bf16.msra.mxu1 %v9128_v0  ;;  %8875 = vmatprep.subr.bf16.mxu0 %v8874_v2  ;;  %v8888_v0 = vpack.c.bf16 %v1622_v53, %v1604_v50  ;;  %v9144_v2 = vpack.c.bf16 %v1624_v56, %v1606_v54  ;;  %v9146_v22 = vpack.c.bf16 %v1661_v61, %v1643_v60  ;;  %v1748_v53 = vld [vmem:[%s19333_s5 + $0x21e0] sm:$0xff]  ;;  %v1766_v54 = vld [vmem:[%s19333_s5 + $0x2270] sm:$0xff]  ;;  %v1803_v60 = vld [vmem:[%s19333_s5 + $0x2398] sm:$0xff] }
 0x2e4   : > { %9131 = vmatprep.subr.bf16.mxu1 %v9130_v17  ;;  %v1642_v17 = vld [vmem:[%s19333_s5 + $0x1e90] sm:$0xff]  ;;  %v8902_v50 = vpack.c.bf16 %v1767_v45, %v1749_v44  ;;  %v1787_v61 = vld [vmem:[%s19333_s5 + $0x2318] sm:$0xff]  ;;  %v1876_v44 = vld [vmem:[%s19333_s5 + $0x25e0] sm:$0xff] }
 0x2e5   : > { %v1893_v45 = vld [vmem:[%s19333_s5 + $0x2668] sm:$0xff] }
 0x2e6   : > { %8877 = vmatpush1.bf16.msra.mxu0 %v8876_v19  ;;  %v1697_v19 = vld [vmem:[%s19333_s5 + $0x2048] sm:$0xff] }
 0x2e7   : > { %9133 = vmatpush1.bf16.msra.mxu1 %v9132_v20  ;;  %8879 = vmatprep.subr.bf16.mxu0 %v8878_v47  ;;  %v8892_v20 = vpack.c.bf16 %v1658_v8, %v1640_v7  ;;  %v9148_v47 = vpack.c.bf16 %v1660_v9, %v1642_v17  ;;  %v9150_v51 = vpack.c.bf16 %v1697_v19, %v1679_v18  ;;  %v1784_v8 = vld [vmem:[%s19333_s5 + $0x2300] sm:$0xff]  ;;  %v1802_v17 = vld [vmem:[%s19333_s5 + $0x2390] sm:$0xff]  ;;  %v1839_v18 = vld [vmem:[%s19333_s5 + $0x24b8] sm:$0xff] }
 0x2e8   : > { %9135 = vmatprep.subr.bf16.mxu1 %v9134_v25  ;;  %v1678_v25 = vld [vmem:[%s19333_s5 + $0x1fb0] sm:$0xff]  ;;  %v8906_v7 = vpack.c.bf16 %v1803_v60, %v1785_v59  ;;  %v1823_v19 = vld [vmem:[%s19333_s5 + $0x2438] sm:$0xff]  ;;  %v1912_v59 = vld [vmem:[%s19333_s5 + $0x2700] sm:$0xff] }
 0x2e9   : > { %v1929_v60 = vld [vmem:[%s19333_s5 + $0x2788] sm:$0xff] }
 0x2ea   : > { %8881 = vmatpush1.bf16.msra.mxu0 %v8880_v29  ;;  %v1733_v29 = vld [vmem:[%s19333_s5 + $0x2168] sm:$0xff] }
 0x2eb   : > { %9137 = vmatpush1.bf16.msra.mxu1 %v9136_v39  ;;  %8883 = vmatprep.subr.bf16.mxu0 %v8882_v63  ;;  %v8896_v39 = vpack.c.bf16 %v1694_v23, %v1676_v4  ;;  %v9152_v63 = vpack.c.bf16 %v1696_v31, %v1678_v25  ;;  %v9154_v42 = vpack.c.bf16 %v1733_v29, %v1715_v16  ;;  %v1820_v25 = vld [vmem:[%s19333_s5 + $0x2420] sm:$0xff]  ;;  %v1822_v31 = vld [vmem:[%s19333_s5 + $0x2430] sm:$0xff]  ;;  %v1875_v16 = vld [vmem:[%s19333_s5 + $0x25d8] sm:$0xff] }
 0x2ec   : > { %9139 = vmatprep.subr.bf16.mxu1 %v9138_v41  ;;  %v1714_v41 = vld [vmem:[%s19333_s5 + $0x20d0] sm:$0xff]  ;;  %v8910_v4 = vpack.c.bf16 %v1839_v18, %v1821_v13  ;;  %v1859_v29 = vld [vmem:[%s19333_s5 + $0x2558] sm:$0xff]  ;;  %v1948_v13 = vld [vmem:[%s19333_s5 + $0x2820] sm:$0xff] }
 0x2ed   : > { %v1965_v18 = vld [vmem:[%s19333_s5 + $0x28a8] sm:$0xff] }
 0x2ee   : > { %8885 = vmatpush1.bf16.msra.mxu0 %v8884_v46  ;;  %v1769_v46 = vld [vmem:[%s19333_s5 + $0x2288] sm:$0xff] }
 0x2ef   : > { %9141 = vmatpush1.bf16.msra.mxu1 %v9140_v48  ;;  %8887 = vmatprep.subr.bf16.mxu0 %v8886_v49  ;;  %v8900_v48 = vpack.c.bf16 %v1730_v38, %v1712_v21  ;;  %v9156_v49 = vpack.c.bf16 %v1732_v43, %v1714_v41  ;;  %v9158_v56 = vpack.c.bf16 %v1769_v46, %v1751_v34  ;;  %v1856_v38 = vld [vmem:[%s19333_s5 + $0x2540] sm:$0xff]  ;;  %v1874_v41 = vld [vmem:[%s19333_s5 + $0x25d0] sm:$0xff]  ;;  %v1911_v34 = vld [vmem:[%s19333_s5 + $0x26f8] sm:$0xff] }
 0x2f0   : > { %9143 = vmatprep.subr.bf16.mxu1 %v9142_v55  ;;  %v1750_v55 = vld [vmem:[%s19333_s5 + $0x21f0] sm:$0xff]  ;;  %v8914_v21 = vpack.c.bf16 %v1875_v16, %v1857_v35  ;;  %v1895_v46 = vld [vmem:[%s19333_s5 + $0x2678] sm:$0xff]  ;;  %v1984_v35 = vld [vmem:[%s19333_s5 + $0x2940] sm:$0xff] }
 0x2f1   : > { %v2001_v16 = vld [vmem:[%s19333_s5 + $0x29c8] sm:$0xff] }
 0x2f2   : > { %8889 = vmatpush1.bf16.msra.mxu0 %v8888_v0  ;;  %v1805_v0 = vld [vmem:[%s19333_s5 + $0x23a8] sm:$0xff] }
 0x2f3   : > { %9145 = vmatpush1.bf16.msra.mxu1 %v9144_v2  ;;  %8891 = vmatprep.subr.bf16.mxu0 %v8890_v3  ;;  %v8904_v2 = vpack.c.bf16 %v1766_v54, %v1748_v53  ;;  %v9160_v3 = vpack.c.bf16 %v1768_v58, %v1750_v55  ;;  %v9162_v9 = vpack.c.bf16 %v1805_v0, %v1787_v61  ;;  %v1892_v54 = vld [vmem:[%s19333_s5 + $0x2660] sm:$0xff]  ;;  %v1910_v55 = vld [vmem:[%s19333_s5 + $0x26f0] sm:$0xff]  ;;  %v1947_v61 = vld [vmem:[%s19333_s5 + $0x2818] sm:$0xff] }
 0x2f4   : > { %9147 = vmatprep.subr.bf16.mxu1 %v9146_v22  ;;  %v1786_v22 = vld [vmem:[%s19333_s5 + $0x2310] sm:$0xff]  ;;  %v8918_v53 = vpack.c.bf16 %v1911_v34, %v1893_v45  ;;  %v1931_v0 = vld [vmem:[%s19333_s5 + $0x2798] sm:$0xff]  ;;  %v2020_v45 = vld [vmem:[%s19333_s5 + $0x2a60] sm:$0xff] }
 0x2f5   : > { %v2037_v34 = vld [vmem:[%s19333_s5 + $0x2ae8] sm:$0xff] }
 0x2f6   : > { %8893 = vmatpush1.bf16.msra.mxu0 %v8892_v20  ;;  %v1841_v20 = vld [vmem:[%s19333_s5 + $0x24c8] sm:$0xff] }
 0x2f7   : > { %9149 = vmatpush1.bf16.msra.mxu1 %v9148_v47  ;;  %8895 = vmatprep.subr.bf16.mxu0 %v8894_v15  ;;  %v8908_v47 = vpack.c.bf16 %v1802_v17, %v1784_v8  ;;  %v9164_v15 = vpack.c.bf16 %v1804_v10, %v1786_v22  ;;  %v9166_v23 = vpack.c.bf16 %v1841_v20, %v1823_v19  ;;  %v1928_v17 = vld [vmem:[%s19333_s5 + $0x2780] sm:$0xff]  ;;  %v1946_v22 = vld [vmem:[%s19333_s5 + $0x2810] sm:$0xff]  ;;  %v1983_v19 = vld [vmem:[%s19333_s5 + $0x2938] sm:$0xff] }
 0x2f8   : > { %9151 = vmatprep.subr.bf16.mxu1 %v9150_v51  ;;  %v1838_v51 = vld [vmem:[%s19333_s5 + $0x24b0] sm:$0xff]  ;;  %v8922_v8 = vpack.c.bf16 %v1947_v61, %v1929_v60  ;;  %v1967_v20 = vld [vmem:[%s19333_s5 + $0x28b8] sm:$0xff]  ;;  %v2056_v60 = vld [vmem:[%s19333_s5 + $0x2b80] sm:$0xff] }
 0x2f9   : > { %v2073_v61 = vld [vmem:[%s19333_s5 + $0x2c08] sm:$0xff] }
 0x2fa   : > { %8897 = vmatpush1.bf16.msra.mxu0 %v8896_v39  ;;  %v1877_v39 = vld [vmem:[%s19333_s5 + $0x25e8] sm:$0xff] }
 0x2fb   : > { %9153 = vmatpush1.bf16.msra.mxu1 %v9152_v63  ;;  %8899 = vmatprep.subr.bf16.mxu0 %v8898_v36  ;;  %v8912_v63 = vpack.c.bf16 %v1838_v51, %v1820_v25  ;;  %v9168_v36 = vpack.c.bf16 %v1840_v32, %v1822_v31  ;;  %v9170_v43 = vpack.c.bf16 %v1877_v39, %v1859_v29  ;;  %v1964_v25 = vld [vmem:[%s19333_s5 + $0x28a0] sm:$0xff]  ;;  %v1982_v51 = vld [vmem:[%s19333_s5 + $0x2930] sm:$0xff]  ;;  %v2019_v29 = vld [vmem:[%s19333_s5 + $0x2a58] sm:$0xff] }
 0x2fc   : > { %9155 = vmatprep.subr.bf16.mxu1 %v9154_v42  ;;  %v1858_v42 = vld [vmem:[%s19333_s5 + $0x2550] sm:$0xff]  ;;  %v2003_v39 = vld [vmem:[%s19333_s5 + $0x29d8] sm:$0xff] }
 0x2fd   : > { %v1966_v31 = vld [vmem:[%s19333_s5 + $0x28b0] sm:$0xff] }
 0x2fe   : > { %8901 = vmatpush1.bf16.msra.mxu0 %v8900_v48  ;;  %v1913_v48 = vld [vmem:[%s19333_s5 + $0x2708] sm:$0xff] }
 0x2ff   : > { %9157 = vmatpush1.bf16.msra.mxu1 %v9156_v49  ;;  %8903 = vmatprep.subr.bf16.mxu0 %v8902_v50  ;;  %v8916_v49 = vpack.c.bf16 %v1874_v41, %v1856_v38  ;;  %v9172_v50 = vpack.c.bf16 %v1876_v44, %v1858_v42  ;;  %v9174_v58 = vpack.c.bf16 %v1913_v48, %v1895_v46  ;;  %v2000_v41 = vld [vmem:[%s19333_s5 + $0x29c0] sm:$0xff]  ;;  %v2018_v42 = vld [vmem:[%s19333_s5 + $0x2a50] sm:$0xff]  ;;  %v2055_v46 = vld [vmem:[%s19333_s5 + $0x2b78] sm:$0xff] }
 0x300   : > { %9159 = vmatprep.subr.bf16.mxu1 %v9158_v56  ;;  %v1894_v56 = vld [vmem:[%s19333_s5 + $0x2670] sm:$0xff]  ;;  %v8930_v38 = vpack.c.bf16 %v2019_v29, %v2001_v16  ;;  %v2039_v48 = vld [vmem:[%s19333_s5 + $0x2af8] sm:$0xff]  ;;  %v2128_v16 = vld [vmem:[%s19333_s5 + $0x2dc0] sm:$0xff] }
 0x301   : > { %v2145_v29 = vld [vmem:[%s19333_s5 + $0x2e48] sm:$0xff] }
 0x302   : > { %8905 = vmatpush1.bf16.msra.mxu0 %v8904_v2  ;;  %v1949_v2 = vld [vmem:[%s19333_s5 + $0x2828] sm:$0xff] }
 0x303   : > { %9161 = vmatpush1.bf16.msra.mxu1 %v9160_v3  ;;  %8907 = vmatprep.subr.bf16.mxu0 %v8906_v7  ;;  %v8920_v3 = vpack.c.bf16 %v1910_v55, %v1892_v54  ;;  %v9176_v7 = vpack.c.bf16 %v1912_v59, %v1894_v56  ;;  %v9178_v10 = vpack.c.bf16 %v1949_v2, %v1931_v0  ;;  %v2036_v55 = vld [vmem:[%s19333_s5 + $0x2ae0] sm:$0xff]  ;;  %v2054_v56 = vld [vmem:[%s19333_s5 + $0x2b70] sm:$0xff]  ;;  %v2091_v0 = vld [vmem:[%s19333_s5 + $0x2c98] sm:$0xff] }
 0x304   : > { %9163 = vmatprep.subr.bf16.mxu1 %v9162_v9  ;;  %v1930_v9 = vld [vmem:[%s19333_s5 + $0x2790] sm:$0xff]  ;;  %v8934_v54 = vpack.c.bf16 %v2055_v46, %v2037_v34  ;;  %v2075_v2 = vld [vmem:[%s19333_s5 + $0x2c18] sm:$0xff]  ;;  %v2164_v34 = vld [vmem:[%s19333_s5 + $0x2ee0] sm:$0xff] }
 0x305   : > { %v2181_v46 = vld [vmem:[%s19333_s5 + $0x2f68] sm:$0xff] }
 0x306   : > { %8909 = vmatpush1.bf16.msra.mxu0 %v8908_v47  ;;  %v1985_v47 = vld [vmem:[%s19333_s5 + $0x2948] sm:$0xff] }
 0x307   : > { %9165 = vmatpush1.bf16.msra.mxu1 %v9164_v15  ;;  %8911 = vmatprep.subr.bf16.mxu0 %v8910_v4  ;;  %v8924_v15 = vpack.c.bf16 %v1946_v22, %v1928_v17  ;;  %v9180_v4 = vpack.c.bf16 %v1948_v13, %v1930_v9  ;;  %v9182_v32 = vpack.c.bf16 %v1985_v47, %v1967_v20  ;;  %v2072_v22 = vld [vmem:[%s19333_s5 + $0x2c00] sm:$0xff]  ;;  %v2090_v9 = vld [vmem:[%s19333_s5 + $0x2c90] sm:$0xff]  ;;  %v2127_v20 = vld [vmem:[%s19333_s5 + $0x2db8] sm:$0xff] }
 0x308   : > { %9167 = vmatprep.subr.bf16.mxu1 %v9166_v23  ;;  %v8926_v23 = vpack.c.bf16 %v1983_v19, %v1965_v18  ;;  %v8938_v17 = vpack.c.bf16 %v2091_v0, %v2073_v61  ;;  %v2092_v18 = vld [vmem:[%s19333_s5 + $0x2ca0] sm:$0xff]  ;;  %v2109_v19 = vld [vmem:[%s19333_s5 + $0x2d28] sm:$0xff]  ;;  %v2111_v47 = vld [vmem:[%s19333_s5 + $0x2d38] sm:$0xff] }
 0x309   : > { %3726 = vmatmul.mubr.f32.vlgmr.msra.gmra.mrb[4].mxu0 %v11839_v62  ;;  %v2200_v61 = vld [vmem:[%s19333_s5 + $0x3000] sm:$0xff]  ;;  %v2217_v0 = vld [vmem:[%s19333_s5 + $0x3088] sm:$0xff] }
 0x30a   : > { %4034 = vmatmul.mubr.f32.vlgmr.msra.gmra.mrb[22].mxu1 %v11839_v62  ;;  %3731 = vmatprep.mubr.f32.mxu0 %v11848_v5 }
 0x30b   : > { %8913 = vmatpush1.bf16.msra.mxu0 %v8912_v63  ;;  %4039 = vmatprep.mubr.f32.mxu1 %v11848_v5  ;;  %v2021_v63 = vld [vmem:[%s19333_s5 + $0x2a68] sm:$0xff] }
 0x30c   : > { %9169 = vmatpush1.bf16.msra.mxu1 %v9168_v36  ;;  %8915 = vmatprep.subr.bf16.mxu0 %v8914_v21  ;;  %v8928_v36 = vpack.c.bf16 %v1982_v51, %v1964_v25  ;;  %v9184_v21 = vpack.c.bf16 %v1984_v35, %v1966_v31  ;;  %v9186_v44 = vpack.c.bf16 %v2021_v63, %v2003_v39  ;;  %v2108_v51 = vld [vmem:[%s19333_s5 + $0x2d20] sm:$0xff]  ;;  %v2126_v31 = vld [vmem:[%s19333_s5 + $0x2db0] sm:$0xff]  ;;  %v2163_v39 = vld [vmem:[%s19333_s5 + $0x2ed8] sm:$0xff] }
 0x30d   : > { %3732 = vmatmul.mubr.f32.gmra.mrb[6].mxu0 %v11872_v14  ;;  %9171 = vmatprep.subr.bf16.mxu1 %v9170_v43  ;;  %v2002_v43 = vld [vmem:[%s19333_s5 + $0x29d0] sm:$0xff]  ;;  %v8942_v25 = vpack.c.bf16 %v2127_v20, %v2109_v19  ;;  %v2147_v63 = vld [vmem:[%s19333_s5 + $0x2e58] sm:$0xff]  ;;  %v2236_v19 = vld [vmem:[%s19333_s5 + $0x3120] sm:$0xff] }
 0x30e   : > { %4040 = vmatmul.mubr.f32.gmra.mrb[24].mxu1 %v11872_v14  ;;  %3802 = vmatprep.mubr.f32.mxu0 %v11888_v33  ;;  %v2253_v20 = vld [vmem:[%s19333_s5 + $0x31a8] sm:$0xff] }
 0x30f   : > { %8917 = vmatpush1.bf16.msra.mxu0 %v8916_v49  ;;  %4110 = vmatprep.mubr.f32.mxu1 %v11888_v33  ;;  %v2057_v49 = vld [vmem:[%s19333_s5 + $0x2b88] sm:$0xff] }
 0x310   : > { %9173 = vmatpush1.bf16.msra.mxu1 %v9172_v50  ;;  %8919 = vmatprep.subr.bf16.mxu0 %v8918_v53  ;;  %v8932_v50 = vpack.c.bf16 %v2018_v42, %v2000_v41  ;;  %v9188_v53 = vpack.c.bf16 %v2020_v45, %v2002_v43  ;;  %v9190_v59 = vpack.c.bf16 %v2057_v49, %v2039_v48  ;;  %v2144_v42 = vld [vmem:[%s19333_s5 + $0x2e40] sm:$0xff]  ;;  %v2162_v43 = vld [vmem:[%s19333_s5 + $0x2ed0] sm:$0xff]  ;;  %v2199_v48 = vld [vmem:[%s19333_s5 + $0x2ff8] sm:$0xff] }
 0x311   : > { %9175 = vmatprep.subr.bf16.mxu1 %v9174_v58  ;;  %v2038_v58 = vld [vmem:[%s19333_s5 + $0x2af0] sm:$0xff]  ;;  %v8946_v41 = vpack.c.bf16 %v2163_v39, %v2145_v29  ;;  %v2183_v49 = vld [vmem:[%s19333_s5 + $0x2f78] sm:$0xff]  ;;  %v2272_v29 = vld [vmem:[%s19333_s5 + $0x3240] sm:$0xff] }
 0x312   : > { %v2289_v39 = vld [vmem:[%s19333_s5 + $0x32c8] sm:$0xff] }
 0x313   : > { %8921 = vmatpush1.bf16.msra.mxu0 %v8920_v3  ;;  %v2093_v3 = vld [vmem:[%s19333_s5 + $0x2ca8] sm:$0xff] }
 0x314   : > { %9177 = vmatpush1.bf16.msra.mxu1 %v9176_v7  ;;  %8923 = vmatprep.subr.bf16.mxu0 %v8922_v8  ;;  %v8936_v7 = vpack.c.bf16 %v2054_v56, %v2036_v55  ;;  %v9192_v8 = vpack.c.bf16 %v2056_v60, %v2038_v58  ;;  %v9194_v13 = vpack.c.bf16 %v2093_v3, %v2075_v2  ;;  %v2180_v56 = vld [vmem:[%s19333_s5 + $0x2f60] sm:$0xff]  ;;  %v2198_v58 = vld [vmem:[%s19333_s5 + $0x2ff0] sm:$0xff]  ;;  %v2235_v2 = vld [vmem:[%s19333_s5 + $0x3118] sm:$0xff] }
 0x315   : > { %9179 = vmatprep.subr.bf16.mxu1 %v9178_v10  ;;  %v2074_v10 = vld [vmem:[%s19333_s5 + $0x2c10] sm:$0xff]  ;;  %v8950_v55 = vpack.c.bf16 %v2199_v48, %v2181_v46  ;;  %v2219_v3 = vld [vmem:[%s19333_s5 + $0x3098] sm:$0xff]  ;;  %v2308_v46 = vld [vmem:[%s19333_s5 + $0x3360] sm:$0xff] }
 0x316   : > { %v2325_v48 = vld [vmem:[%s19333_s5 + $0x33e8] sm:$0xff] }
 0x317   : > { %8925 = vmatpush1.bf16.msra.mxu0 %v8924_v15  ;;  %v2129_v15 = vld [vmem:[%s19333_s5 + $0x2dc8] sm:$0xff] }
 0x318   : > { %9181 = vmatpush1.bf16.msra.mxu1 %v9180_v4  ;;  %8927 = vmatprep.subr.bf16.mxu0 %v8926_v23  ;;  %v8940_v4 = vpack.c.bf16 %v2090_v9, %v2072_v22  ;;  %v9196_v23 = vpack.c.bf16 %v2092_v18, %v2074_v10  ;;  %v9198_v35 = vpack.c.bf16 %v2129_v15, %v2111_v47  ;;  %v2216_v9 = vld [vmem:[%s19333_s5 + $0x3080] sm:$0xff]  ;;  %v2234_v10 = vld [vmem:[%s19333_s5 + $0x3110] sm:$0xff]  ;;  %v2271_v47 = vld [vmem:[%s19333_s5 + $0x3238] sm:$0xff] }
 0x319   : > { %9183 = vmatprep.subr.bf16.mxu1 %v9182_v32  ;;  %v2110_v32 = vld [vmem:[%s19333_s5 + $0x2d30] sm:$0xff]  ;;  %v8954_v22 = vpack.c.bf16 %v2235_v2, %v2217_v0  ;;  %v2255_v15 = vld [vmem:[%s19333_s5 + $0x31b8] sm:$0xff]  ;;  %v2344_v0 = vld [vmem:[%s19333_s5 + $0x3480] sm:$0xff] }
 0x31a   : > { %v2361_v2 = vld [vmem:[%s19333_s5 + $0x3508] sm:$0xff] }
 0x31b   : > { %8929 = vmatpush1.bf16.msra.mxu0 %v8928_v36  ;;  %v2165_v36 = vld [vmem:[%s19333_s5 + $0x2ee8] sm:$0xff] }
 0x31c   : > { %9185 = vmatpush1.bf16.msra.mxu1 %v9184_v21  ;;  %8931 = vmatprep.subr.bf16.mxu0 %v8930_v38  ;;  %v8944_v21 = vpack.c.bf16 %v2126_v31, %v2108_v51  ;;  %v9200_v38 = vpack.c.bf16 %v2128_v16, %v2110_v32  ;;  %v9202_v45 = vpack.c.bf16 %v2165_v36, %v2147_v63  ;;  %v2252_v31 = vld [vmem:[%s19333_s5 + $0x31a0] sm:$0xff]  ;;  %v2270_v32 = vld [vmem:[%s19333_s5 + $0x3230] sm:$0xff]  ;;  %v2307_v63 = vld [vmem:[%s19333_s5 + $0x3358] sm:$0xff] }
 0x31d   : > { %9187 = vmatprep.subr.bf16.mxu1 %v9186_v44  ;;  %v2146_v44 = vld [vmem:[%s19333_s5 + $0x2e50] sm:$0xff]  ;;  %v8958_v51 = vpack.c.bf16 %v2271_v47, %v2253_v20  ;;  %v2291_v36 = vld [vmem:[%s19333_s5 + $0x32d8] sm:$0xff]  ;;  %v2380_v20 = vld [vmem:[%s19333_s5 + $0x35a0] sm:$0xff] }
 0x31e   : > { %v2397_v47 = vld [vmem:[%s19333_s5 + $0x3628] sm:$0xff] }
 0x31f   : > { %8933 = vmatpush1.bf16.msra.mxu0 %v8932_v50  ;;  %v2201_v50 = vld [vmem:[%s19333_s5 + $0x3008] sm:$0xff] }
 0x320   : > { %9189 = vmatpush1.bf16.msra.mxu1 %v9188_v53  ;;  %8935 = vmatprep.subr.bf16.mxu0 %v8934_v54  ;;  %v8948_v53 = vpack.c.bf16 %v2162_v43, %v2144_v42  ;;  %v9204_v54 = vpack.c.bf16 %v2164_v34, %v2146_v44  ;;  %v9206_v60 = vpack.c.bf16 %v2201_v50, %v2183_v49  ;;  %v2288_v43 = vld [vmem:[%s19333_s5 + $0x32c0] sm:$0xff]  ;;  %v2306_v44 = vld [vmem:[%s19333_s5 + $0x3350] sm:$0xff]  ;;  %v2343_v49 = vld [vmem:[%s19333_s5 + $0x3478] sm:$0xff] }
 0x321   : > { %9191 = vmatprep.subr.bf16.mxu1 %v9190_v59  ;;  %v2182_v59 = vld [vmem:[%s19333_s5 + $0x2f70] sm:$0xff]  ;;  %v8962_v42 = vpack.c.bf16 %v2307_v63, %v2289_v39  ;;  %v2327_v50 = vld [vmem:[%s19333_s5 + $0x33f8] sm:$0xff]  ;;  %v2416_v39 = vld [vmem:[%s19333_s5 + $0x36c0] sm:$0xff] }
 0x322   : > { %v2433_v63 = vld [vmem:[%s19333_s5 + $0x3748] sm:$0xff] }
 0x323   : > { %8937 = vmatpush1.bf16.msra.mxu0 %v8936_v7  ;;  %v2237_v7 = vld [vmem:[%s19333_s5 + $0x3128] sm:$0xff] }
 0x324   : > { %9193 = vmatpush1.bf16.msra.mxu1 %v9192_v8  ;;  %8939 = vmatprep.subr.bf16.mxu0 %v8938_v17  ;;  %v8952_v8 = vpack.c.bf16 %v2198_v58, %v2180_v56  ;;  %v9208_v17 = vpack.c.bf16 %v2200_v61, %v2182_v59  ;;  %v9210_v18 = vpack.c.bf16 %v2237_v7, %v2219_v3  ;;  %v2324_v58 = vld [vmem:[%s19333_s5 + $0x33e0] sm:$0xff]  ;;  %v2342_v59 = vld [vmem:[%s19333_s5 + $0x3470] sm:$0xff]  ;;  %v2379_v3 = vld [vmem:[%s19333_s5 + $0x3598] sm:$0xff] }
 0x325   : > { %9195 = vmatprep.subr.bf16.mxu1 %v9194_v13  ;;  %v2218_v13 = vld [vmem:[%s19333_s5 + $0x3090] sm:$0xff]  ;;  %v8966_v56 = vpack.c.bf16 %v2343_v49, %v2325_v48  ;;  %v2363_v7 = vld [vmem:[%s19333_s5 + $0x3518] sm:$0xff]  ;;  %v2452_v48 = vld [vmem:[%s19333_s5 + $0x37e0] sm:$0xff] }
 0x326   : > { %v2469_v49 = vld [vmem:[%s19333_s5 + $0x3868] sm:$0xff] }
 0x327   : > { %8941 = vmatpush1.bf16.msra.mxu0 %v8940_v4  ;;  %v2273_v4 = vld [vmem:[%s19333_s5 + $0x3248] sm:$0xff] }
 0x328   : > { %9197 = vmatpush1.bf16.msra.mxu1 %v9196_v23  ;;  %8943 = vmatprep.subr.bf16.mxu0 %v8942_v25  ;;  %v8956_v23 = vpack.c.bf16 %v2234_v10, %v2216_v9  ;;  %v9212_v25 = vpack.c.bf16 %v2236_v19, %v2218_v13  ;;  %v9214_v16 = vpack.c.bf16 %v2273_v4, %v2255_v15  ;;  %v2360_v10 = vld [vmem:[%s19333_s5 + $0x3500] sm:$0xff]  ;;  %v2378_v13 = vld [vmem:[%s19333_s5 + $0x3590] sm:$0xff]  ;;  %v2415_v15 = vld [vmem:[%s19333_s5 + $0x36b8] sm:$0xff] }
 0x329   : > { %9199 = vmatprep.subr.bf16.mxu1 %v9198_v35  ;;  %v2254_v35 = vld [vmem:[%s19333_s5 + $0x31b0] sm:$0xff]  ;;  %v8970_v9 = vpack.c.bf16 %v2379_v3, %v2361_v2  ;;  %v2399_v4 = vld [vmem:[%s19333_s5 + $0x3638] sm:$0xff]  ;;  %v2488_v2 = vld [vmem:[%s19333_s5 + $0x3900] sm:$0xff] }
 0x32a   : > { %v2505_v3 = vld [vmem:[%s19333_s5 + $0x3988] sm:$0xff] }
 0x32b   : > { %8945 = vmatpush1.bf16.msra.mxu0 %v8944_v21  ;;  %v2309_v21 = vld [vmem:[%s19333_s5 + $0x3368] sm:$0xff] }
 0x32c   : > { %9201 = vmatpush1.bf16.msra.mxu1 %v9200_v38  ;;  %8947 = vmatprep.subr.bf16.mxu0 %v8946_v41  ;;  %v8960_v38 = vpack.c.bf16 %v2270_v32, %v2252_v31  ;;  %v9216_v41 = vpack.c.bf16 %v2272_v29, %v2254_v35  ;;  %v9218_v34 = vpack.c.bf16 %v2309_v21, %v2291_v36  ;;  %v2396_v35 = vld [vmem:[%s19333_s5 + $0x3620] sm:$0xff]  ;;  %v2398_v29 = vld [vmem:[%s19333_s5 + $0x3630] sm:$0xff]  ;;  %v2451_v36 = vld [vmem:[%s19333_s5 + $0x37d8] sm:$0xff] }
 0x32d   : > { %9203 = vmatprep.subr.bf16.mxu1 %v9202_v45  ;;  %v2290_v45 = vld [vmem:[%s19333_s5 + $0x32d0] sm:$0xff]  ;;  %v8974_v31 = vpack.c.bf16 %v2415_v15, %v2397_v47  ;;  %v2435_v21 = vld [vmem:[%s19333_s5 + $0x3758] sm:$0xff]  ;;  %v2524_v47 = vld [vmem:[%s19333_s5 + $0x3a20] sm:$0xff] }
 0x32e   : > { %v2541_v15 = vld [vmem:[%s19333_s5 + $0x3aa8] sm:$0xff] }
 0x32f   : > { %8949 = vmatpush1.bf16.msra.mxu0 %v8948_v53  ;;  %v2345_v53 = vld [vmem:[%s19333_s5 + $0x3488] sm:$0xff] }
 0x330   : > { %9205 = vmatpush1.bf16.msra.mxu1 %v9204_v54  ;;  %8951 = vmatprep.subr.bf16.mxu0 %v8950_v55  ;;  %v8964_v54 = vpack.c.bf16 %v2306_v44, %v2288_v43  ;;  %v9220_v55 = vpack.c.bf16 %v2308_v46, %v2290_v45  ;;  %v9222_v61 = vpack.c.bf16 %v2345_v53, %v2327_v50  ;;  %v2432_v44 = vld [vmem:[%s19333_s5 + $0x3740] sm:$0xff]  ;;  %v2450_v45 = vld [vmem:[%s19333_s5 + $0x37d0] sm:$0xff]  ;;  %v2487_v50 = vld [vmem:[%s19333_s5 + $0x38f8] sm:$0xff] }
 0x331   : > { %9207 = vmatprep.subr.bf16.mxu1 %v9206_v60  ;;  %v2326_v60 = vld [vmem:[%s19333_s5 + $0x33f0] sm:$0xff]  ;;  %v8978_v43 = vpack.c.bf16 %v2451_v36, %v2433_v63  ;;  %v2471_v53 = vld [vmem:[%s19333_s5 + $0x3878] sm:$0xff]  ;;  %v2560_v63 = vld [vmem:[%s19333_s5 + $0x3b40] sm:$0xff] }
 0x332   : > { %v2577_v36 = vld [vmem:[%s19333_s5 + $0x3bc8] sm:$0xff] }
 0x333   : > { %8953 = vmatpush1.bf16.msra.mxu0 %v8952_v8  ;;  %v2381_v8 = vld [vmem:[%s19333_s5 + $0x35a8] sm:$0xff] }
 0x334   : > { %9209 = vmatpush1.bf16.msra.mxu1 %v9208_v17  ;;  %8955 = vmatprep.subr.bf16.mxu0 %v8954_v22  ;;  %v8968_v17 = vpack.c.bf16 %v2342_v59, %v2324_v58  ;;  %v9224_v22 = vpack.c.bf16 %v2344_v0, %v2326_v60  ;;  %v9226_v19 = vpack.c.bf16 %v2381_v8, %v2363_v7  ;;  %v2468_v59 = vld [vmem:[%s19333_s5 + $0x3860] sm:$0xff]  ;;  %v2486_v60 = vld [vmem:[%s19333_s5 + $0x38f0] sm:$0xff]  ;;  %v2523_v7 = vld [vmem:[%s19333_s5 + $0x3a18] sm:$0xff] }
 0x335   : > { %9211 = vmatprep.subr.bf16.mxu1 %v9210_v18  ;;  %v2362_v18 = vld [vmem:[%s19333_s5 + $0x3510] sm:$0xff]  ;;  %v8982_v58 = vpack.c.bf16 %v2487_v50, %v2469_v49  ;;  %v2507_v8 = vld [vmem:[%s19333_s5 + $0x3998] sm:$0xff]  ;;  %v2596_v50 = vld [vmem:[%s19333_s5 + $0x3c60] sm:$0xff] }
 0x337   : > { %8957 = vmatpush1.bf16.msra.mxu0 %v8956_v23  ;;  %v2417_v23 = vld [vmem:[%s19333_s5 + $0x36c8] sm:$0xff] }
 0x338   : > { %9213 = vmatpush1.bf16.msra.mxu1 %v9212_v25  ;;  %8959 = vmatprep.subr.bf16.mxu0 %v8958_v51  ;;  %v8972_v25 = vpack.c.bf16 %v2378_v13, %v2360_v10  ;;  %v9228_v51 = vpack.c.bf16 %v2380_v20, %v2362_v18  ;;  %v9230_v32 = vpack.c.bf16 %v2417_v23, %v2399_v4  ;;  %v2504_v13 = vld [vmem:[%s19333_s5 + $0x3980] sm:$0xff]  ;;  %v2522_v18 = vld [vmem:[%s19333_s5 + $0x3a10] sm:$0xff]  ;;  %v2559_v4 = vld [vmem:[%s19333_s5 + $0x3b38] sm:$0xff] }
 0x339   : > { %9215 = vmatprep.subr.bf16.mxu1 %v9214_v16  ;;  %v2414_v16 = vld [vmem:[%s19333_s5 + $0x36b0] sm:$0xff]  ;;  %v8986_v10 = vpack.c.bf16 %v2523_v7, %v2505_v3  ;;  %v2543_v23 = vld [vmem:[%s19333_s5 + $0x3ab8] sm:$0xff]  ;;  %v2612_v3 = vld [vmem:[%s19333_s5 + $0x3ce0] sm:$0xff] }
 0x33a   : > { %v2630_v7 = vld [vmem:[%s19333_s5 + $0x3d70] sm:$0xff] }
 0x33b   : > { %8961 = vmatpush1.bf16.msra.mxu0 %v8960_v38  ;;  %v2453_v38 = vld [vmem:[%s19333_s5 + $0x37e8] sm:$0xff] }
 0x33c   : > { %9217 = vmatpush1.bf16.msra.mxu1 %v9216_v41  ;;  %8963 = vmatprep.subr.bf16.mxu0 %v8962_v42  ;;  %v8976_v41 = vpack.c.bf16 %v2414_v16, %v2396_v35  ;;  %v9232_v42 = vpack.c.bf16 %v2416_v39, %v2398_v29  ;;  %v9234_v46 = vpack.c.bf16 %v2453_v38, %v2435_v21  ;;  %v2540_v35 = vld [vmem:[%s19333_s5 + $0x3aa0] sm:$0xff]  ;;  %v2558_v16 = vld [vmem:[%s19333_s5 + $0x3b30] sm:$0xff]  ;;  %v2595_v21 = vld [vmem:[%s19333_s5 + $0x3c58] sm:$0xff] }
 0x33d   : > { %9219 = vmatprep.subr.bf16.mxu1 %v9218_v34  ;;  %v2434_v34 = vld [vmem:[%s19333_s5 + $0x3750] sm:$0xff]  ;;  %v2579_v38 = vld [vmem:[%s19333_s5 + $0x3bd8] sm:$0xff] }
 0x33e   : > { %v2542_v29 = vld [vmem:[%s19333_s5 + $0x3ab0] sm:$0xff] }
 0x33f   : > { %8965 = vmatpush1.bf16.msra.mxu0 %v8964_v54  ;;  %v2489_v54 = vld [vmem:[%s19333_s5 + $0x3908] sm:$0xff] }
 0x340   : > { %9221 = vmatpush1.bf16.msra.mxu1 %v9220_v55  ;;  %8967 = vmatprep.subr.bf16.mxu0 %v8966_v56  ;;  %v8980_v55 = vpack.c.bf16 %v2450_v45, %v2432_v44  ;;  %v9236_v56 = vpack.c.bf16 %v2452_v48, %v2434_v34  ;;  %v9238_v0 = vpack.c.bf16 %v2489_v54, %v2471_v53  ;;  %v2576_v45 = vld [vmem:[%s19333_s5 + $0x3bc0] sm:$0xff]  ;;  %v2594_v34 = vld [vmem:[%s19333_s5 + $0x3c50] sm:$0xff]  ;;  %v2613_v53 = vld [vmem:[%s19333_s5 + $0x3ce8] sm:$0xff] }
 0x341   : > { %9223 = vmatprep.subr.bf16.mxu1 %v9222_v61  ;;  %v2470_v61 = vld [vmem:[%s19333_s5 + $0x3870] sm:$0xff]  ;;  %v8994_v44 = vpack.c.bf16 %v2595_v21, %v2577_v36  ;;  %v2631_v54 = vld [vmem:[%s19333_s5 + $0x3d78] sm:$0xff]  ;;  %v2668_v36 = vld [vmem:[%s19333_s5 + $0x3ea0] sm:$0xff] }
 0x342   : > { %v2685_v21 = vld [vmem:[%s19333_s5 + $0x3f28] sm:$0xff] }
 0x343   : > { %8969 = vmatpush1.bf16.msra.mxu0 %v8968_v17  ;;  %v2525_v17 = vld [vmem:[%s19333_s5 + $0x3a28] sm:$0xff] }
 0x344   : > { %9225 = vmatpush1.bf16.msra.mxu1 %v9224_v22  ;;  %8971 = vmatprep.subr.bf16.mxu0 %v8970_v9  ;;  %v8984_v22 = vpack.c.bf16 %v2486_v60, %v2468_v59  ;;  %v9240_v9 = vpack.c.bf16 %v2488_v2, %v2470_v61  ;;  %v9242_v20 = vpack.c.bf16 %v2525_v17, %v2507_v8  ;;  %v2633_v59 = vld [vmem:[%s19333_s5 + $0x3d88] sm:$0xff]  ;;  %v2614_v8 = vld [vmem:[%s19333_s5 + $0x3cf0] sm:$0xff] }
 0x345   : > { %9227 = vmatprep.subr.bf16.mxu1 %v9226_v19  ;;  %v2506_v19 = vld [vmem:[%s19333_s5 + $0x3990] sm:$0xff]  ;;  %v8996_v61 = vpack.c.bf16 %v2594_v34, %v2576_v45  ;;  %v8998_v2 = vpack.c.bf16 %v2631_v54, %v2613_v53  ;;  %v2684_v34 = vld [vmem:[%s19333_s5 + $0x3f20] sm:$0xff]  ;;  %v2721_v54 = vld [vmem:[%s19333_s5 + $0x4048] sm:$0xff] }
 0x346   : > { %v2704_v53 = vld [vmem:[%s19333_s5 + $0x3fc0] sm:$0xff] }
 0x347   : > { %8973 = vmatpush1.bf16.msra.mxu0 %v8972_v25  ;;  %v2561_v25 = vld [vmem:[%s19333_s5 + $0x3b48] sm:$0xff] }
 0x348   : > { %9229 = vmatpush1.bf16.msra.mxu1 %v9228_v51  ;;  %8975 = vmatprep.subr.bf16.mxu0 %v8974_v31  ;;  %v8988_v51 = vpack.c.bf16 %v2522_v18, %v2504_v13  ;;  %v9244_v31 = vpack.c.bf16 %v2524_v47, %v2506_v19  ;;  %v9246_v39 = vpack.c.bf16 %v2561_v25, %v2543_v23  ;;  %v2667_v13 = vld [vmem:[%s19333_s5 + $0x3e98] sm:$0xff] }
 0x349   : > { %9231 = vmatprep.subr.bf16.mxu1 %v9230_v32  ;;  %v8990_v32 = vpack.c.bf16 %v2559_v4, %v2541_v15  ;;  %v2651_v47 = vld [vmem:[%s19333_s5 + $0x3e18] sm:$0xff]  ;;  %v2669_v15 = vld [vmem:[%s19333_s5 + $0x3ea8] sm:$0xff] }
 0x34a   : > { %3803 = vmatmul.mubr.f32.vlgmr.msra.gmra.mrb[4].mxu0 %v12247_v37 }
 0x34b   : > { %4111 = vmatmul.mubr.f32.vlgmr.msra.gmra.mrb[22].mxu1 %v12247_v37  ;;  %3808 = vmatprep.mubr.f32.mxu0 %v12250_v12 }
 0x34c   : > { %8977 = vmatpush1.bf16.msra.mxu0 %v8976_v41  ;;  %4116 = vmatprep.mubr.f32.mxu1 %v12250_v12  ;;  %v2597_v41 = vld [vmem:[%s19333_s5 + $0x3c68] sm:$0xff] }
 0x34d   : > { %9233 = vmatpush1.bf16.msra.mxu1 %v9232_v42  ;;  %8979 = vmatprep.subr.bf16.mxu0 %v8978_v43  ;;  %v8992_v42 = vpack.c.bf16 %v2558_v16, %v2540_v35  ;;  %v9248_v43 = vpack.c.bf16 %v2560_v63, %v2542_v29  ;;  %v9250_v49 = vpack.c.bf16 %v2597_v41, %v2579_v38  ;;  %v2648_v16 = vld [vmem:[%s19333_s5 + $0x3e00] sm:$0xff]  ;;  %v2666_v29 = vld [vmem:[%s19333_s5 + $0x3e90] sm:$0xff]  ;;  %v2703_v38 = vld [vmem:[%s19333_s5 + $0x3fb8] sm:$0xff] }
 0x34e   : > { %3809 = vmatmul.mubr.f32.gmra.mrb[6].mxu0 %v12280_v28  ;;  %9235 = vmatprep.subr.bf16.mxu1 %v9234_v46  ;;  %v2578_v46 = vld [vmem:[%s19333_s5 + $0x3bd0] sm:$0xff]  ;;  %v9258_v63 = vpack.c.bf16 %v2669_v15, %v2651_v47  ;;  %v2687_v41 = vld [vmem:[%s19333_s5 + $0x3f38] sm:$0xff]  ;;  %v9006_v45 = vpack.c.bf16 %v2703_v38, %v2685_v21  ;;  %v2776_v21 = vld [vmem:[%s19333_s5 + $0x4200] sm:$0xff] }
 0x34f   : > { %4117 = vmatmul.mubr.f32.gmra.mrb[24].mxu1 %v12280_v28  ;;  %3879 = vmatprep.mubr.f32.mxu0 %v12287_v30  ;;  %v2775_v47 = vld [vmem:[%s19333_s5 + $0x41f8] sm:$0xff]  ;;  %v2793_v38 = vld [vmem:[%s19333_s5 + $0x4288] sm:$0xff] }
 0x350   : > { %8981 = vmatpush1.bf16.msra.mxu0 %v8980_v55  ;;  %4187 = vmatprep.mubr.f32.mxu1 %v12287_v30  ;;  %v2759_v15 = vld [vmem:[%s19333_s5 + $0x4178] sm:$0xff] }
 0x351   : > { %9237 = vmatpush1.bf16.msra.mxu1 %v9236_v56  ;;  %8983 = vmatprep.subr.bf16.mxu0 %v8982_v58  ;;  %v2615_v58 = vld [vmem:[%s19333_s5 + $0x3cf8] sm:$0xff] }
 0x352   : > { %9239 = vmatprep.subr.bf16.mxu1 %v9238_v0  ;;  %v9252_v0 = vpack.c.bf16 %v2596_v50, %v2578_v46  ;;  %v2702_v46 = vld [vmem:[%s19333_s5 + $0x3fb0] sm:$0xff] }
 0x354   : > { %8985 = vmatpush1.bf16.msra.mxu0 %v8984_v22  ;;  %v9254_v22 = vpack.c.bf16 %v2633_v59, %v2615_v58  ;;  %v2739_v58 = vld [vmem:[%s19333_s5 + $0x40d8] sm:$0xff] }
 0x355   : > { %9241 = vmatpush1.bf16.msra.mxu1 %v9240_v9  ;;  %8987 = vmatprep.subr.bf16.mxu0 %v8986_v10  ;;  %v2632_v9 = vld [vmem:[%s19333_s5 + $0x3d80] sm:$0xff]  ;;  %v2649_v10 = vld [vmem:[%s19333_s5 + $0x3e08] sm:$0xff]  ;;  %v2723_v59 = vld [vmem:[%s19333_s5 + $0x4058] sm:$0xff] }
 0x356   : > { %9243 = vmatprep.subr.bf16.mxu1 %v9242_v20  ;;  %v9002_v35 = vpack.c.bf16 %v2667_v13, %v2649_v10  ;;  %v2740_v10 = vld [vmem:[%s19333_s5 + $0x40e0] sm:$0xff]  ;;  %v2757_v13 = vld [vmem:[%s19333_s5 + $0x4168] sm:$0xff] }
 0x358   : > { %8989 = vmatpush1.bf16.msra.mxu0 %v8988_v51  ;;  %v9000_v51 = vpack.c.bf16 %v2630_v7, %v2612_v3  ;;  %v9010_v3 = vpack.c.bf16 %v2739_v58, %v2721_v54  ;;  %v2720_v7 = vld [vmem:[%s19333_s5 + $0x4040] sm:$0xff]  ;;  %v2829_v58 = vld [vmem:[%s19333_s5 + $0x43a8] sm:$0xff] }
 0x359   : > { %9245 = vmatpush1.bf16.msra.mxu1 %v9244_v31  ;;  %8991 = vmatprep.subr.bf16.mxu0 %v8990_v32  ;;  %v9256_v32 = vpack.c.bf16 %v2632_v9, %v2614_v8  ;;  %v2738_v8 = vld [vmem:[%s19333_s5 + $0x40d0] sm:$0xff]  ;;  %v2812_v54 = vld [vmem:[%s19333_s5 + $0x4320] sm:$0xff] }
 0x35a   : > { %9247 = vmatprep.subr.bf16.mxu1 %v9246_v39  ;;  %v13952_v48 = vpop.f32.mrb[0].mxu0  ;;  %v2650_v39 = vld [vmem:[%s19333_s5 + $0x3e10] sm:$0xff] }
 0x35b   : > { %v13963_v55 = vpop.f32.mrb[18].mxu1  ;;  %v13965_v56 = vpop.f32.mrb[1].mxu0 }
 0x35c   : > { %8993 = vmatpush1.bf16.msra.mxu0 %v8992_v42  ;;  %v13973_v60 = vpop.f32.mrb[19].mxu1  ;;  %v2705_v42 = vld [vmem:[%s19333_s5 + $0x3fc8] sm:$0xff] }
 0x35d   : > { %9249 = vmatpush1.bf16.msra.mxu1 %v9248_v43  ;;  %8995 = vmatprep.subr.bf16.mxu0 %v8994_v44  ;;  %v9004_v43 = vpack.c.bf16 %v2666_v29, %v2648_v16  ;;  %v9260_v44 = vpack.c.bf16 %v2668_v36, %v2650_v39  ;;  %v9262_v50 = vpack.c.bf16 %v2705_v42, %v2687_v41  ;;  %v2756_v29 = vld [vmem:[%s19333_s5 + $0x4160] sm:$0xff]  ;;  %v2774_v39 = vld [vmem:[%s19333_s5 + $0x41f0] sm:$0xff]  ;;  %v2811_v41 = vld [vmem:[%s19333_s5 + $0x4318] sm:$0xff] }
 0x35e   : > { %9251 = vmatprep.subr.bf16.mxu1 %v9250_v49  ;;  %v13984_v17 = vpop.f32.mrb[2].mxu0  ;;  %v2686_v49 = vld [vmem:[%s19333_s5 + $0x3f30] sm:$0xff]  ;;  %v9014_v16 = vpack.c.bf16 %v2775_v47, %v2757_v13  ;;  %v2795_v42 = vld [vmem:[%s19333_s5 + $0x4298] sm:$0xff]  ;;  %v2848_v13 = vld [vmem:[%s19333_s5 + $0x4440] sm:$0xff] }
 0x35f   : > { %v10576_v18 = vpack.c.bf16 %v13984_v17, %v13952_v48  ;;  %v13997_v19 = vpop.f32.mrb[20].mxu1  ;;  %v13999_v20 = vpop.f32.mrb[3].mxu0  ;;  %v2865_v47 = vld [vmem:[%s19333_s5 + $0x44c8] sm:$0xff]  ;;  %v807_v17 = vld [vmem:[%s19333_s5 + $0x478] sm:$0xff] }
 0x360   : > { %8997 = vmatpush1.bf16.msra.mxu0 %v8996_v61  ;;  %v10580_v4 = vpack.c.bf16 %v13997_v19, %v13963_v55  ;;  %v10574_v23 = vpack.c.bf16 %v13999_v20, %v13965_v56  ;;  %v14011_v25 = vpop.f32.mrb[21].mxu1  ;;  %v2741_v61 = vld [vmem:[%s19333_s5 + $0x40e8] sm:$0xff]  ;;  %v771_v56 = vld [vmem:[%s19333_s5 + $0x358] sm:$0xff]  ;;  %v842_v55 = vld [vmem:[%s19333_s5 + $0x590] sm:$0xff] }
 0x361   : > { %9253 = vmatpush1.bf16.msra.mxu1 %v9252_v0  ;;  %v10578_v31 = vpack.c.bf16 %v14011_v25, %v13973_v60  ;;  %8999 = vmatprep.subr.bf16.mxu0 %v8998_v2  ;;  %v9008_v0 = vpack.c.bf16 %v2702_v46, %v2684_v34  ;;  %v9264_v2 = vpack.c.bf16 %v2704_v53, %v2686_v49  ;;  %v2792_v46 = vld [vmem:[%s19333_s5 + $0x4280] sm:$0xff]  ;;  %v2810_v49 = vld [vmem:[%s19333_s5 + $0x4310] sm:$0xff]  ;;  %v789_v48 = vld [vmem:[%s19333_s5 + $0x3e8] sm:$0xff] }
 0x362   : > { %9255 = vmatprep.subr.bf16.mxu1 %v9254_v22  ;;  %v2722_v22 = vld [vmem:[%s19333_s5 + $0x4050] sm:$0xff]  ;;  %v9266_v9 = vpack.c.bf16 %v2741_v61, %v2723_v59  ;;  %v9018_v34 = vpack.c.bf16 %v2811_v41, %v2793_v38  ;;  %v2847_v59 = vld [vmem:[%s19333_s5 + $0x4438] sm:$0xff]  ;;  %v2884_v38 = vld [vmem:[%s19333_s5 + $0x4560] sm:$0xff] }
 0x363   : > { %v2831_v61 = vld [vmem:[%s19333_s5 + $0x43b8] sm:$0xff]  ;;  %v2901_v41 = vld [vmem:[%s19333_s5 + $0x45e8] sm:$0xff]  ;;  %v17465_v60 = vld [vmem:[%s19334_s6] sm:$0xff] }
 0x364   : > { %9001 = vmatpush1.bf16.msra.mxu0 %v9000_v51  ;;  %v2777_v51 = vld [vmem:[%s19333_s5 + $0x4208] sm:$0xff]  ;;  %v806_v25 = vld [vmem:[%s19333_s5 + $0x470] sm:$0xff] }
 0x365   : > { %9257 = vmatpush1.bf16.msra.mxu1 %v9256_v32  ;;  %9003 = vmatprep.subr.bf16.mxu0 %v9002_v35  ;;  %v9012_v32 = vpack.c.bf16 %v2738_v8, %v2720_v7  ;;  %v9268_v35 = vpack.c.bf16 %v2740_v10, %v2722_v22  ;;  %v9270_v36 = vpack.c.bf16 %v2777_v51, %v2759_v15  ;;  %v2828_v8 = vld [vmem:[%s19333_s5 + $0x43a0] sm:$0xff]  ;;  %v2846_v22 = vld [vmem:[%s19333_s5 + $0x4430] sm:$0xff]  ;;  %v2883_v15 = vld [vmem:[%s19333_s5 + $0x4558] sm:$0xff] }
 0x366   : > { %9259 = vmatprep.subr.bf16.mxu1 %v9258_v63  ;;  %v2758_v63 = vld [vmem:[%s19333_s5 + $0x4170] sm:$0xff]  ;;  %v9022_v7 = vpack.c.bf16 %v2847_v59, %v2829_v58  ;;  %v2867_v51 = vld [vmem:[%s19333_s5 + $0x44d8] sm:$0xff]  ;;  %v2920_v58 = vld [vmem:[%s19333_s5 + $0x4680] sm:$0xff] }
 0x367   : > { %v2937_v59 = vld [vmem:[%s19333_s5 + $0x4708] sm:$0xff] }
 0x368   : > { %9005 = vmatpush1.bf16.msra.mxu0 %v9004_v43  ;;  %v2813_v43 = vld [vmem:[%s19333_s5 + $0x4328] sm:$0xff] }
 0x369   : > { %9261 = vmatpush1.bf16.msra.mxu1 %v9260_v44  ;;  %9007 = vmatprep.subr.bf16.mxu0 %v9006_v45  ;;  %v9016_v44 = vpack.c.bf16 %v2774_v39, %v2756_v29  ;;  %v9272_v45 = vpack.c.bf16 %v2776_v21, %v2758_v63  ;;  %v9274_v53 = vpack.c.bf16 %v2813_v43, %v2795_v42  ;;  %v2864_v39 = vld [vmem:[%s19333_s5 + $0x44c0] sm:$0xff]  ;;  %v2882_v63 = vld [vmem:[%s19333_s5 + $0x4550] sm:$0xff]  ;;  %v2919_v42 = vld [vmem:[%s19333_s5 + $0x4678] sm:$0xff] }
 0x36a   : > { %9263 = vmatprep.subr.bf16.mxu1 %v9262_v50  ;;  %v2794_v50 = vld [vmem:[%s19333_s5 + $0x4290] sm:$0xff]  ;;  %v9026_v29 = vpack.c.bf16 %v2883_v15, %v2865_v47  ;;  %v2903_v43 = vld [vmem:[%s19333_s5 + $0x45f8] sm:$0xff]  ;;  %v2956_v47 = vld [vmem:[%s19333_s5 + $0x47a0] sm:$0xff] }
 0x36b   : > { %v673_v15 = vld [vmem:[%s19333_s5 + $0x48] sm:$0xff] }
 0x36c   : > { %9009 = vmatpush1.bf16.msra.mxu0 %v9008_v0  ;;  %v2849_v0 = vld [vmem:[%s19333_s5 + $0x4448] sm:$0xff] }
 0x36d   : > { %9265 = vmatpush1.bf16.msra.mxu1 %v9264_v2  ;;  %9011 = vmatprep.subr.bf16.mxu0 %v9010_v3  ;;  %v9020_v2 = vpack.c.bf16 %v2810_v49, %v2792_v46  ;;  %v9276_v3 = vpack.c.bf16 %v2812_v54, %v2794_v50  ;;  %v9278_v10 = vpack.c.bf16 %v2849_v0, %v2831_v61  ;;  %v2900_v49 = vld [vmem:[%s19333_s5 + $0x45e0] sm:$0xff]  ;;  %v2918_v50 = vld [vmem:[%s19333_s5 + $0x4670] sm:$0xff]  ;;  %v2955_v61 = vld [vmem:[%s19333_s5 + $0x4798] sm:$0xff] }
 0x36e   : > { %9267 = vmatprep.subr.bf16.mxu1 %v9266_v9  ;;  %v2830_v9 = vld [vmem:[%s19333_s5 + $0x43b0] sm:$0xff]  ;;  %v9030_v46 = vpack.c.bf16 %v2919_v42, %v2901_v41  ;;  %v2939_v0 = vld [vmem:[%s19333_s5 + $0x4718] sm:$0xff]  ;;  %v692_v41 = vld [vmem:[%s19333_s5 + $0xe0] sm:$0xff] }
 0x36f   : > { %v709_v42 = vld [vmem:[%s19333_s5 + $0x168] sm:$0xff] }
 0x370   : > { %9013 = vmatpush1.bf16.msra.mxu0 %v9012_v32  ;;  %v2885_v32 = vld [vmem:[%s19333_s5 + $0x4568] sm:$0xff] }
 0x371   : > { %9269 = vmatpush1.bf16.msra.mxu1 %v9268_v35  ;;  %9015 = vmatprep.subr.bf16.mxu0 %v9014_v16  ;;  %v9024_v35 = vpack.c.bf16 %v2846_v22, %v2828_v8  ;;  %v9280_v16 = vpack.c.bf16 %v2848_v13, %v2830_v9  ;;  %v9282_v21 = vpack.c.bf16 %v2885_v32, %v2867_v51  ;;  %v2936_v22 = vld [vmem:[%s19333_s5 + $0x4700] sm:$0xff]  ;;  %v2954_v9 = vld [vmem:[%s19333_s5 + $0x4790] sm:$0xff]  ;;  %v691_v51 = vld [vmem:[%s19333_s5 + $0xd8] sm:$0xff] }
 0x372   : > { %9271 = vmatprep.subr.bf16.mxu1 %v9270_v36  ;;  %v2866_v36 = vld [vmem:[%s19333_s5 + $0x44d0] sm:$0xff]  ;;  %v9034_v8 = vpack.c.bf16 %v2955_v61, %v2937_v59  ;;  %v675_v32 = vld [vmem:[%s19333_s5 + $0x58] sm:$0xff]  ;;  %v728_v59 = vld [vmem:[%s19333_s5 + $0x200] sm:$0xff] }
 0x373   : > { %v745_v61 = vld [vmem:[%s19333_s5 + $0x288] sm:$0xff] }
 0x374   : > { %9017 = vmatpush1.bf16.msra.mxu0 %v9016_v44  ;;  %v2921_v44 = vld [vmem:[%s19333_s5 + $0x4688] sm:$0xff] }
 0x375   : > { %9273 = vmatpush1.bf16.msra.mxu1 %v9272_v45  ;;  %9019 = vmatprep.subr.bf16.mxu0 %v9018_v34  ;;  %v9028_v45 = vpack.c.bf16 %v2882_v63, %v2864_v39  ;;  %v9284_v34 = vpack.c.bf16 %v2884_v38, %v2866_v36  ;;  %v9286_v54 = vpack.c.bf16 %v2921_v44, %v2903_v43  ;;  %v672_v36 = vld [vmem:[%s19333_s5 + $0x40] sm:$0xff]  ;;  %v674_v38 = vld [vmem:[%s19333_s5 + $0x50] sm:$0xff]  ;;  %v727_v43 = vld [vmem:[%s19333_s5 + $0x1f8] sm:$0xff] }
 0x376   : > { %9275 = vmatprep.subr.bf16.mxu1 %v9274_v53  ;;  %v2902_v53 = vld [vmem:[%s19333_s5 + $0x45f0] sm:$0xff]  ;;  %v9294_v39 = vpack.c.bf16 %v691_v51, %v673_v15  ;;  %v711_v44 = vld [vmem:[%s19333_s5 + $0x178] sm:$0xff]  ;;  %v764_v15 = vld [vmem:[%s19333_s5 + $0x320] sm:$0xff] }
 0x377   : > { %v781_v51 = vld [vmem:[%s19333_s5 + $0x3a8] sm:$0xff] }
 0x378   : > { %9021 = vmatpush1.bf16.msra.mxu0 %v9020_v2  ;;  %v2957_v2 = vld [vmem:[%s19333_s5 + $0x47a8] sm:$0xff] }
 0x379   : > { %9277 = vmatpush1.bf16.msra.mxu1 %v9276_v3  ;;  %9023 = vmatprep.subr.bf16.mxu0 %v9022_v7  ;;  %v9032_v3 = vpack.c.bf16 %v2918_v50, %v2900_v49  ;;  %v9288_v7 = vpack.c.bf16 %v2920_v58, %v2902_v53  ;;  %v9290_v13 = vpack.c.bf16 %v2957_v2, %v2939_v0  ;;  %v708_v50 = vld [vmem:[%s19333_s5 + $0x160] sm:$0xff]  ;;  %v726_v53 = vld [vmem:[%s19333_s5 + $0x1f0] sm:$0xff]  ;;  %v763_v0 = vld [vmem:[%s19333_s5 + $0x318] sm:$0xff] }
 0x37a   : > { %9279 = vmatprep.subr.bf16.mxu1 %v9278_v10  ;;  %v2938_v10 = vld [vmem:[%s19333_s5 + $0x4710] sm:$0xff]  ;;  %v9298_v49 = vpack.c.bf16 %v727_v43, %v709_v42  ;;  %v747_v2 = vld [vmem:[%s19333_s5 + $0x298] sm:$0xff]  ;;  %v800_v42 = vld [vmem:[%s19333_s5 + $0x440] sm:$0xff] }
 0x37b   : > { %v817_v43 = vld [vmem:[%s19333_s5 + $0x4c8] sm:$0xff] }
 0x37c   : > { %9025 = vmatpush1.bf16.msra.mxu0 %v9024_v35  ;;  %v693_v35 = vld [vmem:[%s19333_s5 + $0xe8] sm:$0xff] }
 0x37d   : > { %9281 = vmatpush1.bf16.msra.mxu1 %v9280_v16  ;;  %9027 = vmatprep.subr.bf16.mxu0 %v9026_v29  ;;  %v9036_v16 = vpack.c.bf16 %v2954_v9, %v2936_v22  ;;  %v9292_v29 = vpack.c.bf16 %v2956_v47, %v2938_v10  ;;  %v9550_v63 = vpack.c.bf16 %v693_v35, %v675_v32  ;;  %v744_v9 = vld [vmem:[%s19333_s5 + $0x280] sm:$0xff]  ;;  %v762_v10 = vld [vmem:[%s19333_s5 + $0x310] sm:$0xff]  ;;  %v799_v32 = vld [vmem:[%s19333_s5 + $0x438] sm:$0xff] }
 0x37e   : > { %9283 = vmatprep.subr.bf16.mxu1 %v9282_v21  ;;  %v690_v21 = vld [vmem:[%s19333_s5 + $0xd0] sm:$0xff]  ;;  %v9302_v22 = vpack.c.bf16 %v763_v0, %v745_v61  ;;  %v783_v35 = vld [vmem:[%s19333_s5 + $0x3b8] sm:$0xff]  ;;  %v836_v61 = vld [vmem:[%s19333_s5 + $0x560] sm:$0xff] }
 0x37f   : > { %v853_v0 = vld [vmem:[%s19333_s5 + $0x5e8] sm:$0xff] }
 0x380   : > { %9029 = vmatpush1.bf16.msra.mxu0 %v9028_v45  ;;  %v729_v45 = vld [vmem:[%s19333_s5 + $0x208] sm:$0xff] }
 0x381   : > { %9285 = vmatpush1.bf16.msra.mxu1 %v9284_v34  ;;  %9031 = vmatprep.subr.bf16.mxu0 %v9030_v46  ;;  %v9296_v34 = vpack.c.bf16 %v690_v21, %v672_v36  ;;  %v9552_v46 = vpack.c.bf16 %v692_v41, %v674_v38  ;;  %v9554_v58 = vpack.c.bf16 %v729_v45, %v711_v44  ;;  %v780_v36 = vld [vmem:[%s19333_s5 + $0x3a0] sm:$0xff]  ;;  %v798_v21 = vld [vmem:[%s19333_s5 + $0x430] sm:$0xff]  ;;  %v835_v44 = vld [vmem:[%s19333_s5 + $0x558] sm:$0xff] }
 0x382   : > { %9287 = vmatprep.subr.bf16.mxu1 %v9286_v54  ;;  %v710_v54 = vld [vmem:[%s19333_s5 + $0x170] sm:$0xff]  ;;  %v819_v45 = vld [vmem:[%s19333_s5 + $0x4d8] sm:$0xff]  ;;  %v861_v19 = vld [vmem:[%s19333_s5 + $0x628] sm:$0xff] }
 0x383   : > { %v782_v38 = vld [vmem:[%s19333_s5 + $0x3b0] sm:$0xff] }
 0x384   : > { %9033 = vmatpush1.bf16.msra.mxu0 %v9032_v3  ;;  %v765_v3 = vld [vmem:[%s19333_s5 + $0x328] sm:$0xff] }
 0x385   : > { %9289 = vmatpush1.bf16.msra.mxu1 %v9288_v7  ;;  %9035 = vmatprep.subr.bf16.mxu0 %v9034_v8  ;;  %v9300_v7 = vpack.c.bf16 %v726_v53, %v708_v50  ;;  %v9556_v8 = vpack.c.bf16 %v728_v59, %v710_v54  ;;  %v9558_v47 = vpack.c.bf16 %v765_v3, %v747_v2  ;;  %v816_v53 = vld [vmem:[%s19333_s5 + $0x4c0] sm:$0xff]  ;;  %v834_v54 = vld [vmem:[%s19333_s5 + $0x550] sm:$0xff]  ;;  %v871_v2 = vld [vmem:[%s19333_s5 + $0x678] sm:$0xff] }
 0x386   : > { %9291 = vmatprep.subr.bf16.mxu1 %v9290_v13  ;;  %v746_v13 = vld [vmem:[%s19333_s5 + $0x290] sm:$0xff]  ;;  %v9310_v50 = vpack.c.bf16 %v835_v44, %v817_v43  ;;  %v855_v3 = vld [vmem:[%s19333_s5 + $0x5f8] sm:$0xff]  ;;  %v908_v43 = vld [vmem:[%s19333_s5 + $0x7a0] sm:$0xff] }
 0x387   : > { %v925_v44 = vld [vmem:[%s19333_s5 + $0x828] sm:$0xff] }
 0x388   : > { %9037 = vmatpush1.bf16.msra.mxu0 %v9036_v16  ;;  %v801_v16 = vld [vmem:[%s19333_s5 + $0x448] sm:$0xff] }
 0x389   : > { %9293 = vmatpush1.bf16.msra.mxu1 %v9292_v29  ;;  %9295 = vmatprep.subr.bf16.mxu0 %v9294_v39  ;;  %v9304_v29 = vpack.c.bf16 %v762_v10, %v744_v9  ;;  %v9560_v39 = vpack.c.bf16 %v764_v15, %v746_v13  ;;  %v9562_v41 = vpack.c.bf16 %v801_v16, %v783_v35  ;;  %v852_v10 = vld [vmem:[%s19333_s5 + $0x5e0] sm:$0xff]  ;;  %v870_v13 = vld [vmem:[%s19333_s5 + $0x670] sm:$0xff]  ;;  %v907_v35 = vld [vmem:[%s19333_s5 + $0x798] sm:$0xff] }
 0x38a   : > { %9551 = vmatprep.subr.bf16.mxu1 %v9550_v63  ;;  %v9306_v63 = vpack.c.bf16 %v799_v32, %v781_v51  ;;  %v9314_v9 = vpack.c.bf16 %v871_v2, %v853_v0  ;;  %v872_v51 = vld [vmem:[%s19333_s5 + $0x680] sm:$0xff]  ;;  %v889_v32 = vld [vmem:[%s19333_s5 + $0x708] sm:$0xff]  ;;  %v891_v16 = vld [vmem:[%s19333_s5 + $0x718] sm:$0xff] }
 0x38b   : > { %3880 = vmatmul.mubr.f32.vlgmr.msra.gmra.mrb[4].mxu0 %v12655_v24  ;;  %v944_v0 = vld [vmem:[%s19333_s5 + $0x8c0] sm:$0xff]  ;;  %v961_v2 = vld [vmem:[%s19333_s5 + $0x948] sm:$0xff] }
 0x38c   : > { %4188 = vmatmul.mubr.f32.vlgmr.msra.gmra.mrb[22].mxu1 %v12655_v24  ;;  %3885 = vmatprep.mubr.f32.mxu0 %v12658_v26 }
 0x38d   : > { %4193 = vmatprep.mubr.f32.mxu1 %v12658_v26  ;;  %9297 = vmatpush1.bf16.msra.mxu0 %v9296_v34  ;;  %v837_v34 = vld [vmem:[%s19333_s5 + $0x568] sm:$0xff] }
 0x38e   : > { %9553 = vmatpush1.bf16.msra.mxu1 %v9552_v46  ;;  %9299 = vmatprep.subr.bf16.mxu0 %v9298_v49  ;;  %v9308_v46 = vpack.c.bf16 %v798_v21, %v780_v36  ;;  %v9564_v49 = vpack.c.bf16 %v800_v42, %v782_v38  ;;  %v9566_v59 = vpack.c.bf16 %v837_v34, %v819_v45  ;;  %v888_v21 = vld [vmem:[%s19333_s5 + $0x700] sm:$0xff]  ;;  %v906_v38 = vld [vmem:[%s19333_s5 + $0x790] sm:$0xff]  ;;  %v943_v45 = vld [vmem:[%s19333_s5 + $0x8b8] sm:$0xff] }
 0x38f   : > { %3886 = vmatmul.mubr.f32.gmra.mrb[6].mxu0 %v12688_v40  ;;  %9555 = vmatprep.subr.bf16.mxu1 %v9554_v58  ;;  %v818_v58 = vld [vmem:[%s19333_s5 + $0x4d0] sm:$0xff]  ;;  %v9318_v36 = vpack.c.bf16 %v907_v35, %v889_v32  ;;  %v927_v34 = vld [vmem:[%s19333_s5 + $0x838] sm:$0xff]  ;;  %v980_v32 = vld [vmem:[%s19333_s5 + $0x9e0] sm:$0xff] }
 0x390   : > { %4194 = vmatmul.mubr.f32.gmra.mrb[24].mxu1 %v12688_v40  ;;  %4264 = vmatprep.mubr.f32.mxu0 %v11408_v52  ;;  %v997_v35 = vld [vmem:[%s19333_s5 + $0xa68] sm:$0xff] }
 0x391   : > { %9301 = vmatpush1.bf16.msra.mxu0 %v9300_v7  ;;  %4572 = vmatprep.mubr.f32.mxu1 %v11408_v52  ;;  %v873_v7 = vld [vmem:[%s19333_s5 + $0x688] sm:$0xff] }
 0x392   : > { %9557 = vmatpush1.bf16.msra.mxu1 %v9556_v8  ;;  %9303 = vmatprep.subr.bf16.mxu0 %v9302_v22  ;;  %v9312_v8 = vpack.c.bf16 %v834_v54, %v816_v53  ;;  %v9568_v22 = vpack.c.bf16 %v836_v61, %v818_v58  ;;  %v9570_v15 = vpack.c.bf16 %v873_v7, %v855_v3  ;;  %v924_v54 = vld [vmem:[%s19333_s5 + $0x820] sm:$0xff]  ;;  %v942_v58 = vld [vmem:[%s19333_s5 + $0x8b0] sm:$0xff]  ;;  %v979_v3 = vld [vmem:[%s19333_s5 + $0x9d8] sm:$0xff] }
 0x393   : > { %9559 = vmatprep.subr.bf16.mxu1 %v9558_v47  ;;  %v854_v47 = vld [vmem:[%s19333_s5 + $0x5f0] sm:$0xff]  ;;  %v9322_v53 = vpack.c.bf16 %v943_v45, %v925_v44  ;;  %v963_v7 = vld [vmem:[%s19333_s5 + $0x958] sm:$0xff]  ;;  %v1016_v44 = vld [vmem:[%s19333_s5 + $0xb00] sm:$0xff] }
 0x394   : > { %v1033_v45 = vld [vmem:[%s19333_s5 + $0xb88] sm:$0xff] }
 0x395   : > { %9305 = vmatpush1.bf16.msra.mxu0 %v9304_v29  ;;  %v909_v29 = vld [vmem:[%s19333_s5 + $0x7a8] sm:$0xff] }
 0x396   : > { %9561 = vmatpush1.bf16.msra.mxu1 %v9560_v39  ;;  %9307 = vmatprep.subr.bf16.mxu0 %v9306_v63  ;;  %v9316_v39 = vpack.c.bf16 %v870_v13, %v852_v10  ;;  %v9572_v63 = vpack.c.bf16 %v872_v51, %v854_v47  ;;  %v9574_v42 = vpack.c.bf16 %v909_v29, %v891_v16  ;;  %v960_v13 = vld [vmem:[%s19333_s5 + $0x940] sm:$0xff]  ;;  %v978_v47 = vld [vmem:[%s19333_s5 + $0x9d0] sm:$0xff]  ;;  %v1015_v16 = vld [vmem:[%s19333_s5 + $0xaf8] sm:$0xff] }
 0x397   : > { %9563 = vmatprep.subr.bf16.mxu1 %v9562_v41  ;;  %v890_v41 = vld [vmem:[%s19333_s5 + $0x710] sm:$0xff]  ;;  %v9326_v10 = vpack.c.bf16 %v979_v3, %v961_v2  ;;  %v999_v29 = vld [vmem:[%s19333_s5 + $0xa78] sm:$0xff]  ;;  %v1052_v2 = vld [vmem:[%s19333_s5 + $0xc20] sm:$0xff] }
 0x398   : > { %v1069_v3 = vld [vmem:[%s19333_s5 + $0xca8] sm:$0xff] }
 0x399   : > { %9309 = vmatpush1.bf16.msra.mxu0 %v9308_v46  ;;  %v945_v46 = vld [vmem:[%s19333_s5 + $0x8c8] sm:$0xff] }
 0x39a   : > { %9565 = vmatpush1.bf16.msra.mxu1 %v9564_v49  ;;  %9311 = vmatprep.subr.bf16.mxu0 %v9310_v50  ;;  %v9320_v49 = vpack.c.bf16 %v906_v38, %v888_v21  ;;  %v9576_v50 = vpack.c.bf16 %v908_v43, %v890_v41  ;;  %v9578_v61 = vpack.c.bf16 %v945_v46, %v927_v34  ;;  %v996_v38 = vld [vmem:[%s19333_s5 + $0xa60] sm:$0xff]  ;;  %v1014_v41 = vld [vmem:[%s19333_s5 + $0xaf0] sm:$0xff]  ;;  %v1051_v34 = vld [vmem:[%s19333_s5 + $0xc18] sm:$0xff] }
 0x39b   : > { %9567 = vmatprep.subr.bf16.mxu1 %v9566_v59  ;;  %v926_v59 = vld [vmem:[%s19333_s5 + $0x830] sm:$0xff]  ;;  %v9330_v21 = vpack.c.bf16 %v1015_v16, %v997_v35  ;;  %v1035_v46 = vld [vmem:[%s19333_s5 + $0xb98] sm:$0xff]  ;;  %v1088_v35 = vld [vmem:[%s19333_s5 + $0xd40] sm:$0xff] }
 0x39c   : > { %v1105_v16 = vld [vmem:[%s19333_s5 + $0xdc8] sm:$0xff] }
 0x39d   : > { %9313 = vmatpush1.bf16.msra.mxu0 %v9312_v8  ;;  %v981_v8 = vld [vmem:[%s19333_s5 + $0x9e8] sm:$0xff] }
 0x39e   : > { %9569 = vmatpush1.bf16.msra.mxu1 %v9568_v22  ;;  %9315 = vmatprep.subr.bf16.mxu0 %v9314_v9  ;;  %v9324_v22 = vpack.c.bf16 %v942_v58, %v924_v54  ;;  %v9580_v9 = vpack.c.bf16 %v944_v0, %v926_v59  ;;  %v9582_v51 = vpack.c.bf16 %v981_v8, %v963_v7  ;;  %v1032_v58 = vld [vmem:[%s19333_s5 + $0xb80] sm:$0xff]  ;;  %v1050_v59 = vld [vmem:[%s19333_s5 + $0xc10] sm:$0xff]  ;;  %v1087_v7 = vld [vmem:[%s19333_s5 + $0xd38] sm:$0xff] }
 0x39f   : > { %9571 = vmatprep.subr.bf16.mxu1 %v9570_v15  ;;  %v962_v15 = vld [vmem:[%s19333_s5 + $0x950] sm:$0xff]  ;;  %v9334_v54 = vpack.c.bf16 %v1051_v34, %v1033_v45  ;;  %v1071_v8 = vld [vmem:[%s19333_s5 + $0xcb8] sm:$0xff]  ;;  %v1124_v45 = vld [vmem:[%s19333_s5 + $0xe60] sm:$0xff] }
 0x3a0   : > { %v1141_v34 = vld [vmem:[%s19333_s5 + $0xee8] sm:$0xff] }
 0x3a1   : > { %9317 = vmatpush1.bf16.msra.mxu0 %v9316_v39  ;;  %v1017_v39 = vld [vmem:[%s19333_s5 + $0xb08] sm:$0xff] }
 0x3a2   : > { %9573 = vmatpush1.bf16.msra.mxu1 %v9572_v63  ;;  %9319 = vmatprep.subr.bf16.mxu0 %v9318_v36  ;;  %v9328_v63 = vpack.c.bf16 %v978_v47, %v960_v13  ;;  %v9584_v36 = vpack.c.bf16 %v980_v32, %v962_v15  ;;  %v9586_v43 = vpack.c.bf16 %v1017_v39, %v999_v29  ;;  %v1068_v47 = vld [vmem:[%s19333_s5 + $0xca0] sm:$0xff]  ;;  %v1086_v15 = vld [vmem:[%s19333_s5 + $0xd30] sm:$0xff]  ;;  %v1123_v29 = vld [vmem:[%s19333_s5 + $0xe58] sm:$0xff] }
 0x3a3   : > { %9575 = vmatprep.subr.bf16.mxu1 %v9574_v42  ;;  %v998_v42 = vld [vmem:[%s19333_s5 + $0xa70] sm:$0xff]  ;;  %v9338_v13 = vpack.c.bf16 %v1087_v7, %v1069_v3  ;;  %v1107_v39 = vld [vmem:[%s19333_s5 + $0xdd8] sm:$0xff]  ;;  %v1160_v3 = vld [vmem:[%s19333_s5 + $0xf80] sm:$0xff] }
 0x3a4   : > { %v1177_v7 = vld [vmem:[%s19333_s5 + $0x1008] sm:$0xff] }
 0x3a5   : > { %9321 = vmatpush1.bf16.msra.mxu0 %v9320_v49  ;;  %v1053_v49 = vld [vmem:[%s19333_s5 + $0xc28] sm:$0xff] }
 0x3a6   : > { %9577 = vmatpush1.bf16.msra.mxu1 %v9576_v50  ;;  %9323 = vmatprep.subr.bf16.mxu0 %v9322_v53  ;;  %v9332_v50 = vpack.c.bf16 %v1014_v41, %v996_v38  ;;  %v9588_v53 = vpack.c.bf16 %v1016_v44, %v998_v42  ;;  %v9590_v0 = vpack.c.bf16 %v1053_v49, %v1035_v46  ;;  %v1104_v41 = vld [vmem:[%s19333_s5 + $0xdc0] sm:$0xff]  ;;  %v1122_v42 = vld [vmem:[%s19333_s5 + $0xe50] sm:$0xff]  ;;  %v1159_v46 = vld [vmem:[%s19333_s5 + $0xf78] sm:$0xff] }
 0x3a7   : > { %9579 = vmatprep.subr.bf16.mxu1 %v9578_v61  ;;  %v1034_v61 = vld [vmem:[%s19333_s5 + $0xb90] sm:$0xff]  ;;  %v9342_v38 = vpack.c.bf16 %v1123_v29, %v1105_v16  ;;  %v1143_v49 = vld [vmem:[%s19333_s5 + $0xef8] sm:$0xff]  ;;  %v1196_v16 = vld [vmem:[%s19333_s5 + $0x10a0] sm:$0xff] }
 0x3a8   : > { %v1213_v29 = vld [vmem:[%s19333_s5 + $0x1128] sm:$0xff] }
 0x3a9   : > { %9325 = vmatpush1.bf16.msra.mxu0 %v9324_v22  ;;  %v1089_v22 = vld [vmem:[%s19333_s5 + $0xd48] sm:$0xff] }
 0x3aa   : > { %9581 = vmatpush1.bf16.msra.mxu1 %v9580_v9  ;;  %9327 = vmatprep.subr.bf16.mxu0 %v9326_v10  ;;  %v9336_v9 = vpack.c.bf16 %v1050_v59, %v1032_v58  ;;  %v9592_v10 = vpack.c.bf16 %v1052_v2, %v1034_v61  ;;  %v9594_v32 = vpack.c.bf16 %v1089_v22, %v1071_v8  ;;  %v1140_v59 = vld [vmem:[%s19333_s5 + $0xee0] sm:$0xff]  ;;  %v1158_v61 = vld [vmem:[%s19333_s5 + $0xf70] sm:$0xff]  ;;  %v1195_v8 = vld [vmem:[%s19333_s5 + $0x1098] sm:$0xff] }
 0x3ab   : > { %9583 = vmatprep.subr.bf16.mxu1 %v9582_v51  ;;  %v1070_v51 = vld [vmem:[%s19333_s5 + $0xcb0] sm:$0xff]  ;;  %v9346_v58 = vpack.c.bf16 %v1159_v46, %v1141_v34  ;;  %v1179_v22 = vld [vmem:[%s19333_s5 + $0x1018] sm:$0xff]  ;;  %v1232_v34 = vld [vmem:[%s19333_s5 + $0x11c0] sm:$0xff] }
 0x3ac   : > { %v1249_v46 = vld [vmem:[%s19333_s5 + $0x1248] sm:$0xff] }
 0x3ad   : > { %9329 = vmatpush1.bf16.msra.mxu0 %v9328_v63  ;;  %v1125_v63 = vld [vmem:[%s19333_s5 + $0xe68] sm:$0xff] }
 0x3ae   : > { %9585 = vmatpush1.bf16.msra.mxu1 %v9584_v36  ;;  %9331 = vmatprep.subr.bf16.mxu0 %v9330_v21  ;;  %v9340_v36 = vpack.c.bf16 %v1086_v15, %v1068_v47  ;;  %v9596_v21 = vpack.c.bf16 %v1088_v35, %v1070_v51  ;;  %v9598_v44 = vpack.c.bf16 %v1125_v63, %v1107_v39  ;;  %v1176_v15 = vld [vmem:[%s19333_s5 + $0x1000] sm:$0xff]  ;;  %v1194_v51 = vld [vmem:[%s19333_s5 + $0x1090] sm:$0xff]  ;;  %v1231_v39 = vld [vmem:[%s19333_s5 + $0x11b8] sm:$0xff] }
 0x3af   : > { %9587 = vmatprep.subr.bf16.mxu1 %v9586_v43  ;;  %v1106_v43 = vld [vmem:[%s19333_s5 + $0xdd0] sm:$0xff]  ;;  %v9350_v47 = vpack.c.bf16 %v1195_v8, %v1177_v7  ;;  %v1215_v63 = vld [vmem:[%s19333_s5 + $0x1138] sm:$0xff]  ;;  %v1268_v7 = vld [vmem:[%s19333_s5 + $0x12e0] sm:$0xff] }
 0x3b0   : > { %v1285_v8 = vld [vmem:[%s19333_s5 + $0x1368] sm:$0xff] }
 0x3b1   : > { %9333 = vmatpush1.bf16.msra.mxu0 %v9332_v50  ;;  %v1161_v50 = vld [vmem:[%s19333_s5 + $0xf88] sm:$0xff] }
 0x3b2   : > { %9589 = vmatpush1.bf16.msra.mxu1 %v9588_v53  ;;  %9335 = vmatprep.subr.bf16.mxu0 %v9334_v54  ;;  %v9344_v53 = vpack.c.bf16 %v1122_v42, %v1104_v41  ;;  %v9600_v54 = vpack.c.bf16 %v1124_v45, %v1106_v43  ;;  %v9602_v2 = vpack.c.bf16 %v1161_v50, %v1143_v49  ;;  %v1212_v42 = vld [vmem:[%s19333_s5 + $0x1120] sm:$0xff]  ;;  %v1230_v43 = vld [vmem:[%s19333_s5 + $0x11b0] sm:$0xff]  ;;  %v1267_v49 = vld [vmem:[%s19333_s5 + $0x12d8] sm:$0xff] }
 0x3b3   : > { %9591 = vmatprep.subr.bf16.mxu1 %v9590_v0  ;;  %v1142_v0 = vld [vmem:[%s19333_s5 + $0xef0] sm:$0xff]  ;;  %v9354_v41 = vpack.c.bf16 %v1231_v39, %v1213_v29  ;;  %v1251_v50 = vld [vmem:[%s19333_s5 + $0x1258] sm:$0xff]  ;;  %v1304_v29 = vld [vmem:[%s19333_s5 + $0x1400] sm:$0xff] }
 0x3b4   : > { %v1321_v39 = vld [vmem:[%s19333_s5 + $0x1488] sm:$0xff] }
 0x3b5   : > { %9337 = vmatpush1.bf16.msra.mxu0 %v9336_v9  ;;  %v1197_v9 = vld [vmem:[%s19333_s5 + $0x10a8] sm:$0xff] }
 0x3b6   : > { %9593 = vmatpush1.bf16.msra.mxu1 %v9592_v10  ;;  %9339 = vmatprep.subr.bf16.mxu0 %v9338_v13  ;;  %v9348_v10 = vpack.c.bf16 %v1158_v61, %v1140_v59  ;;  %v9604_v13 = vpack.c.bf16 %v1160_v3, %v1142_v0  ;;  %v9606_v35 = vpack.c.bf16 %v1197_v9, %v1179_v22  ;;  %v1248_v0 = vld [vmem:[%s19333_s5 + $0x1240] sm:$0xff]  ;;  %v1250_v3 = vld [vmem:[%s19333_s5 + $0x1250] sm:$0xff]  ;;  %v1303_v22 = vld [vmem:[%s19333_s5 + $0x13f8] sm:$0xff] }
 0x3b7   : > { %9595 = vmatprep.subr.bf16.mxu1 %v9594_v32  ;;  %v1178_v32 = vld [vmem:[%s19333_s5 + $0x1010] sm:$0xff]  ;;  %v9358_v59 = vpack.c.bf16 %v1267_v49, %v1249_v46  ;;  %v1287_v9 = vld [vmem:[%s19333_s5 + $0x1378] sm:$0xff]  ;;  %v1340_v46 = vld [vmem:[%s19333_s5 + $0x1520] sm:$0xff] }
 0x3b8   : > { %v1357_v49 = vld [vmem:[%s19333_s5 + $0x15a8] sm:$0xff] }
 0x3b9   : > { %9341 = vmatpush1.bf16.msra.mxu0 %v9340_v36  ;;  %v1233_v36 = vld [vmem:[%s19333_s5 + $0x11c8] sm:$0xff] }
 0x3ba   : > { %9597 = vmatpush1.bf16.msra.mxu1 %v9596_v21  ;;  %9343 = vmatprep.subr.bf16.mxu0 %v9342_v38  ;;  %v9352_v21 = vpack.c.bf16 %v1194_v51, %v1176_v15  ;;  %v9608_v38 = vpack.c.bf16 %v1196_v16, %v1178_v32  ;;  %v9610_v45 = vpack.c.bf16 %v1233_v36, %v1215_v63  ;;  %v1284_v51 = vld [vmem:[%s19333_s5 + $0x1360] sm:$0xff]  ;;  %v1302_v32 = vld [vmem:[%s19333_s5 + $0x13f0] sm:$0xff]  ;;  %v1339_v63 = vld [vmem:[%s19333_s5 + $0x1518] sm:$0xff] }
 0x3bb   : > { %9599 = vmatprep.subr.bf16.mxu1 %v9598_v44  ;;  %v1214_v44 = vld [vmem:[%s19333_s5 + $0x1130] sm:$0xff]  ;;  %v9362_v15 = vpack.c.bf16 %v1303_v22, %v1285_v8  ;;  %v1323_v36 = vld [vmem:[%s19333_s5 + $0x1498] sm:$0xff]  ;;  %v1376_v8 = vld [vmem:[%s19333_s5 + $0x1640] sm:$0xff] }
 0x3bc   : > { %v1393_v22 = vld [vmem:[%s19333_s5 + $0x16c8] sm:$0xff] }
 0x3bd   : > { %9345 = vmatpush1.bf16.msra.mxu0 %v9344_v53  ;;  %v1269_v53 = vld [vmem:[%s19333_s5 + $0x12e8] sm:$0xff] }
 0x3be   : > { %9601 = vmatpush1.bf16.msra.mxu1 %v9600_v54  ;;  %9347 = vmatprep.subr.bf16.mxu0 %v9346_v58  ;;  %v9356_v54 = vpack.c.bf16 %v1230_v43, %v1212_v42  ;;  %v9612_v58 = vpack.c.bf16 %v1232_v34, %v1214_v44  ;;  %v9614_v61 = vpack.c.bf16 %v1269_v53, %v1251_v50  ;;  %v1320_v43 = vld [vmem:[%s19333_s5 + $0x1480] sm:$0xff]  ;;  %v1338_v44 = vld [vmem:[%s19333_s5 + $0x1510] sm:$0xff]  ;;  %v1375_v50 = vld [vmem:[%s19333_s5 + $0x1638] sm:$0xff] }
 0x3bf   : > { %9603 = vmatprep.subr.bf16.mxu1 %v9602_v2  ;;  %v1266_v2 = vld [vmem:[%s19333_s5 + $0x12d0] sm:$0xff]  ;;  %v9366_v42 = vpack.c.bf16 %v1339_v63, %v1321_v39  ;;  %v1359_v53 = vld [vmem:[%s19333_s5 + $0x15b8] sm:$0xff]  ;;  %v1412_v39 = vld [vmem:[%s19333_s5 + $0x1760] sm:$0xff] }
 0x3c0   : > { %v1429_v63 = vld [vmem:[%s19333_s5 + $0x17e8] sm:$0xff] }
 0x3c1   : > { %9349 = vmatpush1.bf16.msra.mxu0 %v9348_v10  ;;  %v1305_v10 = vld [vmem:[%s19333_s5 + $0x1408] sm:$0xff] }
 0x3c2   : > { %9605 = vmatpush1.bf16.msra.mxu1 %v9604_v13  ;;  %9351 = vmatprep.subr.bf16.mxu0 %v9350_v47  ;;  %v9360_v13 = vpack.c.bf16 %v1266_v2, %v1248_v0  ;;  %v9616_v47 = vpack.c.bf16 %v1268_v7, %v1250_v3  ;;  %v9618_v16 = vpack.c.bf16 %v1305_v10, %v1287_v9  ;;  %v1356_v0 = vld [vmem:[%s19333_s5 + $0x15a0] sm:$0xff]  ;;  %v1374_v2 = vld [vmem:[%s19333_s5 + $0x1630] sm:$0xff]  ;;  %v1411_v9 = vld [vmem:[%s19333_s5 + $0x1758] sm:$0xff] }
 0x3c3   : > { %9607 = vmatprep.subr.bf16.mxu1 %v9606_v35  ;;  %v1286_v35 = vld [vmem:[%s19333_s5 + $0x1370] sm:$0xff]  ;;  %v1395_v10 = vld [vmem:[%s19333_s5 + $0x16d8] sm:$0xff] }
 0x3c4   : > { %v1358_v3 = vld [vmem:[%s19333_s5 + $0x15b0] sm:$0xff] }
 0x3c5   : > { %9353 = vmatpush1.bf16.msra.mxu0 %v9352_v21  ;;  %v1341_v21 = vld [vmem:[%s19333_s5 + $0x1528] sm:$0xff] }
 0x3c6   : > { %9609 = vmatpush1.bf16.msra.mxu1 %v9608_v38  ;;  %9355 = vmatprep.subr.bf16.mxu0 %v9354_v41  ;;  %v9364_v38 = vpack.c.bf16 %v1302_v32, %v1284_v51  ;;  %v9620_v41 = vpack.c.bf16 %v1304_v29, %v1286_v35  ;;  %v9622_v34 = vpack.c.bf16 %v1341_v21, %v1323_v36  ;;  %v1392_v32 = vld [vmem:[%s19333_s5 + $0x16c0] sm:$0xff]  ;;  %v1410_v35 = vld [vmem:[%s19333_s5 + $0x1750] sm:$0xff]  ;;  %v1447_v36 = vld [vmem:[%s19333_s5 + $0x1878] sm:$0xff] }
 0x3c7   : > { %9611 = vmatprep.subr.bf16.mxu1 %v9610_v45  ;;  %v1322_v45 = vld [vmem:[%s19333_s5 + $0x1490] sm:$0xff]  ;;  %v9374_v51 = vpack.c.bf16 %v1411_v9, %v1393_v22  ;;  %v1431_v21 = vld [vmem:[%s19333_s5 + $0x17f8] sm:$0xff]  ;;  %v1484_v22 = vld [vmem:[%s19333_s5 + $0x19a0] sm:$0xff] }
 0x3c8   : > { %v1501_v9 = vld [vmem:[%s19333_s5 + $0x1a28] sm:$0xff] }
 0x3c9   : > { %9357 = vmatpush1.bf16.msra.mxu0 %v9356_v54  ;;  %v1377_v54 = vld [vmem:[%s19333_s5 + $0x1648] sm:$0xff] }
 0x3ca   : > { %9613 = vmatpush1.bf16.msra.mxu1 %v9612_v58  ;;  %9359 = vmatprep.subr.bf16.mxu0 %v9358_v59  ;;  %v9368_v58 = vpack.c.bf16 %v1338_v44, %v1320_v43  ;;  %v9624_v59 = vpack.c.bf16 %v1340_v46, %v1322_v45  ;;  %v9626_v7 = vpack.c.bf16 %v1377_v54, %v1359_v53  ;;  %v1428_v44 = vld [vmem:[%s19333_s5 + $0x17e0] sm:$0xff]  ;;  %v1446_v45 = vld [vmem:[%s19333_s5 + $0x1870] sm:$0xff]  ;;  %v1483_v53 = vld [vmem:[%s19333_s5 + $0x1998] sm:$0xff] }
 0x3cb   : > { %9615 = vmatprep.subr.bf16.mxu1 %v9614_v61  ;;  %v9370_v61 = vpack.c.bf16 %v1375_v50, %v1357_v49  ;;  %v9378_v43 = vpack.c.bf16 %v1447_v36, %v1429_v63  ;;  %v1448_v49 = vld [vmem:[%s19333_s5 + $0x1880] sm:$0xff]  ;;  %v1465_v50 = vld [vmem:[%s19333_s5 + $0x1908] sm:$0xff]  ;;  %v1467_v54 = vld [vmem:[%s19333_s5 + $0x1918] sm:$0xff] }
 0x3cc   : > { %4265 = vmatmul.mubr.f32.vlgmr.msra.gmra.mrb[8].mxu0 %v11416_v57  ;;  %v1520_v63 = vld [vmem:[%s19333_s5 + $0x1ac0] sm:$0xff]  ;;  %v1537_v36 = vld [vmem:[%s19333_s5 + $0x1b48] sm:$0xff] }
 0x3cd   : > { %4573 = vmatmul.mubr.f32.vlgmr.msra.gmra.mrb[26].mxu1 %v11416_v57  ;;  %4270 = vmatprep.mubr.f32.mxu0 %v11448_v11 }
 0x3ce   : > { %9361 = vmatpush1.bf16.msra.mxu0 %v9360_v13  ;;  %4578 = vmatprep.mubr.f32.mxu1 %v11448_v11  ;;  %v1413_v13 = vld [vmem:[%s19333_s5 + $0x1768] sm:$0xff] }
 0x3cf   : > { %9617 = vmatpush1.bf16.msra.mxu1 %v9616_v47  ;;  %9363 = vmatprep.subr.bf16.mxu0 %v9362_v15  ;;  %v9372_v47 = vpack.c.bf16 %v1374_v2, %v1356_v0  ;;  %v9628_v15 = vpack.c.bf16 %v1376_v8, %v1358_v3  ;;  %v9630_v29 = vpack.c.bf16 %v1413_v13, %v1395_v10  ;;  %v1464_v2 = vld [vmem:[%s19333_s5 + $0x1900] sm:$0xff]  ;;  %v1482_v3 = vld [vmem:[%s19333_s5 + $0x1990] sm:$0xff]  ;;  %v1519_v10 = vld [vmem:[%s19333_s5 + $0x1ab8] sm:$0xff] }
 0x3d0   : > { %4271 = vmatmul.mubr.f32.gmra.mrb[10].mxu0 %v11440_v6  ;;  %9619 = vmatprep.subr.bf16.mxu1 %v9618_v16  ;;  %v1394_v16 = vld [vmem:[%s19333_s5 + $0x16d0] sm:$0xff]  ;;  %v9382_v0 = vpack.c.bf16 %v1483_v53, %v1465_v50  ;;  %v1503_v13 = vld [vmem:[%s19333_s5 + $0x1a38] sm:$0xff]  ;;  %v1556_v50 = vld [vmem:[%s19333_s5 + $0x1be0] sm:$0xff] }
 0x3d1   : > { %4579 = vmatmul.mubr.f32.gmra.mrb[28].mxu1 %v11440_v6  ;;  %4341 = vmatprep.mubr.f32.mxu0 %v11483_v27  ;;  %v1573_v53 = vld [vmem:[%s19333_s5 + $0x1c68] sm:$0xff] }
 0x3d2   : > { %9365 = vmatpush1.bf16.msra.mxu0 %v9364_v38  ;;  %4649 = vmatprep.mubr.f32.mxu1 %v11483_v27  ;;  %v1449_v38 = vld [vmem:[%s19333_s5 + $0x1888] sm:$0xff] }
 0x3d3   : > { %9621 = vmatpush1.bf16.msra.mxu1 %v9620_v41  ;;  %9367 = vmatprep.subr.bf16.mxu0 %v9366_v42  ;;  %v9376_v41 = vpack.c.bf16 %v1410_v35, %v1392_v32  ;;  %v9632_v42 = vpack.c.bf16 %v1412_v39, %v1394_v16  ;;  %v9634_v46 = vpack.c.bf16 %v1449_v38, %v1431_v21  ;;  %v1500_v35 = vld [vmem:[%s19333_s5 + $0x1a20] sm:$0xff]  ;;  %v1518_v16 = vld [vmem:[%s19333_s5 + $0x1ab0] sm:$0xff]  ;;  %v1555_v21 = vld [vmem:[%s19333_s5 + $0x1bd8] sm:$0xff] }
 0x3d4   : > { %9623 = vmatprep.subr.bf16.mxu1 %v9622_v34  ;;  %v1430_v34 = vld [vmem:[%s19333_s5 + $0x17f0] sm:$0xff]  ;;  %v9386_v32 = vpack.c.bf16 %v1519_v10, %v1501_v9  ;;  %v1539_v38 = vld [vmem:[%s19333_s5 + $0x1b58] sm:$0xff]  ;;  %v1592_v9 = vld [vmem:[%s19333_s5 + $0x1d00] sm:$0xff] }
 0x3d5   : > { %v1609_v10 = vld [vmem:[%s19333_s5 + $0x1d88] sm:$0xff] }
 0x3d6   : > { %9369 = vmatpush1.bf16.msra.mxu0 %v9368_v58  ;;  %v1485_v58 = vld [vmem:[%s19333_s5 + $0x19a8] sm:$0xff] }
 0x3d7   : > { %9625 = vmatpush1.bf16.msra.mxu1 %v9624_v59  ;;  %9371 = vmatprep.subr.bf16.mxu0 %v9370_v61  ;;  %v9380_v59 = vpack.c.bf16 %v1446_v45, %v1428_v44  ;;  %v9636_v61 = vpack.c.bf16 %v1448_v49, %v1430_v34  ;;  %v9638_v8 = vpack.c.bf16 %v1485_v58, %v1467_v54  ;;  %v1536_v45 = vld [vmem:[%s19333_s5 + $0x1b40] sm:$0xff]  ;;  %v1554_v34 = vld [vmem:[%s19333_s5 + $0x1bd0] sm:$0xff]  ;;  %v1591_v54 = vld [vmem:[%s19333_s5 + $0x1cf8] sm:$0xff] }
 0x3d8   : > { %9627 = vmatprep.subr.bf16.mxu1 %v9626_v7  ;;  %v1466_v7 = vld [vmem:[%s19333_s5 + $0x1910] sm:$0xff]  ;;  %v9390_v44 = vpack.c.bf16 %v1555_v21, %v1537_v36  ;;  %v1575_v58 = vld [vmem:[%s19333_s5 + $0x1c78] sm:$0xff]  ;;  %v1628_v36 = vld [vmem:[%s19333_s5 + $0x1e20] sm:$0xff] }
 0x3d9   : > { %v1645_v21 = vld [vmem:[%s19333_s5 + $0x1ea8] sm:$0xff] }
 0x3da   : > { %9373 = vmatpush1.bf16.msra.mxu0 %v9372_v47  ;;  %v1521_v47 = vld [vmem:[%s19333_s5 + $0x1ac8] sm:$0xff] }
 0x3db   : > { %9629 = vmatpush1.bf16.msra.mxu1 %v9628_v15  ;;  %9375 = vmatprep.subr.bf16.mxu0 %v9374_v51  ;;  %v9384_v15 = vpack.c.bf16 %v1482_v3, %v1464_v2  ;;  %v9640_v51 = vpack.c.bf16 %v1484_v22, %v1466_v7  ;;  %v9642_v39 = vpack.c.bf16 %v1521_v47, %v1503_v13  ;;  %v1572_v3 = vld [vmem:[%s19333_s5 + $0x1c60] sm:$0xff]  ;;  %v1590_v7 = vld [vmem:[%s19333_s5 + $0x1cf0] sm:$0xff]  ;;  %v1627_v13 = vld [vmem:[%s19333_s5 + $0x1e18] sm:$0xff] }
 0x3dc   : > { %9631 = vmatprep.subr.bf16.mxu1 %v9630_v29  ;;  %v1502_v29 = vld [vmem:[%s19333_s5 + $0x1a30] sm:$0xff]  ;;  %v9394_v2 = vpack.c.bf16 %v1591_v54, %v1573_v53  ;;  %v1611_v47 = vld [vmem:[%s19333_s5 + $0x1d98] sm:$0xff]  ;;  %v1664_v53 = vld [vmem:[%s19333_s5 + $0x1f40] sm:$0xff] }
 0x3dd   : > { %v1681_v54 = vld [vmem:[%s19333_s5 + $0x1fc8] sm:$0xff] }
 0x3de   : > { %9377 = vmatpush1.bf16.msra.mxu0 %v9376_v41  ;;  %v1557_v41 = vld [vmem:[%s19333_s5 + $0x1be8] sm:$0xff] }
 0x3df   : > { %9633 = vmatpush1.bf16.msra.mxu1 %v9632_v42  ;;  %9379 = vmatprep.subr.bf16.mxu0 %v9378_v43  ;;  %v9388_v42 = vpack.c.bf16 %v1518_v16, %v1500_v35  ;;  %v9644_v43 = vpack.c.bf16 %v1520_v63, %v1502_v29  ;;  %v9646_v49 = vpack.c.bf16 %v1557_v41, %v1539_v38  ;;  %v1608_v16 = vld [vmem:[%s19333_s5 + $0x1d80] sm:$0xff]  ;;  %v1626_v29 = vld [vmem:[%s19333_s5 + $0x1e10] sm:$0xff]  ;;  %v1663_v38 = vld [vmem:[%s19333_s5 + $0x1f38] sm:$0xff] }
 0x3e0   : > { %9635 = vmatprep.subr.bf16.mxu1 %v9634_v46  ;;  %v1538_v46 = vld [vmem:[%s19333_s5 + $0x1b50] sm:$0xff]  ;;  %v9398_v35 = vpack.c.bf16 %v1627_v13, %v1609_v10  ;;  %v1647_v41 = vld [vmem:[%s19333_s5 + $0x1eb8] sm:$0xff]  ;;  %v1700_v10 = vld [vmem:[%s19333_s5 + $0x2060] sm:$0xff] }
 0x3e1   : > { %v1717_v13 = vld [vmem:[%s19333_s5 + $0x20e8] sm:$0xff] }
 0x3e2   : > { %9381 = vmatpush1.bf16.msra.mxu0 %v9380_v59  ;;  %v1593_v59 = vld [vmem:[%s19333_s5 + $0x1d08] sm:$0xff] }
 0x3e3   : > { %9637 = vmatpush1.bf16.msra.mxu1 %v9636_v61  ;;  %9383 = vmatprep.subr.bf16.mxu0 %v9382_v0  ;;  %v9392_v61 = vpack.c.bf16 %v1554_v34, %v1536_v45  ;;  %v9648_v0 = vpack.c.bf16 %v1556_v50, %v1538_v46  ;;  %v9650_v22 = vpack.c.bf16 %v1593_v59, %v1575_v58  ;;  %v1644_v34 = vld [vmem:[%s19333_s5 + $0x1ea0] sm:$0xff]  ;;  %v1662_v46 = vld [vmem:[%s19333_s5 + $0x1f30] sm:$0xff]  ;;  %v1699_v58 = vld [vmem:[%s19333_s5 + $0x2058] sm:$0xff] }
 0x3e4   : > { %9639 = vmatprep.subr.bf16.mxu1 %v9638_v8  ;;  %v1574_v8 = vld [vmem:[%s19333_s5 + $0x1c70] sm:$0xff]  ;;  %v9402_v45 = vpack.c.bf16 %v1663_v38, %v1645_v21  ;;  %v1683_v59 = vld [vmem:[%s19333_s5 + $0x1fd8] sm:$0xff]  ;;  %v1736_v21 = vld [vmem:[%s19333_s5 + $0x2180] sm:$0xff] }
 0x3e5   : > { %v1753_v38 = vld [vmem:[%s19333_s5 + $0x2208] sm:$0xff] }
 0x3e6   : > { %9385 = vmatpush1.bf16.msra.mxu0 %v9384_v15  ;;  %v1629_v15 = vld [vmem:[%s19333_s5 + $0x1e28] sm:$0xff] }
 0x3e7   : > { %9641 = vmatpush1.bf16.msra.mxu1 %v9640_v51  ;;  %9387 = vmatprep.subr.bf16.mxu0 %v9386_v32  ;;  %v9396_v51 = vpack.c.bf16 %v1590_v7, %v1572_v3  ;;  %v9652_v32 = vpack.c.bf16 %v1592_v9, %v1574_v8  ;;  %v9654_v63 = vpack.c.bf16 %v1629_v15, %v1611_v47  ;;  %v1680_v7 = vld [vmem:[%s19333_s5 + $0x1fc0] sm:$0xff]  ;;  %v1698_v8 = vld [vmem:[%s19333_s5 + $0x2050] sm:$0xff]  ;;  %v1735_v47 = vld [vmem:[%s19333_s5 + $0x2178] sm:$0xff] }
 0x3e8   : > { %9643 = vmatprep.subr.bf16.mxu1 %v9642_v39  ;;  %v1610_v39 = vld [vmem:[%s19333_s5 + $0x1d90] sm:$0xff]  ;;  %v9406_v3 = vpack.c.bf16 %v1699_v58, %v1681_v54  ;;  %v1719_v15 = vld [vmem:[%s19333_s5 + $0x20f8] sm:$0xff]  ;;  %v1772_v54 = vld [vmem:[%s19333_s5 + $0x22a0] sm:$0xff] }
 0x3e9   : > { %v1789_v58 = vld [vmem:[%s19333_s5 + $0x2328] sm:$0xff] }
 0x3ea   : > { %9389 = vmatpush1.bf16.msra.mxu0 %v9388_v42  ;;  %v1665_v42 = vld [vmem:[%s19333_s5 + $0x1f48] sm:$0xff] }
 0x3eb   : > { %9645 = vmatpush1.bf16.msra.mxu1 %v9644_v43  ;;  %9391 = vmatprep.subr.bf16.mxu0 %v9390_v44  ;;  %v9400_v43 = vpack.c.bf16 %v1626_v29, %v1608_v16  ;;  %v9656_v44 = vpack.c.bf16 %v1628_v36, %v1610_v39  ;;  %v9658_v50 = vpack.c.bf16 %v1665_v42, %v1647_v41  ;;  %v1716_v29 = vld [vmem:[%s19333_s5 + $0x20e0] sm:$0xff]  ;;  %v1734_v39 = vld [vmem:[%s19333_s5 + $0x2170] sm:$0xff]  ;;  %v1771_v41 = vld [vmem:[%s19333_s5 + $0x2298] sm:$0xff] }
 0x3ec   : > { %9647 = vmatprep.subr.bf16.mxu1 %v9646_v49  ;;  %v1646_v49 = vld [vmem:[%s19333_s5 + $0x1eb0] sm:$0xff]  ;;  %v9410_v16 = vpack.c.bf16 %v1735_v47, %v1717_v13  ;;  %v1755_v42 = vld [vmem:[%s19333_s5 + $0x2218] sm:$0xff]  ;;  %v1808_v13 = vld [vmem:[%s19333_s5 + $0x23c0] sm:$0xff] }
 0x3ed   : > { %v1825_v47 = vld [vmem:[%s19333_s5 + $0x2448] sm:$0xff] }
 0x3ee   : > { %9393 = vmatpush1.bf16.msra.mxu0 %v9392_v61  ;;  %v1701_v61 = vld [vmem:[%s19333_s5 + $0x2068] sm:$0xff] }
 0x3ef   : > { %9649 = vmatpush1.bf16.msra.mxu1 %v9648_v0  ;;  %9395 = vmatprep.subr.bf16.mxu0 %v9394_v2  ;;  %v9404_v0 = vpack.c.bf16 %v1662_v46, %v1644_v34  ;;  %v9660_v2 = vpack.c.bf16 %v1664_v53, %v1646_v49  ;;  %v9662_v9 = vpack.c.bf16 %v1701_v61, %v1683_v59  ;;  %v1752_v46 = vld [vmem:[%s19333_s5 + $0x2200] sm:$0xff]  ;;  %v1770_v49 = vld [vmem:[%s19333_s5 + $0x2290] sm:$0xff]  ;;  %v1807_v59 = vld [vmem:[%s19333_s5 + $0x23b8] sm:$0xff] }
 0x3f0   : > { %9651 = vmatprep.subr.bf16.mxu1 %v9650_v22  ;;  %v1682_v22 = vld [vmem:[%s19333_s5 + $0x1fd0] sm:$0xff]  ;;  %v9414_v34 = vpack.c.bf16 %v1771_v41, %v1753_v38  ;;  %v1791_v61 = vld [vmem:[%s19333_s5 + $0x2338] sm:$0xff]  ;;  %v1844_v38 = vld [vmem:[%s19333_s5 + $0x24e0] sm:$0xff] }
 0x3f1   : > { %v1861_v41 = vld [vmem:[%s19333_s5 + $0x2568] sm:$0xff] }
 0x3f2   : > { %9397 = vmatpush1.bf16.msra.mxu0 %v9396_v51  ;;  %v1737_v51 = vld [vmem:[%s19333_s5 + $0x2188] sm:$0xff] }
 0x3f3   : > { %9653 = vmatpush1.bf16.msra.mxu1 %v9652_v32  ;;  %9399 = vmatprep.subr.bf16.mxu0 %v9398_v35  ;;  %v9408_v32 = vpack.c.bf16 %v1698_v8, %v1680_v7  ;;  %v9664_v35 = vpack.c.bf16 %v1700_v10, %v1682_v22  ;;  %v9666_v36 = vpack.c.bf16 %v1737_v51, %v1719_v15  ;;  %v1788_v8 = vld [vmem:[%s19333_s5 + $0x2320] sm:$0xff]  ;;  %v1806_v22 = vld [vmem:[%s19333_s5 + $0x23b0] sm:$0xff]  ;;  %v1843_v15 = vld [vmem:[%s19333_s5 + $0x24d8] sm:$0xff] }
 0x3f4   : > { %9655 = vmatprep.subr.bf16.mxu1 %v9654_v63  ;;  %v1718_v63 = vld [vmem:[%s19333_s5 + $0x20f0] sm:$0xff]  ;;  %v9418_v7 = vpack.c.bf16 %v1807_v59, %v1789_v58  ;;  %v1827_v51 = vld [vmem:[%s19333_s5 + $0x2458] sm:$0xff]  ;;  %v1880_v58 = vld [vmem:[%s19333_s5 + $0x2600] sm:$0xff] }
 0x3f5   : > { %v1897_v59 = vld [vmem:[%s19333_s5 + $0x2688] sm:$0xff] }
 0x3f6   : > { %9401 = vmatpush1.bf16.msra.mxu0 %v9400_v43  ;;  %v1773_v43 = vld [vmem:[%s19333_s5 + $0x22a8] sm:$0xff] }
 0x3f7   : > { %9657 = vmatpush1.bf16.msra.mxu1 %v9656_v44  ;;  %9403 = vmatprep.subr.bf16.mxu0 %v9402_v45  ;;  %v9412_v44 = vpack.c.bf16 %v1734_v39, %v1716_v29  ;;  %v9668_v45 = vpack.c.bf16 %v1736_v21, %v1718_v63  ;;  %v9670_v53 = vpack.c.bf16 %v1773_v43, %v1755_v42  ;;  %v1824_v63 = vld [vmem:[%s19333_s5 + $0x2440] sm:$0xff]  ;;  %v1826_v21 = vld [vmem:[%s19333_s5 + $0x2450] sm:$0xff]  ;;  %v1879_v42 = vld [vmem:[%s19333_s5 + $0x25f8] sm:$0xff] }
 0x3f8   : > { %9659 = vmatprep.subr.bf16.mxu1 %v9658_v50  ;;  %v1754_v50 = vld [vmem:[%s19333_s5 + $0x2210] sm:$0xff]  ;;  %v9422_v29 = vpack.c.bf16 %v1843_v15, %v1825_v47  ;;  %v1863_v43 = vld [vmem:[%s19333_s5 + $0x2578] sm:$0xff]  ;;  %v1916_v47 = vld [vmem:[%s19333_s5 + $0x2720] sm:$0xff] }
 0x3f9   : > { %v1933_v15 = vld [vmem:[%s19333_s5 + $0x27a8] sm:$0xff] }
 0x3fa   : > { %9405 = vmatpush1.bf16.msra.mxu0 %v9404_v0  ;;  %v1809_v0 = vld [vmem:[%s19333_s5 + $0x23c8] sm:$0xff] }
 0x3fb   : > { %9661 = vmatpush1.bf16.msra.mxu1 %v9660_v2  ;;  %9407 = vmatprep.subr.bf16.mxu0 %v9406_v3  ;;  %v9416_v2 = vpack.c.bf16 %v1770_v49, %v1752_v46  ;;  %v9672_v3 = vpack.c.bf16 %v1772_v54, %v1754_v50  ;;  %v9674_v10 = vpack.c.bf16 %v1809_v0, %v1791_v61  ;;  %v1860_v49 = vld [vmem:[%s19333_s5 + $0x2560] sm:$0xff]  ;;  %v1878_v50 = vld [vmem:[%s19333_s5 + $0x25f0] sm:$0xff]  ;;  %v1915_v61 = vld [vmem:[%s19333_s5 + $0x2718] sm:$0xff] }
 0x3fc   : > { %9663 = vmatprep.subr.bf16.mxu1 %v9662_v9  ;;  %v1790_v9 = vld [vmem:[%s19333_s5 + $0x2330] sm:$0xff]  ;;  %v9426_v46 = vpack.c.bf16 %v1879_v42, %v1861_v41  ;;  %v1899_v0 = vld [vmem:[%s19333_s5 + $0x2698] sm:$0xff]  ;;  %v1952_v41 = vld [vmem:[%s19333_s5 + $0x2840] sm:$0xff] }
 0x3fd   : > { %v1969_v42 = vld [vmem:[%s19333_s5 + $0x28c8] sm:$0xff] }
 0x3fe   : > { %9409 = vmatpush1.bf16.msra.mxu0 %v9408_v32  ;;  %v1845_v32 = vld [vmem:[%s19333_s5 + $0x24e8] sm:$0xff] }
 0x3ff   : > { %9665 = vmatpush1.bf16.msra.mxu1 %v9664_v35  ;;  %9411 = vmatprep.subr.bf16.mxu0 %v9410_v16  ;;  %v9420_v35 = vpack.c.bf16 %v1806_v22, %v1788_v8  ;;  %v9676_v16 = vpack.c.bf16 %v1808_v13, %v1790_v9  ;;  %v9678_v39 = vpack.c.bf16 %v1845_v32, %v1827_v51  ;;  %v1896_v22 = vld [vmem:[%s19333_s5 + $0x2680] sm:$0xff]  ;;  %v1914_v9 = vld [vmem:[%s19333_s5 + $0x2710] sm:$0xff]  ;;  %v1951_v51 = vld [vmem:[%s19333_s5 + $0x2838] sm:$0xff] }
 0x400   : > { %9667 = vmatprep.subr.bf16.mxu1 %v9666_v36  ;;  %v1842_v36 = vld [vmem:[%s19333_s5 + $0x24d0] sm:$0xff]  ;;  %v9430_v8 = vpack.c.bf16 %v1915_v61, %v1897_v59  ;;  %v1935_v32 = vld [vmem:[%s19333_s5 + $0x27b8] sm:$0xff]  ;;  %v1988_v59 = vld [vmem:[%s19333_s5 + $0x2960] sm:$0xff] }
 0x401   : > { %v2005_v61 = vld [vmem:[%s19333_s5 + $0x29e8] sm:$0xff] }
 0x402   : > { %9413 = vmatpush1.bf16.msra.mxu0 %v9412_v44  ;;  %v1881_v44 = vld [vmem:[%s19333_s5 + $0x2608] sm:$0xff] }
 0x403   : > { %9669 = vmatpush1.bf16.msra.mxu1 %v9668_v45  ;;  %9415 = vmatprep.subr.bf16.mxu0 %v9414_v34  ;;  %v9424_v45 = vpack.c.bf16 %v1842_v36, %v1824_v63  ;;  %v9680_v34 = vpack.c.bf16 %v1844_v38, %v1826_v21  ;;  %v9682_v54 = vpack.c.bf16 %v1881_v44, %v1863_v43  ;;  %v1932_v63 = vld [vmem:[%s19333_s5 + $0x27a0] sm:$0xff]  ;;  %v1950_v36 = vld [vmem:[%s19333_s5 + $0x2830] sm:$0xff]  ;;  %v1987_v43 = vld [vmem:[%s19333_s5 + $0x2958] sm:$0xff] }
 0x404   : > { %9671 = vmatprep.subr.bf16.mxu1 %v9670_v53  ;;  %v1862_v53 = vld [vmem:[%s19333_s5 + $0x2570] sm:$0xff]  ;;  %v1971_v44 = vld [vmem:[%s19333_s5 + $0x28d8] sm:$0xff] }
 0x405   : > { %v1934_v21 = vld [vmem:[%s19333_s5 + $0x27b0] sm:$0xff] }
 0x406   : > { %9417 = vmatpush1.bf16.msra.mxu0 %v9416_v2  ;;  %v1917_v2 = vld [vmem:[%s19333_s5 + $0x2728] sm:$0xff] }
 0x407   : > { %9673 = vmatpush1.bf16.msra.mxu1 %v9672_v3  ;;  %9419 = vmatprep.subr.bf16.mxu0 %v9418_v7  ;;  %v9428_v3 = vpack.c.bf16 %v1878_v50, %v1860_v49  ;;  %v9684_v7 = vpack.c.bf16 %v1880_v58, %v1862_v53  ;;  %v9686_v13 = vpack.c.bf16 %v1917_v2, %v1899_v0  ;;  %v1968_v50 = vld [vmem:[%s19333_s5 + $0x28c0] sm:$0xff]  ;;  %v1986_v53 = vld [vmem:[%s19333_s5 + $0x2950] sm:$0xff]  ;;  %v2023_v0 = vld [vmem:[%s19333_s5 + $0x2a78] sm:$0xff] }
 0x408   : > { %9675 = vmatprep.subr.bf16.mxu1 %v9674_v10  ;;  %v1898_v10 = vld [vmem:[%s19333_s5 + $0x2690] sm:$0xff]  ;;  %v9438_v49 = vpack.c.bf16 %v1987_v43, %v1969_v42  ;;  %v2007_v2 = vld [vmem:[%s19333_s5 + $0x29f8] sm:$0xff]  ;;  %v2060_v42 = vld [vmem:[%s19333_s5 + $0x2ba0] sm:$0xff] }
 0x409   : > { %v2077_v43 = vld [vmem:[%s19333_s5 + $0x2c28] sm:$0xff] }
 0x40a   : > { %9421 = vmatpush1.bf16.msra.mxu0 %v9420_v35  ;;  %v1953_v35 = vld [vmem:[%s19333_s5 + $0x2848] sm:$0xff] }
 0x40b   : > { %9677 = vmatpush1.bf16.msra.mxu1 %v9676_v16  ;;  %9423 = vmatprep.subr.bf16.mxu0 %v9422_v29  ;;  %v9432_v16 = vpack.c.bf16 %v1914_v9, %v1896_v22  ;;  %v9688_v29 = vpack.c.bf16 %v1916_v47, %v1898_v10  ;;  %v9690_v38 = vpack.c.bf16 %v1953_v35, %v1935_v32  ;;  %v2004_v9 = vld [vmem:[%s19333_s5 + $0x29e0] sm:$0xff]  ;;  %v2022_v10 = vld [vmem:[%s19333_s5 + $0x2a70] sm:$0xff]  ;;  %v2059_v32 = vld [vmem:[%s19333_s5 + $0x2b98] sm:$0xff] }
 0x40c   : > { %9679 = vmatprep.subr.bf16.mxu1 %v9678_v39  ;;  %v9434_v39 = vpack.c.bf16 %v1951_v51, %v1933_v15  ;;  %v9442_v22 = vpack.c.bf16 %v2023_v0, %v2005_v61  ;;  %v2024_v15 = vld [vmem:[%s19333_s5 + $0x2a80] sm:$0xff]  ;;  %v2041_v51 = vld [vmem:[%s19333_s5 + $0x2b08] sm:$0xff]  ;;  %v2043_v35 = vld [vmem:[%s19333_s5 + $0x2b18] sm:$0xff] }
 0x40d   : > { %4342 = vmatmul.mubr.f32.vlgmr.msra.gmra.mrb[8].mxu0 %v11839_v62  ;;  %v2096_v61 = vld [vmem:[%s19333_s5 + $0x2cc0] sm:$0xff]  ;;  %v2113_v0 = vld [vmem:[%s19333_s5 + $0x2d48] sm:$0xff] }
 0x40e   : > { %4650 = vmatmul.mubr.f32.vlgmr.msra.gmra.mrb[26].mxu1 %v11839_v62  ;;  %4347 = vmatprep.mubr.f32.mxu0 %v11848_v5 }
 0x40f   : > { %9425 = vmatpush1.bf16.msra.mxu0 %v9424_v45  ;;  %4655 = vmatprep.mubr.f32.mxu1 %v11848_v5  ;;  %v1989_v45 = vld [vmem:[%s19333_s5 + $0x2968] sm:$0xff] }
 0x410   : > { %9681 = vmatpush1.bf16.msra.mxu1 %v9680_v34  ;;  %9427 = vmatprep.subr.bf16.mxu0 %v9426_v46  ;;  %v9436_v34 = vpack.c.bf16 %v1950_v36, %v1932_v63  ;;  %v9692_v46 = vpack.c.bf16 %v1952_v41, %v1934_v21  ;;  %v9694_v58 = vpack.c.bf16 %v1989_v45, %v1971_v44  ;;  %v2040_v36 = vld [vmem:[%s19333_s5 + $0x2b00] sm:$0xff]  ;;  %v2058_v21 = vld [vmem:[%s19333_s5 + $0x2b90] sm:$0xff]  ;;  %v2095_v44 = vld [vmem:[%s19333_s5 + $0x2cb8] sm:$0xff] }
 0x411   : > { %4348 = vmatmul.mubr.f32.gmra.mrb[10].mxu0 %v11872_v14  ;;  %9683 = vmatprep.subr.bf16.mxu1 %v9682_v54  ;;  %v1970_v54 = vld [vmem:[%s19333_s5 + $0x28d0] sm:$0xff]  ;;  %v9446_v63 = vpack.c.bf16 %v2059_v32, %v2041_v51  ;;  %v2079_v45 = vld [vmem:[%s19333_s5 + $0x2c38] sm:$0xff]  ;;  %v2132_v51 = vld [vmem:[%s19333_s5 + $0x2de0] sm:$0xff] }
 0x412   : > { %4656 = vmatmul.mubr.f32.gmra.mrb[28].mxu1 %v11872_v14  ;;  %4418 = vmatprep.mubr.f32.mxu0 %v11888_v33  ;;  %v2149_v32 = vld [vmem:[%s19333_s5 + $0x2e68] sm:$0xff] }
 0x413   : > { %9429 = vmatpush1.bf16.msra.mxu0 %v9428_v3  ;;  %4726 = vmatprep.mubr.f32.mxu1 %v11888_v33  ;;  %v2025_v3 = vld [vmem:[%s19333_s5 + $0x2a88] sm:$0xff] }
 0x414   : > { %9685 = vmatpush1.bf16.msra.mxu1 %v9684_v7  ;;  %9431 = vmatprep.subr.bf16.mxu0 %v9430_v8  ;;  %v9440_v7 = vpack.c.bf16 %v1986_v53, %v1968_v50  ;;  %v9696_v8 = vpack.c.bf16 %v1988_v59, %v1970_v54  ;;  %v9698_v47 = vpack.c.bf16 %v2025_v3, %v2007_v2  ;;  %v2076_v53 = vld [vmem:[%s19333_s5 + $0x2c20] sm:$0xff]  ;;  %v2094_v54 = vld [vmem:[%s19333_s5 + $0x2cb0] sm:$0xff]  ;;  %v2131_v2 = vld [vmem:[%s19333_s5 + $0x2dd8] sm:$0xff] }
 0x415   : > { %9687 = vmatprep.subr.bf16.mxu1 %v9686_v13  ;;  %v2006_v13 = vld [vmem:[%s19333_s5 + $0x29f0] sm:$0xff]  ;;  %v9450_v50 = vpack.c.bf16 %v2095_v44, %v2077_v43  ;;  %v2115_v3 = vld [vmem:[%s19333_s5 + $0x2d58] sm:$0xff]  ;;  %v2168_v43 = vld [vmem:[%s19333_s5 + $0x2f00] sm:$0xff] }
 0x416   : > { %v2185_v44 = vld [vmem:[%s19333_s5 + $0x2f88] sm:$0xff] }
 0x417   : > { %9433 = vmatpush1.bf16.msra.mxu0 %v9432_v16  ;;  %v2061_v16 = vld [vmem:[%s19333_s5 + $0x2ba8] sm:$0xff] }
 0x418   : > { %9689 = vmatpush1.bf16.msra.mxu1 %v9688_v29  ;;  %9435 = vmatprep.subr.bf16.mxu0 %v9434_v39  ;;  %v9444_v29 = vpack.c.bf16 %v2022_v10, %v2004_v9  ;;  %v9700_v39 = vpack.c.bf16 %v2024_v15, %v2006_v13  ;;  %v9702_v41 = vpack.c.bf16 %v2061_v16, %v2043_v35  ;;  %v2112_v10 = vld [vmem:[%s19333_s5 + $0x2d40] sm:$0xff]  ;;  %v2130_v13 = vld [vmem:[%s19333_s5 + $0x2dd0] sm:$0xff]  ;;  %v2167_v35 = vld [vmem:[%s19333_s5 + $0x2ef8] sm:$0xff] }
 0x419   : > { %9691 = vmatprep.subr.bf16.mxu1 %v9690_v38  ;;  %v2042_v38 = vld [vmem:[%s19333_s5 + $0x2b10] sm:$0xff]  ;;  %v9454_v9 = vpack.c.bf16 %v2131_v2, %v2113_v0  ;;  %v2151_v16 = vld [vmem:[%s19333_s5 + $0x2e78] sm:$0xff]  ;;  %v2204_v0 = vld [vmem:[%s19333_s5 + $0x3020] sm:$0xff] }
 0x41a   : > { %v2221_v2 = vld [vmem:[%s19333_s5 + $0x30a8] sm:$0xff] }
 0x41b   : > { %9437 = vmatpush1.bf16.msra.mxu0 %v9436_v34  ;;  %v2097_v34 = vld [vmem:[%s19333_s5 + $0x2cc8] sm:$0xff] }
 0x41c   : > { %9693 = vmatpush1.bf16.msra.mxu1 %v9692_v46  ;;  %9439 = vmatprep.subr.bf16.mxu0 %v9438_v49  ;;  %v9448_v46 = vpack.c.bf16 %v2058_v21, %v2040_v36  ;;  %v9704_v49 = vpack.c.bf16 %v2060_v42, %v2042_v38  ;;  %v9706_v59 = vpack.c.bf16 %v2097_v34, %v2079_v45  ;;  %v2148_v21 = vld [vmem:[%s19333_s5 + $0x2e60] sm:$0xff]  ;;  %v2166_v38 = vld [vmem:[%s19333_s5 + $0x2ef0] sm:$0xff]  ;;  %v2203_v45 = vld [vmem:[%s19333_s5 + $0x3018] sm:$0xff] }
 0x41d   : > { %9695 = vmatprep.subr.bf16.mxu1 %v9694_v58  ;;  %v2078_v58 = vld [vmem:[%s19333_s5 + $0x2c30] sm:$0xff]  ;;  %v9458_v36 = vpack.c.bf16 %v2167_v35, %v2149_v32  ;;  %v2187_v34 = vld [vmem:[%s19333_s5 + $0x2f98] sm:$0xff]  ;;  %v2240_v32 = vld [vmem:[%s19333_s5 + $0x3140] sm:$0xff] }
 0x41e   : > { %v2257_v35 = vld [vmem:[%s19333_s5 + $0x31c8] sm:$0xff] }
 0x41f   : > { %9441 = vmatpush1.bf16.msra.mxu0 %v9440_v7  ;;  %v2133_v7 = vld [vmem:[%s19333_s5 + $0x2de8] sm:$0xff] }
 0x420   : > { %9697 = vmatpush1.bf16.msra.mxu1 %v9696_v8  ;;  %9443 = vmatprep.subr.bf16.mxu0 %v9442_v22  ;;  %v9452_v8 = vpack.c.bf16 %v2094_v54, %v2076_v53  ;;  %v9708_v22 = vpack.c.bf16 %v2096_v61, %v2078_v58  ;;  %v9710_v15 = vpack.c.bf16 %v2133_v7, %v2115_v3  ;;  %v2184_v54 = vld [vmem:[%s19333_s5 + $0x2f80] sm:$0xff]  ;;  %v2202_v58 = vld [vmem:[%s19333_s5 + $0x3010] sm:$0xff]  ;;  %v2239_v3 = vld [vmem:[%s19333_s5 + $0x3138] sm:$0xff] }
 0x421   : > { %9699 = vmatprep.subr.bf16.mxu1 %v9698_v47  ;;  %v2114_v47 = vld [vmem:[%s19333_s5 + $0x2d50] sm:$0xff]  ;;  %v9462_v53 = vpack.c.bf16 %v2203_v45, %v2185_v44  ;;  %v2223_v7 = vld [vmem:[%s19333_s5 + $0x30b8] sm:$0xff]  ;;  %v2276_v44 = vld [vmem:[%s19333_s5 + $0x3260] sm:$0xff] }
 0x422   : > { %v2293_v45 = vld [vmem:[%s19333_s5 + $0x32e8] sm:$0xff] }
 0x423   : > { %9445 = vmatpush1.bf16.msra.mxu0 %v9444_v29  ;;  %v2169_v29 = vld [vmem:[%s19333_s5 + $0x2f08] sm:$0xff] }
 0x424   : > { %9701 = vmatpush1.bf16.msra.mxu1 %v9700_v39  ;;  %9447 = vmatprep.subr.bf16.mxu0 %v9446_v63  ;;  %v9456_v39 = vpack.c.bf16 %v2130_v13, %v2112_v10  ;;  %v9712_v63 = vpack.c.bf16 %v2132_v51, %v2114_v47  ;;  %v9714_v42 = vpack.c.bf16 %v2169_v29, %v2151_v16  ;;  %v2220_v13 = vld [vmem:[%s19333_s5 + $0x30a0] sm:$0xff]  ;;  %v2238_v47 = vld [vmem:[%s19333_s5 + $0x3130] sm:$0xff]  ;;  %v2275_v16 = vld [vmem:[%s19333_s5 + $0x3258] sm:$0xff] }
 0x425   : > { %9703 = vmatprep.subr.bf16.mxu1 %v9702_v41  ;;  %v2150_v41 = vld [vmem:[%s19333_s5 + $0x2e70] sm:$0xff]  ;;  %v9466_v10 = vpack.c.bf16 %v2239_v3, %v2221_v2  ;;  %v2259_v29 = vld [vmem:[%s19333_s5 + $0x31d8] sm:$0xff]  ;;  %v2312_v2 = vld [vmem:[%s19333_s5 + $0x3380] sm:$0xff] }
 0x426   : > { %v2329_v3 = vld [vmem:[%s19333_s5 + $0x3408] sm:$0xff] }
 0x427   : > { %9449 = vmatpush1.bf16.msra.mxu0 %v9448_v46  ;;  %v2205_v46 = vld [vmem:[%s19333_s5 + $0x3028] sm:$0xff] }
 0x428   : > { %9705 = vmatpush1.bf16.msra.mxu1 %v9704_v49  ;;  %9451 = vmatprep.subr.bf16.mxu0 %v9450_v50  ;;  %v9460_v49 = vpack.c.bf16 %v2166_v38, %v2148_v21  ;;  %v9716_v50 = vpack.c.bf16 %v2168_v43, %v2150_v41  ;;  %v9718_v61 = vpack.c.bf16 %v2205_v46, %v2187_v34  ;;  %v2256_v38 = vld [vmem:[%s19333_s5 + $0x31c0] sm:$0xff]  ;;  %v2274_v41 = vld [vmem:[%s19333_s5 + $0x3250] sm:$0xff]  ;;  %v2311_v34 = vld [vmem:[%s19333_s5 + $0x3378] sm:$0xff] }
 0x429   : > { %9707 = vmatprep.subr.bf16.mxu1 %v9706_v59  ;;  %v2186_v59 = vld [vmem:[%s19333_s5 + $0x2f90] sm:$0xff]  ;;  %v9470_v21 = vpack.c.bf16 %v2275_v16, %v2257_v35  ;;  %v2295_v46 = vld [vmem:[%s19333_s5 + $0x32f8] sm:$0xff]  ;;  %v2348_v35 = vld [vmem:[%s19333_s5 + $0x34a0] sm:$0xff] }
 0x42a   : > { %v2365_v16 = vld [vmem:[%s19333_s5 + $0x3528] sm:$0xff] }
 0x42b   : > { %9453 = vmatpush1.bf16.msra.mxu0 %v9452_v8  ;;  %v2241_v8 = vld [vmem:[%s19333_s5 + $0x3148] sm:$0xff] }
 0x42c   : > { %9709 = vmatpush1.bf16.msra.mxu1 %v9708_v22  ;;  %9455 = vmatprep.subr.bf16.mxu0 %v9454_v9  ;;  %v9464_v22 = vpack.c.bf16 %v2202_v58, %v2184_v54  ;;  %v9720_v9 = vpack.c.bf16 %v2204_v0, %v2186_v59  ;;  %v9722_v51 = vpack.c.bf16 %v2241_v8, %v2223_v7  ;;  %v2292_v58 = vld [vmem:[%s19333_s5 + $0x32e0] sm:$0xff]  ;;  %v2310_v59 = vld [vmem:[%s19333_s5 + $0x3370] sm:$0xff]  ;;  %v2347_v7 = vld [vmem:[%s19333_s5 + $0x3498] sm:$0xff] }
 0x42d   : > { %9711 = vmatprep.subr.bf16.mxu1 %v9710_v15  ;;  %v2222_v15 = vld [vmem:[%s19333_s5 + $0x30b0] sm:$0xff]  ;;  %v9474_v54 = vpack.c.bf16 %v2311_v34, %v2293_v45  ;;  %v2331_v8 = vld [vmem:[%s19333_s5 + $0x3418] sm:$0xff]  ;;  %v2384_v45 = vld [vmem:[%s19333_s5 + $0x35c0] sm:$0xff] }
 0x42e   : > { %v2401_v34 = vld [vmem:[%s19333_s5 + $0x3648] sm:$0xff] }
 0x42f   : > { %9457 = vmatpush1.bf16.msra.mxu0 %v9456_v39  ;;  %v2277_v39 = vld [vmem:[%s19333_s5 + $0x3268] sm:$0xff] }
 0x430   : > { %9713 = vmatpush1.bf16.msra.mxu1 %v9712_v63  ;;  %9459 = vmatprep.subr.bf16.mxu0 %v9458_v36  ;;  %v9468_v63 = vpack.c.bf16 %v2238_v47, %v2220_v13  ;;  %v9724_v36 = vpack.c.bf16 %v2240_v32, %v2222_v15  ;;  %v9726_v43 = vpack.c.bf16 %v2277_v39, %v2259_v29  ;;  %v2328_v47 = vld [vmem:[%s19333_s5 + $0x3400] sm:$0xff]  ;;  %v2346_v15 = vld [vmem:[%s19333_s5 + $0x3490] sm:$0xff]  ;;  %v2383_v29 = vld [vmem:[%s19333_s5 + $0x35b8] sm:$0xff] }
 0x431   : > { %9715 = vmatprep.subr.bf16.mxu1 %v9714_v42  ;;  %v2258_v42 = vld [vmem:[%s19333_s5 + $0x31d0] sm:$0xff]  ;;  %v9478_v13 = vpack.c.bf16 %v2347_v7, %v2329_v3  ;;  %v2367_v39 = vld [vmem:[%s19333_s5 + $0x3538] sm:$0xff]  ;;  %v2420_v3 = vld [vmem:[%s19333_s5 + $0x36e0] sm:$0xff] }
 0x432   : > { %v2437_v7 = vld [vmem:[%s19333_s5 + $0x3768] sm:$0xff] }
 0x433   : > { %9461 = vmatpush1.bf16.msra.mxu0 %v9460_v49  ;;  %v2313_v49 = vld [vmem:[%s19333_s5 + $0x3388] sm:$0xff] }
 0x434   : > { %9717 = vmatpush1.bf16.msra.mxu1 %v9716_v50  ;;  %9463 = vmatprep.subr.bf16.mxu0 %v9462_v53  ;;  %v9472_v50 = vpack.c.bf16 %v2274_v41, %v2256_v38  ;;  %v9728_v53 = vpack.c.bf16 %v2276_v44, %v2258_v42  ;;  %v9730_v0 = vpack.c.bf16 %v2313_v49, %v2295_v46  ;;  %v2364_v41 = vld [vmem:[%s19333_s5 + $0x3520] sm:$0xff]  ;;  %v2382_v42 = vld [vmem:[%s19333_s5 + $0x35b0] sm:$0xff]  ;;  %v2419_v46 = vld [vmem:[%s19333_s5 + $0x36d8] sm:$0xff] }
 0x435   : > { %9719 = vmatprep.subr.bf16.mxu1 %v9718_v61  ;;  %v2294_v61 = vld [vmem:[%s19333_s5 + $0x32f0] sm:$0xff]  ;;  %v9482_v38 = vpack.c.bf16 %v2383_v29, %v2365_v16  ;;  %v2403_v49 = vld [vmem:[%s19333_s5 + $0x3658] sm:$0xff]  ;;  %v2456_v16 = vld [vmem:[%s19333_s5 + $0x3800] sm:$0xff] }
 0x436   : > { %v2473_v29 = vld [vmem:[%s19333_s5 + $0x3888] sm:$0xff] }
 0x437   : > { %9465 = vmatpush1.bf16.msra.mxu0 %v9464_v22  ;;  %v2349_v22 = vld [vmem:[%s19333_s5 + $0x34a8] sm:$0xff] }
 0x438   : > { %9721 = vmatpush1.bf16.msra.mxu1 %v9720_v9  ;;  %9467 = vmatprep.subr.bf16.mxu0 %v9466_v10  ;;  %v9476_v9 = vpack.c.bf16 %v2310_v59, %v2292_v58  ;;  %v9732_v10 = vpack.c.bf16 %v2312_v2, %v2294_v61  ;;  %v9734_v32 = vpack.c.bf16 %v2349_v22, %v2331_v8  ;;  %v2400_v61 = vld [vmem:[%s19333_s5 + $0x3640] sm:$0xff]  ;;  %v2402_v2 = vld [vmem:[%s19333_s5 + $0x3650] sm:$0xff]  ;;  %v2455_v8 = vld [vmem:[%s19333_s5 + $0x37f8] sm:$0xff] }
 0x439   : > { %9723 = vmatprep.subr.bf16.mxu1 %v9722_v51  ;;  %v2330_v51 = vld [vmem:[%s19333_s5 + $0x3410] sm:$0xff]  ;;  %v9486_v58 = vpack.c.bf16 %v2419_v46, %v2401_v34  ;;  %v2439_v22 = vld [vmem:[%s19333_s5 + $0x3778] sm:$0xff]  ;;  %v2492_v34 = vld [vmem:[%s19333_s5 + $0x3920] sm:$0xff] }
 0x43a   : > { %v2509_v46 = vld [vmem:[%s19333_s5 + $0x39a8] sm:$0xff] }
 0x43b   : > { %9469 = vmatpush1.bf16.msra.mxu0 %v9468_v63  ;;  %v2385_v63 = vld [vmem:[%s19333_s5 + $0x35c8] sm:$0xff] }
 0x43c   : > { %9725 = vmatpush1.bf16.msra.mxu1 %v9724_v36  ;;  %9471 = vmatprep.subr.bf16.mxu0 %v9470_v21  ;;  %v9480_v36 = vpack.c.bf16 %v2346_v15, %v2328_v47  ;;  %v9736_v21 = vpack.c.bf16 %v2348_v35, %v2330_v51  ;;  %v9738_v44 = vpack.c.bf16 %v2385_v63, %v2367_v39  ;;  %v2436_v15 = vld [vmem:[%s19333_s5 + $0x3760] sm:$0xff]  ;;  %v2454_v51 = vld [vmem:[%s19333_s5 + $0x37f0] sm:$0xff]  ;;  %v2491_v39 = vld [vmem:[%s19333_s5 + $0x3918] sm:$0xff] }
 0x43d   : > { %9727 = vmatprep.subr.bf16.mxu1 %v9726_v43  ;;  %v2366_v43 = vld [vmem:[%s19333_s5 + $0x3530] sm:$0xff]  ;;  %v9490_v47 = vpack.c.bf16 %v2455_v8, %v2437_v7  ;;  %v2475_v63 = vld [vmem:[%s19333_s5 + $0x3898] sm:$0xff]  ;;  %v2528_v7 = vld [vmem:[%s19333_s5 + $0x3a40] sm:$0xff] }
 0x43e   : > { %v2545_v8 = vld [vmem:[%s19333_s5 + $0x3ac8] sm:$0xff] }
 0x43f   : > { %9473 = vmatpush1.bf16.msra.mxu0 %v9472_v50  ;;  %v2421_v50 = vld [vmem:[%s19333_s5 + $0x36e8] sm:$0xff] }
 0x440   : > { %9729 = vmatpush1.bf16.msra.mxu1 %v9728_v53  ;;  %9475 = vmatprep.subr.bf16.mxu0 %v9474_v54  ;;  %v9484_v53 = vpack.c.bf16 %v2382_v42, %v2364_v41  ;;  %v9740_v54 = vpack.c.bf16 %v2384_v45, %v2366_v43  ;;  %v9742_v59 = vpack.c.bf16 %v2421_v50, %v2403_v49  ;;  %v2472_v42 = vld [vmem:[%s19333_s5 + $0x3880] sm:$0xff]  ;;  %v2490_v43 = vld [vmem:[%s19333_s5 + $0x3910] sm:$0xff]  ;;  %v2527_v49 = vld [vmem:[%s19333_s5 + $0x3a38] sm:$0xff] }
 0x441   : > { %9731 = vmatprep.subr.bf16.mxu1 %v9730_v0  ;;  %v2418_v0 = vld [vmem:[%s19333_s5 + $0x36d0] sm:$0xff]  ;;  %v9494_v41 = vpack.c.bf16 %v2491_v39, %v2473_v29  ;;  %v2511_v50 = vld [vmem:[%s19333_s5 + $0x39b8] sm:$0xff]  ;;  %v2564_v29 = vld [vmem:[%s19333_s5 + $0x3b60] sm:$0xff] }
 0x442   : > { %v2581_v39 = vld [vmem:[%s19333_s5 + $0x3be8] sm:$0xff] }
 0x443   : > { %9477 = vmatpush1.bf16.msra.mxu0 %v9476_v9  ;;  %v2457_v9 = vld [vmem:[%s19333_s5 + $0x3808] sm:$0xff] }
 0x444   : > { %9733 = vmatpush1.bf16.msra.mxu1 %v9732_v10  ;;  %9479 = vmatprep.subr.bf16.mxu0 %v9478_v13  ;;  %v9488_v10 = vpack.c.bf16 %v2418_v0, %v2400_v61  ;;  %v9744_v13 = vpack.c.bf16 %v2420_v3, %v2402_v2  ;;  %v9746_v35 = vpack.c.bf16 %v2457_v9, %v2439_v22  ;;  %v2508_v61 = vld [vmem:[%s19333_s5 + $0x39a0] sm:$0xff]  ;;  %v2526_v0 = vld [vmem:[%s19333_s5 + $0x3a30] sm:$0xff]  ;;  %v2563_v22 = vld [vmem:[%s19333_s5 + $0x3b58] sm:$0xff] }
 0x445   : > { %9735 = vmatprep.subr.bf16.mxu1 %v9734_v32  ;;  %v2438_v32 = vld [vmem:[%s19333_s5 + $0x3770] sm:$0xff]  ;;  %v2547_v9 = vld [vmem:[%s19333_s5 + $0x3ad8] sm:$0xff] }
 0x446   : > { %v2510_v2 = vld [vmem:[%s19333_s5 + $0x39b0] sm:$0xff] }
 0x447   : > { %9481 = vmatpush1.bf16.msra.mxu0 %v9480_v36  ;;  %v2493_v36 = vld [vmem:[%s19333_s5 + $0x3928] sm:$0xff] }
 0x448   : > { %9737 = vmatpush1.bf16.msra.mxu1 %v9736_v21  ;;  %9483 = vmatprep.subr.bf16.mxu0 %v9482_v38  ;;  %v9492_v21 = vpack.c.bf16 %v2454_v51, %v2436_v15  ;;  %v9748_v38 = vpack.c.bf16 %v2456_v16, %v2438_v32  ;;  %v9750_v45 = vpack.c.bf16 %v2493_v36, %v2475_v63  ;;  %v2544_v51 = vld [vmem:[%s19333_s5 + $0x3ac0] sm:$0xff]  ;;  %v2562_v32 = vld [vmem:[%s19333_s5 + $0x3b50] sm:$0xff]  ;;  %v2599_v63 = vld [vmem:[%s19333_s5 + $0x3c78] sm:$0xff] }
 0x449   : > { %9739 = vmatprep.subr.bf16.mxu1 %v9738_v44  ;;  %v2474_v44 = vld [vmem:[%s19333_s5 + $0x3890] sm:$0xff]  ;;  %v9502_v15 = vpack.c.bf16 %v2563_v22, %v2545_v8  ;;  %v2583_v36 = vld [vmem:[%s19333_s5 + $0x3bf8] sm:$0xff]  ;;  %v2616_v8 = vld [vmem:[%s19333_s5 + $0x3d00] sm:$0xff] }
 0x44a   : > { %v2634_v22 = vld [vmem:[%s19333_s5 + $0x3d90] sm:$0xff] }
 0x44b   : > { %9485 = vmatpush1.bf16.msra.mxu0 %v9484_v53  ;;  %v2529_v53 = vld [vmem:[%s19333_s5 + $0x3a48] sm:$0xff] }
 0x44c   : > { %9741 = vmatpush1.bf16.msra.mxu1 %v9740_v54  ;;  %9487 = vmatprep.subr.bf16.mxu0 %v9486_v58  ;;  %v9496_v54 = vpack.c.bf16 %v2490_v43, %v2472_v42  ;;  %v9752_v58 = vpack.c.bf16 %v2492_v34, %v2474_v44  ;;  %v9754_v3 = vpack.c.bf16 %v2529_v53, %v2511_v50  ;;  %v2580_v43 = vld [vmem:[%s19333_s5 + $0x3be0] sm:$0xff]  ;;  %v2598_v44 = vld [vmem:[%s19333_s5 + $0x3c70] sm:$0xff]  ;;  %v2617_v50 = vld [vmem:[%s19333_s5 + $0x3d08] sm:$0xff] }
 0x44d   : > { %9743 = vmatprep.subr.bf16.mxu1 %v9742_v59  ;;  %v9498_v59 = vpack.c.bf16 %v2527_v49, %v2509_v46  ;;  %v9506_v42 = vpack.c.bf16 %v2599_v63, %v2581_v39  ;;  %v2600_v49 = vld [vmem:[%s19333_s5 + $0x3c80] sm:$0xff]  ;;  %v2635_v53 = vld [vmem:[%s19333_s5 + $0x3d98] sm:$0xff]  ;;  %v2673_v39 = vld [vmem:[%s19333_s5 + $0x3ec8] sm:$0xff] }
 0x44e   : > { %4419 = vmatmul.mubr.f32.vlgmr.msra.gmra.mrb[8].mxu0 %v12247_v37  ;;  %v2694_v63 = vld [vmem:[%s19333_s5 + $0x3f70] sm:$0xff] }
 0x44f   : > { %4727 = vmatmul.mubr.f32.vlgmr.msra.gmra.mrb[26].mxu1 %v12247_v37  ;;  %4424 = vmatprep.mubr.f32.mxu0 %v12250_v12 }
 0x450   : > { %9489 = vmatpush1.bf16.msra.mxu0 %v9488_v10  ;;  %4732 = vmatprep.mubr.f32.mxu1 %v12250_v12  ;;  %v2565_v10 = vld [vmem:[%s19333_s5 + $0x3b68] sm:$0xff] }
 0x451   : > { %9745 = vmatpush1.bf16.msra.mxu1 %v9744_v13  ;;  %9491 = vmatprep.subr.bf16.mxu0 %v9490_v47  ;;  %v9500_v13 = vpack.c.bf16 %v2526_v0, %v2508_v61  ;;  %v9756_v47 = vpack.c.bf16 %v2528_v7, %v2510_v2  ;;  %v9758_v16 = vpack.c.bf16 %v2565_v10, %v2547_v9  ;;  %v2637_v61 = vld [vmem:[%s19333_s5 + $0x3da8] sm:$0xff]  ;;  %v2618_v9 = vld [vmem:[%s19333_s5 + $0x3d10] sm:$0xff] }
 0x452   : > { %4425 = vmatmul.mubr.f32.gmra.mrb[10].mxu0 %v12280_v28  ;;  %9747 = vmatprep.subr.bf16.mxu1 %v9746_v35  ;;  %v2546_v35 = vld [vmem:[%s19333_s5 + $0x3ad0] sm:$0xff]  ;;  %v9508_v2 = vpack.c.bf16 %v2598_v44, %v2580_v43  ;;  %v9510_v7 = vpack.c.bf16 %v2635_v53, %v2617_v50  ;;  %v2652_v44 = vld [vmem:[%s19333_s5 + $0x3e20] sm:$0xff]  ;;  %v2689_v53 = vld [vmem:[%s19333_s5 + $0x3f48] sm:$0xff] }
 0x453   : > { %4733 = vmatmul.mubr.f32.gmra.mrb[28].mxu1 %v12280_v28  ;;  %4495 = vmatprep.mubr.f32.mxu0 %v12287_v30  ;;  %v2672_v50 = vld [vmem:[%s19333_s5 + $0x3ec0] sm:$0xff] }
 0x454   : > { %9493 = vmatpush1.bf16.msra.mxu0 %v9492_v21  ;;  %4803 = vmatprep.mubr.f32.mxu1 %v12287_v30  ;;  %v2601_v21 = vld [vmem:[%s19333_s5 + $0x3c88] sm:$0xff] }
 0x455   : > { %9749 = vmatpush1.bf16.msra.mxu1 %v9748_v38  ;;  %9495 = vmatprep.subr.bf16.mxu0 %v9494_v41  ;;  %v9504_v38 = vpack.c.bf16 %v2562_v32, %v2544_v51  ;;  %v9760_v41 = vpack.c.bf16 %v2564_v29, %v2546_v35  ;;  %v9762_v46 = vpack.c.bf16 %v2601_v21, %v2583_v36  ;;  %v2671_v51 = vld [vmem:[%s19333_s5 + $0x3eb8] sm:$0xff] }
 0x456   : > { %9751 = vmatprep.subr.bf16.mxu1 %v9750_v45  ;;  %v2582_v45 = vld [vmem:[%s19333_s5 + $0x3bf0] sm:$0xff]  ;;  %v2655_v29 = vld [vmem:[%s19333_s5 + $0x3e38] sm:$0xff] }
 0x458   : > { %9497 = vmatpush1.bf16.msra.mxu0 %v9496_v54 }
 0x459   : > { %9753 = vmatpush1.bf16.msra.mxu1 %v9752_v58  ;;  %9499 = vmatprep.subr.bf16.mxu0 %v9498_v59  ;;  %v2619_v59 = vld [vmem:[%s19333_s5 + $0x3d18] sm:$0xff] }
 0x45a   : > { %9755 = vmatprep.subr.bf16.mxu1 %v9754_v3  ;;  %v9764_v3 = vpack.c.bf16 %v2600_v49, %v2582_v45  ;;  %v2670_v45 = vld [vmem:[%s19333_s5 + $0x3eb0] sm:$0xff]  ;;  %v9770_v49 = vpack.c.bf16 %v2673_v39, %v2655_v29  ;;  %v2743_v29 = vld [vmem:[%s19333_s5 + $0x40f8] sm:$0xff] }
 0x45b   : > { %v2727_v39 = vld [vmem:[%s19333_s5 + $0x4078] sm:$0xff] }
 0x45c   : > { %9501 = vmatpush1.bf16.msra.mxu0 %v9500_v13  ;;  %v9766_v13 = vpack.c.bf16 %v2637_v61, %v2619_v59  ;;  %v2707_v59 = vld [vmem:[%s19333_s5 + $0x3fd8] sm:$0xff] }
 0x45d   : > { %9757 = vmatpush1.bf16.msra.mxu1 %v9756_v47  ;;  %9503 = vmatprep.subr.bf16.mxu0 %v9502_v15  ;;  %v2636_v47 = vld [vmem:[%s19333_s5 + $0x3da0] sm:$0xff]  ;;  %v2653_v15 = vld [vmem:[%s19333_s5 + $0x3e28] sm:$0xff]  ;;  %v2691_v61 = vld [vmem:[%s19333_s5 + $0x3f58] sm:$0xff] }
 0x45e   : > { %9759 = vmatprep.subr.bf16.mxu1 %v9758_v16  ;;  %v15544_v34 = vpop.f32.mrb[4].mxu0  ;;  %v9514_v43 = vpack.c.bf16 %v2671_v51, %v2653_v15  ;;  %v2708_v15 = vld [vmem:[%s19333_s5 + $0x3fe0] sm:$0xff]  ;;  %v2725_v51 = vld [vmem:[%s19333_s5 + $0x4068] sm:$0xff] }
 0x45f   : > { %v15555_v54 = vpop.f32.mrb[22].mxu1  ;;  %v15557_v58 = vpop.f32.mrb[5].mxu0 }
 0x460   : > { %9505 = vmatpush1.bf16.msra.mxu0 %v9504_v38  ;;  %v15565_v0 = vpop.f32.mrb[23].mxu1  ;;  %v9512_v38 = vpack.c.bf16 %v2634_v22, %v2616_v8  ;;  %v9518_v8 = vpack.c.bf16 %v2707_v59, %v2689_v53  ;;  %v2688_v22 = vld [vmem:[%s19333_s5 + $0x3f40] sm:$0xff]  ;;  %v2761_v59 = vld [vmem:[%s19333_s5 + $0x4188] sm:$0xff] }
 0x461   : > { %9761 = vmatpush1.bf16.msra.mxu1 %v9760_v41  ;;  %9507 = vmatprep.subr.bf16.mxu0 %v9506_v42  ;;  %v9768_v42 = vpack.c.bf16 %v2636_v47, %v2618_v9  ;;  %v2706_v9 = vld [vmem:[%s19333_s5 + $0x3fd0] sm:$0xff]  ;;  %v2744_v53 = vld [vmem:[%s19333_s5 + $0x4100] sm:$0xff] }
 0x462   : > { %9763 = vmatprep.subr.bf16.mxu1 %v9762_v46  ;;  %v15576_v10 = vpop.f32.mrb[6].mxu0  ;;  %v2654_v46 = vld [vmem:[%s19333_s5 + $0x3e30] sm:$0xff] }
 0x463   : > { %v15589_v35 = vpop.f32.mrb[24].mxu1  ;;  %v15591_v16 = vpop.f32.mrb[7].mxu0 }
 0x464   : > { %9509 = vmatpush1.bf16.msra.mxu0 %v9508_v2  ;;  %v15603_v21 = vpop.f32.mrb[25].mxu1  ;;  %v2709_v2 = vld [vmem:[%s19333_s5 + $0x3fe8] sm:$0xff] }
 0x465   : > { %9765 = vmatpush1.bf16.msra.mxu1 %v9764_v3  ;;  %9511 = vmatprep.subr.bf16.mxu0 %v9510_v7  ;;  %v9516_v3 = vpack.c.bf16 %v2670_v45, %v2652_v44  ;;  %v9772_v7 = vpack.c.bf16 %v2672_v50, %v2654_v46  ;;  %v9774_v47 = vpack.c.bf16 %v2709_v2, %v2691_v61  ;;  %v2724_v45 = vld [vmem:[%s19333_s5 + $0x4060] sm:$0xff]  ;;  %v2742_v46 = vld [vmem:[%s19333_s5 + $0x40f0] sm:$0xff]  ;;  %v2779_v61 = vld [vmem:[%s19333_s5 + $0x4218] sm:$0xff] }
 0x466   : > { %9767 = vmatprep.subr.bf16.mxu1 %v9766_v13  ;;  %v2690_v13 = vld [vmem:[%s19333_s5 + $0x3f50] sm:$0xff]  ;;  %v9522_v44 = vpack.c.bf16 %v2743_v29, %v2725_v51  ;;  %v2763_v2 = vld [vmem:[%s19333_s5 + $0x4198] sm:$0xff]  ;;  %v2780_v51 = vld [vmem:[%s19333_s5 + $0x4220] sm:$0xff] }
 0x467   : > { %v2797_v29 = vld [vmem:[%s19333_s5 + $0x42a8] sm:$0xff] }
 0x468   : > { %9513 = vmatpush1.bf16.msra.mxu0 %v9512_v38  ;;  %v2745_v38 = vld [vmem:[%s19333_s5 + $0x4108] sm:$0xff] }
 0x469   : > { %9769 = vmatpush1.bf16.msra.mxu1 %v9768_v42  ;;  %9515 = vmatprep.subr.bf16.mxu0 %v9514_v43  ;;  %v9520_v42 = vpack.c.bf16 %v2706_v9, %v2688_v22  ;;  %v9776_v43 = vpack.c.bf16 %v2708_v15, %v2690_v13  ;;  %v9778_v50 = vpack.c.bf16 %v2745_v38, %v2727_v39  ;;  %v2760_v9 = vld [vmem:[%s19333_s5 + $0x4180] sm:$0xff]  ;;  %v2778_v13 = vld [vmem:[%s19333_s5 + $0x4210] sm:$0xff]  ;;  %v2815_v39 = vld [vmem:[%s19333_s5 + $0x4338] sm:$0xff] }
 0x46a   : > { %9771 = vmatprep.subr.bf16.mxu1 %v9770_v49  ;;  %v2726_v49 = vld [vmem:[%s19333_s5 + $0x4070] sm:$0xff]  ;;  %v9526_v22 = vpack.c.bf16 %v2779_v61, %v2761_v59  ;;  %v2799_v38 = vld [vmem:[%s19333_s5 + $0x42b8] sm:$0xff]  ;;  %v2816_v59 = vld [vmem:[%s19333_s5 + $0x4340] sm:$0xff] }
 0x46b   : > { %v2833_v61 = vld [vmem:[%s19333_s5 + $0x43c8] sm:$0xff] }
 0x46c   : > { %9517 = vmatpush1.bf16.msra.mxu0 %v9516_v3  ;;  %v2781_v3 = vld [vmem:[%s19333_s5 + $0x4228] sm:$0xff] }
 0x46d   : > { %9773 = vmatpush1.bf16.msra.mxu1 %v9772_v7  ;;  %9519 = vmatprep.subr.bf16.mxu0 %v9518_v8  ;;  %v9524_v7 = vpack.c.bf16 %v2742_v46, %v2724_v45  ;;  %v9780_v8 = vpack.c.bf16 %v2744_v53, %v2726_v49  ;;  %v9782_v15 = vpack.c.bf16 %v2781_v3, %v2763_v2  ;;  %v2796_v46 = vld [vmem:[%s19333_s5 + $0x42a0] sm:$0xff]  ;;  %v2814_v49 = vld [vmem:[%s19333_s5 + $0x4330] sm:$0xff]  ;;  %v2851_v2 = vld [vmem:[%s19333_s5 + $0x4458] sm:$0xff] }
 0x46e   : > { %9775 = vmatprep.subr.bf16.mxu1 %v9774_v47  ;;  %v2762_v47 = vld [vmem:[%s19333_s5 + $0x4190] sm:$0xff]  ;;  %v9530_v45 = vpack.c.bf16 %v2815_v39, %v2797_v29  ;;  %v2835_v3 = vld [vmem:[%s19333_s5 + $0x43d8] sm:$0xff]  ;;  %v2852_v29 = vld [vmem:[%s19333_s5 + $0x4460] sm:$0xff] }
 0x46f   : > { %v2869_v39 = vld [vmem:[%s19333_s5 + $0x44e8] sm:$0xff] }
 0x470   : > { %9521 = vmatpush1.bf16.msra.mxu0 %v9520_v42  ;;  %v2817_v42 = vld [vmem:[%s19333_s5 + $0x4348] sm:$0xff] }
 0x471   : > { %9777 = vmatpush1.bf16.msra.mxu1 %v9776_v43  ;;  %9523 = vmatprep.subr.bf16.mxu0 %v9522_v44  ;;  %v9528_v43 = vpack.c.bf16 %v2778_v13, %v2760_v9  ;;  %v9784_v44 = vpack.c.bf16 %v2780_v51, %v2762_v47  ;;  %v9786_v53 = vpack.c.bf16 %v2817_v42, %v2799_v38  ;;  %v2832_v13 = vld [vmem:[%s19333_s5 + $0x43c0] sm:$0xff]  ;;  %v2850_v47 = vld [vmem:[%s19333_s5 + $0x4450] sm:$0xff]  ;;  %v2887_v38 = vld [vmem:[%s19333_s5 + $0x4578] sm:$0xff] }
 0x472   : > { %9779 = vmatprep.subr.bf16.mxu1 %v9778_v50  ;;  %v2798_v50 = vld [vmem:[%s19333_s5 + $0x42b0] sm:$0xff]  ;;  %v9534_v9 = vpack.c.bf16 %v2851_v2, %v2833_v61  ;;  %v2871_v42 = vld [vmem:[%s19333_s5 + $0x44f8] sm:$0xff]  ;;  %v2888_v61 = vld [vmem:[%s19333_s5 + $0x4580] sm:$0xff] }
 0x473   : > { %v2905_v2 = vld [vmem:[%s19333_s5 + $0x4608] sm:$0xff] }
 0x474   : > { %9525 = vmatpush1.bf16.msra.mxu0 %v9524_v7  ;;  %v2853_v7 = vld [vmem:[%s19333_s5 + $0x4468] sm:$0xff] }
 0x475   : > { %9781 = vmatpush1.bf16.msra.mxu1 %v9780_v8  ;;  %9527 = vmatprep.subr.bf16.mxu0 %v9526_v22  ;;  %v9532_v8 = vpack.c.bf16 %v2814_v49, %v2796_v46  ;;  %v9788_v22 = vpack.c.bf16 %v2816_v59, %v2798_v50  ;;  %v9790_v51 = vpack.c.bf16 %v2853_v7, %v2835_v3  ;;  %v2868_v49 = vld [vmem:[%s19333_s5 + $0x44e0] sm:$0xff]  ;;  %v2886_v50 = vld [vmem:[%s19333_s5 + $0x4570] sm:$0xff]  ;;  %v2923_v3 = vld [vmem:[%s19333_s5 + $0x4698] sm:$0xff] }
 0x476   : > { %9783 = vmatprep.subr.bf16.mxu1 %v9782_v15  ;;  %v2834_v15 = vld [vmem:[%s19333_s5 + $0x43d0] sm:$0xff]  ;;  %v9538_v46 = vpack.c.bf16 %v2887_v38, %v2869_v39  ;;  %v2907_v7 = vld [vmem:[%s19333_s5 + $0x4618] sm:$0xff]  ;;  %v2924_v39 = vld [vmem:[%s19333_s5 + $0x46a0] sm:$0xff] }
 0x477   : > { %v2941_v38 = vld [vmem:[%s19333_s5 + $0x4728] sm:$0xff] }
 0x478   : > { %9529 = vmatpush1.bf16.msra.mxu0 %v9528_v43  ;;  %v2889_v43 = vld [vmem:[%s19333_s5 + $0x4588] sm:$0xff] }
 0x479   : > { %9785 = vmatpush1.bf16.msra.mxu1 %v9784_v44  ;;  %9531 = vmatprep.subr.bf16.mxu0 %v9530_v45  ;;  %v9536_v44 = vpack.c.bf16 %v2850_v47, %v2832_v13  ;;  %v9792_v45 = vpack.c.bf16 %v2852_v29, %v2834_v15  ;;  %v9794_v59 = vpack.c.bf16 %v2889_v43, %v2871_v42  ;;  %v2904_v47 = vld [vmem:[%s19333_s5 + $0x4600] sm:$0xff]  ;;  %v2922_v15 = vld [vmem:[%s19333_s5 + $0x4690] sm:$0xff]  ;;  %v2959_v42 = vld [vmem:[%s19333_s5 + $0x47b8] sm:$0xff] }
 0x47a   : > { %9787 = vmatprep.subr.bf16.mxu1 %v9786_v53  ;;  %v2870_v53 = vld [vmem:[%s19333_s5 + $0x44f0] sm:$0xff]  ;;  %v9542_v13 = vpack.c.bf16 %v2923_v3, %v2905_v2  ;;  %v2943_v43 = vld [vmem:[%s19333_s5 + $0x4738] sm:$0xff]  ;;  %v2960_v2 = vld [vmem:[%s19333_s5 + $0x47c0] sm:$0xff] }
 0x47b   : > { %v677_v3 = vld [vmem:[%s19333_s5 + $0x68] sm:$0xff] }
 0x47c   : > { %9533 = vmatpush1.bf16.msra.mxu0 %v9532_v8  ;;  %v2925_v8 = vld [vmem:[%s19333_s5 + $0x46a8] sm:$0xff] }
 0x47d   : > { %9789 = vmatpush1.bf16.msra.mxu1 %v9788_v22  ;;  %9535 = vmatprep.subr.bf16.mxu0 %v9534_v9  ;;  %v9540_v22 = vpack.c.bf16 %v2886_v50, %v2868_v49  ;;  %v9796_v9 = vpack.c.bf16 %v2888_v61, %v2870_v53  ;;  %v9798_v29 = vpack.c.bf16 %v2925_v8, %v2907_v7  ;;  %v2940_v50 = vld [vmem:[%s19333_s5 + $0x4720] sm:$0xff]  ;;  %v2958_v53 = vld [vmem:[%s19333_s5 + $0x47b0] sm:$0xff]  ;;  %v695_v7 = vld [vmem:[%s19333_s5 + $0xf8] sm:$0xff] }
 0x47e   : > { %9791 = vmatprep.subr.bf16.mxu1 %v9790_v51  ;;  %v2906_v51 = vld [vmem:[%s19333_s5 + $0x4610] sm:$0xff]  ;;  %v9546_v49 = vpack.c.bf16 %v2959_v42, %v2941_v38  ;;  %v679_v8 = vld [vmem:[%s19333_s5 + $0x78] sm:$0xff]  ;;  %v696_v38 = vld [vmem:[%s19333_s5 + $0x100] sm:$0xff] }
 0x47f   : > { %v713_v42 = vld [vmem:[%s19333_s5 + $0x188] sm:$0xff] }
 0x480   : > { %9537 = vmatpush1.bf16.msra.mxu0 %v9536_v44  ;;  %v2961_v44 = vld [vmem:[%s19333_s5 + $0x47c8] sm:$0xff] }
 0x481   : > { %9793 = vmatpush1.bf16.msra.mxu1 %v9792_v45  ;;  %9539 = vmatprep.subr.bf16.mxu0 %v9538_v46  ;;  %v9544_v45 = vpack.c.bf16 %v2922_v15, %v2904_v47  ;;  %v9800_v46 = vpack.c.bf16 %v2924_v39, %v2906_v51  ;;  %v9802_v61 = vpack.c.bf16 %v2961_v44, %v2943_v43  ;;  %v676_v51 = vld [vmem:[%s19333_s5 + $0x60] sm:$0xff]  ;;  %v678_v39 = vld [vmem:[%s19333_s5 + $0x70] sm:$0xff]  ;;  %v731_v43 = vld [vmem:[%s19333_s5 + $0x218] sm:$0xff] }
 0x482   : > { %9795 = vmatprep.subr.bf16.mxu1 %v9794_v59  ;;  %v2942_v59 = vld [vmem:[%s19333_s5 + $0x4730] sm:$0xff]  ;;  %v9806_v47 = vpack.c.bf16 %v695_v7, %v677_v3  ;;  %v715_v44 = vld [vmem:[%s19333_s5 + $0x198] sm:$0xff]  ;;  %v732_v3 = vld [vmem:[%s19333_s5 + $0x220] sm:$0xff] }
 0x483   : > { %v749_v7 = vld [vmem:[%s19333_s5 + $0x2a8] sm:$0xff] }
 0x484   : > { %9541 = vmatpush1.bf16.msra.mxu0 %v9540_v22  ;;  %v697_v22 = vld [vmem:[%s19333_s5 + $0x108] sm:$0xff] }
 0x485   : > { %9797 = vmatpush1.bf16.msra.mxu1 %v9796_v9  ;;  %9543 = vmatprep.subr.bf16.mxu0 %v9542_v13  ;;  %v9548_v9 = vpack.c.bf16 %v2958_v53, %v2940_v50  ;;  %v9804_v13 = vpack.c.bf16 %v2960_v2, %v2942_v59  ;;  %v10062_v15 = vpack.c.bf16 %v697_v22, %v679_v8  ;;  %v712_v53 = vld [vmem:[%s19333_s5 + $0x180] sm:$0xff]  ;;  %v730_v59 = vld [vmem:[%s19333_s5 + $0x210] sm:$0xff]  ;;  %v767_v8 = vld [vmem:[%s19333_s5 + $0x338] sm:$0xff] }
 0x486   : > { %9799 = vmatprep.subr.bf16.mxu1 %v9798_v29  ;;  %v694_v29 = vld [vmem:[%s19333_s5 + $0xf0] sm:$0xff]  ;;  %v9810_v50 = vpack.c.bf16 %v731_v43, %v713_v42  ;;  %v751_v22 = vld [vmem:[%s19333_s5 + $0x2b8] sm:$0xff]  ;;  %v768_v42 = vld [vmem:[%s19333_s5 + $0x340] sm:$0xff] }
 0x487   : > { %v785_v43 = vld [vmem:[%s19333_s5 + $0x3c8] sm:$0xff] }
 0x488   : > { %9545 = vmatpush1.bf16.msra.mxu0 %v9544_v45  ;;  %v733_v45 = vld [vmem:[%s19333_s5 + $0x228] sm:$0xff] }
 0x489   : > { %9801 = vmatpush1.bf16.msra.mxu1 %v9800_v46  ;;  %9547 = vmatprep.subr.bf16.mxu0 %v9546_v49  ;;  %v9808_v46 = vpack.c.bf16 %v694_v29, %v676_v51  ;;  %v10064_v49 = vpack.c.bf16 %v696_v38, %v678_v39  ;;  %v10066_v2 = vpack.c.bf16 %v733_v45, %v715_v44  ;;  %v748_v51 = vld [vmem:[%s19333_s5 + $0x2a0] sm:$0xff]  ;;  %v766_v29 = vld [vmem:[%s19333_s5 + $0x330] sm:$0xff]  ;;  %v803_v44 = vld [vmem:[%s19333_s5 + $0x458] sm:$0xff] }
 0x48a   : > { %9803 = vmatprep.subr.bf16.mxu1 %v9802_v61  ;;  %v714_v61 = vld [vmem:[%s19333_s5 + $0x190] sm:$0xff]  ;;  %v787_v45 = vld [vmem:[%s19333_s5 + $0x3d8] sm:$0xff] }
 0x48b   : > { %v750_v39 = vld [vmem:[%s19333_s5 + $0x2b0] sm:$0xff] }
 0x48c   : > { %9549 = vmatpush1.bf16.msra.mxu0 %v9548_v9  ;;  %v769_v9 = vld [vmem:[%s19333_s5 + $0x348] sm:$0xff] }
 0x48d   : > { %9805 = vmatpush1.bf16.msra.mxu1 %v9804_v13  ;;  %9807 = vmatprep.subr.bf16.mxu0 %v9806_v47  ;;  %v9812_v13 = vpack.c.bf16 %v730_v59, %v712_v53  ;;  %v10068_v47 = vpack.c.bf16 %v732_v3, %v714_v61  ;;  %v10070_v38 = vpack.c.bf16 %v769_v9, %v751_v22  ;;  %v784_v59 = vld [vmem:[%s19333_s5 + $0x3c0] sm:$0xff]  ;;  %v802_v61 = vld [vmem:[%s19333_s5 + $0x450] sm:$0xff]  ;;  %v839_v22 = vld [vmem:[%s19333_s5 + $0x578] sm:$0xff] }
 0x48e   : > { %10063 = vmatprep.subr.bf16.mxu1 %v10062_v15  ;;  %v9814_v15 = vpack.c.bf16 %v767_v8, %v749_v7  ;;  %v9818_v53 = vpack.c.bf16 %v803_v44, %v785_v43  ;;  %v804_v7 = vld [vmem:[%s19333_s5 + $0x460] sm:$0xff]  ;;  %v821_v8 = vld [vmem:[%s19333_s5 + $0x4e8] sm:$0xff]  ;;  %v823_v9 = vld [vmem:[%s19333_s5 + $0x4f8] sm:$0xff] }
 0x48f   : > { %4496 = vmatmul.mubr.f32.vlgmr.msra.gmra.mrb[8].mxu0 %v12655_v24  ;;  %v840_v43 = vld [vmem:[%s19333_s5 + $0x580] sm:$0xff]  ;;  %v857_v44 = vld [vmem:[%s19333_s5 + $0x608] sm:$0xff] }
 0x490   : > { %4804 = vmatmul.mubr.f32.vlgmr.msra.gmra.mrb[26].mxu1 %v12655_v24  ;;  %4501 = vmatprep.mubr.f32.mxu0 %v12658_v26 }
 0x491   : > { %4809 = vmatprep.mubr.f32.mxu1 %v12658_v26  ;;  %9809 = vmatpush1.bf16.msra.mxu0 %v9808_v46  ;;  %v805_v46 = vld [vmem:[%s19333_s5 + $0x468] sm:$0xff] }
 0x492   : > { %10065 = vmatpush1.bf16.msra.mxu1 %v10064_v49  ;;  %9811 = vmatprep.subr.bf16.mxu0 %v9810_v50  ;;  %v9816_v49 = vpack.c.bf16 %v766_v29, %v748_v51  ;;  %v10072_v50 = vpack.c.bf16 %v768_v42, %v750_v39  ;;  %v10074_v3 = vpack.c.bf16 %v805_v46, %v787_v45  ;;  %v820_v29 = vld [vmem:[%s19333_s5 + $0x4e0] sm:$0xff]  ;;  %v838_v39 = vld [vmem:[%s19333_s5 + $0x570] sm:$0xff]  ;;  %v875_v45 = vld [vmem:[%s19333_s5 + $0x698] sm:$0xff] }
 0x493   : > { %4502 = vmatmul.mubr.f32.gmra.mrb[10].mxu0 %v12688_v40  ;;  %10067 = vmatprep.subr.bf16.mxu1 %v10066_v2  ;;  %v786_v2 = vld [vmem:[%s19333_s5 + $0x3d0] sm:$0xff]  ;;  %v9822_v51 = vpack.c.bf16 %v839_v22, %v821_v8  ;;  %v859_v46 = vld [vmem:[%s19333_s5 + $0x618] sm:$0xff]  ;;  %v876_v8 = vld [vmem:[%s19333_s5 + $0x6a0] sm:$0xff] }
 0x494   : > { %4810 = vmatmul.mubr.f32.gmra.mrb[28].mxu1 %v12688_v40  ;;  %4880 = vmatprep.mubr.f32.mxu0 %v11408_v52  ;;  %v893_v22 = vld [vmem:[%s19333_s5 + $0x728] sm:$0xff] }
 0x495   : > { %9813 = vmatpush1.bf16.msra.mxu0 %v9812_v13  ;;  %5188 = vmatprep.mubr.f32.mxu1 %v11408_v52  ;;  %v841_v13 = vld [vmem:[%s19333_s5 + $0x588] sm:$0xff] }
 0x496   : > { %10069 = vmatpush1.bf16.msra.mxu1 %v10068_v47  ;;  %9815 = vmatprep.subr.bf16.mxu0 %v9814_v15  ;;  %v9820_v47 = vpack.c.bf16 %v802_v61, %v784_v59  ;;  %v10076_v15 = vpack.c.bf16 %v804_v7, %v786_v2  ;;  %v10078_v42 = vpack.c.bf16 %v841_v13, %v823_v9  ;;  %v856_v61 = vld [vmem:[%s19333_s5 + $0x600] sm:$0xff]  ;;  %v874_v2 = vld [vmem:[%s19333_s5 + $0x690] sm:$0xff]  ;;  %v911_v9 = vld [vmem:[%s19333_s5 + $0x7b8] sm:$0xff] }
 0x497   : > { %10071 = vmatprep.subr.bf16.mxu1 %v10070_v38  ;;  %v822_v38 = vld [vmem:[%s19333_s5 + $0x4f0] sm:$0xff]  ;;  %v9826_v59 = vpack.c.bf16 %v875_v45, %v857_v44  ;;  %v895_v13 = vld [vmem:[%s19333_s5 + $0x738] sm:$0xff]  ;;  %v912_v44 = vld [vmem:[%s19333_s5 + $0x7c0] sm:$0xff] }
 0x498   : > { %v929_v45 = vld [vmem:[%s19333_s5 + $0x848] sm:$0xff] }
 0x499   : > { %9817 = vmatpush1.bf16.msra.mxu0 %v9816_v49  ;;  %v877_v49 = vld [vmem:[%s19333_s5 + $0x6a8] sm:$0xff] }
 0x49a   : > { %10073 = vmatpush1.bf16.msra.mxu1 %v10072_v50  ;;  %9819 = vmatprep.subr.bf16.mxu0 %v9818_v53  ;;  %v9824_v50 = vpack.c.bf16 %v838_v39, %v820_v29  ;;  %v10080_v53 = vpack.c.bf16 %v840_v43, %v822_v38  ;;  %v10082_v7 = vpack.c.bf16 %v877_v49, %v859_v46  ;;  %v892_v39 = vld [vmem:[%s19333_s5 + $0x720] sm:$0xff]  ;;  %v910_v38 = vld [vmem:[%s19333_s5 + $0x7b0] sm:$0xff]  ;;  %v947_v46 = vld [vmem:[%s19333_s5 + $0x8d8] sm:$0xff] }
 0x49b   : > { %10075 = vmatprep.subr.bf16.mxu1 %v10074_v3  ;;  %v858_v3 = vld [vmem:[%s19333_s5 + $0x610] sm:$0xff]  ;;  %v9830_v29 = vpack.c.bf16 %v911_v9, %v893_v22  ;;  %v931_v49 = vld [vmem:[%s19333_s5 + $0x858] sm:$0xff]  ;;  %v948_v22 = vld [vmem:[%s19333_s5 + $0x8e0] sm:$0xff] }
 0x49c   : > { %v965_v9 = vld [vmem:[%s19333_s5 + $0x968] sm:$0xff] }
 0x49d   : > { %9821 = vmatpush1.bf16.msra.mxu0 %v9820_v47  ;;  %v913_v47 = vld [vmem:[%s19333_s5 + $0x7c8] sm:$0xff] }
 0x49e   : > { %10077 = vmatpush1.bf16.msra.mxu1 %v10076_v15  ;;  %9823 = vmatprep.subr.bf16.mxu0 %v9822_v51  ;;  %v9828_v15 = vpack.c.bf16 %v874_v2, %v856_v61  ;;  %v10084_v51 = vpack.c.bf16 %v876_v8, %v858_v3  ;;  %v10086_v43 = vpack.c.bf16 %v913_v47, %v895_v13  ;;  %v928_v2 = vld [vmem:[%s19333_s5 + $0x840] sm:$0xff]  ;;  %v946_v3 = vld [vmem:[%s19333_s5 + $0x8d0] sm:$0xff]  ;;  %v983_v13 = vld [vmem:[%s19333_s5 + $0x9f8] sm:$0xff] }
 0x49f   : > { %10079 = vmatprep.subr.bf16.mxu1 %v10078_v42  ;;  %v894_v42 = vld [vmem:[%s19333_s5 + $0x730] sm:$0xff]  ;;  %v9834_v61 = vpack.c.bf16 %v947_v46, %v929_v45  ;;  %v967_v47 = vld [vmem:[%s19333_s5 + $0x978] sm:$0xff]  ;;  %v984_v45 = vld [vmem:[%s19333_s5 + $0xa00] sm:$0xff] }
 0x4a0   : > { %v1001_v46 = vld [vmem:[%s19333_s5 + $0xa88] sm:$0xff] }
 0x4a1   : > { %9825 = vmatpush1.bf16.msra.mxu0 %v9824_v50  ;;  %v949_v50 = vld [vmem:[%s19333_s5 + $0x8e8] sm:$0xff] }
 0x4a2   : > { %10081 = vmatpush1.bf16.msra.mxu1 %v10080_v53  ;;  %9827 = vmatprep.subr.bf16.mxu0 %v9826_v59  ;;  %v9832_v53 = vpack.c.bf16 %v910_v38, %v892_v39  ;;  %v10088_v59 = vpack.c.bf16 %v912_v44, %v894_v42  ;;  %v10090_v8 = vpack.c.bf16 %v949_v50, %v931_v49  ;;  %v964_v38 = vld [vmem:[%s19333_s5 + $0x960] sm:$0xff]  ;;  %v982_v42 = vld [vmem:[%s19333_s5 + $0x9f0] sm:$0xff]  ;;  %v1019_v49 = vld [vmem:[%s19333_s5 + $0xb18] sm:$0xff] }
 0x4a3   : > { %10083 = vmatprep.subr.bf16.mxu1 %v10082_v7  ;;  %v930_v7 = vld [vmem:[%s19333_s5 + $0x850] sm:$0xff]  ;;  %v9838_v39 = vpack.c.bf16 %v983_v13, %v965_v9  ;;  %v1003_v50 = vld [vmem:[%s19333_s5 + $0xa98] sm:$0xff]  ;;  %v1020_v9 = vld [vmem:[%s19333_s5 + $0xb20] sm:$0xff] }
 0x4a4   : > { %v1037_v13 = vld [vmem:[%s19333_s5 + $0xba8] sm:$0xff] }
 0x4a5   : > { %9829 = vmatpush1.bf16.msra.mxu0 %v9828_v15  ;;  %v985_v15 = vld [vmem:[%s19333_s5 + $0xa08] sm:$0xff] }
 0x4a6   : > { %10085 = vmatpush1.bf16.msra.mxu1 %v10084_v51  ;;  %9831 = vmatprep.subr.bf16.mxu0 %v9830_v29  ;;  %v9836_v51 = vpack.c.bf16 %v946_v3, %v928_v2  ;;  %v10092_v29 = vpack.c.bf16 %v948_v22, %v930_v7  ;;  %v10094_v44 = vpack.c.bf16 %v985_v15, %v967_v47  ;;  %v1000_v3 = vld [vmem:[%s19333_s5 + $0xa80] sm:$0xff]  ;;  %v1018_v7 = vld [vmem:[%s19333_s5 + $0xb10] sm:$0xff]  ;;  %v1055_v47 = vld [vmem:[%s19333_s5 + $0xc38] sm:$0xff] }
 0x4a7   : > { %10087 = vmatprep.subr.bf16.mxu1 %v10086_v43  ;;  %v966_v43 = vld [vmem:[%s19333_s5 + $0x970] sm:$0xff]  ;;  %v9842_v2 = vpack.c.bf16 %v1019_v49, %v1001_v46  ;;  %v1039_v15 = vld [vmem:[%s19333_s5 + $0xbb8] sm:$0xff]  ;;  %v1056_v46 = vld [vmem:[%s19333_s5 + $0xc40] sm:$0xff] }
 0x4a8   : > { %v1073_v49 = vld [vmem:[%s19333_s5 + $0xcc8] sm:$0xff] }
 0x4a9   : > { %9833 = vmatpush1.bf16.msra.mxu0 %v9832_v53  ;;  %v1021_v53 = vld [vmem:[%s19333_s5 + $0xb28] sm:$0xff] }
 0x4aa   : > { %10089 = vmatpush1.bf16.msra.mxu1 %v10088_v59  ;;  %9835 = vmatprep.subr.bf16.mxu0 %v9834_v61  ;;  %v9840_v59 = vpack.c.bf16 %v982_v42, %v964_v38  ;;  %v10096_v61 = vpack.c.bf16 %v984_v45, %v966_v43  ;;  %v10098_v22 = vpack.c.bf16 %v1021_v53, %v1003_v50  ;;  %v1036_v42 = vld [vmem:[%s19333_s5 + $0xba0] sm:$0xff]  ;;  %v1054_v43 = vld [vmem:[%s19333_s5 + $0xc30] sm:$0xff]  ;;  %v1091_v50 = vld [vmem:[%s19333_s5 + $0xd58] sm:$0xff] }
 0x4ab   : > { %10091 = vmatprep.subr.bf16.mxu1 %v10090_v8  ;;  %v1002_v8 = vld [vmem:[%s19333_s5 + $0xa90] sm:$0xff]  ;;  %v9846_v38 = vpack.c.bf16 %v1055_v47, %v1037_v13  ;;  %v1075_v53 = vld [vmem:[%s19333_s5 + $0xcd8] sm:$0xff]  ;;  %v1092_v13 = vld [vmem:[%s19333_s5 + $0xd60] sm:$0xff] }
 0x4ac   : > { %v1109_v47 = vld [vmem:[%s19333_s5 + $0xde8] sm:$0xff] }
 0x4ad   : > { %9837 = vmatpush1.bf16.msra.mxu0 %v9836_v51  ;;  %v1057_v51 = vld [vmem:[%s19333_s5 + $0xc48] sm:$0xff] }
 0x4ae   : > { %10093 = vmatpush1.bf16.msra.mxu1 %v10092_v29  ;;  %9839 = vmatprep.subr.bf16.mxu0 %v9838_v39  ;;  %v9844_v29 = vpack.c.bf16 %v1018_v7, %v1000_v3  ;;  %v10100_v39 = vpack.c.bf16 %v1020_v9, %v1002_v8  ;;  %v10102_v45 = vpack.c.bf16 %v1057_v51, %v1039_v15  ;;  %v1072_v7 = vld [vmem:[%s19333_s5 + $0xcc0] sm:$0xff]  ;;  %v1090_v8 = vld [vmem:[%s19333_s5 + $0xd50] sm:$0xff]  ;;  %v1127_v15 = vld [vmem:[%s19333_s5 + $0xe78] sm:$0xff] }
 0x4af   : > { %10095 = vmatprep.subr.bf16.mxu1 %v10094_v44  ;;  %v1038_v44 = vld [vmem:[%s19333_s5 + $0xbb0] sm:$0xff]  ;;  %v9850_v3 = vpack.c.bf16 %v1091_v50, %v1073_v49  ;;  %v1111_v51 = vld [vmem:[%s19333_s5 + $0xdf8] sm:$0xff]  ;;  %v1128_v49 = vld [vmem:[%s19333_s5 + $0xe80] sm:$0xff] }
 0x4b0   : > { %v1145_v50 = vld [vmem:[%s19333_s5 + $0xf08] sm:$0xff] }
 0x4b1   : > { %9841 = vmatpush1.bf16.msra.mxu0 %v9840_v59  ;;  %v1093_v59 = vld [vmem:[%s19333_s5 + $0xd68] sm:$0xff] }
 0x4b2   : > { %10097 = vmatpush1.bf16.msra.mxu1 %v10096_v61  ;;  %9843 = vmatprep.subr.bf16.mxu0 %v9842_v2  ;;  %v9848_v61 = vpack.c.bf16 %v1054_v43, %v1036_v42  ;;  %v10104_v2 = vpack.c.bf16 %v1056_v46, %v1038_v44  ;;  %v10106_v9 = vpack.c.bf16 %v1093_v59, %v1075_v53  ;;  %v1108_v43 = vld [vmem:[%s19333_s5 + $0xde0] sm:$0xff]  ;;  %v1126_v44 = vld [vmem:[%s19333_s5 + $0xe70] sm:$0xff]  ;;  %v1163_v53 = vld [vmem:[%s19333_s5 + $0xf98] sm:$0xff] }
 0x4b3   : > { %10099 = vmatprep.subr.bf16.mxu1 %v10098_v22  ;;  %v1074_v22 = vld [vmem:[%s19333_s5 + $0xcd0] sm:$0xff]  ;;  %v9854_v42 = vpack.c.bf16 %v1127_v15, %v1109_v47  ;;  %v1147_v59 = vld [vmem:[%s19333_s5 + $0xf18] sm:$0xff]  ;;  %v1164_v47 = vld [vmem:[%s19333_s5 + $0xfa0] sm:$0xff] }
 0x4b4   : > { %v1181_v15 = vld [vmem:[%s19333_s5 + $0x1028] sm:$0xff] }
 0x4b5   : > { %9845 = vmatpush1.bf16.msra.mxu0 %v9844_v29  ;;  %v1129_v29 = vld [vmem:[%s19333_s5 + $0xe88] sm:$0xff] }
 0x4b6   : > { %10101 = vmatpush1.bf16.msra.mxu1 %v10100_v39  ;;  %9847 = vmatprep.subr.bf16.mxu0 %v9846_v38  ;;  %v9852_v39 = vpack.c.bf16 %v1090_v8, %v1072_v7  ;;  %v10108_v38 = vpack.c.bf16 %v1092_v13, %v1074_v22  ;;  %v10110_v46 = vpack.c.bf16 %v1129_v29, %v1111_v51  ;;  %v1144_v8 = vld [vmem:[%s19333_s5 + $0xf00] sm:$0xff]  ;;  %v1162_v22 = vld [vmem:[%s19333_s5 + $0xf90] sm:$0xff]  ;;  %v1199_v51 = vld [vmem:[%s19333_s5 + $0x10b8] sm:$0xff] }
 0x4b7   : > { %10103 = vmatprep.subr.bf16.mxu1 %v10102_v45  ;;  %v1110_v45 = vld [vmem:[%s19333_s5 + $0xdf0] sm:$0xff]  ;;  %v9858_v7 = vpack.c.bf16 %v1163_v53, %v1145_v50  ;;  %v1183_v29 = vld [vmem:[%s19333_s5 + $0x1038] sm:$0xff]  ;;  %v1200_v50 = vld [vmem:[%s19333_s5 + $0x10c0] sm:$0xff] }
 0x4b8   : > { %v1217_v53 = vld [vmem:[%s19333_s5 + $0x1148] sm:$0xff] }
 0x4b9   : > { %9849 = vmatpush1.bf16.msra.mxu0 %v9848_v61  ;;  %v1165_v61 = vld [vmem:[%s19333_s5 + $0xfa8] sm:$0xff] }
 0x4ba   : > { %10105 = vmatpush1.bf16.msra.mxu1 %v10104_v2  ;;  %9851 = vmatprep.subr.bf16.mxu0 %v9850_v3  ;;  %v9856_v2 = vpack.c.bf16 %v1126_v44, %v1108_v43  ;;  %v10112_v3 = vpack.c.bf16 %v1128_v49, %v1110_v45  ;;  %v10114_v13 = vpack.c.bf16 %v1165_v61, %v1147_v59  ;;  %v1180_v44 = vld [vmem:[%s19333_s5 + $0x1020] sm:$0xff]  ;;  %v1198_v45 = vld [vmem:[%s19333_s5 + $0x10b0] sm:$0xff]  ;;  %v1235_v59 = vld [vmem:[%s19333_s5 + $0x11d8] sm:$0xff] }
 0x4bb   : > { %10107 = vmatprep.subr.bf16.mxu1 %v10106_v9  ;;  %v1146_v9 = vld [vmem:[%s19333_s5 + $0xf10] sm:$0xff]  ;;  %v9862_v43 = vpack.c.bf16 %v1199_v51, %v1181_v15  ;;  %v1219_v61 = vld [vmem:[%s19333_s5 + $0x1158] sm:$0xff]  ;;  %v1236_v15 = vld [vmem:[%s19333_s5 + $0x11e0] sm:$0xff] }
 0x4bc   : > { %v1253_v51 = vld [vmem:[%s19333_s5 + $0x1268] sm:$0xff] }
 0x4bd   : > { %9853 = vmatpush1.bf16.msra.mxu0 %v9852_v39  ;;  %v1201_v39 = vld [vmem:[%s19333_s5 + $0x10c8] sm:$0xff] }
 0x4be   : > { %10109 = vmatpush1.bf16.msra.mxu1 %v10108_v38  ;;  %9855 = vmatprep.subr.bf16.mxu0 %v9854_v42  ;;  %v9860_v38 = vpack.c.bf16 %v1162_v22, %v1144_v8  ;;  %v10116_v42 = vpack.c.bf16 %v1164_v47, %v1146_v9  ;;  %v10118_v49 = vpack.c.bf16 %v1201_v39, %v1183_v29  ;;  %v1216_v22 = vld [vmem:[%s19333_s5 + $0x1140] sm:$0xff]  ;;  %v1234_v9 = vld [vmem:[%s19333_s5 + $0x11d0] sm:$0xff]  ;;  %v1271_v29 = vld [vmem:[%s19333_s5 + $0x12f8] sm:$0xff] }
 0x4bf   : > { %10111 = vmatprep.subr.bf16.mxu1 %v10110_v46  ;;  %v1182_v46 = vld [vmem:[%s19333_s5 + $0x1030] sm:$0xff]  ;;  %v9866_v8 = vpack.c.bf16 %v1235_v59, %v1217_v53  ;;  %v1255_v39 = vld [vmem:[%s19333_s5 + $0x1278] sm:$0xff]  ;;  %v1272_v53 = vld [vmem:[%s19333_s5 + $0x1300] sm:$0xff] }
 0x4c0   : > { %v1289_v59 = vld [vmem:[%s19333_s5 + $0x1388] sm:$0xff] }
 0x4c1   : > { %9857 = vmatpush1.bf16.msra.mxu0 %v9856_v2  ;;  %v1237_v2 = vld [vmem:[%s19333_s5 + $0x11e8] sm:$0xff] }
 0x4c2   : > { %10113 = vmatpush1.bf16.msra.mxu1 %v10112_v3  ;;  %9859 = vmatprep.subr.bf16.mxu0 %v9858_v7  ;;  %v9864_v3 = vpack.c.bf16 %v1198_v45, %v1180_v44  ;;  %v10120_v7 = vpack.c.bf16 %v1200_v50, %v1182_v46  ;;  %v10122_v47 = vpack.c.bf16 %v1237_v2, %v1219_v61  ;;  %v1252_v46 = vld [vmem:[%s19333_s5 + $0x1260] sm:$0xff]  ;;  %v1254_v50 = vld [vmem:[%s19333_s5 + $0x1270] sm:$0xff]  ;;  %v1307_v61 = vld [vmem:[%s19333_s5 + $0x1418] sm:$0xff] }
 0x4c3   : > { %10115 = vmatprep.subr.bf16.mxu1 %v10114_v13  ;;  %v1218_v13 = vld [vmem:[%s19333_s5 + $0x1150] sm:$0xff]  ;;  %v9870_v44 = vpack.c.bf16 %v1271_v29, %v1253_v51  ;;  %v1291_v2 = vld [vmem:[%s19333_s5 + $0x1398] sm:$0xff]  ;;  %v1308_v51 = vld [vmem:[%s19333_s5 + $0x1420] sm:$0xff] }
 0x4c4   : > { %v1325_v29 = vld [vmem:[%s19333_s5 + $0x14a8] sm:$0xff] }
 0x4c5   : > { %9861 = vmatpush1.bf16.msra.mxu0 %v9860_v38  ;;  %v1273_v38 = vld [vmem:[%s19333_s5 + $0x1308] sm:$0xff] }
 0x4c6   : > { %10117 = vmatpush1.bf16.msra.mxu1 %v10116_v42  ;;  %9863 = vmatprep.subr.bf16.mxu0 %v9862_v43  ;;  %v9868_v42 = vpack.c.bf16 %v1234_v9, %v1216_v22  ;;  %v10124_v43 = vpack.c.bf16 %v1236_v15, %v1218_v13  ;;  %v10126_v45 = vpack.c.bf16 %v1273_v38, %v1255_v39  ;;  %v1288_v9 = vld [vmem:[%s19333_s5 + $0x1380] sm:$0xff]  ;;  %v1306_v13 = vld [vmem:[%s19333_s5 + $0x1410] sm:$0xff]  ;;  %v1343_v39 = vld [vmem:[%s19333_s5 + $0x1538] sm:$0xff] }
 0x4c7   : > { %10119 = vmatprep.subr.bf16.mxu1 %v10118_v49  ;;  %v1270_v49 = vld [vmem:[%s19333_s5 + $0x12f0] sm:$0xff]  ;;  %v9874_v22 = vpack.c.bf16 %v1307_v61, %v1289_v59  ;;  %v1327_v38 = vld [vmem:[%s19333_s5 + $0x14b8] sm:$0xff]  ;;  %v1344_v59 = vld [vmem:[%s19333_s5 + $0x1540] sm:$0xff] }
 0x4c8   : > { %v1361_v61 = vld [vmem:[%s19333_s5 + $0x15c8] sm:$0xff] }
 0x4c9   : > { %9865 = vmatpush1.bf16.msra.mxu0 %v9864_v3  ;;  %v1309_v3 = vld [vmem:[%s19333_s5 + $0x1428] sm:$0xff] }
 0x4ca   : > { %10121 = vmatpush1.bf16.msra.mxu1 %v10120_v7  ;;  %9867 = vmatprep.subr.bf16.mxu0 %v9866_v8  ;;  %v9872_v7 = vpack.c.bf16 %v1270_v49, %v1252_v46  ;;  %v10128_v8 = vpack.c.bf16 %v1272_v53, %v1254_v50  ;;  %v10130_v15 = vpack.c.bf16 %v1309_v3, %v1291_v2  ;;  %v1324_v46 = vld [vmem:[%s19333_s5 + $0x14a0] sm:$0xff]  ;;  %v1342_v49 = vld [vmem:[%s19333_s5 + $0x1530] sm:$0xff]  ;;  %v1379_v2 = vld [vmem:[%s19333_s5 + $0x1658] sm:$0xff] }
 0x4cb   : > { %10123 = vmatprep.subr.bf16.mxu1 %v10122_v47  ;;  %v1290_v47 = vld [vmem:[%s19333_s5 + $0x1390] sm:$0xff]  ;;  %v1363_v3 = vld [vmem:[%s19333_s5 + $0x15d8] sm:$0xff] }
 0x4cc   : > { %v1326_v50 = vld [vmem:[%s19333_s5 + $0x14b0] sm:$0xff] }
 0x4cd   : > { %9869 = vmatpush1.bf16.msra.mxu0 %v9868_v42  ;;  %v1345_v42 = vld [vmem:[%s19333_s5 + $0x1548] sm:$0xff] }
 0x4ce   : > { %10125 = vmatpush1.bf16.msra.mxu1 %v10124_v43  ;;  %9871 = vmatprep.subr.bf16.mxu0 %v9870_v44  ;;  %v9876_v43 = vpack.c.bf16 %v1306_v13, %v1288_v9  ;;  %v10132_v44 = vpack.c.bf16 %v1308_v51, %v1290_v47  ;;  %v10134_v53 = vpack.c.bf16 %v1345_v42, %v1327_v38  ;;  %v1360_v13 = vld [vmem:[%s19333_s5 + $0x15c0] sm:$0xff]  ;;  %v1378_v47 = vld [vmem:[%s19333_s5 + $0x1650] sm:$0xff]  ;;  %v1415_v38 = vld [vmem:[%s19333_s5 + $0x1778] sm:$0xff] }
 0x4cf   : > { %10127 = vmatprep.subr.bf16.mxu1 %v10126_v45  ;;  %v9878_v45 = vpack.c.bf16 %v1343_v39, %v1325_v29  ;;  %v9882_v9 = vpack.c.bf16 %v1379_v2, %v1361_v61  ;;  %v1380_v29 = vld [vmem:[%s19333_s5 + $0x1660] sm:$0xff]  ;;  %v1397_v39 = vld [vmem:[%s19333_s5 + $0x16e8] sm:$0xff]  ;;  %v1399_v42 = vld [vmem:[%s19333_s5 + $0x16f8] sm:$0xff] }
 0x4d0   : > { %4881 = vmatmul.mubr.f32.vlgmr.msra.gmra.mrb[12].mxu0 %v11416_v57  ;;  %v1416_v61 = vld [vmem:[%s19333_s5 + $0x1780] sm:$0xff]  ;;  %v1433_v2 = vld [vmem:[%s19333_s5 + $0x1808] sm:$0xff] }
 0x4d1   : > { %5189 = vmatmul.mubr.f32.vlgmr.msra.gmra.mrb[30].mxu1 %v11416_v57  ;;  %4886 = vmatprep.mubr.f32.mxu0 %v11448_v11 }
 0x4d2   : > { %9873 = vmatpush1.bf16.msra.mxu0 %v9872_v7  ;;  %5194 = vmatprep.mubr.f32.mxu1 %v11448_v11  ;;  %v1381_v7 = vld [vmem:[%s19333_s5 + $0x1668] sm:$0xff] }
 0x4d3   : > { %10129 = vmatpush1.bf16.msra.mxu1 %v10128_v8  ;;  %9875 = vmatprep.subr.bf16.mxu0 %v9874_v22  ;;  %v9880_v8 = vpack.c.bf16 %v1342_v49, %v1324_v46  ;;  %v10136_v22 = vpack.c.bf16 %v1344_v59, %v1326_v50  ;;  %v10138_v51 = vpack.c.bf16 %v1381_v7, %v1363_v3  ;;  %v1396_v49 = vld [vmem:[%s19333_s5 + $0x16e0] sm:$0xff]  ;;  %v1414_v50 = vld [vmem:[%s19333_s5 + $0x1770] sm:$0xff]  ;;  %v1451_v3 = vld [vmem:[%s19333_s5 + $0x1898] sm:$0xff] }
 0x4d4   : > { %4887 = vmatmul.mubr.f32.gmra.mrb[14].mxu0 %v11440_v6  ;;  %10131 = vmatprep.subr.bf16.mxu1 %v10130_v15  ;;  %v1362_v15 = vld [vmem:[%s19333_s5 + $0x15d0] sm:$0xff]  ;;  %v9886_v46 = vpack.c.bf16 %v1415_v38, %v1397_v39  ;;  %v1435_v7 = vld [vmem:[%s19333_s5 + $0x1818] sm:$0xff]  ;;  %v1452_v39 = vld [vmem:[%s19333_s5 + $0x18a0] sm:$0xff] }
 0x4d5   : > { %5195 = vmatmul.mubr.f32.gmra.mrb[32].mxu1 %v11440_v6  ;;  %4957 = vmatprep.mubr.f32.mxu0 %v11483_v27  ;;  %v1469_v38 = vld [vmem:[%s19333_s5 + $0x1928] sm:$0xff] }
 0x4d6   : > { %9877 = vmatpush1.bf16.msra.mxu0 %v9876_v43  ;;  %5265 = vmatprep.mubr.f32.mxu1 %v11483_v27  ;;  %v1417_v43 = vld [vmem:[%s19333_s5 + $0x1788] sm:$0xff] }
 0x4d7   : > { %10133 = vmatpush1.bf16.msra.mxu1 %v10132_v44  ;;  %9879 = vmatprep.subr.bf16.mxu0 %v9878_v45  ;;  %v9884_v44 = vpack.c.bf16 %v1378_v47, %v1360_v13  ;;  %v10140_v45 = vpack.c.bf16 %v1380_v29, %v1362_v15  ;;  %v10142_v59 = vpack.c.bf16 %v1417_v43, %v1399_v42  ;;  %v1432_v47 = vld [vmem:[%s19333_s5 + $0x1800] sm:$0xff]  ;;  %v1450_v15 = vld [vmem:[%s19333_s5 + $0x1890] sm:$0xff]  ;;  %v1487_v42 = vld [vmem:[%s19333_s5 + $0x19b8] sm:$0xff] }
 0x4d8   : > { %10135 = vmatprep.subr.bf16.mxu1 %v10134_v53  ;;  %v1398_v53 = vld [vmem:[%s19333_s5 + $0x16f0] sm:$0xff]  ;;  %v9890_v13 = vpack.c.bf16 %v1451_v3, %v1433_v2  ;;  %v1471_v43 = vld [vmem:[%s19333_s5 + $0x1938] sm:$0xff]  ;;  %v1488_v2 = vld [vmem:[%s19333_s5 + $0x19c0] sm:$0xff] }
 0x4d9   : > { %v1505_v3 = vld [vmem:[%s19333_s5 + $0x1a48] sm:$0xff] }
 0x4da   : > { %9881 = vmatpush1.bf16.msra.mxu0 %v9880_v8  ;;  %v1453_v8 = vld [vmem:[%s19333_s5 + $0x18a8] sm:$0xff] }
 0x4db   : > { %10137 = vmatpush1.bf16.msra.mxu1 %v10136_v22  ;;  %9883 = vmatprep.subr.bf16.mxu0 %v9882_v9  ;;  %v9888_v22 = vpack.c.bf16 %v1414_v50, %v1396_v49  ;;  %v10144_v9 = vpack.c.bf16 %v1416_v61, %v1398_v53  ;;  %v10146_v29 = vpack.c.bf16 %v1453_v8, %v1435_v7  ;;  %v1468_v50 = vld [vmem:[%s19333_s5 + $0x1920] sm:$0xff]  ;;  %v1486_v53 = vld [vmem:[%s19333_s5 + $0x19b0] sm:$0xff]  ;;  %v1523_v7 = vld [vmem:[%s19333_s5 + $0x1ad8] sm:$0xff] }
 0x4dc   : > { %10139 = vmatprep.subr.bf16.mxu1 %v10138_v51  ;;  %v1434_v51 = vld [vmem:[%s19333_s5 + $0x1810] sm:$0xff]  ;;  %v9894_v49 = vpack.c.bf16 %v1487_v42, %v1469_v38  ;;  %v1507_v8 = vld [vmem:[%s19333_s5 + $0x1a58] sm:$0xff]  ;;  %v1524_v38 = vld [vmem:[%s19333_s5 + $0x1ae0] sm:$0xff] }
 0x4dd   : > { %v1541_v42 = vld [vmem:[%s19333_s5 + $0x1b68] sm:$0xff] }
 0x4de   : > { %9885 = vmatpush1.bf16.msra.mxu0 %v9884_v44  ;;  %v1489_v44 = vld [vmem:[%s19333_s5 + $0x19c8] sm:$0xff] }
 0x4df   : > { %10141 = vmatpush1.bf16.msra.mxu1 %v10140_v45  ;;  %9887 = vmatprep.subr.bf16.mxu0 %v9886_v46  ;;  %v9892_v45 = vpack.c.bf16 %v1450_v15, %v1432_v47  ;;  %v10148_v46 = vpack.c.bf16 %v1452_v39, %v1434_v51  ;;  %v10150_v61 = vpack.c.bf16 %v1489_v44, %v1471_v43  ;;  %v1504_v15 = vld [vmem:[%s19333_s5 + $0x1a40] sm:$0xff]  ;;  %v1522_v51 = vld [vmem:[%s19333_s5 + $0x1ad0] sm:$0xff]  ;;  %v1559_v43 = vld [vmem:[%s19333_s5 + $0x1bf8] sm:$0xff] }
 0x4e0   : > { %10143 = vmatprep.subr.bf16.mxu1 %v10142_v59  ;;  %v1470_v59 = vld [vmem:[%s19333_s5 + $0x1930] sm:$0xff]  ;;  %v9898_v47 = vpack.c.bf16 %v1523_v7, %v1505_v3  ;;  %v1543_v44 = vld [vmem:[%s19333_s5 + $0x1b78] sm:$0xff]  ;;  %v1560_v3 = vld [vmem:[%s19333_s5 + $0x1c00] sm:$0xff] }
 0x4e1   : > { %v1577_v7 = vld [vmem:[%s19333_s5 + $0x1c88] sm:$0xff] }
 0x4e2   : > { %9889 = vmatpush1.bf16.msra.mxu0 %v9888_v22  ;;  %v1525_v22 = vld [vmem:[%s19333_s5 + $0x1ae8] sm:$0xff] }
 0x4e3   : > { %10145 = vmatpush1.bf16.msra.mxu1 %v10144_v9  ;;  %9891 = vmatprep.subr.bf16.mxu0 %v9890_v13  ;;  %v9896_v9 = vpack.c.bf16 %v1486_v53, %v1468_v50  ;;  %v10152_v13 = vpack.c.bf16 %v1488_v2, %v1470_v59  ;;  %v10154_v39 = vpack.c.bf16 %v1525_v22, %v1507_v8  ;;  %v1540_v53 = vld [vmem:[%s19333_s5 + $0x1b60] sm:$0xff]  ;;  %v1558_v59 = vld [vmem:[%s19333_s5 + $0x1bf0] sm:$0xff]  ;;  %v1595_v8 = vld [vmem:[%s19333_s5 + $0x1d18] sm:$0xff] }
 0x4e4   : > { %10147 = vmatprep.subr.bf16.mxu1 %v10146_v29  ;;  %v1506_v29 = vld [vmem:[%s19333_s5 + $0x1a50] sm:$0xff]  ;;  %v9902_v50 = vpack.c.bf16 %v1559_v43, %v1541_v42  ;;  %v1579_v22 = vld [vmem:[%s19333_s5 + $0x1c98] sm:$0xff]  ;;  %v1596_v42 = vld [vmem:[%s19333_s5 + $0x1d20] sm:$0xff] }
 0x4e5   : > { %v1613_v43 = vld [vmem:[%s19333_s5 + $0x1da8] sm:$0xff] }
 0x4e6   : > { %9893 = vmatpush1.bf16.msra.mxu0 %v9892_v45  ;;  %v1561_v45 = vld [vmem:[%s19333_s5 + $0x1c08] sm:$0xff] }
 0x4e7   : > { %10149 = vmatpush1.bf16.msra.mxu1 %v10148_v46  ;;  %9895 = vmatprep.subr.bf16.mxu0 %v9894_v49  ;;  %v9900_v46 = vpack.c.bf16 %v1522_v51, %v1504_v15  ;;  %v10156_v49 = vpack.c.bf16 %v1524_v38, %v1506_v29  ;;  %v10158_v2 = vpack.c.bf16 %v1561_v45, %v1543_v44  ;;  %v1576_v51 = vld [vmem:[%s19333_s5 + $0x1c80] sm:$0xff]  ;;  %v1594_v29 = vld [vmem:[%s19333_s5 + $0x1d10] sm:$0xff]  ;;  %v1631_v44 = vld [vmem:[%s19333_s5 + $0x1e38] sm:$0xff] }
 0x4e8   : > { %10151 = vmatprep.subr.bf16.mxu1 %v10150_v61  ;;  %v1542_v61 = vld [vmem:[%s19333_s5 + $0x1b70] sm:$0xff]  ;;  %v9906_v15 = vpack.c.bf16 %v1595_v8, %v1577_v7  ;;  %v1615_v45 = vld [vmem:[%s19333_s5 + $0x1db8] sm:$0xff]  ;;  %v1632_v7 = vld [vmem:[%s19333_s5 + $0x1e40] sm:$0xff] }
 0x4e9   : > { %v1649_v8 = vld [vmem:[%s19333_s5 + $0x1ec8] sm:$0xff] }
 0x4ea   : > { %9897 = vmatpush1.bf16.msra.mxu0 %v9896_v9  ;;  %v1597_v9 = vld [vmem:[%s19333_s5 + $0x1d28] sm:$0xff] }
 0x4eb   : > { %10153 = vmatpush1.bf16.msra.mxu1 %v10152_v13  ;;  %9899 = vmatprep.subr.bf16.mxu0 %v9898_v47  ;;  %v9904_v13 = vpack.c.bf16 %v1558_v59, %v1540_v53  ;;  %v10160_v47 = vpack.c.bf16 %v1560_v3, %v1542_v61  ;;  %v10162_v38 = vpack.c.bf16 %v1597_v9, %v1579_v22  ;;  %v1612_v59 = vld [vmem:[%s19333_s5 + $0x1da0] sm:$0xff]  ;;  %v1630_v61 = vld [vmem:[%s19333_s5 + $0x1e30] sm:$0xff]  ;;  %v1667_v22 = vld [vmem:[%s19333_s5 + $0x1f58] sm:$0xff] }
 0x4ec   : > { %10155 = vmatprep.subr.bf16.mxu1 %v10154_v39  ;;  %v1578_v39 = vld [vmem:[%s19333_s5 + $0x1c90] sm:$0xff]  ;;  %v9910_v53 = vpack.c.bf16 %v1631_v44, %v1613_v43  ;;  %v1651_v9 = vld [vmem:[%s19333_s5 + $0x1ed8] sm:$0xff]  ;;  %v1668_v43 = vld [vmem:[%s19333_s5 + $0x1f60] sm:$0xff] }
 0x4ed   : > { %v1685_v44 = vld [vmem:[%s19333_s5 + $0x1fe8] sm:$0xff] }
 0x4ee   : > { %9901 = vmatpush1.bf16.msra.mxu0 %v9900_v46  ;;  %v1633_v46 = vld [vmem:[%s19333_s5 + $0x1e48] sm:$0xff] }
 0x4ef   : > { %10157 = vmatpush1.bf16.msra.mxu1 %v10156_v49  ;;  %9903 = vmatprep.subr.bf16.mxu0 %v9902_v50  ;;  %v9908_v49 = vpack.c.bf16 %v1594_v29, %v1576_v51  ;;  %v10164_v50 = vpack.c.bf16 %v1596_v42, %v1578_v39  ;;  %v10166_v3 = vpack.c.bf16 %v1633_v46, %v1615_v45  ;;  %v1648_v29 = vld [vmem:[%s19333_s5 + $0x1ec0] sm:$0xff]  ;;  %v1666_v39 = vld [vmem:[%s19333_s5 + $0x1f50] sm:$0xff]  ;;  %v1703_v45 = vld [vmem:[%s19333_s5 + $0x2078] sm:$0xff] }
 0x4f0   : > { %10159 = vmatprep.subr.bf16.mxu1 %v10158_v2  ;;  %v1614_v2 = vld [vmem:[%s19333_s5 + $0x1db0] sm:$0xff]  ;;  %v9914_v51 = vpack.c.bf16 %v1667_v22, %v1649_v8  ;;  %v1687_v46 = vld [vmem:[%s19333_s5 + $0x1ff8] sm:$0xff]  ;;  %v1704_v8 = vld [vmem:[%s19333_s5 + $0x2080] sm:$0xff] }
 0x4f1   : > { %v1721_v22 = vld [vmem:[%s19333_s5 + $0x2108] sm:$0xff] }
 0x4f2   : > { %9905 = vmatpush1.bf16.msra.mxu0 %v9904_v13  ;;  %v1669_v13 = vld [vmem:[%s19333_s5 + $0x1f68] sm:$0xff] }
 0x4f3   : > { %10161 = vmatpush1.bf16.msra.mxu1 %v10160_v47  ;;  %9907 = vmatprep.subr.bf16.mxu0 %v9906_v15  ;;  %v9912_v47 = vpack.c.bf16 %v1630_v61, %v1612_v59  ;;  %v10168_v15 = vpack.c.bf16 %v1632_v7, %v1614_v2  ;;  %v10170_v42 = vpack.c.bf16 %v1669_v13, %v1651_v9  ;;  %v1684_v61 = vld [vmem:[%s19333_s5 + $0x1fe0] sm:$0xff]  ;;  %v1702_v2 = vld [vmem:[%s19333_s5 + $0x2070] sm:$0xff]  ;;  %v1739_v9 = vld [vmem:[%s19333_s5 + $0x2198] sm:$0xff] }
 0x4f4   : > { %10163 = vmatprep.subr.bf16.mxu1 %v10162_v38  ;;  %v1650_v38 = vld [vmem:[%s19333_s5 + $0x1ed0] sm:$0xff]  ;;  %v9918_v59 = vpack.c.bf16 %v1703_v45, %v1685_v44  ;;  %v1723_v13 = vld [vmem:[%s19333_s5 + $0x2118] sm:$0xff]  ;;  %v1740_v44 = vld [vmem:[%s19333_s5 + $0x21a0] sm:$0xff] }
 0x4f5   : > { %v1757_v45 = vld [vmem:[%s19333_s5 + $0x2228] sm:$0xff] }
 0x4f6   : > { %9909 = vmatpush1.bf16.msra.mxu0 %v9908_v49  ;;  %v1705_v49 = vld [vmem:[%s19333_s5 + $0x2088] sm:$0xff] }
 0x4f7   : > { %10165 = vmatpush1.bf16.msra.mxu1 %v10164_v50  ;;  %9911 = vmatprep.subr.bf16.mxu0 %v9910_v53  ;;  %v9916_v50 = vpack.c.bf16 %v1666_v39, %v1648_v29  ;;  %v10172_v53 = vpack.c.bf16 %v1668_v43, %v1650_v38  ;;  %v10174_v7 = vpack.c.bf16 %v1705_v49, %v1687_v46  ;;  %v1720_v39 = vld [vmem:[%s19333_s5 + $0x2100] sm:$0xff]  ;;  %v1738_v38 = vld [vmem:[%s19333_s5 + $0x2190] sm:$0xff]  ;;  %v1775_v46 = vld [vmem:[%s19333_s5 + $0x22b8] sm:$0xff] }
 0x4f8   : > { %10167 = vmatprep.subr.bf16.mxu1 %v10166_v3  ;;  %v1686_v3 = vld [vmem:[%s19333_s5 + $0x1ff0] sm:$0xff]  ;;  %v9922_v29 = vpack.c.bf16 %v1739_v9, %v1721_v22  ;;  %v1759_v49 = vld [vmem:[%s19333_s5 + $0x2238] sm:$0xff]  ;;  %v1776_v22 = vld [vmem:[%s19333_s5 + $0x22c0] sm:$0xff] }
 0x4f9   : > { %v1793_v9 = vld [vmem:[%s19333_s5 + $0x2348] sm:$0xff] }
 0x4fa   : > { %9913 = vmatpush1.bf16.msra.mxu0 %v9912_v47  ;;  %v1741_v47 = vld [vmem:[%s19333_s5 + $0x21a8] sm:$0xff] }
 0x4fb   : > { %10169 = vmatpush1.bf16.msra.mxu1 %v10168_v15  ;;  %9915 = vmatprep.subr.bf16.mxu0 %v9914_v51  ;;  %v9920_v15 = vpack.c.bf16 %v1702_v2, %v1684_v61  ;;  %v10176_v51 = vpack.c.bf16 %v1704_v8, %v1686_v3  ;;  %v10178_v43 = vpack.c.bf16 %v1741_v47, %v1723_v13  ;;  %v1756_v2 = vld [vmem:[%s19333_s5 + $0x2220] sm:$0xff]  ;;  %v1774_v3 = vld [vmem:[%s19333_s5 + $0x22b0] sm:$0xff]  ;;  %v1811_v13 = vld [vmem:[%s19333_s5 + $0x23d8] sm:$0xff] }
 0x4fc   : > { %10171 = vmatprep.subr.bf16.mxu1 %v10170_v42  ;;  %v1722_v42 = vld [vmem:[%s19333_s5 + $0x2110] sm:$0xff]  ;;  %v9926_v61 = vpack.c.bf16 %v1775_v46, %v1757_v45  ;;  %v1795_v47 = vld [vmem:[%s19333_s5 + $0x2358] sm:$0xff]  ;;  %v1812_v45 = vld [vmem:[%s19333_s5 + $0x23e0] sm:$0xff] }
 0x4fd   : > { %v1829_v46 = vld [vmem:[%s19333_s5 + $0x2468] sm:$0xff] }
 0x4fe   : > { %9917 = vmatpush1.bf16.msra.mxu0 %v9916_v50  ;;  %v1777_v50 = vld [vmem:[%s19333_s5 + $0x22c8] sm:$0xff] }
 0x4ff   : > { %10173 = vmatpush1.bf16.msra.mxu1 %v10172_v53  ;;  %9919 = vmatprep.subr.bf16.mxu0 %v9918_v59  ;;  %v9924_v53 = vpack.c.bf16 %v1738_v38, %v1720_v39  ;;  %v10180_v59 = vpack.c.bf16 %v1740_v44, %v1722_v42  ;;  %v10182_v8 = vpack.c.bf16 %v1777_v50, %v1759_v49  ;;  %v1792_v38 = vld [vmem:[%s19333_s5 + $0x2340] sm:$0xff]  ;;  %v1810_v42 = vld [vmem:[%s19333_s5 + $0x23d0] sm:$0xff]  ;;  %v1847_v49 = vld [vmem:[%s19333_s5 + $0x24f8] sm:$0xff] }
 0x500   : > { %10175 = vmatprep.subr.bf16.mxu1 %v10174_v7  ;;  %v1758_v7 = vld [vmem:[%s19333_s5 + $0x2230] sm:$0xff]  ;;  %v9930_v39 = vpack.c.bf16 %v1811_v13, %v1793_v9  ;;  %v1831_v50 = vld [vmem:[%s19333_s5 + $0x2478] sm:$0xff]  ;;  %v1848_v9 = vld [vmem:[%s19333_s5 + $0x2500] sm:$0xff] }
 0x501   : > { %v1865_v13 = vld [vmem:[%s19333_s5 + $0x2588] sm:$0xff] }
 0x502   : > { %9921 = vmatpush1.bf16.msra.mxu0 %v9920_v15  ;;  %v1813_v15 = vld [vmem:[%s19333_s5 + $0x23e8] sm:$0xff] }
 0x503   : > { %10177 = vmatpush1.bf16.msra.mxu1 %v10176_v51  ;;  %9923 = vmatprep.subr.bf16.mxu0 %v9922_v29  ;;  %v9928_v51 = vpack.c.bf16 %v1774_v3, %v1756_v2  ;;  %v10184_v29 = vpack.c.bf16 %v1776_v22, %v1758_v7  ;;  %v10186_v44 = vpack.c.bf16 %v1813_v15, %v1795_v47  ;;  %v1828_v7 = vld [vmem:[%s19333_s5 + $0x2460] sm:$0xff]  ;;  %v1830_v22 = vld [vmem:[%s19333_s5 + $0x2470] sm:$0xff]  ;;  %v1883_v47 = vld [vmem:[%s19333_s5 + $0x2618] sm:$0xff] }
 0x504   : > { %10179 = vmatprep.subr.bf16.mxu1 %v10178_v43  ;;  %v1794_v43 = vld [vmem:[%s19333_s5 + $0x2350] sm:$0xff]  ;;  %v9934_v2 = vpack.c.bf16 %v1847_v49, %v1829_v46  ;;  %v1867_v15 = vld [vmem:[%s19333_s5 + $0x2598] sm:$0xff]  ;;  %v1884_v46 = vld [vmem:[%s19333_s5 + $0x2620] sm:$0xff] }
 0x505   : > { %v1901_v49 = vld [vmem:[%s19333_s5 + $0x26a8] sm:$0xff] }
 0x506   : > { %9925 = vmatpush1.bf16.msra.mxu0 %v9924_v53  ;;  %v1849_v53 = vld [vmem:[%s19333_s5 + $0x2508] sm:$0xff] }
 0x507   : > { %10181 = vmatpush1.bf16.msra.mxu1 %v10180_v59  ;;  %9927 = vmatprep.subr.bf16.mxu0 %v9926_v61  ;;  %v9932_v59 = vpack.c.bf16 %v1810_v42, %v1792_v38  ;;  %v10188_v61 = vpack.c.bf16 %v1812_v45, %v1794_v43  ;;  %v10190_v3 = vpack.c.bf16 %v1849_v53, %v1831_v50  ;;  %v1864_v42 = vld [vmem:[%s19333_s5 + $0x2580] sm:$0xff]  ;;  %v1882_v43 = vld [vmem:[%s19333_s5 + $0x2610] sm:$0xff]  ;;  %v1919_v50 = vld [vmem:[%s19333_s5 + $0x2738] sm:$0xff] }
 0x508   : > { %10183 = vmatprep.subr.bf16.mxu1 %v10182_v8  ;;  %v1846_v8 = vld [vmem:[%s19333_s5 + $0x24f0] sm:$0xff]  ;;  %v9938_v38 = vpack.c.bf16 %v1883_v47, %v1865_v13  ;;  %v1903_v53 = vld [vmem:[%s19333_s5 + $0x26b8] sm:$0xff]  ;;  %v1920_v13 = vld [vmem:[%s19333_s5 + $0x2740] sm:$0xff] }
 0x509   : > { %v1937_v47 = vld [vmem:[%s19333_s5 + $0x27c8] sm:$0xff] }
 0x50a   : > { %9929 = vmatpush1.bf16.msra.mxu0 %v9928_v51  ;;  %v1885_v51 = vld [vmem:[%s19333_s5 + $0x2628] sm:$0xff] }
 0x50b   : > { %10185 = vmatpush1.bf16.msra.mxu1 %v10184_v29  ;;  %9931 = vmatprep.subr.bf16.mxu0 %v9930_v39  ;;  %v9936_v29 = vpack.c.bf16 %v1846_v8, %v1828_v7  ;;  %v10192_v39 = vpack.c.bf16 %v1848_v9, %v1830_v22  ;;  %v10194_v45 = vpack.c.bf16 %v1885_v51, %v1867_v15  ;;  %v1900_v7 = vld [vmem:[%s19333_s5 + $0x26a0] sm:$0xff]  ;;  %v1918_v8 = vld [vmem:[%s19333_s5 + $0x2730] sm:$0xff]  ;;  %v1955_v15 = vld [vmem:[%s19333_s5 + $0x2858] sm:$0xff] }
 0x50c   : > { %10187 = vmatprep.subr.bf16.mxu1 %v10186_v44  ;;  %v1866_v44 = vld [vmem:[%s19333_s5 + $0x2590] sm:$0xff]  ;;  %v1939_v51 = vld [vmem:[%s19333_s5 + $0x27d8] sm:$0xff] }
 0x50d   : > { %v1902_v22 = vld [vmem:[%s19333_s5 + $0x26b0] sm:$0xff] }
 0x50e   : > { %9933 = vmatpush1.bf16.msra.mxu0 %v9932_v59  ;;  %v1921_v59 = vld [vmem:[%s19333_s5 + $0x2748] sm:$0xff] }
 0x50f   : > { %10189 = vmatpush1.bf16.msra.mxu1 %v10188_v61  ;;  %9935 = vmatprep.subr.bf16.mxu0 %v9934_v2  ;;  %v9940_v61 = vpack.c.bf16 %v1882_v43, %v1864_v42  ;;  %v10196_v2 = vpack.c.bf16 %v1884_v46, %v1866_v44  ;;  %v10198_v9 = vpack.c.bf16 %v1921_v59, %v1903_v53  ;;  %v1936_v43 = vld [vmem:[%s19333_s5 + $0x27c0] sm:$0xff]  ;;  %v1954_v44 = vld [vmem:[%s19333_s5 + $0x2850] sm:$0xff]  ;;  %v1991_v53 = vld [vmem:[%s19333_s5 + $0x2978] sm:$0xff] }
 0x510   : > { %10191 = vmatprep.subr.bf16.mxu1 %v10190_v3  ;;  %v9942_v3 = vpack.c.bf16 %v1919_v50, %v1901_v49  ;;  %v9946_v42 = vpack.c.bf16 %v1955_v15, %v1937_v47  ;;  %v1956_v49 = vld [vmem:[%s19333_s5 + $0x2860] sm:$0xff]  ;;  %v1973_v50 = vld [vmem:[%s19333_s5 + $0x28e8] sm:$0xff]  ;;  %v1975_v59 = vld [vmem:[%s19333_s5 + $0x28f8] sm:$0xff] }
 0x511   : > { %4958 = vmatmul.mubr.f32.vlgmr.msra.gmra.mrb[12].mxu0 %v11839_v62  ;;  %v1992_v47 = vld [vmem:[%s19333_s5 + $0x2980] sm:$0xff]  ;;  %v2009_v15 = vld [vmem:[%s19333_s5 + $0x2a08] sm:$0xff] }
 0x512   : > { %5266 = vmatmul.mubr.f32.vlgmr.msra.gmra.mrb[30].mxu1 %v11839_v62  ;;  %4963 = vmatprep.mubr.f32.mxu0 %v11848_v5 }
 0x513   : > { %9937 = vmatpush1.bf16.msra.mxu0 %v9936_v29  ;;  %5271 = vmatprep.mubr.f32.mxu1 %v11848_v5  ;;  %v1957_v29 = vld [vmem:[%s19333_s5 + $0x2868] sm:$0xff] }
 0x514   : > { %10193 = vmatpush1.bf16.msra.mxu1 %v10192_v39  ;;  %9939 = vmatprep.subr.bf16.mxu0 %v9938_v38  ;;  %v9944_v39 = vpack.c.bf16 %v1918_v8, %v1900_v7  ;;  %v10200_v38 = vpack.c.bf16 %v1920_v13, %v1902_v22  ;;  %v10202_v46 = vpack.c.bf16 %v1957_v29, %v1939_v51  ;;  %v1972_v8 = vld [vmem:[%s19333_s5 + $0x28e0] sm:$0xff]  ;;  %v1990_v22 = vld [vmem:[%s19333_s5 + $0x2970] sm:$0xff]  ;;  %v2027_v51 = vld [vmem:[%s19333_s5 + $0x2a98] sm:$0xff] }
 0x515   : > { %4964 = vmatmul.mubr.f32.gmra.mrb[14].mxu0 %v11872_v14  ;;  %10195 = vmatprep.subr.bf16.mxu1 %v10194_v45  ;;  %v1938_v45 = vld [vmem:[%s19333_s5 + $0x27d0] sm:$0xff]  ;;  %v9950_v7 = vpack.c.bf16 %v1991_v53, %v1973_v50  ;;  %v2011_v29 = vld [vmem:[%s19333_s5 + $0x2a18] sm:$0xff]  ;;  %v2028_v50 = vld [vmem:[%s19333_s5 + $0x2aa0] sm:$0xff] }
 0x516   : > { %5272 = vmatmul.mubr.f32.gmra.mrb[32].mxu1 %v11872_v14  ;;  %5034 = vmatprep.mubr.f32.mxu0 %v11888_v33  ;;  %v2045_v53 = vld [vmem:[%s19333_s5 + $0x2b28] sm:$0xff] }
 0x517   : > { %9941 = vmatpush1.bf16.msra.mxu0 %v9940_v61  ;;  %5342 = vmatprep.mubr.f32.mxu1 %v11888_v33  ;;  %v1993_v61 = vld [vmem:[%s19333_s5 + $0x2988] sm:$0xff] }
 0x518   : > { %10197 = vmatpush1.bf16.msra.mxu1 %v10196_v2  ;;  %9943 = vmatprep.subr.bf16.mxu0 %v9942_v3  ;;  %v9948_v2 = vpack.c.bf16 %v1954_v44, %v1936_v43  ;;  %v10204_v3 = vpack.c.bf16 %v1956_v49, %v1938_v45  ;;  %v10206_v13 = vpack.c.bf16 %v1993_v61, %v1975_v59  ;;  %v2008_v44 = vld [vmem:[%s19333_s5 + $0x2a00] sm:$0xff]  ;;  %v2026_v45 = vld [vmem:[%s19333_s5 + $0x2a90] sm:$0xff]  ;;  %v2063_v59 = vld [vmem:[%s19333_s5 + $0x2bb8] sm:$0xff] }
 0x519   : > { %10199 = vmatprep.subr.bf16.mxu1 %v10198_v9  ;;  %v1974_v9 = vld [vmem:[%s19333_s5 + $0x28f0] sm:$0xff]  ;;  %v9954_v43 = vpack.c.bf16 %v2027_v51, %v2009_v15  ;;  %v2047_v61 = vld [vmem:[%s19333_s5 + $0x2b38] sm:$0xff]  ;;  %v2064_v15 = vld [vmem:[%s19333_s5 + $0x2bc0] sm:$0xff] }
 0x51a   : > { %v2081_v51 = vld [vmem:[%s19333_s5 + $0x2c48] sm:$0xff] }
 0x51b   : > { %9945 = vmatpush1.bf16.msra.mxu0 %v9944_v39  ;;  %v2029_v39 = vld [vmem:[%s19333_s5 + $0x2aa8] sm:$0xff] }
 0x51c   : > { %10201 = vmatpush1.bf16.msra.mxu1 %v10200_v38  ;;  %9947 = vmatprep.subr.bf16.mxu0 %v9946_v42  ;;  %v9952_v38 = vpack.c.bf16 %v1990_v22, %v1972_v8  ;;  %v10208_v42 = vpack.c.bf16 %v1992_v47, %v1974_v9  ;;  %v10210_v49 = vpack.c.bf16 %v2029_v39, %v2011_v29  ;;  %v2044_v22 = vld [vmem:[%s19333_s5 + $0x2b20] sm:$0xff]  ;;  %v2062_v9 = vld [vmem:[%s19333_s5 + $0x2bb0] sm:$0xff]  ;;  %v2099_v29 = vld [vmem:[%s19333_s5 + $0x2cd8] sm:$0xff] }
 0x51d   : > { %10203 = vmatprep.subr.bf16.mxu1 %v10202_v46  ;;  %v2010_v46 = vld [vmem:[%s19333_s5 + $0x2a10] sm:$0xff]  ;;  %v9958_v8 = vpack.c.bf16 %v2063_v59, %v2045_v53  ;;  %v2083_v39 = vld [vmem:[%s19333_s5 + $0x2c58] sm:$0xff]  ;;  %v2100_v53 = vld [vmem:[%s19333_s5 + $0x2ce0] sm:$0xff] }
 0x51e   : > { %v2117_v59 = vld [vmem:[%s19333_s5 + $0x2d68] sm:$0xff] }
 0x51f   : > { %9949 = vmatpush1.bf16.msra.mxu0 %v9948_v2  ;;  %v2065_v2 = vld [vmem:[%s19333_s5 + $0x2bc8] sm:$0xff] }
 0x520   : > { %10205 = vmatpush1.bf16.msra.mxu1 %v10204_v3  ;;  %9951 = vmatprep.subr.bf16.mxu0 %v9950_v7  ;;  %v9956_v3 = vpack.c.bf16 %v2026_v45, %v2008_v44  ;;  %v10212_v7 = vpack.c.bf16 %v2028_v50, %v2010_v46  ;;  %v10214_v47 = vpack.c.bf16 %v2065_v2, %v2047_v61  ;;  %v2080_v45 = vld [vmem:[%s19333_s5 + $0x2c40] sm:$0xff]  ;;  %v2098_v46 = vld [vmem:[%s19333_s5 + $0x2cd0] sm:$0xff]  ;;  %v2135_v61 = vld [vmem:[%s19333_s5 + $0x2df8] sm:$0xff] }
 0x521   : > { %10207 = vmatprep.subr.bf16.mxu1 %v10206_v13  ;;  %v2046_v13 = vld [vmem:[%s19333_s5 + $0x2b30] sm:$0xff]  ;;  %v9962_v44 = vpack.c.bf16 %v2099_v29, %v2081_v51  ;;  %v2119_v2 = vld [vmem:[%s19333_s5 + $0x2d78] sm:$0xff]  ;;  %v2136_v51 = vld [vmem:[%s19333_s5 + $0x2e00] sm:$0xff] }
 0x522   : > { %v2153_v29 = vld [vmem:[%s19333_s5 + $0x2e88] sm:$0xff] }
 0x523   : > { %9953 = vmatpush1.bf16.msra.mxu0 %v9952_v38  ;;  %v2101_v38 = vld [vmem:[%s19333_s5 + $0x2ce8] sm:$0xff] }
 0x524   : > { %10209 = vmatpush1.bf16.msra.mxu1 %v10208_v42  ;;  %9955 = vmatprep.subr.bf16.mxu0 %v9954_v43  ;;  %v9960_v42 = vpack.c.bf16 %v2062_v9, %v2044_v22  ;;  %v10216_v43 = vpack.c.bf16 %v2064_v15, %v2046_v13  ;;  %v10218_v50 = vpack.c.bf16 %v2101_v38, %v2083_v39  ;;  %v2116_v9 = vld [vmem:[%s19333_s5 + $0x2d60] sm:$0xff]  ;;  %v2134_v13 = vld [vmem:[%s19333_s5 + $0x2df0] sm:$0xff]  ;;  %v2171_v39 = vld [vmem:[%s19333_s5 + $0x2f18] sm:$0xff] }
 0x525   : > { %10211 = vmatprep.subr.bf16.mxu1 %v10210_v49  ;;  %v2082_v49 = vld [vmem:[%s19333_s5 + $0x2c50] sm:$0xff]  ;;  %v9966_v22 = vpack.c.bf16 %v2135_v61, %v2117_v59  ;;  %v2155_v38 = vld [vmem:[%s19333_s5 + $0x2e98] sm:$0xff]  ;;  %v2172_v59 = vld [vmem:[%s19333_s5 + $0x2f20] sm:$0xff] }
 0x526   : > { %v2189_v61 = vld [vmem:[%s19333_s5 + $0x2fa8] sm:$0xff] }
 0x527   : > { %9957 = vmatpush1.bf16.msra.mxu0 %v9956_v3  ;;  %v2137_v3 = vld [vmem:[%s19333_s5 + $0x2e08] sm:$0xff] }
 0x528   : > { %10213 = vmatpush1.bf16.msra.mxu1 %v10212_v7  ;;  %9959 = vmatprep.subr.bf16.mxu0 %v9958_v8  ;;  %v9964_v7 = vpack.c.bf16 %v2098_v46, %v2080_v45  ;;  %v10220_v8 = vpack.c.bf16 %v2100_v53, %v2082_v49  ;;  %v10222_v15 = vpack.c.bf16 %v2137_v3, %v2119_v2  ;;  %v2152_v46 = vld [vmem:[%s19333_s5 + $0x2e80] sm:$0xff]  ;;  %v2170_v49 = vld [vmem:[%s19333_s5 + $0x2f10] sm:$0xff]  ;;  %v2207_v2 = vld [vmem:[%s19333_s5 + $0x3038] sm:$0xff] }
 0x529   : > { %10215 = vmatprep.subr.bf16.mxu1 %v10214_v47  ;;  %v2118_v47 = vld [vmem:[%s19333_s5 + $0x2d70] sm:$0xff]  ;;  %v9970_v45 = vpack.c.bf16 %v2171_v39, %v2153_v29  ;;  %v2191_v3 = vld [vmem:[%s19333_s5 + $0x2fb8] sm:$0xff]  ;;  %v2208_v29 = vld [vmem:[%s19333_s5 + $0x3040] sm:$0xff] }
 0x52a   : > { %v2225_v39 = vld [vmem:[%s19333_s5 + $0x30c8] sm:$0xff] }
 0x52b   : > { %9961 = vmatpush1.bf16.msra.mxu0 %v9960_v42  ;;  %v2173_v42 = vld [vmem:[%s19333_s5 + $0x2f28] sm:$0xff] }
 0x52c   : > { %10217 = vmatpush1.bf16.msra.mxu1 %v10216_v43  ;;  %9963 = vmatprep.subr.bf16.mxu0 %v9962_v44  ;;  %v9968_v43 = vpack.c.bf16 %v2134_v13, %v2116_v9  ;;  %v10224_v44 = vpack.c.bf16 %v2136_v51, %v2118_v47  ;;  %v10226_v53 = vpack.c.bf16 %v2173_v42, %v2155_v38  ;;  %v2188_v13 = vld [vmem:[%s19333_s5 + $0x2fa0] sm:$0xff]  ;;  %v2206_v47 = vld [vmem:[%s19333_s5 + $0x3030] sm:$0xff]  ;;  %v2243_v38 = vld [vmem:[%s19333_s5 + $0x3158] sm:$0xff] }
 0x52d   : > { %10219 = vmatprep.subr.bf16.mxu1 %v10218_v50  ;;  %v2154_v50 = vld [vmem:[%s19333_s5 + $0x2e90] sm:$0xff]  ;;  %v9974_v9 = vpack.c.bf16 %v2207_v2, %v2189_v61  ;;  %v2227_v42 = vld [vmem:[%s19333_s5 + $0x30d8] sm:$0xff]  ;;  %v2244_v61 = vld [vmem:[%s19333_s5 + $0x3160] sm:$0xff] }
 0x52e   : > { %v2261_v2 = vld [vmem:[%s19333_s5 + $0x31e8] sm:$0xff] }
 0x52f   : > { %9965 = vmatpush1.bf16.msra.mxu0 %v9964_v7  ;;  %v2209_v7 = vld [vmem:[%s19333_s5 + $0x3048] sm:$0xff] }
 0x530   : > { %10221 = vmatpush1.bf16.msra.mxu1 %v10220_v8  ;;  %9967 = vmatprep.subr.bf16.mxu0 %v9966_v22  ;;  %v9972_v8 = vpack.c.bf16 %v2170_v49, %v2152_v46  ;;  %v10228_v22 = vpack.c.bf16 %v2172_v59, %v2154_v50  ;;  %v10230_v51 = vpack.c.bf16 %v2209_v7, %v2191_v3  ;;  %v2224_v49 = vld [vmem:[%s19333_s5 + $0x30c0] sm:$0xff]  ;;  %v2242_v50 = vld [vmem:[%s19333_s5 + $0x3150] sm:$0xff]  ;;  %v2279_v3 = vld [vmem:[%s19333_s5 + $0x3278] sm:$0xff] }
 0x531   : > { %10223 = vmatprep.subr.bf16.mxu1 %v10222_v15  ;;  %v2190_v15 = vld [vmem:[%s19333_s5 + $0x2fb0] sm:$0xff]  ;;  %v9978_v46 = vpack.c.bf16 %v2243_v38, %v2225_v39  ;;  %v2263_v7 = vld [vmem:[%s19333_s5 + $0x31f8] sm:$0xff]  ;;  %v2280_v39 = vld [vmem:[%s19333_s5 + $0x3280] sm:$0xff] }
 0x532   : > { %v2297_v38 = vld [vmem:[%s19333_s5 + $0x3308] sm:$0xff] }
 0x533   : > { %9969 = vmatpush1.bf16.msra.mxu0 %v9968_v43  ;;  %v2245_v43 = vld [vmem:[%s19333_s5 + $0x3168] sm:$0xff] }
 0x534   : > { %10225 = vmatpush1.bf16.msra.mxu1 %v10224_v44  ;;  %9971 = vmatprep.subr.bf16.mxu0 %v9970_v45  ;;  %v9976_v44 = vpack.c.bf16 %v2206_v47, %v2188_v13  ;;  %v10232_v45 = vpack.c.bf16 %v2208_v29, %v2190_v15  ;;  %v10234_v59 = vpack.c.bf16 %v2245_v43, %v2227_v42  ;;  %v2260_v47 = vld [vmem:[%s19333_s5 + $0x31e0] sm:$0xff]  ;;  %v2278_v15 = vld [vmem:[%s19333_s5 + $0x3270] sm:$0xff]  ;;  %v2315_v42 = vld [vmem:[%s19333_s5 + $0x3398] sm:$0xff] }
 0x535   : > { %10227 = vmatprep.subr.bf16.mxu1 %v10226_v53  ;;  %v2226_v53 = vld [vmem:[%s19333_s5 + $0x30d0] sm:$0xff]  ;;  %v9982_v13 = vpack.c.bf16 %v2279_v3, %v2261_v2  ;;  %v2299_v43 = vld [vmem:[%s19333_s5 + $0x3318] sm:$0xff]  ;;  %v2316_v2 = vld [vmem:[%s19333_s5 + $0x33a0] sm:$0xff] }
 0x536   : > { %v2333_v3 = vld [vmem:[%s19333_s5 + $0x3428] sm:$0xff] }
 0x537   : > { %9973 = vmatpush1.bf16.msra.mxu0 %v9972_v8  ;;  %v2281_v8 = vld [vmem:[%s19333_s5 + $0x3288] sm:$0xff] }
 0x538   : > { %10229 = vmatpush1.bf16.msra.mxu1 %v10228_v22  ;;  %9975 = vmatprep.subr.bf16.mxu0 %v9974_v9  ;;  %v9980_v22 = vpack.c.bf16 %v2242_v50, %v2224_v49  ;;  %v10236_v9 = vpack.c.bf16 %v2244_v61, %v2226_v53  ;;  %v10238_v29 = vpack.c.bf16 %v2281_v8, %v2263_v7  ;;  %v2296_v50 = vld [vmem:[%s19333_s5 + $0x3300] sm:$0xff]  ;;  %v2314_v53 = vld [vmem:[%s19333_s5 + $0x3390] sm:$0xff]  ;;  %v2351_v7 = vld [vmem:[%s19333_s5 + $0x34b8] sm:$0xff] }
 0x539   : > { %10231 = vmatprep.subr.bf16.mxu1 %v10230_v51  ;;  %v2262_v51 = vld [vmem:[%s19333_s5 + $0x31f0] sm:$0xff]  ;;  %v9986_v49 = vpack.c.bf16 %v2315_v42, %v2297_v38  ;;  %v2335_v8 = vld [vmem:[%s19333_s5 + $0x3438] sm:$0xff]  ;;  %v2352_v38 = vld [vmem:[%s19333_s5 + $0x34c0] sm:$0xff] }
 0x53a   : > { %v2369_v42 = vld [vmem:[%s19333_s5 + $0x3548] sm:$0xff] }
 0x53b   : > { %9977 = vmatpush1.bf16.msra.mxu0 %v9976_v44  ;;  %v2317_v44 = vld [vmem:[%s19333_s5 + $0x33a8] sm:$0xff] }
 0x53c   : > { %10233 = vmatpush1.bf16.msra.mxu1 %v10232_v45  ;;  %9979 = vmatprep.subr.bf16.mxu0 %v9978_v46  ;;  %v9984_v45 = vpack.c.bf16 %v2278_v15, %v2260_v47  ;;  %v10240_v46 = vpack.c.bf16 %v2280_v39, %v2262_v51  ;;  %v10242_v61 = vpack.c.bf16 %v2317_v44, %v2299_v43  ;;  %v2332_v15 = vld [vmem:[%s19333_s5 + $0x3420] sm:$0xff]  ;;  %v2350_v51 = vld [vmem:[%s19333_s5 + $0x34b0] sm:$0xff]  ;;  %v2387_v43 = vld [vmem:[%s19333_s5 + $0x35d8] sm:$0xff] }
 0x53d   : > { %10235 = vmatprep.subr.bf16.mxu1 %v10234_v59  ;;  %v2298_v59 = vld [vmem:[%s19333_s5 + $0x3310] sm:$0xff]  ;;  %v9990_v47 = vpack.c.bf16 %v2351_v7, %v2333_v3  ;;  %v2371_v44 = vld [vmem:[%s19333_s5 + $0x3558] sm:$0xff]  ;;  %v2388_v3 = vld [vmem:[%s19333_s5 + $0x35e0] sm:$0xff] }
 0x53e   : > { %v2405_v7 = vld [vmem:[%s19333_s5 + $0x3668] sm:$0xff] }
 0x53f   : > { %9981 = vmatpush1.bf16.msra.mxu0 %v9980_v22  ;;  %v2353_v22 = vld [vmem:[%s19333_s5 + $0x34c8] sm:$0xff] }
 0x540   : > { %10237 = vmatpush1.bf16.msra.mxu1 %v10236_v9  ;;  %9983 = vmatprep.subr.bf16.mxu0 %v9982_v13  ;;  %v9988_v9 = vpack.c.bf16 %v2314_v53, %v2296_v50  ;;  %v10244_v13 = vpack.c.bf16 %v2316_v2, %v2298_v59  ;;  %v10246_v39 = vpack.c.bf16 %v2353_v22, %v2335_v8  ;;  %v2368_v53 = vld [vmem:[%s19333_s5 + $0x3540] sm:$0xff]  ;;  %v2386_v59 = vld [vmem:[%s19333_s5 + $0x35d0] sm:$0xff]  ;;  %v2423_v8 = vld [vmem:[%s19333_s5 + $0x36f8] sm:$0xff] }
 0x541   : > { %10239 = vmatprep.subr.bf16.mxu1 %v10238_v29  ;;  %v2334_v29 = vld [vmem:[%s19333_s5 + $0x3430] sm:$0xff]  ;;  %v9994_v50 = vpack.c.bf16 %v2387_v43, %v2369_v42  ;;  %v2407_v22 = vld [vmem:[%s19333_s5 + $0x3678] sm:$0xff]  ;;  %v2424_v42 = vld [vmem:[%s19333_s5 + $0x3700] sm:$0xff] }
 0x542   : > { %v2441_v43 = vld [vmem:[%s19333_s5 + $0x3788] sm:$0xff] }
 0x543   : > { %9985 = vmatpush1.bf16.msra.mxu0 %v9984_v45  ;;  %v2389_v45 = vld [vmem:[%s19333_s5 + $0x35e8] sm:$0xff] }
 0x544   : > { %10241 = vmatpush1.bf16.msra.mxu1 %v10240_v46  ;;  %9987 = vmatprep.subr.bf16.mxu0 %v9986_v49  ;;  %v9992_v46 = vpack.c.bf16 %v2350_v51, %v2332_v15  ;;  %v10248_v49 = vpack.c.bf16 %v2352_v38, %v2334_v29  ;;  %v10250_v2 = vpack.c.bf16 %v2389_v45, %v2371_v44  ;;  %v2404_v29 = vld [vmem:[%s19333_s5 + $0x3660] sm:$0xff]  ;;  %v2406_v38 = vld [vmem:[%s19333_s5 + $0x3670] sm:$0xff]  ;;  %v2459_v44 = vld [vmem:[%s19333_s5 + $0x3818] sm:$0xff] }
 0x545   : > { %10243 = vmatprep.subr.bf16.mxu1 %v10242_v61  ;;  %v2370_v61 = vld [vmem:[%s19333_s5 + $0x3550] sm:$0xff]  ;;  %v9998_v15 = vpack.c.bf16 %v2423_v8, %v2405_v7  ;;  %v2443_v45 = vld [vmem:[%s19333_s5 + $0x3798] sm:$0xff]  ;;  %v2460_v7 = vld [vmem:[%s19333_s5 + $0x3820] sm:$0xff] }
 0x546   : > { %v2477_v8 = vld [vmem:[%s19333_s5 + $0x38a8] sm:$0xff] }
 0x547   : > { %9989 = vmatpush1.bf16.msra.mxu0 %v9988_v9  ;;  %v2425_v9 = vld [vmem:[%s19333_s5 + $0x3708] sm:$0xff] }
 0x548   : > { %10245 = vmatpush1.bf16.msra.mxu1 %v10244_v13  ;;  %9991 = vmatprep.subr.bf16.mxu0 %v9990_v47  ;;  %v9996_v13 = vpack.c.bf16 %v2386_v59, %v2368_v53  ;;  %v10252_v47 = vpack.c.bf16 %v2388_v3, %v2370_v61  ;;  %v10254_v51 = vpack.c.bf16 %v2425_v9, %v2407_v22  ;;  %v2440_v59 = vld [vmem:[%s19333_s5 + $0x3780] sm:$0xff]  ;;  %v2458_v61 = vld [vmem:[%s19333_s5 + $0x3810] sm:$0xff]  ;;  %v2495_v22 = vld [vmem:[%s19333_s5 + $0x3938] sm:$0xff] }
 0x549   : > { %10247 = vmatprep.subr.bf16.mxu1 %v10246_v39  ;;  %v2422_v39 = vld [vmem:[%s19333_s5 + $0x36f0] sm:$0xff]  ;;  %v10002_v53 = vpack.c.bf16 %v2459_v44, %v2441_v43  ;;  %v2479_v9 = vld [vmem:[%s19333_s5 + $0x38b8] sm:$0xff]  ;;  %v2496_v43 = vld [vmem:[%s19333_s5 + $0x3940] sm:$0xff] }
 0x54a   : > { %v2513_v44 = vld [vmem:[%s19333_s5 + $0x39c8] sm:$0xff] }
 0x54b   : > { %9993 = vmatpush1.bf16.msra.mxu0 %v9992_v46  ;;  %v2461_v46 = vld [vmem:[%s19333_s5 + $0x3828] sm:$0xff] }
 0x54c   : > { %10249 = vmatpush1.bf16.msra.mxu1 %v10248_v49  ;;  %9995 = vmatprep.subr.bf16.mxu0 %v9994_v50  ;;  %v10000_v49 = vpack.c.bf16 %v2422_v39, %v2404_v29  ;;  %v10256_v50 = vpack.c.bf16 %v2424_v42, %v2406_v38  ;;  %v10258_v3 = vpack.c.bf16 %v2461_v46, %v2443_v45  ;;  %v2476_v29 = vld [vmem:[%s19333_s5 + $0x38a0] sm:$0xff]  ;;  %v2494_v39 = vld [vmem:[%s19333_s5 + $0x3930] sm:$0xff]  ;;  %v2531_v45 = vld [vmem:[%s19333_s5 + $0x3a58] sm:$0xff] }
 0x54d   : > { %10251 = vmatprep.subr.bf16.mxu1 %v10250_v2  ;;  %v2442_v2 = vld [vmem:[%s19333_s5 + $0x3790] sm:$0xff]  ;;  %v2515_v46 = vld [vmem:[%s19333_s5 + $0x39d8] sm:$0xff] }
 0x54e   : > { %v2478_v38 = vld [vmem:[%s19333_s5 + $0x38b0] sm:$0xff] }
 0x54f   : > { %9997 = vmatpush1.bf16.msra.mxu0 %v9996_v13  ;;  %v2497_v13 = vld [vmem:[%s19333_s5 + $0x3948] sm:$0xff] }
 0x550   : > { %10253 = vmatpush1.bf16.msra.mxu1 %v10252_v47  ;;  %9999 = vmatprep.subr.bf16.mxu0 %v9998_v15  ;;  %v10004_v47 = vpack.c.bf16 %v2458_v61, %v2440_v59  ;;  %v10260_v15 = vpack.c.bf16 %v2460_v7, %v2442_v2  ;;  %v10262_v42 = vpack.c.bf16 %v2497_v13, %v2479_v9  ;;  %v2512_v61 = vld [vmem:[%s19333_s5 + $0x39c0] sm:$0xff]  ;;  %v2530_v2 = vld [vmem:[%s19333_s5 + $0x3a50] sm:$0xff]  ;;  %v2567_v9 = vld [vmem:[%s19333_s5 + $0x3b78] sm:$0xff] }
 0x551   : > { %10255 = vmatprep.subr.bf16.mxu1 %v10254_v51  ;;  %v10006_v51 = vpack.c.bf16 %v2495_v22, %v2477_v8  ;;  %v10010_v59 = vpack.c.bf16 %v2531_v45, %v2513_v44  ;;  %v2532_v8 = vld [vmem:[%s19333_s5 + $0x3a60] sm:$0xff]  ;;  %v2549_v22 = vld [vmem:[%s19333_s5 + $0x3ae8] sm:$0xff]  ;;  %v2551_v13 = vld [vmem:[%s19333_s5 + $0x3af8] sm:$0xff] }
 0x552   : > { %5035 = vmatmul.mubr.f32.vlgmr.msra.gmra.mrb[12].mxu0 %v12247_v37  ;;  %v2568_v44 = vld [vmem:[%s19333_s5 + $0x3b80] sm:$0xff]  ;;  %v2585_v45 = vld [vmem:[%s19333_s5 + $0x3c08] sm:$0xff] }
 0x553   : > { %5343 = vmatmul.mubr.f32.vlgmr.msra.gmra.mrb[30].mxu1 %v12247_v37  ;;  %5040 = vmatprep.mubr.f32.mxu0 %v12250_v12 }
 0x554   : > { %10001 = vmatpush1.bf16.msra.mxu0 %v10000_v49  ;;  %5348 = vmatprep.mubr.f32.mxu1 %v12250_v12  ;;  %v2533_v49 = vld [vmem:[%s19333_s5 + $0x3a68] sm:$0xff] }
 0x555   : > { %10257 = vmatpush1.bf16.msra.mxu1 %v10256_v50  ;;  %10003 = vmatprep.subr.bf16.mxu0 %v10002_v53  ;;  %v10008_v50 = vpack.c.bf16 %v2494_v39, %v2476_v29  ;;  %v10264_v53 = vpack.c.bf16 %v2496_v43, %v2478_v38  ;;  %v10266_v7 = vpack.c.bf16 %v2533_v49, %v2515_v46  ;;  %v2548_v39 = vld [vmem:[%s19333_s5 + $0x3ae0] sm:$0xff]  ;;  %v2566_v38 = vld [vmem:[%s19333_s5 + $0x3b70] sm:$0xff]  ;;  %v2603_v46 = vld [vmem:[%s19333_s5 + $0x3c98] sm:$0xff] }
 0x556   : > { %5041 = vmatmul.mubr.f32.gmra.mrb[14].mxu0 %v12280_v28  ;;  %10259 = vmatprep.subr.bf16.mxu1 %v10258_v3  ;;  %v2514_v3 = vld [vmem:[%s19333_s5 + $0x39d0] sm:$0xff]  ;;  %v10014_v29 = vpack.c.bf16 %v2567_v9, %v2549_v22  ;;  %v2587_v49 = vld [vmem:[%s19333_s5 + $0x3c18] sm:$0xff]  ;;  %v2604_v9 = vld [vmem:[%s19333_s5 + $0x3ca0] sm:$0xff] }
 0x557   : > { %5349 = vmatmul.mubr.f32.gmra.mrb[32].mxu1 %v12280_v28  ;;  %5111 = vmatprep.mubr.f32.mxu0 %v12287_v30 }
 0x558   : > { %10005 = vmatpush1.bf16.msra.mxu0 %v10004_v47  ;;  %5419 = vmatprep.mubr.f32.mxu1 %v12287_v30  ;;  %v2569_v47 = vld [vmem:[%s19333_s5 + $0x3b88] sm:$0xff] }
 0x559   : > { %10261 = vmatpush1.bf16.msra.mxu1 %v10260_v15  ;;  %10007 = vmatprep.subr.bf16.mxu0 %v10006_v51  ;;  %v10012_v15 = vpack.c.bf16 %v2530_v2, %v2512_v61  ;;  %v10268_v51 = vpack.c.bf16 %v2532_v8, %v2514_v3  ;;  %v10270_v43 = vpack.c.bf16 %v2569_v47, %v2551_v13  ;;  %v2584_v2 = vld [vmem:[%s19333_s5 + $0x3c00] sm:$0xff]  ;;  %v2602_v3 = vld [vmem:[%s19333_s5 + $0x3c90] sm:$0xff]  ;;  %v2621_v13 = vld [vmem:[%s19333_s5 + $0x3d28] sm:$0xff] }
 0x55a   : > { %10263 = vmatprep.subr.bf16.mxu1 %v10262_v42  ;;  %v2550_v42 = vld [vmem:[%s19333_s5 + $0x3af0] sm:$0xff]  ;;  %v10018_v61 = vpack.c.bf16 %v2603_v46, %v2585_v45  ;;  %v2639_v47 = vld [vmem:[%s19333_s5 + $0x3db8] sm:$0xff]  ;;  %v2620_v45 = vld [vmem:[%s19333_s5 + $0x3d20] sm:$0xff] }
 0x55b   : > { %v2638_v46 = vld [vmem:[%s19333_s5 + $0x3db0] sm:$0xff] }
 0x55c   : > { %10009 = vmatpush1.bf16.msra.mxu0 %v10008_v50  ;;  %v2605_v50 = vld [vmem:[%s19333_s5 + $0x3ca8] sm:$0xff] }
 0x55d   : > { %10265 = vmatpush1.bf16.msra.mxu1 %v10264_v53  ;;  %10011 = vmatprep.subr.bf16.mxu0 %v10010_v59  ;;  %v10016_v53 = vpack.c.bf16 %v2566_v38, %v2548_v39  ;;  %v10272_v59 = vpack.c.bf16 %v2568_v44, %v2550_v42  ;;  %v10274_v22 = vpack.c.bf16 %v2605_v50, %v2587_v49  ;;  %v2641_v39 = vld [vmem:[%s19333_s5 + $0x3dc8] sm:$0xff]  ;;  %v2622_v49 = vld [vmem:[%s19333_s5 + $0x3d30] sm:$0xff] }
 0x55e   : > { %10267 = vmatprep.subr.bf16.mxu1 %v10266_v7  ;;  %v2586_v7 = vld [vmem:[%s19333_s5 + $0x3c10] sm:$0xff]  ;;  %v10020_v42 = vpack.c.bf16 %v2602_v3, %v2584_v2  ;;  %v10022_v44 = vpack.c.bf16 %v2639_v47, %v2621_v13  ;;  %v2675_v2 = vld [vmem:[%s19333_s5 + $0x3ed8] sm:$0xff]  ;;  %v2677_v13 = vld [vmem:[%s19333_s5 + $0x3ee8] sm:$0xff]  ;;  %v10024_v3 = vpack.c.bf16 %v2638_v46, %v2620_v45 }
 0x55f   : > { %v2674_v47 = vld [vmem:[%s19333_s5 + $0x3ed0] sm:$0xff]  ;;  %v2693_v45 = vld [vmem:[%s19333_s5 + $0x3f68] sm:$0xff]  ;;  %v2711_v46 = vld [vmem:[%s19333_s5 + $0x3ff8] sm:$0xff] }
 0x560   : > { %10013 = vmatpush1.bf16.msra.mxu0 %v10012_v15 }
 0x561   : > { %10269 = vmatpush1.bf16.msra.mxu1 %v10268_v51  ;;  %10015 = vmatprep.subr.bf16.mxu0 %v10014_v29  ;;  %v2623_v29 = vld [vmem:[%s19333_s5 + $0x3d38] sm:$0xff] }
 0x562   : > { %10271 = vmatprep.subr.bf16.mxu1 %v10270_v43  ;;  %v17136_v8 = vpop.f32.mrb[8].mxu0  ;;  %v10276_v43 = vpack.c.bf16 %v2604_v9, %v2586_v7  ;;  %v2659_v9 = vld [vmem:[%s19333_s5 + $0x3e58] sm:$0xff] }
 0x563   : > { %v17147_v15 = vpop.f32.mrb[26].mxu1  ;;  %v17149_v51 = vpop.f32.mrb[9].mxu0 }
 0x564   : > { %10017 = vmatpush1.bf16.msra.mxu0 %v10016_v53  ;;  %v17157_v38 = vpop.f32.mrb[27].mxu1  ;;  %v10278_v53 = vpack.c.bf16 %v2641_v39, %v2623_v29  ;;  %v2658_v29 = vld [vmem:[%s19333_s5 + $0x3e50] sm:$0xff] }
 0x565   : > { %10273 = vmatpush1.bf16.msra.mxu1 %v10272_v59  ;;  %10019 = vmatprep.subr.bf16.mxu0 %v10018_v61  ;;  %v2640_v59 = vld [vmem:[%s19333_s5 + $0x3dc0] sm:$0xff]  ;;  %v2657_v61 = vld [vmem:[%s19333_s5 + $0x3e48] sm:$0xff] }
 0x566   : > { %10275 = vmatprep.subr.bf16.mxu1 %v10274_v22  ;;  %v17168_v50 = vpop.f32.mrb[10].mxu0  ;;  %v10280_v41 = vpack.c.bf16 %v2640_v59, %v2622_v49  ;;  %v10026_v32 = vpack.c.bf16 %v2675_v2, %v2657_v61  ;;  %v2695_v49 = vld [vmem:[%s19333_s5 + $0x3f78] sm:$0xff]  ;;  %v10030_v2 = vpack.c.bf16 %v2711_v46, %v2693_v45  ;;  %v2728_v45 = vld [vmem:[%s19333_s5 + $0x4080] sm:$0xff]  ;;  %v2746_v46 = vld [vmem:[%s19333_s5 + $0x4110] sm:$0xff] }
 0x567   : > { %v17181_v7 = vpop.f32.mrb[28].mxu1  ;;  %v17183_v22 = vpop.f32.mrb[11].mxu0 }
 0x568   : > { %10021 = vmatpush1.bf16.msra.mxu0 %v10020_v42  ;;  %v17195_v39 = vpop.f32.mrb[29].mxu1  ;;  %v2656_v42 = vld [vmem:[%s19333_s5 + $0x3e40] sm:$0xff] }
 0x569   : > { %10277 = vmatpush1.bf16.msra.mxu1 %v10276_v43  ;;  %10023 = vmatprep.subr.bf16.mxu0 %v10022_v44  ;;  %v10282_v43 = vpack.c.bf16 %v2677_v13, %v2659_v9  ;;  %v2676_v44 = vld [vmem:[%s19333_s5 + $0x3ee0] sm:$0xff]  ;;  %v10028_v59 = vpack.c.bf16 %v2674_v47, %v2656_v42  ;;  %v2710_v13 = vld [vmem:[%s19333_s5 + $0x3ff0] sm:$0xff]  ;;  %v2731_v47 = vld [vmem:[%s19333_s5 + $0x4098] sm:$0xff] }
 0x56a   : > { %10279 = vmatprep.subr.bf16.mxu1 %v10278_v53  ;;  %v2713_v53 = vld [vmem:[%s19333_s5 + $0x4008] sm:$0xff]  ;;  %v10284_v61 = vpack.c.bf16 %v2676_v44, %v2658_v29  ;;  %v2692_v9 = vld [vmem:[%s19333_s5 + $0x3f60] sm:$0xff] }
 0x56b   : > { %v10286_v36 = vpack.c.bf16 %v2713_v53, %v2695_v49  ;;  %v2749_v29 = vld [vmem:[%s19333_s5 + $0x4128] sm:$0xff]  ;;  %v10032_v42 = vpack.c.bf16 %v2710_v13, %v2692_v9  ;;  %v2730_v49 = vld [vmem:[%s19333_s5 + $0x4090] sm:$0xff]  ;;  %v10036_v9 = vpack.c.bf16 %v2746_v46, %v2728_v45  ;;  %v2803_v45 = vld [vmem:[%s19333_s5 + $0x42d8] sm:$0xff] }
 0x56c   : > { %10025 = vmatpush1.bf16.msra.mxu0 %v10024_v3  ;;  %v2747_v3 = vld [vmem:[%s19333_s5 + $0x4118] sm:$0xff]  ;;  %v10290_v53 = vpack.c.bf16 %v2749_v29, %v2731_v47  ;;  %v2766_v47 = vld [vmem:[%s19333_s5 + $0x41b0] sm:$0xff]  ;;  %v2821_v46 = vld [vmem:[%s19333_s5 + $0x4368] sm:$0xff] }
 0x56d   : > { %10281 = vmatpush1.bf16.msra.mxu1 %v10280_v41  ;;  %10027 = vmatprep.subr.bf16.mxu0 %v10026_v32  ;;  %v2712_v32 = vld [vmem:[%s19333_s5 + $0x4000] sm:$0xff]  ;;  %v2729_v41 = vld [vmem:[%s19333_s5 + $0x4088] sm:$0xff] }
 0x56e   : > { %10283 = vmatprep.subr.bf16.mxu1 %v10282_v43  ;;  %v10288_v43 = vpack.c.bf16 %v2712_v32, %v2694_v63  ;;  %v10034_v44 = vpack.c.bf16 %v2747_v3, %v2729_v41  ;;  %v2765_v63 = vld [vmem:[%s19333_s5 + $0x41a8] sm:$0xff]  ;;  %v2764_v41 = vld [vmem:[%s19333_s5 + $0x41a0] sm:$0xff]  ;;  %v2782_v3 = vld [vmem:[%s19333_s5 + $0x4230] sm:$0xff] }
 0x570   : > { %10029 = vmatpush1.bf16.msra.mxu0 %v10028_v59  ;;  %v2748_v59 = vld [vmem:[%s19333_s5 + $0x4120] sm:$0xff] }
 0x571   : > { %10285 = vmatpush1.bf16.msra.mxu1 %v10284_v61  ;;  %10031 = vmatprep.subr.bf16.mxu0 %v10030_v2  ;;  %v2783_v61 = vld [vmem:[%s19333_s5 + $0x4238] sm:$0xff]  ;;  %v10292_v13 = vpack.c.bf16 %v2748_v59, %v2730_v49  ;;  %v10040_v49 = vpack.c.bf16 %v2782_v3, %v2764_v41  ;;  %v2857_v3 = vld [vmem:[%s19333_s5 + $0x4488] sm:$0xff] }
 0x572   : > { %10287 = vmatprep.subr.bf16.mxu1 %v10286_v36  ;;  %v2767_v2 = vld [vmem:[%s19333_s5 + $0x41b8] sm:$0xff]  ;;  %v2785_v36 = vld [vmem:[%s19333_s5 + $0x4248] sm:$0xff]  ;;  %v10038_v32 = vpack.c.bf16 %v2783_v61, %v2765_v63  ;;  %v2800_v63 = vld [vmem:[%s19333_s5 + $0x42c0] sm:$0xff] }
 0x573   : > { %v10294_v29 = vpack.c.bf16 %v2785_v36, %v2767_v2  ;;  %v2818_v61 = vld [vmem:[%s19333_s5 + $0x4350] sm:$0xff]  ;;  %v10298_v36 = vpack.c.bf16 %v2821_v46, %v2803_v45  ;;  %v2839_v41 = vld [vmem:[%s19333_s5 + $0x43f8] sm:$0xff] }
 0x574   : > { %10033 = vmatpush1.bf16.msra.mxu0 %v10032_v42  ;;  %v2784_v42 = vld [vmem:[%s19333_s5 + $0x4240] sm:$0xff]  ;;  %v2802_v2 = vld [vmem:[%s19333_s5 + $0x42d0] sm:$0xff]  ;;  %v10302_v46 = vpack.c.bf16 %v2857_v3, %v2839_v41 }
 0x575   : > { %10289 = vmatpush1.bf16.msra.mxu1 %v10288_v43  ;;  %10035 = vmatprep.subr.bf16.mxu0 %v10034_v44  ;;  %v2801_v43 = vld [vmem:[%s19333_s5 + $0x42c8] sm:$0xff]  ;;  %v2819_v44 = vld [vmem:[%s19333_s5 + $0x4358] sm:$0xff]  ;;  %v2838_v45 = vld [vmem:[%s19333_s5 + $0x43f0] sm:$0xff] }
 0x576   : > { %10291 = vmatprep.subr.bf16.mxu1 %v10290_v53  ;;  %v10296_v53 = vpack.c.bf16 %v2784_v42, %v2766_v47  ;;  %v10042_v59 = vpack.c.bf16 %v2819_v44, %v2801_v43  ;;  %v10044_v47 = vpack.c.bf16 %v2818_v61, %v2800_v63  ;;  %v2836_v43 = vld [vmem:[%s19333_s5 + $0x43e0] sm:$0xff]  ;;  %v2854_v44 = vld [vmem:[%s19333_s5 + $0x4470] sm:$0xff]  ;;  %v2875_v63 = vld [vmem:[%s19333_s5 + $0x4518] sm:$0xff] }
 0x577   : > { %v2893_v61 = vld [vmem:[%s19333_s5 + $0x45a8] sm:$0xff]  ;;  %v2874_v41 = vld [vmem:[%s19333_s5 + $0x4510] sm:$0xff] }
 0x578   : > { %10037 = vmatpush1.bf16.msra.mxu0 %v10036_v9  ;;  %v2820_v9 = vld [vmem:[%s19333_s5 + $0x4360] sm:$0xff]  ;;  %v10306_v3 = vpack.c.bf16 %v2893_v61, %v2875_v63  ;;  %v2910_v63 = vld [vmem:[%s19333_s5 + $0x4630] sm:$0xff] }
 0x579   : > { %10293 = vmatpush1.bf16.msra.mxu1 %v10292_v13  ;;  %10039 = vmatprep.subr.bf16.mxu0 %v10038_v32  ;;  %v2837_v13 = vld [vmem:[%s19333_s5 + $0x43e8] sm:$0xff]  ;;  %v2855_v32 = vld [vmem:[%s19333_s5 + $0x4478] sm:$0xff] }
 0x57a   : > { %10295 = vmatprep.subr.bf16.mxu1 %v10294_v29  ;;  %v10300_v29 = vpack.c.bf16 %v2820_v9, %v2802_v2  ;;  %v10046_v42 = vpack.c.bf16 %v2855_v32, %v2837_v13  ;;  %v10048_v2 = vpack.c.bf16 %v2854_v44, %v2836_v43  ;;  %v2872_v13 = vld [vmem:[%s19333_s5 + $0x4500] sm:$0xff]  ;;  %v2890_v32 = vld [vmem:[%s19333_s5 + $0x4590] sm:$0xff]  ;;  %v2911_v43 = vld [vmem:[%s19333_s5 + $0x4638] sm:$0xff] }
 0x57b   : > { %v2929_v44 = vld [vmem:[%s19333_s5 + $0x46c8] sm:$0xff] }
 0x57c   : > { %10041 = vmatpush1.bf16.msra.mxu0 %v10040_v49  ;;  %v2856_v49 = vld [vmem:[%s19333_s5 + $0x4480] sm:$0xff]  ;;  %v10310_v61 = vpack.c.bf16 %v2929_v44, %v2911_v43  ;;  %v2946_v43 = vld [vmem:[%s19333_s5 + $0x4750] sm:$0xff] }
 0x57d   : > { %10297 = vmatpush1.bf16.msra.mxu1 %v10296_v53  ;;  %10043 = vmatprep.subr.bf16.mxu0 %v10042_v59  ;;  %v2873_v53 = vld [vmem:[%s19333_s5 + $0x4508] sm:$0xff]  ;;  %v2891_v59 = vld [vmem:[%s19333_s5 + $0x4598] sm:$0xff] }
 0x57e   : > { %10299 = vmatprep.subr.bf16.mxu1 %v10298_v36  ;;  %v10304_v36 = vpack.c.bf16 %v2856_v49, %v2838_v45  ;;  %v10050_v9 = vpack.c.bf16 %v2891_v59, %v2873_v53  ;;  %v10052_v45 = vpack.c.bf16 %v2890_v32, %v2872_v13  ;;  %v2908_v53 = vld [vmem:[%s19333_s5 + $0x4620] sm:$0xff]  ;;  %v2926_v59 = vld [vmem:[%s19333_s5 + $0x46b0] sm:$0xff]  ;;  %v2947_v13 = vld [vmem:[%s19333_s5 + $0x4758] sm:$0xff] }
 0x57f   : > { %v2965_v32 = vld [vmem:[%s19333_s5 + $0x47e8] sm:$0xff] }
 0x580   : > { %10045 = vmatpush1.bf16.msra.mxu0 %v10044_v47  ;;  %v2892_v47 = vld [vmem:[%s19333_s5 + $0x45a0] sm:$0xff]  ;;  %v10314_v44 = vpack.c.bf16 %v2965_v32, %v2947_v13 }
 0x581   : > { %10301 = vmatpush1.bf16.msra.mxu1 %v10300_v29  ;;  %10047 = vmatprep.subr.bf16.mxu0 %v10046_v42  ;;  %v2909_v29 = vld [vmem:[%s19333_s5 + $0x4628] sm:$0xff]  ;;  %v2927_v42 = vld [vmem:[%s19333_s5 + $0x46b8] sm:$0xff] }
 0x582   : > { %10303 = vmatprep.subr.bf16.mxu1 %v10302_v46  ;;  %v10308_v46 = vpack.c.bf16 %v2892_v47, %v2874_v41  ;;  %v10054_v49 = vpack.c.bf16 %v2927_v42, %v2909_v29  ;;  %v10056_v41 = vpack.c.bf16 %v2926_v59, %v2908_v53  ;;  %v2944_v29 = vld [vmem:[%s19333_s5 + $0x4740] sm:$0xff]  ;;  %v2962_v42 = vld [vmem:[%s19333_s5 + $0x47d0] sm:$0xff] }
 0x583   : > { %v10060_v53 = vpack.c.bf16 %v2962_v42, %v2944_v29  ;;  %v752_v29 = vld [vmem:[%s19333_s5 + $0x2c0] sm:$0xff]  ;;  %v770_v42 = vld [vmem:[%s19333_s5 + $0x350] sm:$0xff] }
 0x584   : > { %10049 = vmatpush1.bf16.msra.mxu0 %v10048_v2  ;;  %v2928_v2 = vld [vmem:[%s19333_s5 + $0x46c0] sm:$0xff] }
 0x585   : > { %10305 = vmatpush1.bf16.msra.mxu1 %v10304_v36  ;;  %10051 = vmatprep.subr.bf16.mxu0 %v10050_v9  ;;  %v2945_v36 = vld [vmem:[%s19333_s5 + $0x4748] sm:$0xff]  ;;  %v2963_v9 = vld [vmem:[%s19333_s5 + $0x47d8] sm:$0xff] }
 0x586   : > { %10307 = vmatprep.subr.bf16.mxu1 %v10306_v3  ;;  %v10312_v3 = vpack.c.bf16 %v2928_v2, %v2910_v63  ;;  %v10058_v47 = vpack.c.bf16 %v2963_v9, %v2945_v36  ;;  %v698_v2 = vld [vmem:[%s19333_s5 + $0x110] sm:$0xff]  ;;  %v717_v36 = vld [vmem:[%s19333_s5 + $0x1a8] sm:$0xff]  ;;  %v735_v9 = vld [vmem:[%s19333_s5 + $0x238] sm:$0xff] }
 0x587   : > { %v10322_v32 = vpack.c.bf16 %v735_v9, %v717_v36  ;;  %v897_v36 = vld [vmem:[%s19333_s5 + $0x748] sm:$0xff]  ;;  %v915_v9 = vld [vmem:[%s19333_s5 + $0x7d8] sm:$0xff] }
 0x588   : > { %10053 = vmatpush1.bf16.msra.mxu0 %v10052_v45  ;;  %v2964_v45 = vld [vmem:[%s19333_s5 + $0x47e0] sm:$0xff] }
 0x589   : > { %10309 = vmatpush1.bf16.msra.mxu1 %v10308_v46  ;;  %10055 = vmatprep.subr.bf16.mxu0 %v10054_v49  ;;  %v681_v46 = vld [vmem:[%s19333_s5 + $0x88] sm:$0xff]  ;;  %v699_v49 = vld [vmem:[%s19333_s5 + $0x118] sm:$0xff]  ;;  %v10316_v59 = vpack.c.bf16 %v2964_v45, %v2946_v43 }
 0x58a   : > { %10311 = vmatprep.subr.bf16.mxu1 %v10310_v61  ;;  %v10318_v63 = vpack.c.bf16 %v699_v49, %v681_v46  ;;  %v680_v61 = vld [vmem:[%s19333_s5 + $0x80] sm:$0xff]  ;;  %v825_v43 = vld [vmem:[%s19333_s5 + $0x508] sm:$0xff]  ;;  %v19362_v49 = vpack.c.bf16 %v15591_v16, %v15557_v58  ;;  %v17511_v58 = vld [vmem:[%s19334_s6 + $0x10] sm:$0xff] }
 0x58b   : > { %v10320_v13 = vpack.c.bf16 %v698_v2, %v680_v61  ;;  %v17487_v45 = vld [vmem:[%s19334_s6 + $0x8] sm:$0xff]  ;;  %v860_v61 = vld [vmem:[%s19333_s5 + $0x620] sm:$0xff]  ;;  %v878_v2 = vld [vmem:[%s19333_s5 + $0x6b0] sm:$0xff] }
 0x58c   : > { %10057 = vmatpush1.bf16.msra.mxu0 %v10056_v41  ;;  %v716_v41 = vld [vmem:[%s19333_s5 + $0x1a0] sm:$0xff] }
 0x58d   : > { %10313 = vmatpush1.bf16.msra.mxu1 %v10312_v3  ;;  %10059 = vmatprep.subr.bf16.mxu0 %v10058_v47  ;;  %v734_v3 = vld [vmem:[%s19333_s5 + $0x230] sm:$0xff]  ;;  %v753_v47 = vld [vmem:[%s19333_s5 + $0x2c8] sm:$0xff] }
 0x58e   : > { %10315 = vmatprep.subr.bf16.mxu1 %v10314_v44  ;;  %v10324_v20 = vpack.c.bf16 %v734_v3, %v716_v41  ;;  %v843_v44 = vld [vmem:[%s19333_s5 + $0x598] sm:$0xff]  ;;  %v10342_v41 = vpack.c.bf16 %v915_v9, %v897_v36  ;;  %v896_v3 = vld [vmem:[%s19333_s5 + $0x740] sm:$0xff] }
 0x58f   : > { %v1076_v9 = vld [vmem:[%s19333_s5 + $0xce0] sm:$0xff] }
 0x590   : > { %10061 = vmatpush1.bf16.msra.mxu0 %v10060_v53  ;;  %v10334_v53 = vpack.c.bf16 %v843_v44, %v825_v43  ;;  %v968_v44 = vld [vmem:[%s19333_s5 + $0x980] sm:$0xff] }
 0x591   : > { %10317 = vmatpush1.bf16.msra.mxu1 %v10316_v59  ;;  %10319 = vmatprep.subr.bf16.mxu0 %v10318_v63  ;;  %v824_v59 = vld [vmem:[%s19333_s5 + $0x500] sm:$0xff] }
 0x592   : > { %10575 = vmatprep.subr.bf16.mxu1 %v10574_v23  ;;  %v10326_v23 = vpack.c.bf16 %v771_v56, %v753_v47  ;;  %v10336_v16 = vpack.c.bf16 %v842_v55, %v824_v59  ;;  %v914_v47 = vld [vmem:[%s19333_s5 + $0x7d0] sm:$0xff]  ;;  %v933_v56 = vld [vmem:[%s19333_s5 + $0x868] sm:$0xff]  ;;  %v1059_v55 = vld [vmem:[%s19333_s5 + $0xc58] sm:$0xff] }
 0x593   : > { %5112 = vmatmul.mubr.f32.vlgmr.msra.gmra.mrb[12].mxu0 %v12655_v24  ;;  %v1041_v59 = vld [vmem:[%s19333_s5 + $0xbc8] sm:$0xff] }
 0x594   : > { %5420 = vmatmul.mubr.f32.vlgmr.msra.gmra.mrb[30].mxu1 %v12655_v24  ;;  %5117 = vmatprep.mubr.f32.mxu0 %v12658_v26 }
 0x595   : > { %5425 = vmatprep.mubr.f32.mxu1 %v12658_v26  ;;  %10321 = vmatpush1.bf16.msra.mxu0 %v10320_v13  ;;  %v17531_v13 = vld [vmem:[%s19334_s6 + $0x18] sm:$0xff] }
 0x596   : > { %10577 = vmatpush1.bf16.msra.mxu1 %v10576_v18  ;;  %10323 = vmatprep.subr.bf16.mxu0 %v10322_v32  ;;  %v10328_v18 = vpack.c.bf16 %v770_v42, %v752_v29  ;;  %v10340_v32 = vpack.c.bf16 %v878_v2, %v860_v61  ;;  %v932_v29 = vld [vmem:[%s19333_s5 + $0x860] sm:$0xff]  ;;  %v950_v42 = vld [vmem:[%s19333_s5 + $0x8f0] sm:$0xff]  ;;  %v1077_v61 = vld [vmem:[%s19333_s5 + $0xce8] sm:$0xff] }
 0x597   : > { %10579 = vmatprep.subr.bf16.mxu1 %v10578_v31  ;;  %5118 = vmatmul.mubr.f32.gmra.mrb[14].mxu0 %v12688_v40  ;;  %v10330_v31 = vpack.c.bf16 %v807_v17, %v789_v48  ;;  %v969_v17 = vld [vmem:[%s19333_s5 + $0x988] sm:$0xff]  ;;  %v1095_v2 = vld [vmem:[%s19333_s5 + $0xd78] sm:$0xff] }
 0x598   : > { %5426 = vmatmul.mubr.f32.gmra.mrb[32].mxu1 %v12688_v40  ;;  %5496 = vmatprep.mubr.f32.mxu0 %v11408_v52  ;;  %v788_v52 = vld [vmem:[%s19333_s5 + $0x3e0] sm:$0xff] }
 0x599   : > { %10325 = vmatpush1.bf16.msra.mxu0 %v10324_v20  ;;  %5845 = vmatprep.mubr.f32.mxu1 %v19340_v1  ;;  %v10332_v46 = vpack.c.bf16 %v806_v25, %v788_v52  ;;  %v951_v20 = vld [vmem:[%s19333_s5 + $0x8f8] sm:$0xff]  ;;  %v19363_v52 = vpack.c.bf16 %v15576_v10, %v15544_v34  ;;  %v10348_v25 = vpack.c.bf16 %v950_v42, %v932_v29  ;;  %v1005_v34 = vld [vmem:[%s19333_s5 + $0xaa8] sm:$0xff]  ;;  %v1112_v42 = vld [vmem:[%s19333_s5 + $0xe00] sm:$0xff] }
 0x59a   : > { %10327 = vmatprep.subr.bf16.mxu0 %v10326_v23  ;;  %v10344_v23 = vpack.c.bf16 %v914_v47, %v896_v3  ;;  %v10346_v48 = vpack.c.bf16 %v951_v20, %v933_v56  ;;  %v1113_v3 = vld [vmem:[%s19333_s5 + $0xe08] sm:$0xff]  ;;  %v1131_v47 = vld [vmem:[%s19333_s5 + $0xe98] sm:$0xff]  ;;  %v19365_v56 = vpack.c.bf16 %v15589_v35, %v15555_v54 }
 0x59b   : > { %v10366_v29 = vpack.c.bf16 %v1131_v47, %v1113_v3  ;;  %v1149_v54 = vld [vmem:[%s19333_s5 + $0xf28] sm:$0xff]  ;;  %v1167_v35 = vld [vmem:[%s19333_s5 + $0xfb8] sm:$0xff] }
 0x59c   : > { %8216 = vmatmul.mubr.msk.f32.vlgmr.msra.gmra.mrb[34].mxu1 %vm5768_vm1, %v17465_v60 }
 0x59d   : > { %10581 = vmatpush1.bf16.msra.mxu1 %v10580_v4  ;;  %10329 = vmatpush1.bf16.msra.mxu0 %v10328_v18  ;;  %v879_v4 = vld [vmem:[%s19333_s5 + $0x6b8] sm:$0xff] }
 0x59e   : > { %10583 = vmatprep.subr.bf16.mxu1 %v19362_v49  ;;  %5851 = vmatprep.mubr.f32.mxu1 %v19340_v1  ;;  %v10338_v63 = vpack.c.bf16 %v879_v4, %v861_v19  ;;  %v987_v18 = vld [vmem:[%s19333_s5 + $0xa18] sm:$0xff]  ;;  %v1004_v49 = vld [vmem:[%s19333_s5 + $0xaa0] sm:$0xff]  ;;  %v10358_v4 = vpack.c.bf16 %v1059_v55, %v1041_v59  ;;  %v1257_v59 = vld [vmem:[%s19333_s5 + $0x1288] sm:$0xff] }
 0x59f   : > { %10331 = vmatprep.subr.bf16.mxu0 %v10330_v31  ;;  %v19364_v31 = vpack.c.bf16 %v15603_v21, %v15565_v0  ;;  %v10350_v43 = vpack.c.bf16 %v987_v18, %v969_v17  ;;  %v1023_v0 = vld [vmem:[%s19333_s5 + $0xb38] sm:$0xff]  ;;  %v1148_v17 = vld [vmem:[%s19333_s5 + $0xf20] sm:$0xff]  ;;  %v1166_v18 = vld [vmem:[%s19333_s5 + $0xfb0] sm:$0xff] }
 0x5a0   : > { %8217 = vmatmul.mubr.msk.f32.gmra.mrb[36].mxu1 %vm5768_vm1, %v17487_v45  ;;  %v10354_v21 = vpack.c.bf16 %v1023_v0, %v1005_v34  ;;  %v1221_v34 = vld [vmem:[%s19333_s5 + $0x1168] sm:$0xff]  ;;  %v1239_v0 = vld [vmem:[%s19333_s5 + $0x11f8] sm:$0xff] }
 0x5a1   : > { %10333 = vmatpush1.bf16.msra.mxu0 %v10332_v46  ;;  %5857 = vmatprep.mubr.f32.mxu1 %v19340_v1  ;;  %v986_v46 = vld [vmem:[%s19333_s5 + $0xa10] sm:$0xff]  ;;  %v1275_v55 = vld [vmem:[%s19333_s5 + $0x1318] sm:$0xff] }
 0x5a2   : > { %10335 = vmatprep.subr.bf16.mxu0 %v10334_v53  ;;  %v10352_v10 = vpack.c.bf16 %v986_v46, %v968_v44  ;;  %v1022_v53 = vld [vmem:[%s19333_s5 + $0xb30] sm:$0xff]  ;;  %v1184_v44 = vld [vmem:[%s19333_s5 + $0x1040] sm:$0xff] }
 0x5a3   : > { %v10356_v19 = vpack.c.bf16 %v1022_v53, %v1004_v49  ;;  %v1202_v46 = vld [vmem:[%s19333_s5 + $0x10d0] sm:$0xff]  ;;  %v10378_v53 = vpack.c.bf16 %v1239_v0, %v1221_v34  ;;  %v1472_v0 = vld [vmem:[%s19333_s5 + $0x1940] sm:$0xff] }
 0x5a4   : > { %8218 = vmatmul.mubr.msk.f32.gmra.mrb[38].mxu1 %vm5768_vm1, %v17511_v58  ;;  %v1238_v49 = vld [vmem:[%s19333_s5 + $0x11f0] sm:$0xff] }
 0x5a5   : > { %10337 = vmatpush1.bf16.msra.mxu0 %v10336_v16  ;;  %5863 = vmatprep.mubr.f32.mxu1 %v19340_v1  ;;  %v1040_v16 = vld [vmem:[%s19333_s5 + $0xbc0] sm:$0xff] }
 0x5a6   : > { %10339 = vmatprep.subr.bf16.mxu0 %v10338_v63  ;;  %v1058_v63 = vld [vmem:[%s19333_s5 + $0xc50] sm:$0xff] }
 0x5a7   : > { %v10360_v36 = vpack.c.bf16 %v1058_v63, %v1040_v16  ;;  %v19368_v16 = vpack.c.bf16 %v17195_v39, %v17157_v38  ;;  %v10382_v63 = vpack.c.bf16 %v1275_v55, %v1257_v59  ;;  %v1311_v38 = vld [vmem:[%s19333_s5 + $0x1438] sm:$0xff]  ;;  %v1508_v55 = vld [vmem:[%s19333_s5 + $0x1a60] sm:$0xff] }
 0x5a8   : > { %8219 = vmatmul.mubr.msk.f32.gmra.mrb[40].mxu1 %vm5768_vm1, %v17531_v13 }
 0x5a9   : > { %10341 = vmatpush1.bf16.msra.mxu0 %v10340_v32  ;;  %5934 = vmatprep.mubr.f32.mxu1 %v19340_v1  ;;  %v1094_v32 = vld [vmem:[%s19333_s5 + $0xd70] sm:$0xff] }
 0x5aa   : > { %10343 = vmatprep.subr.bf16.mxu0 %v10342_v41  ;;  %v10362_v41 = vpack.c.bf16 %v1095_v2, %v1077_v61  ;;  %v10364_v20 = vpack.c.bf16 %v1094_v32, %v1076_v9  ;;  %v1256_v61 = vld [vmem:[%s19333_s5 + $0x1280] sm:$0xff]  ;;  %v1274_v2 = vld [vmem:[%s19333_s5 + $0x1310] sm:$0xff]  ;;  %v1329_v32 = vld [vmem:[%s19333_s5 + $0x14c8] sm:$0xff] }
 0x5ab   : > { %v1310_v9 = vld [vmem:[%s19333_s5 + $0x1430] sm:$0xff] }
 0x5ac   : > { %8220 = vmatmul.mubr.msk.f32.vlgmr.msra.gmra.mrb[42].mxu1 %vm5768_vm1, %v17465_v60 }
 0x5ad   : > { %10585 = vmatpush1.bf16.msra.mxu1 %v19363_v52  ;;  %10345 = vmatpush1.bf16.msra.mxu0 %v10344_v23  ;;  %v19366_v23 = vpack.c.bf16 %v17183_v22, %v17149_v51  ;;  %v10370_v22 = vpack.c.bf16 %v1167_v35, %v1149_v54  ;;  %v1185_v52 = vld [vmem:[%s19333_s5 + $0x1048] sm:$0xff]  ;;  %v19369_v54 = vpack.c.bf16 %v17181_v7, %v17147_v15  ;;  %v1455_v15 = vld [vmem:[%s19333_s5 + $0x18b8] sm:$0xff] }
 0x5ae   : > { %10587 = vmatprep.subr.bf16.mxu1 %v19364_v31  ;;  %5940 = vmatprep.mubr.f32.mxu1 %v19340_v1  ;;  %v10372_v31 = vpack.c.bf16 %v1166_v18, %v1148_v17  ;;  %v1418_v17 = vld [vmem:[%s19333_s5 + $0x1790] sm:$0xff]  ;;  %v1437_v18 = vld [vmem:[%s19333_s5 + $0x1828] sm:$0xff] }
 0x5af   : > { %10347 = vmatprep.subr.bf16.mxu0 %v10346_v48  ;;  %v1130_v48 = vld [vmem:[%s19333_s5 + $0xe90] sm:$0xff] }
 0x5b0   : > { %8221 = vmatmul.mubr.msk.f32.gmra.mrb[44].mxu1 %vm5768_vm1, %v17487_v45  ;;  %v10368_v51 = vpack.c.bf16 %v1130_v48, %v1112_v42  ;;  %v1364_v42 = vld [vmem:[%s19333_s5 + $0x15e0] sm:$0xff]  ;;  %v1382_v48 = vld [vmem:[%s19333_s5 + $0x1670] sm:$0xff] }
 0x5b1   : > { %10349 = vmatpush1.bf16.msra.mxu0 %v10348_v25  ;;  %5946 = vmatprep.mubr.f32.mxu1 %v19340_v1  ;;  %v1203_v25 = vld [vmem:[%s19333_s5 + $0x10d8] sm:$0xff]  ;;  %v10396_v35 = vpack.c.bf16 %v1382_v48, %v1364_v42  ;;  %v1689_v42 = vld [vmem:[%s19333_s5 + $0x2008] sm:$0xff] }
 0x5b2   : > { %10351 = vmatprep.subr.bf16.mxu0 %v10350_v43  ;;  %v10374_v43 = vpack.c.bf16 %v1203_v25, %v1185_v52  ;;  %v10402_v52 = vpack.c.bf16 %v1455_v15, %v1437_v18  ;;  %v1436_v25 = vld [vmem:[%s19333_s5 + $0x1820] sm:$0xff]  ;;  %v1742_v15 = vld [vmem:[%s19333_s5 + $0x21b0] sm:$0xff] }
 0x5b3   : > { %v1724_v18 = vld [vmem:[%s19333_s5 + $0x2120] sm:$0xff] }
 0x5b4   : > { %8222 = vmatmul.mubr.msk.f32.gmra.mrb[46].mxu1 %vm5768_vm1, %v17511_v58 }
 0x5b5   : > { %10353 = vmatpush1.bf16.msra.mxu0 %v10352_v10  ;;  %5952 = vmatprep.mubr.f32.mxu1 %v19340_v1  ;;  %v10376_v10 = vpack.c.bf16 %v1202_v46, %v1184_v44  ;;  %v1491_v44 = vld [vmem:[%s19333_s5 + $0x19d8] sm:$0xff] }
 0x5b6   : > { %10355 = vmatprep.subr.bf16.mxu0 %v10354_v21  ;;  %v1220_v21 = vld [vmem:[%s19333_s5 + $0x1160] sm:$0xff] }
 0x5b8   : > { %8223 = vmatmul.mubr.msk.f32.gmra.mrb[48].mxu1 %vm5768_vm1, %v17531_v13 }
 0x5b9   : > { %10357 = vmatpush1.bf16.msra.mxu0 %v10356_v19  ;;  %6023 = vmatprep.mubr.f32.mxu1 %v19340_v1  ;;  %v19367_v19 = vpack.c.bf16 %v17168_v50, %v17136_v8  ;;  %v1293_v8 = vld [vmem:[%s19333_s5 + $0x13a8] sm:$0xff]  ;;  %v10384_v50 = vpack.c.bf16 %v1274_v2, %v1256_v61  ;;  %v1544_v2 = vld [vmem:[%s19333_s5 + $0x1b80] sm:$0xff] }
 0x5ba   : > { %10359 = vmatprep.subr.bf16.mxu0 %v10358_v4  ;;  %v10380_v4 = vpack.c.bf16 %v1238_v49, %v1220_v21  ;;  %v10386_v39 = vpack.c.bf16 %v1311_v38, %v1293_v8  ;;  %v1509_v21 = vld [vmem:[%s19333_s5 + $0x1a68] sm:$0xff]  ;;  %v1527_v49 = vld [vmem:[%s19333_s5 + $0x1af8] sm:$0xff]  ;;  %v1562_v8 = vld [vmem:[%s19333_s5 + $0x1c10] sm:$0xff] }
 0x5bb   : > { %v10410_v59 = vpack.c.bf16 %v1527_v49, %v1509_v21  ;;  %v1581_v38 = vld [vmem:[%s19333_s5 + $0x1ca8] sm:$0xff]  ;;  %v1796_v21 = vld [vmem:[%s19333_s5 + $0x2360] sm:$0xff]  ;;  %v1814_v49 = vld [vmem:[%s19333_s5 + $0x23f0] sm:$0xff] }
 0x5bc   : > { %8224 = vmatmul.mubr.msk.f32.vlgmr.msra.gmra.mrb[50].mxu1 %vm5768_vm1, %v17465_v60 }
 0x5bd   : > { %10589 = vmatpush1.bf16.msra.mxu1 %v19365_v56  ;;  %10361 = vmatpush1.bf16.msra.mxu0 %v10360_v36  ;;  %v1292_v36 = vld [vmem:[%s19333_s5 + $0x13a0] sm:$0xff] }
 0x5be   : > { %10591 = vmatprep.subr.bf16.mxu1 %v19366_v23  ;;  %6029 = vmatprep.mubr.f32.mxu1 %v19340_v1  ;;  %v10388_v3 = vpack.c.bf16 %v1310_v9, %v1292_v36  ;;  %v1328_v56 = vld [vmem:[%s19333_s5 + $0x14c0] sm:$0xff]  ;;  %v1598_v9 = vld [vmem:[%s19333_s5 + $0x1d30] sm:$0xff] }
 0x5bf   : > { %10363 = vmatprep.subr.bf16.mxu0 %v10362_v41  ;;  %v1347_v41 = vld [vmem:[%s19333_s5 + $0x1558] sm:$0xff]  ;;  %v1580_v36 = vld [vmem:[%s19333_s5 + $0x1ca0] sm:$0xff] }
 0x5c0   : > { %8225 = vmatmul.mubr.msk.f32.gmra.mrb[52].mxu1 %vm5768_vm1, %v17487_v45  ;;  %v10390_v47 = vpack.c.bf16 %v1347_v41, %v1329_v32  ;;  %v1617_v32 = vld [vmem:[%s19333_s5 + $0x1dc8] sm:$0xff]  ;;  %v10420_v41 = vpack.c.bf16 %v1598_v9, %v1580_v36 }
 0x5c1   : > { %10365 = vmatpush1.bf16.msra.mxu0 %v10364_v20  ;;  %6035 = vmatprep.mubr.f32.mxu1 %v19340_v1  ;;  %v1346_v20 = vld [vmem:[%s19333_s5 + $0x1550] sm:$0xff] }
 0x5c2   : > { %10367 = vmatprep.subr.bf16.mxu0 %v10366_v29  ;;  %v10392_v23 = vpack.c.bf16 %v1346_v20, %v1328_v56  ;;  %v1634_v56 = vld [vmem:[%s19333_s5 + $0x1e50] sm:$0xff]  ;;  %v1653_v20 = vld [vmem:[%s19333_s5 + $0x1ee8] sm:$0xff] }
 0x5c4   : > { %8226 = vmatmul.mubr.msk.f32.gmra.mrb[54].mxu1 %vm5768_vm1, %v17511_v58 }
 0x5c5   : > { %10369 = vmatpush1.bf16.msra.mxu0 %v10368_v51  ;;  %6041 = vmatprep.mubr.f32.mxu1 %v19340_v1 }
 0x5c6   : > { %10371 = vmatprep.subr.bf16.mxu0 %v10370_v22  ;;  %v1400_v22 = vld [vmem:[%s19333_s5 + $0x1700] sm:$0xff] }
 0x5c7   : > { %v10400_v7 = vpack.c.bf16 %v1418_v17, %v1400_v22 }
 0x5c8   : > { %8227 = vmatmul.mubr.msk.f32.gmra.mrb[56].mxu1 %vm5768_vm1, %v17531_v13 }
 0x5c9   : > { %10373 = vmatpush1.bf16.msra.mxu0 %v10372_v31  ;;  %6112 = vmatprep.mubr.f32.mxu1 %v19340_v1  ;;  %v1454_v31 = vld [vmem:[%s19333_s5 + $0x18b0] sm:$0xff] }
 0x5ca   : > { %10375 = vmatprep.subr.bf16.mxu0 %v10374_v43  ;;  %v1473_v43 = vld [vmem:[%s19333_s5 + $0x1948] sm:$0xff]  ;;  %v10404_v46 = vpack.c.bf16 %v1454_v31, %v1436_v25  ;;  %v10436_v25 = vpack.c.bf16 %v1742_v15, %v1724_v18  ;;  %v2103_v15 = vld [vmem:[%s19333_s5 + $0x2cf8] sm:$0xff] }
 0x5cb   : > { %v10406_v34 = vpack.c.bf16 %v1491_v44, %v1473_v43  ;;  %v1760_v43 = vld [vmem:[%s19333_s5 + $0x2240] sm:$0xff]  ;;  %v1778_v44 = vld [vmem:[%s19333_s5 + $0x22d0] sm:$0xff]  ;;  %v2085_v18 = vld [vmem:[%s19333_s5 + $0x2c68] sm:$0xff] }
 0x5cc   : > { %8228 = vmatmul.mubr.msk.f32.vlgmr.msra.gmra.mrb[58].mxu1 %vm5768_vm1, %v17465_v60 }
 0x5cd   : > { %10593 = vmatpush1.bf16.msra.mxu1 %v19367_v19  ;;  %10377 = vmatpush1.bf16.msra.mxu0 %v10376_v10  ;;  %v1490_v10 = vld [vmem:[%s19333_s5 + $0x19d0] sm:$0xff] }
 0x5ce   : > { %10595 = vmatprep.subr.bf16.mxu1 %v19368_v16  ;;  %6118 = vmatprep.mubr.f32.mxu1 %v19340_v1  ;;  %v1526_v19 = vld [vmem:[%s19333_s5 + $0x1af0] sm:$0xff]  ;;  %v1563_v16 = vld [vmem:[%s19333_s5 + $0x1c18] sm:$0xff] }
 0x5cf   : > { %10379 = vmatprep.subr.bf16.mxu0 %v10378_v53  ;;  %v10408_v53 = vpack.c.bf16 %v1490_v10, %v1472_v0  ;;  %v10440_v0 = vpack.c.bf16 %v1778_v44, %v1760_v43  ;;  %v2121_v43 = vld [vmem:[%s19333_s5 + $0x2d88] sm:$0xff]  ;;  %v2139_v44 = vld [vmem:[%s19333_s5 + $0x2e18] sm:$0xff] }
 0x5d0   : > { %8229 = vmatmul.mubr.msk.f32.gmra.mrb[60].mxu1 %vm5768_vm1, %v17487_v45 }
 0x5d1   : > { %10381 = vmatpush1.bf16.msra.mxu0 %v10380_v4  ;;  %6124 = vmatprep.mubr.f32.mxu1 %v19340_v1  ;;  %v1545_v4 = vld [vmem:[%s19333_s5 + $0x1b88] sm:$0xff] }
 0x5d2   : > { %10383 = vmatprep.subr.bf16.mxu0 %v10382_v63  ;;  %v10412_v63 = vpack.c.bf16 %v1526_v19, %v1508_v55  ;;  %v10414_v61 = vpack.c.bf16 %v1563_v16, %v1545_v4  ;;  %v10444_v55 = vpack.c.bf16 %v1814_v49, %v1796_v21  ;;  %v1832_v4 = vld [vmem:[%s19333_s5 + $0x2480] sm:$0xff]  ;;  %v1850_v16 = vld [vmem:[%s19333_s5 + $0x2510] sm:$0xff]  ;;  %v2157_v21 = vld [vmem:[%s19333_s5 + $0x2ea8] sm:$0xff] }
 0x5d3   : > { %v2175_v49 = vld [vmem:[%s19333_s5 + $0x2f38] sm:$0xff] }
 0x5d4   : > { %5497 = vmatmul.mubr.f32.vlgmr.msra.gmra.mrb[16].mxu0 %v11416_v57  ;;  %8230 = vmatmul.mubr.msk.f32.gmra.mrb[62].mxu1 %vm5768_vm1, %v17511_v58  ;;  %v1365_v57 = vld [vmem:[%s19333_s5 + $0x15e8] sm:$0xff] }
 0x5d5   : > { %5502 = vmatprep.mubr.f32.mxu0 %v11448_v11  ;;  %10385 = vmatpush1.bf16.msra.mxu0 %v10384_v50  ;;  %v1383_v11 = vld [vmem:[%s19333_s5 + $0x1678] sm:$0xff]  ;;  %v10416_v50 = vpack.c.bf16 %v1562_v8, %v1544_v2  ;;  %v10448_v2 = vpack.c.bf16 %v1850_v16, %v1832_v4  ;;  %v2193_v4 = vld [vmem:[%s19333_s5 + $0x2fc8] sm:$0xff] }
 0x5d6   : > { %6130 = vmatprep.mubr.f32.mxu1 %v19340_v1  ;;  %10387 = vmatprep.subr.bf16.mxu0 %v10386_v39  ;;  %v10394_v29 = vpack.c.bf16 %v1383_v11, %v1365_v57  ;;  %v2211_v16 = vld [vmem:[%s19333_s5 + $0x3058] sm:$0xff] }
 0x5d8   : > { %5503 = vmatmul.mubr.f32.gmra.mrb[18].mxu0 %v11440_v6  ;;  %8231 = vmatmul.mubr.msk.f32.gmra.mrb[64].mxu1 %vm5768_vm1, %v17531_v13  ;;  %v1401_v6 = vld [vmem:[%s19333_s5 + $0x1708] sm:$0xff] }
 0x5d9   : > { %10389 = vmatpush1.bf16.msra.mxu0 %v10388_v3  ;;  %5573 = vmatprep.mubr.f32.mxu0 %v11483_v27  ;;  %v1419_v27 = vld [vmem:[%s19333_s5 + $0x1798] sm:$0xff] }
 0x5da   : > { %6201 = vmatprep.mubr.f32.mxu1 %v19340_v1  ;;  %10391 = vmatprep.subr.bf16.mxu0 %v10390_v47  ;;  %v10398_v51 = vpack.c.bf16 %v1419_v27, %v1401_v6  ;;  %v1616_v47 = vld [vmem:[%s19333_s5 + $0x1dc0] sm:$0xff] }
 0x5db   : > { %v10424_v57 = vpack.c.bf16 %v1634_v56, %v1616_v47  ;;  %v1688_v27 = vld [vmem:[%s19333_s5 + $0x2000] sm:$0xff]  ;;  %v1958_v56 = vld [vmem:[%s19333_s5 + $0x2870] sm:$0xff] }
 0x5dc   : > { %8232 = vmatmul.mubr.msk.f32.vlgmr.msra.gmra.mrb[66].mxu1 %vm5768_vm1, %v17465_v60  ;;  %v1940_v47 = vld [vmem:[%s19333_s5 + $0x27e0] sm:$0xff] }
 0x5dd   : > { %10597 = vmatpush1.bf16.msra.mxu1 %v19369_v54  ;;  %10393 = vmatpush1.bf16.msra.mxu0 %v10392_v23  ;;  %v1652_v23 = vld [vmem:[%s19333_s5 + $0x1ee0] sm:$0xff]  ;;  %v1706_v54 = vld [vmem:[%s19333_s5 + $0x2090] sm:$0xff] }
 0x5de   : > { %6207 = vmatprep.mubr.f32.mxu1 %v19340_v1  ;;  %10395 = vmatprep.subr.bf16.mxu0 %v10394_v29  ;;  %v1670_v29 = vld [vmem:[%s19333_s5 + $0x1f70] sm:$0xff]  ;;  %v10432_v22 = vpack.c.bf16 %v1706_v54, %v1688_v27  ;;  %v2049_v27 = vld [vmem:[%s19333_s5 + $0x2b48] sm:$0xff]  ;;  %v2067_v54 = vld [vmem:[%s19333_s5 + $0x2bd8] sm:$0xff] }
 0x5df   : > { %v10428_v48 = vpack.c.bf16 %v1670_v29, %v1652_v23  ;;  %v2013_v23 = vld [vmem:[%s19333_s5 + $0x2a28] sm:$0xff]  ;;  %v2031_v29 = vld [vmem:[%s19333_s5 + $0x2ab8] sm:$0xff] }
 0x5e0   : > { %8233 = vmatmul.mubr.msk.f32.gmra.mrb[68].mxu1 %vm5768_vm1, %v17487_v45 }
 0x5e1   : > { %10397 = vmatpush1.bf16.msra.mxu0 %v10396_v35  ;;  %6213 = vmatprep.mubr.f32.mxu1 %v19340_v1  ;;  %v1725_v35 = vld [vmem:[%s19333_s5 + $0x2128] sm:$0xff] }
 0x5e2   : > { %10399 = vmatprep.subr.bf16.mxu0 %v10398_v51  ;;  %v1743_v51 = vld [vmem:[%s19333_s5 + $0x21b8] sm:$0xff] }
 0x5e3   : > { %v10434_v17 = vpack.c.bf16 %v1743_v51, %v1725_v35  ;;  %v10470_v51 = vpack.c.bf16 %v2067_v54, %v2049_v27 }
 0x5e4   : > { %8234 = vmatmul.mubr.msk.f32.gmra.mrb[70].mxu1 %vm5768_vm1, %v17511_v58 }
 0x5e5   : > { %10401 = vmatpush1.bf16.msra.mxu0 %v10400_v7  ;;  %6219 = vmatprep.mubr.f32.mxu1 %v19340_v1  ;;  %v1761_v7 = vld [vmem:[%s19333_s5 + $0x2248] sm:$0xff] }
 0x5e6   : > { %10403 = vmatprep.subr.bf16.mxu0 %v10402_v52  ;;  %v1779_v52 = vld [vmem:[%s19333_s5 + $0x22d8] sm:$0xff] }
 0x5e7   : > { %v10438_v31 = vpack.c.bf16 %v1779_v52, %v1761_v7  ;;  %v10474_v52 = vpack.c.bf16 %v2103_v15, %v2085_v18 }
 0x5e8   : > { %8235 = vmatmul.mubr.msk.f32.gmra.mrb[72].mxu1 %vm5768_vm1, %v17531_v13 }
 0x5e9   : > { %10405 = vmatpush1.bf16.msra.mxu0 %v10404_v46  ;;  %6290 = vmatprep.mubr.f32.mxu1 %v19340_v1  ;;  %v1797_v46 = vld [vmem:[%s19333_s5 + $0x2368] sm:$0xff] }
 0x5ea   : > { %10407 = vmatprep.subr.bf16.mxu0 %v10406_v34  ;;  %v1815_v34 = vld [vmem:[%s19333_s5 + $0x23f8] sm:$0xff] }
 0x5eb   : > { %v10442_v10 = vpack.c.bf16 %v1815_v34, %v1797_v46  ;;  %v10478_v34 = vpack.c.bf16 %v2139_v44, %v2121_v43 }
 0x5ec   : > { %8236 = vmatmul.mubr.msk.f32.vlgmr.msra.gmra.mrb[74].mxu1 %vm5768_vm1, %v17465_v60  ;;  %v1599_v60 = vld [vmem:[%s19333_s5 + $0x1d38] sm:$0xff] }
 0x5ed   : > { %10409 = vmatpush1.bf16.msra.mxu0 %v10408_v53  ;;  %6296 = vmatprep.mubr.f32.mxu1 %v19340_v1  ;;  %v10418_v39 = vpack.c.bf16 %v1599_v60, %v1581_v38  ;;  %v1833_v53 = vld [vmem:[%s19333_s5 + $0x2488] sm:$0xff]  ;;  %v1868_v38 = vld [vmem:[%s19333_s5 + $0x25a0] sm:$0xff]  ;;  %v1886_v60 = vld [vmem:[%s19333_s5 + $0x2630] sm:$0xff] }
 0x5ee   : > { %10411 = vmatprep.subr.bf16.mxu0 %v10410_v59  ;;  %v1851_v59 = vld [vmem:[%s19333_s5 + $0x2518] sm:$0xff]  ;;  %v10452_v36 = vpack.c.bf16 %v1886_v60, %v1868_v38  ;;  %v2229_v38 = vld [vmem:[%s19333_s5 + $0x30e8] sm:$0xff] }
 0x5ef   : > { %v10446_v19 = vpack.c.bf16 %v1851_v59, %v1833_v53  ;;  %v10482_v59 = vpack.c.bf16 %v2175_v49, %v2157_v21  ;;  %v2247_v60 = vld [vmem:[%s19333_s5 + $0x3178] sm:$0xff] }
 0x5f0   : > { %8237 = vmatmul.mubr.msk.f32.gmra.mrb[76].mxu1 %vm5768_vm1, %v17487_v45  ;;  %v1635_v45 = vld [vmem:[%s19333_s5 + $0x1e58] sm:$0xff] }
 0x5f1   : > { %10413 = vmatpush1.bf16.msra.mxu0 %v10412_v63  ;;  %6302 = vmatprep.mubr.f32.mxu1 %v19340_v1  ;;  %v10422_v3 = vpack.c.bf16 %v1635_v45, %v1617_v32  ;;  %v1869_v63 = vld [vmem:[%s19333_s5 + $0x25a8] sm:$0xff]  ;;  %v1904_v32 = vld [vmem:[%s19333_s5 + $0x26c0] sm:$0xff]  ;;  %v1922_v45 = vld [vmem:[%s19333_s5 + $0x2750] sm:$0xff] }
 0x5f2   : > { %10415 = vmatprep.subr.bf16.mxu0 %v10414_v61  ;;  %v1887_v61 = vld [vmem:[%s19333_s5 + $0x2638] sm:$0xff] }
 0x5f3   : > { %v10450_v8 = vpack.c.bf16 %v1887_v61, %v1869_v63  ;;  %v10486_v61 = vpack.c.bf16 %v2211_v16, %v2193_v4  ;;  %v2516_v4 = vld [vmem:[%s19333_s5 + $0x39e0] sm:$0xff]  ;;  %v2534_v16 = vld [vmem:[%s19333_s5 + $0x3a70] sm:$0xff] }
 0x5f4   : > { %8238 = vmatmul.mubr.msk.f32.gmra.mrb[78].mxu1 %vm5768_vm1, %v17511_v58  ;;  %v1671_v58 = vld [vmem:[%s19333_s5 + $0x1f78] sm:$0xff] }
 0x5f5   : > { %10417 = vmatpush1.bf16.msra.mxu0 %v10416_v50  ;;  %6308 = vmatprep.mubr.f32.mxu1 %v19340_v1  ;;  %v10426_v11 = vpack.c.bf16 %v1671_v58, %v1653_v20  ;;  %v1905_v50 = vld [vmem:[%s19333_s5 + $0x26c8] sm:$0xff] }
 0x5f6   : > { %10419 = vmatprep.subr.bf16.mxu0 %v10418_v39  ;;  %v1923_v39 = vld [vmem:[%s19333_s5 + $0x2758] sm:$0xff]  ;;  %v1977_v20 = vld [vmem:[%s19333_s5 + $0x2908] sm:$0xff] }
 0x5f7   : > { %v10454_v9 = vpack.c.bf16 %v1923_v39, %v1905_v50  ;;  %v10490_v39 = vpack.c.bf16 %v2247_v60, %v2229_v38  ;;  %v2589_v38 = vld [vmem:[%s19333_s5 + $0x3c28] sm:$0xff]  ;;  %v2607_v60 = vld [vmem:[%s19333_s5 + $0x3cb8] sm:$0xff] }
 0x5f8   : > { %8239 = vmatmul.mubr.msk.f32.gmra.mrb[80].mxu1 %vm5768_vm1, %v17531_v13  ;;  %v1707_v13 = vld [vmem:[%s19333_s5 + $0x2098] sm:$0xff] }
 0x5f9   : > { %10421 = vmatpush1.bf16.msra.mxu0 %v10420_v41  ;;  %6379 = vmatprep.mubr.f32.mxu1 %v19340_v1  ;;  %v10430_v6 = vpack.c.bf16 %v1707_v13, %v1689_v42  ;;  %v1941_v41 = vld [vmem:[%s19333_s5 + $0x27e8] sm:$0xff]  ;;  %v10466_v13 = vpack.c.bf16 %v2031_v29, %v2013_v23 }
 0x5fa   : > { %10423 = vmatprep.subr.bf16.mxu0 %v10422_v3 }
 0x5fd   : > { %10425 = vmatpush1.bf16.msra.mxu0 %v10424_v57  ;;  %v1976_v57 = vld [vmem:[%s19333_s5 + $0x2900] sm:$0xff] }
 0x5fe   : > { %10427 = vmatprep.subr.bf16.mxu0 %v10426_v11  ;;  %v1994_v11 = vld [vmem:[%s19333_s5 + $0x2990] sm:$0xff] }
 0x5ff   : > { %v10464_v42 = vpack.c.bf16 %v1994_v11, %v1976_v57  ;;  %v2337_v57 = vld [vmem:[%s19333_s5 + $0x3448] sm:$0xff]  ;;  %v2355_v11 = vld [vmem:[%s19333_s5 + $0x34d8] sm:$0xff] }
 0x600   : > { %v10502_v29 = vpack.c.bf16 %v2355_v11, %v2337_v57 }
 0x601   : > { %10429 = vmatpush1.bf16.msra.mxu0 %v10428_v48  ;;  %v2012_v48 = vld [vmem:[%s19333_s5 + $0x2a20] sm:$0xff] }
 0x602   : > { %10431 = vmatprep.subr.bf16.mxu0 %v10430_v6  ;;  %v2030_v6 = vld [vmem:[%s19333_s5 + $0x2ab0] sm:$0xff] }
 0x603   : > { %v10468_v35 = vpack.c.bf16 %v2030_v6, %v2012_v48  ;;  %v2373_v48 = vld [vmem:[%s19333_s5 + $0x3568] sm:$0xff]  ;;  %v2391_v6 = vld [vmem:[%s19333_s5 + $0x35f8] sm:$0xff] }
 0x604   : > { %v10506_v54 = vpack.c.bf16 %v2391_v6, %v2373_v48 }
 0x605   : > { %10433 = vmatpush1.bf16.msra.mxu0 %v10432_v22  ;;  %v2048_v22 = vld [vmem:[%s19333_s5 + $0x2b40] sm:$0xff] }
 0x606   : > { %10435 = vmatprep.subr.bf16.mxu0 %v10434_v17  ;;  %v2066_v17 = vld [vmem:[%s19333_s5 + $0x2bd0] sm:$0xff] }
 0x607   : > { %v10472_v7 = vpack.c.bf16 %v2066_v17, %v2048_v22  ;;  %v2409_v22 = vld [vmem:[%s19333_s5 + $0x3688] sm:$0xff]  ;;  %v2427_v17 = vld [vmem:[%s19333_s5 + $0x3718] sm:$0xff] }
 0x608   : > { %v10510_v15 = vpack.c.bf16 %v2427_v17, %v2409_v22 }
 0x609   : > { %10437 = vmatpush1.bf16.msra.mxu0 %v10436_v25  ;;  %v2084_v25 = vld [vmem:[%s19333_s5 + $0x2c60] sm:$0xff] }
 0x60a   : > { %10439 = vmatprep.subr.bf16.mxu0 %v10438_v31  ;;  %v2102_v31 = vld [vmem:[%s19333_s5 + $0x2cf0] sm:$0xff] }
 0x60b   : > { %v10476_v46 = vpack.c.bf16 %v2102_v31, %v2084_v25  ;;  %v2445_v25 = vld [vmem:[%s19333_s5 + $0x37a8] sm:$0xff]  ;;  %v2463_v31 = vld [vmem:[%s19333_s5 + $0x3838] sm:$0xff] }
 0x60c   : > { %v10514_v44 = vpack.c.bf16 %v2463_v31, %v2445_v25  ;;  %v2733_v31 = vld [vmem:[%s19333_s5 + $0x40a8] sm:$0xff] }
 0x60d   : > { %10441 = vmatpush1.bf16.msra.mxu0 %v10440_v0  ;;  %v2120_v0 = vld [vmem:[%s19333_s5 + $0x2d80] sm:$0xff] }
 0x60e   : > { %10443 = vmatprep.subr.bf16.mxu0 %v10442_v10  ;;  %v2138_v10 = vld [vmem:[%s19333_s5 + $0x2e10] sm:$0xff] }
 0x60f   : > { %v10480_v53 = vpack.c.bf16 %v2138_v10, %v2120_v0  ;;  %v2481_v0 = vld [vmem:[%s19333_s5 + $0x38c8] sm:$0xff]  ;;  %v2499_v10 = vld [vmem:[%s19333_s5 + $0x3958] sm:$0xff] }
 0x610   : > { %v10518_v49 = vpack.c.bf16 %v2499_v10, %v2481_v0  ;;  %v18246_v0 = vld [vmem:[%s19334_s6] sm:$0xff] }
 0x611   : > { %10445 = vmatpush1.bf16.msra.mxu0 %v10444_v55  ;;  %v2156_v55 = vld [vmem:[%s19333_s5 + $0x2ea0] sm:$0xff] }
 0x612   : > { %10447 = vmatprep.subr.bf16.mxu0 %v10446_v19  ;;  %v2174_v19 = vld [vmem:[%s19333_s5 + $0x2f30] sm:$0xff] }
 0x613   : > { %v10484_v63 = vpack.c.bf16 %v2174_v19, %v2156_v55  ;;  %v2517_v55 = vld [vmem:[%s19333_s5 + $0x39e8] sm:$0xff] }
 0x614   : > { %5574 = vmatmul.mubr.f32.vlgmr.msra.gmra.mrb[16].mxu0 %v11839_v62  ;;  %v1959_v62 = vld [vmem:[%s19333_s5 + $0x2878] sm:$0xff] }
 0x615   : > { %5579 = vmatprep.mubr.f32.mxu0 %v11848_v5  ;;  %10449 = vmatpush1.bf16.msra.mxu0 %v10448_v2  ;;  %v10456_v5 = vpack.c.bf16 %v1922_v45, %v1904_v32  ;;  %v10458_v3 = vpack.c.bf16 %v1959_v62, %v1941_v41  ;;  %v2192_v2 = vld [vmem:[%s19333_s5 + $0x2fc0] sm:$0xff]  ;;  %v2265_v32 = vld [vmem:[%s19333_s5 + $0x3208] sm:$0xff]  ;;  %v2283_v45 = vld [vmem:[%s19333_s5 + $0x3298] sm:$0xff] }
 0x616   : > { %10451 = vmatprep.subr.bf16.mxu0 %v10450_v8  ;;  %v2210_v8 = vld [vmem:[%s19333_s5 + $0x3050] sm:$0xff]  ;;  %v10494_v62 = vpack.c.bf16 %v2283_v45, %v2265_v32  ;;  %v2625_v32 = vld [vmem:[%s19333_s5 + $0x3d48] sm:$0xff]  ;;  %v2643_v45 = vld [vmem:[%s19333_s5 + $0x3dd8] sm:$0xff] }
 0x617   : > { %v10488_v50 = vpack.c.bf16 %v2210_v8, %v2192_v2  ;;  %v2552_v2 = vld [vmem:[%s19333_s5 + $0x3b00] sm:$0xff]  ;;  %v2570_v8 = vld [vmem:[%s19333_s5 + $0x3b90] sm:$0xff] }
 0x618   : > { %5580 = vmatmul.mubr.f32.gmra.mrb[18].mxu0 %v11872_v14  ;;  %v1995_v14 = vld [vmem:[%s19333_s5 + $0x2998] sm:$0xff] }
 0x619   : > { %10453 = vmatpush1.bf16.msra.mxu0 %v10452_v36  ;;  %5650 = vmatprep.mubr.f32.mxu0 %v11888_v33  ;;  %v10460_v33 = vpack.c.bf16 %v1958_v56, %v1940_v47  ;;  %v10462_v58 = vpack.c.bf16 %v1995_v14, %v1977_v20  ;;  %v2228_v36 = vld [vmem:[%s19333_s5 + $0x30e0] sm:$0xff]  ;;  %v2301_v47 = vld [vmem:[%s19333_s5 + $0x3328] sm:$0xff]  ;;  %v2319_v56 = vld [vmem:[%s19333_s5 + $0x33b8] sm:$0xff] }
 0x61a   : > { %10455 = vmatprep.subr.bf16.mxu0 %v10454_v9  ;;  %v2246_v9 = vld [vmem:[%s19333_s5 + $0x3170] sm:$0xff]  ;;  %v10498_v14 = vpack.c.bf16 %v2319_v56, %v2301_v47 }
 0x61b   : > { %v10492_v41 = vpack.c.bf16 %v2246_v9, %v2228_v36  ;;  %v2588_v36 = vld [vmem:[%s19333_s5 + $0x3c20] sm:$0xff]  ;;  %v2606_v9 = vld [vmem:[%s19333_s5 + $0x3cb0] sm:$0xff] }
 0x61c   : > { %v2642_v47 = vld [vmem:[%s19333_s5 + $0x3dd0] sm:$0xff] }
 0x61d   : > { %10457 = vmatpush1.bf16.msra.mxu0 %v10456_v5  ;;  %v2264_v5 = vld [vmem:[%s19333_s5 + $0x3200] sm:$0xff] }
 0x61e   : > { %10459 = vmatprep.subr.bf16.mxu0 %v10458_v3  ;;  %v2282_v3 = vld [vmem:[%s19333_s5 + $0x3290] sm:$0xff] }
 0x61f   : > { %v10496_v20 = vpack.c.bf16 %v2282_v3, %v2264_v5  ;;  %v10534_v5 = vpack.c.bf16 %v2643_v45, %v2625_v32  ;;  %v2624_v3 = vld [vmem:[%s19333_s5 + $0x3d40] sm:$0xff] }
 0x620   : > { %v10536_v57 = vpack.c.bf16 %v2642_v47, %v2624_v3  ;;  %v2822_v3 = vld [vmem:[%s19333_s5 + $0x4370] sm:$0xff] }
 0x621   : > { %10461 = vmatpush1.bf16.msra.mxu0 %v10460_v33  ;;  %v2300_v33 = vld [vmem:[%s19333_s5 + $0x3320] sm:$0xff] }
 0x622   : > { %10463 = vmatprep.subr.bf16.mxu0 %v10462_v58  ;;  %v2318_v58 = vld [vmem:[%s19333_s5 + $0x33b0] sm:$0xff] }
 0x623   : > { %v10500_v23 = vpack.c.bf16 %v2318_v58, %v2300_v33  ;;  %v2679_v33 = vld [vmem:[%s19333_s5 + $0x3ef8] sm:$0xff] }
 0x625   : > { %10465 = vmatpush1.bf16.msra.mxu0 %v10464_v42  ;;  %v2336_v42 = vld [vmem:[%s19333_s5 + $0x3440] sm:$0xff] }
 0x626   : > { %10467 = vmatprep.subr.bf16.mxu0 %v10466_v13  ;;  %v2354_v13 = vld [vmem:[%s19333_s5 + $0x34d0] sm:$0xff] }
 0x627   : > { %v10504_v27 = vpack.c.bf16 %v2354_v13, %v2336_v42  ;;  %v2678_v42 = vld [vmem:[%s19333_s5 + $0x3ef0] sm:$0xff] }
 0x629   : > { %10469 = vmatpush1.bf16.msra.mxu0 %v10468_v35  ;;  %v2372_v35 = vld [vmem:[%s19333_s5 + $0x3560] sm:$0xff] }
 0x62a   : > { %10471 = vmatprep.subr.bf16.mxu0 %v10470_v51  ;;  %v2390_v51 = vld [vmem:[%s19333_s5 + $0x35f0] sm:$0xff] }
 0x62b   : > { %v10508_v18 = vpack.c.bf16 %v2390_v51, %v2372_v35 }
 0x62d   : > { %10473 = vmatpush1.bf16.msra.mxu0 %v10472_v7  ;;  %v2408_v7 = vld [vmem:[%s19333_s5 + $0x3680] sm:$0xff] }
 0x62e   : > { %10475 = vmatprep.subr.bf16.mxu0 %v10474_v52  ;;  %v2426_v52 = vld [vmem:[%s19333_s5 + $0x3710] sm:$0xff] }
 0x62f   : > { %v10512_v43 = vpack.c.bf16 %v2426_v52, %v2408_v7  ;;  %v2696_v7 = vld [vmem:[%s19333_s5 + $0x3f80] sm:$0xff]  ;;  %v2714_v52 = vld [vmem:[%s19333_s5 + $0x4010] sm:$0xff] }
 0x631   : > { %10477 = vmatpush1.bf16.msra.mxu0 %v10476_v46  ;;  %v2444_v46 = vld [vmem:[%s19333_s5 + $0x37a0] sm:$0xff] }
 0x632   : > { %10479 = vmatprep.subr.bf16.mxu0 %v10478_v34  ;;  %v2462_v34 = vld [vmem:[%s19333_s5 + $0x3830] sm:$0xff] }
 0x633   : > { %v10516_v21 = vpack.c.bf16 %v2462_v34, %v2444_v46  ;;  %v10544_v46 = vpack.c.bf16 %v2714_v52, %v2696_v7  ;;  %v18241_v34 = vpop.permute.xlu0 %5755  ;;  %v2876_v7 = vld [vmem:[%s19333_s5 + $0x4520] sm:$0xff]  ;;  %v2894_v52 = vld [vmem:[%s19333_s5 + $0x45b0] sm:$0xff] }
 0x634   : > { %19370 = vst [vmem:[#allocation2_spill] sm:$0xff] %v18241_v34 }
 0x635   : > { %10481 = vmatpush1.bf16.msra.mxu0 %v10480_v53  ;;  %v2480_v53 = vld [vmem:[%s19333_s5 + $0x38c0] sm:$0xff] }
 0x636   : > { %10483 = vmatprep.subr.bf16.mxu0 %v10482_v59  ;;  %v2498_v59 = vld [vmem:[%s19333_s5 + $0x3950] sm:$0xff] }
 0x637   : > { %v18301_v45 = vpop.permute.xlu0 %5765 }
 0x639   : > { %10485 = vmatpush1.bf16.msra.mxu0 %v10484_v63  ;;  %v2553_v63 = vld [vmem:[%s19333_s5 + $0x3b08] sm:$0xff] }
 0x63a   : > { %10487 = vmatprep.subr.bf16.mxu0 %v10486_v61 }
 0x63d   : > { %10489 = vmatpush1.bf16.msra.mxu0 %v10488_v50  ;;  %v10528_v50 = vpack.c.bf16 %v2570_v8, %v2552_v2  ;;  %v2768_v8 = vld [vmem:[%s19333_s5 + $0x41c0] sm:$0xff] }
 0x63e   : > { %10491 = vmatprep.subr.bf16.mxu0 %v10490_v39  ;;  %v10530_v39 = vpack.c.bf16 %v2607_v60, %v2589_v38  ;;  %v2786_v38 = vld [vmem:[%s19333_s5 + $0x4250] sm:$0xff] }
 0x63f   : > { %v10552_v32 = vpack.c.bf16 %v2786_v38, %v2768_v8  ;;  %v2949_v38 = vld [vmem:[%s19333_s5 + $0x4768] sm:$0xff] }
 0x641   : > { %10493 = vmatpush1.bf16.msra.mxu0 %v10492_v41  ;;  %v10532_v41 = vpack.c.bf16 %v2606_v9, %v2588_v36  ;;  %v2823_v36 = vld [vmem:[%s19333_s5 + $0x4378] sm:$0xff] }
 0x642   : > { %10495 = vmatprep.subr.bf16.mxu0 %v10494_v62 }
 0x645   : > { %10497 = vmatpush1.bf16.msra.mxu0 %v10496_v20 }
 0x646   : > { %10499 = vmatprep.subr.bf16.mxu0 %v10498_v14  ;;  %v2661_v14 = vld [vmem:[%s19333_s5 + $0x3e68] sm:$0xff] }
 0x649   : > { %10501 = vmatpush1.bf16.msra.mxu0 %v10500_v23  ;;  %v10538_v23 = vpack.c.bf16 %v2679_v33, %v2661_v14  ;;  %v2859_v14 = vld [vmem:[%s19333_s5 + $0x4498] sm:$0xff] }
 0x64a   : > { %10503 = vmatprep.subr.bf16.mxu0 %v10502_v29  ;;  %v2660_v29 = vld [vmem:[%s19333_s5 + $0x3e60] sm:$0xff] }
 0x64d   : > { %10505 = vmatpush1.bf16.msra.mxu0 %v10504_v27  ;;  %v2697_v27 = vld [vmem:[%s19333_s5 + $0x3f88] sm:$0xff] }
 0x64e   : > { %10507 = vmatprep.subr.bf16.mxu0 %v10506_v54  ;;  %v2715_v54 = vld [vmem:[%s19333_s5 + $0x4018] sm:$0xff] }
 0x651   : > { %10509 = vmatpush1.bf16.msra.mxu0 %v10508_v18  ;;  %v10540_v18 = vpack.c.bf16 %v2678_v42, %v2660_v29 }
 0x652   : > { %10511 = vmatprep.subr.bf16.mxu0 %v10510_v15  ;;  %v10542_v15 = vpack.c.bf16 %v2715_v54, %v2697_v27  ;;  %v2858_v27 = vld [vmem:[%s19333_s5 + $0x4490] sm:$0xff] }
 0x654   : > { %5651 = vmatmul.mubr.f32.vlgmr.msra.gmra.mrb[16].mxu0 %v12247_v37  ;;  %v2535_v37 = vld [vmem:[%s19333_s5 + $0x3a78] sm:$0xff] }
 0x655   : > { %5656 = vmatprep.mubr.f32.mxu0 %v12250_v12  ;;  %10513 = vmatpush1.bf16.msra.mxu0 %v10512_v43  ;;  %v10520_v12 = vpack.c.bf16 %v2498_v59, %v2480_v53  ;;  %v10522_v19 = vpack.c.bf16 %v2535_v37, %v2517_v55  ;;  %v2751_v43 = vld [vmem:[%s19333_s5 + $0x4138] sm:$0xff]  ;;  %v18256_v53 = vpop.permute.xlu1 %5750  ;;  %v2769_v55 = vld [vmem:[%s19333_s5 + $0x41c8] sm:$0xff] }
 0x656   : > { %10515 = vmatprep.subr.bf16.mxu0 %v10514_v44  ;;  %v10546_v10 = vpack.c.bf16 %v2751_v43, %v2733_v31  ;;  %19371 = vst [vmem:[#allocation3_spill] sm:$0xff] %v18256_v53  ;;  %v2787_v37 = vld [vmem:[%s19333_s5 + $0x4258] sm:$0xff]  ;;  %v2913_v31 = vld [vmem:[%s19333_s5 + $0x4648] sm:$0xff] }
 0x657   : > { %v10550_v2 = vpack.c.bf16 %v2787_v37, %v2769_v55  ;;  %v2931_v43 = vld [vmem:[%s19333_s5 + $0x46d8] sm:$0xff] }
 0x658   : > { %5657 = vmatmul.mubr.f32.gmra.mrb[18].mxu0 %v12280_v28  ;;  %v2571_v28 = vld [vmem:[%s19333_s5 + $0x3b98] sm:$0xff]  ;;  %v10566_v37 = vpack.c.bf16 %v2931_v43, %v2913_v31 }
 0x659   : > { %10517 = vmatpush1.bf16.msra.mxu0 %v10516_v21  ;;  %5727 = vmatprep.mubr.f32.mxu0 %v12287_v30  ;;  %v10524_v30 = vpack.c.bf16 %v2534_v16, %v2516_v4  ;;  %v10526_v61 = vpack.c.bf16 %v2571_v28, %v2553_v63  ;;  %v2732_v21 = vld [vmem:[%s19333_s5 + $0x40a0] sm:$0xff]  ;;  %v18316_v47 = vpop.permute.xlu1 %5760 }
 0x65a   : > { %10519 = vmatprep.subr.bf16.mxu0 %v10518_v49  ;;  %v2750_v49 = vld [vmem:[%s19333_s5 + $0x4130] sm:$0xff] }
 0x65b   : > { %v10548_v28 = vpack.c.bf16 %v2750_v49, %v2732_v21 }
 0x65d   : > { %10521 = vmatpush1.bf16.msra.mxu0 %v10520_v12 }
 0x65e   : > { %10523 = vmatprep.subr.bf16.mxu0 %v10522_v19 }
 0x661   : > { %10525 = vmatpush1.bf16.msra.mxu0 %v10524_v30 }
 0x662   : > { %10527 = vmatprep.subr.bf16.mxu0 %v10526_v61  ;;  %v18282_v61 = vld [vmem:[%s19334_s6 + $0x8] sm:$0xff] }
 0x665   : > { %10529 = vmatpush1.bf16.msra.mxu0 %v10528_v50 }
 0x666   : > { %v5113_v62 = vpop.f32.mrb[12].mxu0  ;;  %10531 = vmatprep.subr.bf16.mxu0 %v10530_v39  ;;  %v2805_v39 = vld [vmem:[%s19333_s5 + $0x42e8] sm:$0xff] }
 0x667   : > { %v5421_v56 = vpop.f32.mrb[30].mxu1  ;;  %v5115_v20 = vpop.f32.mrb[13].mxu0 }
 0x668   : > { %v5423_v58 = vpop.f32.mrb[31].mxu1 }
 0x669   : > { %10533 = vmatpush1.bf16.msra.mxu0 %v10532_v41  ;;  %v18306_v41 = vld [vmem:[%s19334_s6 + $0x10] sm:$0xff] }
 0x66a   : > { %v5119_v11 = vpop.f32.mrb[14].mxu0  ;;  %10535 = vmatprep.subr.bf16.mxu0 %v10534_v5  ;;  %v2804_v5 = vld [vmem:[%s19333_s5 + $0x42e0] sm:$0xff] }
 0x66b   : > { %v10600_v13 = vpack.c.bf16 %v5119_v11, %v5113_v62  ;;  %v5427_v48 = vpop.f32.mrb[32].mxu1  ;;  %v5121_v6 = vpop.f32.mrb[15].mxu0  ;;  %v10554_v62 = vpack.c.bf16 %v2823_v36, %v2805_v39  ;;  %v10556_v29 = vpack.c.bf16 %v2822_v3, %v2804_v5 }
 0x66c   : > { %v10604_v35 = vpack.c.bf16 %v5427_v48, %v5421_v56  ;;  %v10598_v51 = vpack.c.bf16 %v5121_v6, %v5115_v20  ;;  %v5429_v22 = vpop.f32.mrb[33].mxu1  ;;  %v2841_v20 = vld [vmem:[%s19333_s5 + $0x4408] sm:$0xff]  ;;  %v2840_v6 = vld [vmem:[%s19333_s5 + $0x4400] sm:$0xff] }
 0x66d   : > { %v10602_v17 = vpack.c.bf16 %v5429_v22, %v5423_v58  ;;  %10537 = vmatpush1.bf16.msra.mxu0 %v10536_v57  ;;  %v10558_v48 = vpack.c.bf16 %v2859_v14, %v2841_v20  ;;  %v2895_v22 = vld [vmem:[%s19333_s5 + $0x45b8] sm:$0xff] }
 0x66e   : > { %10599 = vmatprep.subr.bf16.mxu1 %v10598_v51  ;;  %10539 = vmatprep.subr.bf16.mxu0 %v10538_v23  ;;  %v2877_v51 = vld [vmem:[%s19333_s5 + $0x4528] sm:$0xff] }
 0x66f   : > { %v5847_v25 = vpop.f32.mrb[34].mxu1  ;;  %10601 = vmatpush1.bf16.msra.mxu1 %v10600_v13  ;;  %v18342_v13 = vld [vmem:[%s19334_s6 + $0x18] sm:$0xff] }
 0x670   : > { %v5849_v44 = vpop.f32.mrb[35].mxu1  ;;  %10603 = vmatprep.subr.bf16.mxu1 %v10602_v17  ;;  %v18266_v12 = vadd.f32 %v5847_v25, %v18256_v53 }
 0x671   : > { %10541 = vmatpush1.bf16.msra.mxu0 %v10540_v18  ;;  %v18272_v16 = vadd.f32 %v5849_v44, %v18256_v53  ;;  %v10560_v18 = vpack.c.bf16 %v2858_v27, %v2840_v6 }
 0x672   : > { %8240 = vmatmul.mubr.msk.f32.vlgmr.msra.gmra.mrb[82].mxu1 %vm5768_vm1, %v18246_v0  ;;  %10543 = vmatprep.subr.bf16.mxu0 %v10542_v15  ;;  %v10562_v15 = vpack.c.bf16 %v2895_v22, %v2877_v51 }
 0x673   : > { %v5853_v59 = vpop.f32.mrb[36].mxu1  ;;  %10605 = vmatpush1.bf16.msra.mxu1 %v10604_v35  ;;  %6385 = vmatprep.mubr.f32.mxu1 %v19340_v1 }
 0x674   : > { %v18269_v19 = vadd.f32 %v5853_v59, %v18241_v34  ;;  %v5855_v4 = vpop.f32.mrb[37].mxu1  ;;  %v10564_v59 = vpack.c.bf16 %v2894_v52, %v2876_v7 }
 0x675   : > { %v18275_v63 = vadd.f32 %v5855_v4, %v18241_v34  ;;  %10545 = vmatpush1.bf16.msra.mxu0 %v10544_v46  ;;  %v2912_v4 = vld [vmem:[%s19333_s5 + $0x4640] sm:$0xff] }
 0x676   : > { %8241 = vmatmul.mubr.msk.f32.gmra.mrb[84].mxu1 %vm5768_vm1, %v18282_v61  ;;  %10547 = vmatprep.subr.bf16.mxu0 %v10546_v10 }
 0x677   : > { %v5859_v50 = vpop.f32.mrb[38].mxu1  ;;  %6391 = vmatprep.mubr.f32.mxu1 %v19340_v1 }
 0x678   : > { %v5861_v9 = vpop.f32.mrb[39].mxu1  ;;  %v18326_v33 = vadd.f32 %v5859_v50, %v18316_v47  ;;  %v2967_v50 = vld [vmem:[%s19333_s5 + $0x47f8] sm:$0xff] }
 0x679   : > { %10549 = vmatpush1.bf16.msra.mxu0 %v10548_v28  ;;  %v18332_v11 = vadd.f32 %v5861_v9, %v18316_v47  ;;  %v2930_v28 = vld [vmem:[%s19333_s5 + $0x46d0] sm:$0xff]  ;;  %v10570_v9 = vpack.c.bf16 %v2967_v50, %v2949_v38 }
 0x67a   : > { %8242 = vmatmul.mubr.msk.f32.gmra.mrb[86].mxu1 %vm5768_vm1, %v18306_v41  ;;  %10551 = vmatprep.subr.bf16.mxu0 %v10550_v2  ;;  %v10568_v36 = vpack.c.bf16 %v2930_v28, %v2912_v4 }
 0x67b   : > { %v5865_v56 = vpop.f32.mrb[40].mxu1  ;;  %6397 = vmatprep.mubr.f32.mxu1 %v19340_v1 }
 0x67c   : > { %v18329_v58 = vadd.f32 %v5865_v56, %v18301_v45  ;;  %v5867_v57 = vpop.f32.mrb[41].mxu1 }
 0x67d   : > { %v18335_v23 = vadd.f32 %v5867_v57, %v18301_v45  ;;  %10553 = vmatpush1.bf16.msra.mxu0 %v10552_v32  ;;  %v2948_v32 = vld [vmem:[%s19333_s5 + $0x4760] sm:$0xff] }
 0x67e   : > { %8243 = vmatmul.mubr.msk.f32.gmra.mrb[88].mxu1 %vm5768_vm1, %v18342_v13  ;;  %10555 = vmatprep.subr.bf16.mxu0 %v10554_v62  ;;  %v2966_v62 = vld [vmem:[%s19333_s5 + $0x47f0] sm:$0xff] }
 0x67f   : > { %v5936_v35 = vpop.f32.mrb[42].mxu1  ;;  %6468 = vmatprep.mubr.f32.mxu1 %v19340_v1 }
 0x680   : > { %v5938_v17 = vpop.f32.mrb[43].mxu1  ;;  %v18377_v44 = vadd.f32 %v5936_v35, %v18256_v53 }
 0x681   : > { %10557 = vmatpush1.bf16.msra.mxu0 %v10556_v29  ;;  %v18383_v21 = vadd.f32 %v5938_v17, %v18256_v53  ;;  %v10572_v29 = vpack.c.bf16 %v2966_v62, %v2948_v32 }
 0x682   : > { %8244 = vmatmul.mubr.msk.f32.vlgmr.msra.gmra.mrb[90].mxu1 %vm5768_vm1, %v18246_v0  ;;  %10559 = vmatprep.subr.bf16.mxu0 %v10558_v48 }
 0x683   : > { %v5942_v25 = vpop.f32.mrb[44].mxu1  ;;  %6474 = vmatprep.mubr.f32.mxu1 %v19340_v1 }
 0x684   : > { %v18380_v46 = vadd.f32 %v5942_v25, %v18241_v34  ;;  %v5944_v10 = vpop.f32.mrb[45].mxu1 }
 0x685   : > { %v18386_v49 = vadd.f32 %v5944_v10, %v18241_v34  ;;  %10561 = vmatpush1.bf16.msra.mxu0 %v10560_v18 }
 0x686   : > { %8245 = vmatmul.mubr.msk.f32.gmra.mrb[92].mxu1 %vm5768_vm1, %v18282_v61  ;;  %10563 = vmatprep.subr.bf16.mxu0 %v10562_v15 }
 0x687   : > { %v5948_v8 = vpop.f32.mrb[46].mxu1  ;;  %6480 = vmatprep.mubr.f32.mxu1 %v19340_v1 }
 0x688   : > { %v5950_v39 = vpop.f32.mrb[47].mxu1  ;;  %v18417_v3 = vadd.f32 %v5948_v8, %v18316_v47 }
 0x689   : > { %10565 = vmatpush1.bf16.msra.mxu0 %v10564_v59  ;;  %v18423_v14 = vadd.f32 %v5950_v39, %v18316_v47 }
 0x68a   : > { %8246 = vmatmul.mubr.msk.f32.gmra.mrb[94].mxu1 %vm5768_vm1, %v18306_v41  ;;  %10567 = vmatprep.subr.bf16.mxu0 %v10566_v37 }
 0x68b   : > { %v5954_v5 = vpop.f32.mrb[48].mxu1  ;;  %6486 = vmatprep.mubr.f32.mxu1 %v19340_v1 }
 0x68c   : > { %v18420_v56 = vadd.f32 %v5954_v5, %v18301_v45  ;;  %v5956_v20 = vpop.f32.mrb[49].mxu1 }
 0x68d   : > { %v18426_v57 = vadd.f32 %v5956_v20, %v18301_v45  ;;  %10569 = vmatpush1.bf16.msra.mxu0 %v10568_v36 }
 0x68e   : > { %8247 = vmatmul.mubr.msk.f32.gmra.mrb[96].mxu1 %vm5768_vm1, %v18342_v13  ;;  %10571 = vmatprep.subr.bf16.mxu0 %v10570_v9 }
 0x68f   : > { %v6025_v27 = vpop.f32.mrb[50].mxu1  ;;  %6557 = vmatprep.mubr.f32.mxu1 %v19340_v1 }
 0x690   : > { %v6027_v35 = vpop.f32.mrb[51].mxu1  ;;  %v18436_v22 = vadd.f32 %v6025_v27, %v18256_v53 }
 0x691   : > { %10573 = vmatpush1.bf16.msra.mxu0 %v10572_v29  ;;  %v18443_v15 = vadd.f32 %v6027_v35, %v18256_v53 }
 0x693   : > { %v6031_v51 = vpop.f32.mrb[52].mxu1 }
 0x694   : > { %v18439_v17 = vadd.f32 %v6031_v51, %v18241_v34  ;;  %5728 = vmatmul.mubr.f32.vlgmr.msra.gmra.mrb[16].mxu0 %v12655_v24  ;;  %v6033_v18 = vpop.f32.mrb[53].mxu1 }
 0x695   : > { %v18446_v7 = vadd.f32 %v6033_v18, %v18241_v34  ;;  %5733 = vmatprep.mubr.f32.mxu0 %v12658_v26 }
 0x697   : > { %v6037_v31 = vpop.f32.mrb[54].mxu1 }
 0x698   : > { %5734 = vmatmul.mubr.f32.gmra.mrb[18].mxu0 %v12688_v40  ;;  %v6039_v43 = vpop.f32.mrb[55].mxu1  ;;  %v18455_v10 = vadd.f32 %v6037_v31, %v18316_v47 }
 0x699   : > { %v18461_v26 = vadd.f32 %v6039_v43, %v18316_v47 }
 0x69b   : > { %v6043_v24 = vpop.f32.mrb[56].mxu1 }
 0x69c   : > { %v18458_v59 = vadd.f32 %v6043_v24, %v18301_v45  ;;  %v6045_v37 = vpop.f32.mrb[57].mxu1 }
 0x69d   : > { %v18464_v4 = vadd.f32 %v6045_v37, %v18301_v45 }
 0x69f   : > { %v6114_v8 = vpop.f32.mrb[58].mxu1 }
 0x6a0   : > { %v6116_v38 = vpop.f32.mrb[59].mxu1  ;;  %v18471_v39 = vadd.f32 %v6114_v8, %v18256_v53 }
 0x6a1   : > { %v18477_v32 = vadd.f32 %v6116_v38, %v18256_v53 }
 0x6a3   : > { %v6120_v50 = vpop.f32.mrb[60].mxu1 }
 0x6a4   : > { %v18474_v36 = vadd.f32 %v6120_v50, %v18241_v34  ;;  %v6122_v9 = vpop.f32.mrb[61].mxu1 }
 0x6a5   : > { %v18480_v62 = vadd.f32 %v6122_v9, %v18241_v34 }
 0x6a7   : > { %v6126_v29 = vpop.f32.mrb[62].mxu1 }
 0x6a8   : > { %v6128_v27 = vpop.f32.mrb[63].mxu1  ;;  %v18487_v51 = vadd.f32 %v6126_v29, %v18316_v47 }
 0x6a9   : > { %v18493_v43 = vadd.f32 %v6128_v27, %v18316_v47 }
 0x6ab   : > { %v6132_v35 = vpop.f32.mrb[64].mxu1 }
 0x6ac   : > { %v18490_v18 = vadd.f32 %v6132_v35, %v18301_v45  ;;  %v6134_v31 = vpop.f32.mrb[65].mxu1 }
 0x6ad   : > { %v18496_v24 = vadd.f32 %v6134_v31, %v18301_v45 }
 0x6af   : > { %v6203_v38 = vpop.f32.mrb[66].mxu1 }
 0x6b0   : > { %v6205_v50 = vpop.f32.mrb[67].mxu1  ;;  %v18503_v29 = vadd.f32 %v6203_v38, %v18256_v53 }
 0x6b1   : > { %v18509_v5 = vadd.f32 %v6205_v50, %v18256_v53 }
 0x6b3   : > { %v6209_v9 = vpop.f32.mrb[68].mxu1 }
 0x6b4   : > { %v18506_v35 = vadd.f32 %v6209_v9, %v18241_v34  ;;  %v6211_v27 = vpop.f32.mrb[69].mxu1 }
 0x6b5   : > { %v18512_v31 = vadd.f32 %v6211_v27, %v18241_v34 }
 0x6b7   : > { %v6215_v20 = vpop.f32.mrb[70].mxu1 }
 0x6b8   : > { %v6217_v28 = vpop.f32.mrb[71].mxu1  ;;  %v18519_v40 = vadd.f32 %v6215_v20, %v18316_v47 }
 0x6b9   : > { %v18525_v52 = vadd.f32 %v6217_v28, %v18316_v47 }
 0x6bb   : > { %v6221_v38 = vpop.f32.mrb[72].mxu1 }
 0x6bc   : > { %v18522_v9 = vadd.f32 %v6221_v38, %v18301_v45  ;;  %v6223_v50 = vpop.f32.mrb[73].mxu1 }
 0x6bd   : > { %v18528_v27 = vadd.f32 %v6223_v50, %v18301_v45 }
 0x6bf   : > { %v6292_v25 = vpop.f32.mrb[74].mxu1 }
 0x6c0   : > { %v6294_v48 = vpop.f32.mrb[75].mxu1  ;;  %v18535_v6 = vadd.f32 %v6292_v25, %v18256_v53 }
 0x6c1   : > { %v18541_v55 = vadd.f32 %v6294_v48, %v18256_v53 }
 0x6c2   : > { %19372 = vst [vmem:[#allocation4_spill] sm:$0xff] %v18535_v6 }
 0x6c3   : > { %v6298_v20 = vpop.f32.mrb[76].mxu1 }
 0x6c4   : > { %v18538_v38 = vadd.f32 %v6298_v20, %v18241_v34  ;;  %v6300_v28 = vpop.f32.mrb[77].mxu1 }
 0x6c5   : > { %v18544_v50 = vadd.f32 %v6300_v28, %v18241_v34 }
 0x6c6   : > { %19373 = vst [vmem:[#allocation5_spill] sm:$0xff] %v18538_v38 }
 0x6c7   : > { %v6304_v2 = vpop.f32.mrb[78].mxu1 }
 0x6c8   : > { %v6306_v42 = vpop.f32.mrb[79].mxu1  ;;  %v18551_v54 = vadd.f32 %v6304_v2, %v18316_v47 }
 0x6c9   : > { %v18557_v1 = vadd.f32 %v6306_v42, %v18316_v47 }
 0x6ca   : > { %19374 = vst [vmem:[#allocation6_spill] sm:$0xff] %v18551_v54 }
 0x6cb   : > { %v6310_v25 = vpop.f32.mrb[80].mxu1  ;;  %19376 = vst [vmem:[#allocation8_spill] sm:$0xff] %v18557_v1 }
 0x6cc   : > { %v18554_v20 = vadd.f32 %v6310_v25, %v18301_v45  ;;  %v6312_v48 = vpop.f32.mrb[81].mxu1 }
 0x6cd   : > { %v18560_v28 = vadd.f32 %v6312_v48, %v18301_v45 }
 0x6ce   : > { %19375 = vst [vmem:[#allocation7_spill] sm:$0xff] %v18554_v20 }
 0x6cf   : > { %19377 = vst [vmem:[#allocation9_spill] sm:$0xff] %v18560_v28 }
 0x745   : > { %v6381_v30 = vpop.f32.mrb[82].mxu1 }
 0x746   : > { %v6383_v60 = vpop.f32.mrb[83].mxu1  ;;  %v18567_v6 = vadd.f32 %v6381_v30, %v18256_v53 }
 0x747   : > { %v18573_v38 = vadd.f32 %v6383_v60, %v18256_v53 }
 0x748   : > { %19378 = vst [vmem:[#allocation10_spill] sm:$0xff] %v18567_v6 }
 0x749   : > { %v6387_v2 = vpop.f32.mrb[84].mxu1  ;;  %19380 = vst [vmem:[#allocation12_spill] sm:$0xff] %v18573_v38 }
 0x74a   : > { %v18570_v25 = vadd.f32 %v6387_v2, %v18241_v34  ;;  %v6389_v42 = vpop.f32.mrb[85].mxu1 }
 0x74b   : > { %v18576_v48 = vadd.f32 %v6389_v42, %v18241_v34 }
 0x74c   : > { %19379 = vst [vmem:[#allocation11_spill] sm:$0xff] %v18570_v25 }
 0x74d   : > { %19381 = vst [vmem:[#allocation13_spill] sm:$0xff] %v18576_v48  ;;  %v6393_v54 = vpop.f32.mrb[86].mxu1 }
 0x74e   : > { %v6395_v20 = vpop.f32.mrb[87].mxu1  ;;  %v18583_v1 = vadd.f32 %v6393_v54, %v18316_v47 }
 0x74f   : > { %v18589_v28 = vadd.f32 %v6395_v20, %v18316_v47 }
 0x750   : > { %19382 = vst [vmem:[#allocation14_spill] sm:$0xff] %v18583_v1 }
 0x751   : > { %v6399_v30 = vpop.f32.mrb[88].mxu1  ;;  %19384 = vst [vmem:[#allocation16_spill] sm:$0xff] %v18589_v28 }
 0x752   : > { %v18586_v2 = vadd.f32 %v6399_v30, %v18301_v45  ;;  %v6401_v60 = vpop.f32.mrb[89].mxu1 }
 0x753   : > { %v18592_v42 = vadd.f32 %v6401_v60, %v18301_v45 }
 0x754   : > { %19383 = vst [vmem:[#allocation15_spill] sm:$0xff] %v18586_v2 }
 0x755   : > { %v6470_v6 = vpop.f32.mrb[90].mxu1 }
 0x756   : > { %v6472_v25 = vpop.f32.mrb[91].mxu1  ;;  %v18599_v38 = vadd.f32 %v6470_v6, %v18256_v53 }
 0x757   : > { %v18605_v48 = vadd.f32 %v6472_v25, %v18256_v53 }
 0x758   : > { %19385 = vst [vmem:[#allocation17_spill] sm:$0xff] %v18599_v38 }
 0x759   : > { %v6476_v54 = vpop.f32.mrb[92].mxu1  ;;  %19387 = vst [vmem:[#allocation19_spill] sm:$0xff] %v18605_v48 }
 0x75a   : > { %v18602_v30 = vadd.f32 %v6476_v54, %v18241_v34  ;;  %v6478_v20 = vpop.f32.mrb[93].mxu1 }
 0x75b   : > { %v18608_v60 = vadd.f32 %v6478_v20, %v18241_v34 }
 0x75c   : > { %19386 = vst [vmem:[#allocation18_spill] sm:$0xff] %v18602_v30 }
 0x75d   : > { %v6482_v1 = vpop.f32.mrb[94].mxu1 }
 0x75e   : > { %v6484_v2 = vpop.f32.mrb[95].mxu1  ;;  %v18615_v28 = vadd.f32 %v6482_v1, %v18316_v47 }
 0x75f   : > { %v18621_v53 = vadd.f32 %v6484_v2, %v18316_v47  ;;  %v19388_v2 = vpack.c.bf16 %v18275_v63, %v18272_v16  ;;  %v19392_v16 = vpack.c.bf16 %v18329_v58, %v18326_v33  ;;  %v19395_v63 = vpack.c.bf16 %v18426_v57, %v18423_v14  ;;  %v19410_v57 = vld [vmem:[#allocation5_spill] sm:$0xff] }
 0x760   : > { %v19398_v33 = vpack.c.bf16 %v18439_v17, %v18436_v22  ;;  %v19399_v58 = vpack.c.bf16 %v18464_v4, %v18461_v26  ;;  %v19409_v14 = vpack.c.bf16 %v18544_v50, %v18541_v55  ;;  %v19411_v22 = vld [vmem:[#allocation4_spill] sm:$0xff]  ;;  %v19419_v4 = vld [vmem:[#allocation13_spill] sm:$0xff] }
 0x761   : > { %v6488_v6 = vpop.f32.mrb[96].mxu1  ;;  %v19412_v17 = vpack.c.bf16 %v19410_v57, %v19411_v22  ;;  %v19420_v55 = vld [vmem:[#allocation12_spill] sm:$0xff] }
 0x762   : > { %v18618_v54 = vadd.f32 %v6488_v6, %v18301_v45  ;;  %v6490_v25 = vpop.f32.mrb[97].mxu1 }
 0x763   : > { %v18624_v20 = vadd.f32 %v6490_v25, %v18301_v45  ;;  %v19389_v25 = vpack.c.bf16 %v18269_v19, %v18266_v12  ;;  %v18660_v12 = vld [vmem:[%s19336_s8] sm:$0x3f]  ;;  %v19394_v19 = vpack.c.bf16 %v18380_v46, %v18377_v44  ;;  %v19403_v44 = vpack.c.bf16 %v18496_v24, %v18493_v43  ;;  %v19430_v24 = vld [vmem:[#allocation19_spill] sm:$0xff] }
 0x764   : > { %v10672_v37 = vpack.c.bf16 %v18618_v54, %v18615_v28  ;;  %v19404_v46 = vpack.c.bf16 %v18490_v18, %v18487_v51  ;;  %v19427_v51 = vld [vmem:[#allocation15_spill] sm:$0xff]  ;;  %v19428_v18 = vld [vmem:[#allocation14_spill] sm:$0xff] }
 0x765   : > { %v10670_v8 = vpack.c.bf16 %v18624_v20, %v18621_v53  ;;  %v19390_v53 = vmov 0.0   ;;  %v19429_v43 = vpack.c.bf16 %v19427_v51, %v19428_v18 }
 0x767   : > { %v5729_v34 = vpop.f32.mrb[16].mxu0 }
 0x768   : > { %v5731_v38 = vpop.f32.mrb[17].mxu0 }
 0x76b   : > { %v5735_v1 = vpop.f32.mrb[18].mxu0 }
 0x76c   : > { %v10608_v30 = vpack.c.bf16 %v5735_v1, %v5729_v34  ;;  %v5737_v48 = vpop.f32.mrb[19].mxu0  ;;  %v19391_v34 = vpack.c.bf16 %v18335_v23, %v18332_v11  ;;  %v19400_v11 = vpack.c.bf16 %v18458_v59, %v18455_v10  ;;  %v19401_v23 = vpack.c.bf16 %v18480_v62, %v18477_v32  ;;  %v19416_v10 = vld [vmem:[#allocation7_spill] sm:$0xff]  ;;  %v19417_v59 = vld [vmem:[#allocation6_spill] sm:$0xff]  ;;  %v19425_v62 = vld [vmem:[#allocation16_spill] sm:$0xff] }
 0x76d   : > { %v10606_v6 = vpack.c.bf16 %v5737_v48, %v5731_v38  ;;  %v19418_v26 = vpack.c.bf16 %v19416_v10, %v19417_v59  ;;  %v19435_v48 = vld [vmem:[#allocation3_spill] sm:$0xff] }
 0x76f   : > { %10607 = vmatprep.subr.bf16.mxu1 %v10606_v6 }
 0x770   : > { %10609 = vmatpush1.bf16.msra.mxu1 %v10608_v30  ;;  %v19436_v30 = vld [vmem:[#allocation2_spill] sm:$0xff] }
 0x771   : > { %10611 = vmatprep.subr.bf16.mxu1 %v19388_v2 }
 0x773   : > { %8248 = vmatmul.mubr.msk.f32.vlgmr.msra.gmra.mrb[98].mxu1 %vm5768_vm1, %v18246_v0  ;;  %v19393_v0 = vpack.c.bf16 %v18386_v49, %v18383_v21  ;;  %v19405_v21 = vpack.c.bf16 %v18512_v31, %v18509_v5  ;;  %v19406_v49 = vpack.c.bf16 %v18506_v35, %v18503_v29  ;;  %v19426_v5 = vpack.c.bf16 %v18592_v42, %v19425_v62  ;;  %v19432_v35 = vld [vmem:[#allocation18_spill] sm:$0xff]  ;;  %v19433_v31 = vld [vmem:[#allocation17_spill] sm:$0xff] }
 0x774   : > { %10613 = vmatpush1.bf16.msra.mxu1 %v19389_v25  ;;  %6563 = vmatprep.mubr.f32.mxu1 %v19390_v53  ;;  %v19431_v29 = vpack.c.bf16 %v18608_v60, %v19430_v24 }
 0x775   : > { %10615 = vmatprep.subr.bf16.mxu1 %v19391_v34 }
 0x777   : > { %8249 = vmatmul.mubr.msk.f32.gmra.mrb[100].mxu1 %vm5768_vm1, %v18282_v61  ;;  %v19396_v61 = vpack.c.bf16 %v18420_v56, %v18417_v3  ;;  %v19407_v3 = vpack.c.bf16 %v18528_v27, %v18525_v52  ;;  %v19408_v56 = vpack.c.bf16 %v18522_v9, %v18519_v40  ;;  %v19421_v40 = vpack.c.bf16 %v19419_v4, %v19420_v55 }
 0x778   : > { %10617 = vmatpush1.bf16.msra.mxu1 %v19392_v16  ;;  %6569 = vmatprep.mubr.f32.mxu1 %v19390_v53  ;;  %v19434_v9 = vpack.c.bf16 %v19432_v35, %v19433_v31 }
 0x779   : > { %10619 = vmatprep.subr.bf16.mxu1 %v19393_v0 }
 0x77b   : > { %8250 = vmatmul.mubr.msk.f32.gmra.mrb[102].mxu1 %vm5768_vm1, %v18306_v41  ;;  %v19397_v41 = vpack.c.bf16 %v18446_v7, %v18443_v15  ;;  %v19413_v15 = vld [vmem:[#allocation9_spill] sm:$0xff]  ;;  %v19414_v7 = vld [vmem:[#allocation8_spill] sm:$0xff] }
 0x77c   : > { %6575 = vmatprep.mubr.f32.mxu1 %v19390_v53  ;;  %v19415_v52 = vpack.c.bf16 %v19413_v15, %v19414_v7 }
 0x77f   : > { %8251 = vmatmul.mubr.msk.f32.gmra.mrb[104].mxu1 %vm5768_vm1, %v18342_v13  ;;  %v19402_v13 = vpack.c.bf16 %v18474_v36, %v18471_v39  ;;  %v19422_v39 = vld [vmem:[#allocation11_spill] sm:$0xff]  ;;  %v19423_v36 = vld [vmem:[#allocation10_spill] sm:$0xff] }
 0x780   : > { %6651 = vmatprep.mubr.f32.mxu1 %v19390_v53  ;;  %v19424_v32 = vpack.c.bf16 %v19422_v39, %v19423_v36 }
 0x783   : > { %8252 = vmatmul.mubr.msk.f32.vlgmr.msra.gmra.mrb[106].mxu1 %vm6583_vm2, %v18660_v12 }
 0x784   : > { %10621 = vmatpush1.bf16.msra.mxu1 %v19394_v19  ;;  %6722 = vmatprep.mubr.f32.mxu1 %v19390_v53  ;;  %v10822_v19 = vmov 1983009808  }
 0x785   : > { %10623 = vmatprep.subr.bf16.mxu1 %v19395_v63  ;;  %v7565_v63 = vunpack.c.l.s4 %v10822_v19 }
 0x788   : > { %10625 = vmatpush1.bf16.msra.mxu1 %v19396_v61  ;;  %v7567_v61 = vlaneseq }
 0x789   : > { %10627 = vmatprep.subr.bf16.mxu1 %v19397_v41 }
 0x78b   : > { %8253 = vmatmul.mubr.msk.f32.vlgmr.msra.gmra.mrb[108].mxu1 %vm6583_vm2, %v18660_v12 }
 0x78c   : > { %10629 = vmatpush1.bf16.msra.mxu1 %v19398_v33  ;;  %6793 = vmatprep.mubr.f32.mxu1 %v19390_v53 }
 0x78d   : > { %10631 = vmatprep.subr.bf16.mxu1 %v19399_v58 }
 0x790   : > { %10633 = vmatpush1.bf16.msra.mxu1 %v19400_v11 }
 0x791   : > { %10635 = vmatprep.subr.bf16.mxu1 %v19401_v23 }
 0x793   : > { %8254 = vmatmul.mubr.msk.f32.vlgmr.msra.gmra.mrb[110].mxu1 %vm6583_vm2, %v18660_v12 }
 0x794   : > { %10637 = vmatpush1.bf16.msra.mxu1 %v19402_v13  ;;  %6864 = vmatprep.mubr.f32.mxu1 %v19390_v53 }
 0x795   : > { %10639 = vmatprep.subr.bf16.mxu1 %v19403_v44 }
 0x798   : > { %10641 = vmatpush1.bf16.msra.mxu1 %v19404_v46 }
 0x799   : > { %10643 = vmatprep.subr.bf16.mxu1 %v19405_v21 }
 0x79b   : > { %8255 = vmatmul.mubr.msk.f32.vlgmr.msra.gmra.mrb[112].mxu1 %vm6583_vm2, %v18660_v12 }
 0x79c   : > { %10645 = vmatpush1.bf16.msra.mxu1 %v19406_v49  ;;  %6935 = vmatprep.mubr.f32.mxu1 %v19390_v53 }
 0x79d   : > { %10647 = vmatprep.subr.bf16.mxu1 %v19407_v3 }
 0x7a0   : > { %10649 = vmatpush1.bf16.msra.mxu1 %v19408_v56 }
 0x7a1   : > { %10651 = vmatprep.subr.bf16.mxu1 %v19409_v14 }
 0x7a3   : > { %8256 = vmatmul.mubr.msk.f32.vlgmr.msra.gmra.mrb[114].mxu1 %vm6583_vm2, %v18660_v12 }
 0x7a4   : > { %10653 = vmatpush1.bf16.msra.mxu1 %v19412_v17  ;;  %7006 = vmatprep.mubr.f32.mxu1 %v19390_v53 }
 0x7a5   : > { %10655 = vmatprep.subr.bf16.mxu1 %v19415_v52 }
 0x7a8   : > { %10657 = vmatpush1.bf16.msra.mxu1 %v19418_v26 }
 0x7a9   : > { %10659 = vmatprep.subr.bf16.mxu1 %v19421_v40 }
 0x7ab   : > { %8257 = vmatmul.mubr.msk.f32.vlgmr.msra.gmra.mrb[116].mxu1 %vm6583_vm2, %v18660_v12 }
 0x7ac   : > { %10661 = vmatpush1.bf16.msra.mxu1 %v19424_v32  ;;  %7077 = vmatprep.mubr.f32.mxu1 %v19390_v53 }
 0x7ad   : > { %10663 = vmatprep.subr.bf16.mxu1 %v19426_v5 }
 0x7b0   : > { %10665 = vmatpush1.bf16.msra.mxu1 %v19429_v43 }
 0x7b1   : > { %10667 = vmatprep.subr.bf16.mxu1 %v19431_v29 }
 0x7b3   : > { %8258 = vmatmul.mubr.msk.f32.vlgmr.msra.gmra.mrb[118].mxu1 %vm6583_vm2, %v18660_v12 }
 0x7b4   : > { %10669 = vmatpush1.bf16.msra.mxu1 %v19434_v9  ;;  %7148 = vmatprep.mubr.f32.mxu1 %v19390_v53 }
 0x7b5   : > { %10671 = vmatprep.subr.bf16.mxu1 %v10670_v8 }
 0x7b8   : > { %10673 = vmatpush1.bf16.msra.mxu1 %v10672_v37 }
 0x7bb   : > { %8259 = vmatmul.mubr.msk.f32.vlgmr.msra.gmra.mrb[120].mxu1 %vm6583_vm2, %v18660_v12 }
 0x7bc   : > { %7219 = vmatprep.mubr.f32.mxu1 %v19390_v53 }
 0x846   : > { %v6559_v27 = vpop.f32.mrb[98].mxu1 }
 0x847   : > { %v6561_v38 = vpop.f32.mrb[99].mxu1  ;;  %v6560_v42 = vadd.f32 %v6559_v27, %v19435_v48 }
 0x848   : > { %v6562_v1 = vadd.f32 %v6561_v38, %v19435_v48 }
 0x84a   : > { %v6565_v50 = vpop.f32.mrb[100].mxu1 }
 0x84b   : > { %v6566_v60 = vadd.f32 %v6565_v50, %v19436_v30  ;;  %v6567_v20 = vpop.f32.mrb[101].mxu1 }
 0x84c   : > { %v6568_v8 = vadd.f32 %v6567_v20, %v19436_v30 }
 0x84d   : > { %v10676_v6 = vpack.c.bf16 %v6566_v60, %v6560_v42 }
 0x84e   : > { %v10674_v28 = vpack.c.bf16 %v6568_v8, %v6562_v1  ;;  %v6571_v37 = vpop.f32.mrb[102].mxu1 }
 0x84f   : > { %v6573_v54 = vpop.f32.mrb[103].mxu1  ;;  %v6572_v25 = vadd.f32 %v6571_v37, %v18316_v47 }
 0x850   : > { %10675 = vmatprep.subr.bf16.mxu1 %v10674_v28  ;;  %v6574_v16 = vadd.f32 %v6573_v54, %v18316_v47  ;;  %v7566_v47 = vunpack.c.0.s8 %v7565_v63 }
 0x851   : > { %10677 = vmatpush1.bf16.msra.mxu1 %v10676_v6 }
 0x852   : > { %v6577_v2 = vpop.f32.mrb[104].mxu1 }
 0x853   : > { %v6578_v53 = vadd.f32 %v6577_v2, %v18301_v45  ;;  %v6579_v34 = vpop.f32.mrb[105].mxu1  ;;  %v18971_v2 = vpop.permute.xlu0 %8019 }
 0x854   : > { %v6580_v0 = vadd.f32 %v6579_v34, %v18301_v45  ;;  %v18780_v45 = vshrl.u32 %v7567_v61, 7 }
 0x855   : > { %v10680_v41 = vpack.c.bf16 %v6578_v53, %v6572_v25 }
 0x856   : > { %v10678_v33 = vpack.c.bf16 %v6580_v0, %v6574_v16  ;;  %v18772_v58 = vpop.f32.mrb[106].mxu1  ;;  %v18789_v13 = vsub.s32 %v7566_v47, %v18780_v45 }
 0x857   : > { %7734 = vrot.lane.b32.xlu0 %v18772_v58, %s10823_s20  ;;  %7249 = vrot.lane.b32.xlu1 %v18772_v58, %s10824_s21  ;;  %v18778_v11 = vpop.f32.mrb[107].mxu1  ;;  %v7487_v46 = vrot.slane %v18772_v58, 3 }
 0x858   : > { %10679 = vmatprep.subr.bf16.mxu1 %v10678_v33  ;;  %v7648_v23 = vcombine.high %v18772_v58, %v18778_v11  ;;  %v7488_v21 = vrot.slane %v18778_v11, 3 }
 0x859   : > { %10681 = vmatpush1.bf16.msra.mxu1 %v10680_v41 }
 0x85a   : > { %v18804_v3 = vrot.slane %v7648_v23, %v18789_v13 }
 0x85b   : > { %7376 = vrot.lane.b32.xlu1 %v18772_v58, %s10825_s22  ;;  %7251 = vrot.lane.b32.xlu0 %v18778_v11, %s10824_s21 }
 0x85c   : > { %8260 = vmatmul.mubr.msk.f32.vlgmr.msra.gmra.mrb[122].mxu1 %vm6583_vm2, %v18660_v12 }
 0x85e   : > { %v18793_v44 = vpop.f32.mrb[108].mxu1 }
 0x85f   : > { %7736 = vrot.lane.b32.xlu1 %v18778_v11, %s10823_s20  ;;  %7378 = vrot.lane.b32.xlu0 %v18778_v11, %s10825_s22  ;;  %v18801_v49 = vpop.f32.mrb[109].mxu1  ;;  %v7489_v7 = vrot.slane %v18793_v44, 3 }
 0x860   : > { %v7649_v12 = vcombine.high %v18793_v44, %v18801_v49  ;;  %v7490_v52 = vrot.slane %v18801_v49, 3 }
 0x862   : > { %v18809_v56 = vrot.slane %v7649_v12, %v18789_v13 }
 0x863   : > { %7505 = vrot.lane.b32.xlu0 %v7487_v46, %s10826_s23  ;;  %7507 = vrot.lane.b32.xlu1 %v7488_v21, %s10826_s23 }
 0x864   : > { %v7664_v14 = vcombine.low %v18804_v3, %v18809_v56 }
 0x866   : > { %v18815_v57 = vpop.f32.mrb[110].mxu1 }
 0x867   : > { %7738 = vrot.lane.b32.xlu0 %v18793_v44, %s10823_s20  ;;  %7253 = vrot.lane.b32.xlu1 %v18793_v44, %s10824_s21  ;;  %v18821_v22 = vpop.f32.mrb[111].mxu1  ;;  %v7491_v62 = vrot.slane %v18815_v57, 3 }
 0x868   : > { %v7665_v17 = vcombine.high %v18815_v57, %v18821_v22  ;;  %v7492_v5 = vrot.slane %v18821_v22, 3 }
 0x86a   : > { %v18840_v59 = vrot.slane %v7665_v17, %v18789_v13 }
 0x86b   : > { %7380 = vrot.lane.b32.xlu1 %v18793_v44, %s10825_s22  ;;  %7255 = vrot.lane.b32.xlu0 %v18801_v49, %s10824_s21 }
 0x86e   : > { %v18829_v15 = vpop.f32.mrb[112].mxu1 }
 0x86f   : > { %7740 = vrot.lane.b32.xlu1 %v18801_v49, %s10823_s20  ;;  %7382 = vrot.lane.b32.xlu0 %v18801_v49, %s10825_s22  ;;  %v18837_v10 = vpop.f32.mrb[113].mxu1  ;;  %v7493_v38 = vrot.slane %v18829_v15, 3 }
 0x870   : > { %v7666_v26 = vcombine.high %v18829_v15, %v18837_v10  ;;  %v7494_v50 = vrot.slane %v18837_v10, 3 }
 0x872   : > { %v18845_v4 = vrot.slane %v7666_v26, %v18789_v13 }
 0x873   : > { %7509 = vrot.lane.b32.xlu0 %v7489_v7, %s10826_s23  ;;  %7511 = vrot.lane.b32.xlu1 %v7490_v52, %s10826_s23 }
 0x874   : > { %v7681_v55 = vcombine.low %v18840_v59, %v18845_v4 }
 0x876   : > { %v18851_v40 = vpop.f32.mrb[114].mxu1 }
 0x877   : > { %7742 = vrot.lane.b32.xlu0 %v18815_v57, %s10823_s20  ;;  %7257 = vrot.lane.b32.xlu1 %v18815_v57, %s10824_s21  ;;  %v18857_v39 = vpop.f32.mrb[115].mxu1  ;;  %v7495_v1 = vrot.slane %v18851_v40, 3 }
 0x878   : > { %v7682_v36 = vcombine.high %v18851_v40, %v18857_v39  ;;  %v7496_v8 = vrot.slane %v18857_v39, 3 }
 0x87a   : > { %v18876_v18 = vrot.slane %v7682_v36, %v18789_v13 }
 0x87b   : > { %7384 = vrot.lane.b32.xlu1 %v18815_v57, %s10825_s22  ;;  %7259 = vrot.lane.b32.xlu0 %v18821_v22, %s10824_s21 }
 0x87e   : > { %v18865_v32 = vpop.f32.mrb[116].mxu1 }
 0x87f   : > { %7744 = vrot.lane.b32.xlu1 %v18821_v22, %s10823_s20  ;;  %7386 = vrot.lane.b32.xlu0 %v18821_v22, %s10825_s22  ;;  %v18873_v51 = vpop.f32.mrb[117].mxu1  ;;  %v7497_v6 = vrot.slane %v18865_v32, 3 }
 0x880   : > { %v7683_v43 = vcombine.high %v18865_v32, %v18873_v51  ;;  %v7498_v28 = vrot.slane %v18873_v51, 3 }
 0x882   : > { %v18881_v24 = vrot.slane %v7683_v43, %v18789_v13 }
 0x883   : > { %7513 = vrot.lane.b32.xlu0 %v7491_v62, %s10826_s23  ;;  %7515 = vrot.lane.b32.xlu1 %v7492_v5, %s10826_s23 }
 0x884   : > { %v7698_v29 = vcombine.low %v18876_v18, %v18881_v24 }
 0x886   : > { %v18887_v35 = vpop.f32.mrb[118].mxu1 }
 0x887   : > { %7746 = vrot.lane.b32.xlu0 %v18829_v15, %s10823_s20  ;;  %7261 = vrot.lane.b32.xlu1 %v18829_v15, %s10824_s21  ;;  %v18893_v31 = vpop.f32.mrb[119].mxu1  ;;  %v7499_v37 = vrot.slane %v18887_v35, 3 }
 0x888   : > { %v7699_v9 = vcombine.high %v18887_v35, %v18893_v31  ;;  %v7500_v54 = vrot.slane %v18893_v31, 3 }
 0x88a   : > { %v18914_v30 = vrot.slane %v7699_v9, %v18789_v13 }
 0x88b   : > { %7388 = vrot.lane.b32.xlu1 %v18829_v15, %s10825_s22  ;;  %7263 = vrot.lane.b32.xlu0 %v18837_v10, %s10824_s21 }
 0x88e   : > { %v18901_v27 = vpop.f32.mrb[120].mxu1 }
 0x88f   : > { %7748 = vrot.lane.b32.xlu1 %v18837_v10, %s10823_s20  ;;  %7390 = vrot.lane.b32.xlu0 %v18837_v10, %s10825_s22  ;;  %v18909_v48 = vpop.f32.mrb[121].mxu1  ;;  %v7501_v34 = vrot.slane %v18901_v27, 3 }
 0x890   : > { %v7700_v42 = vcombine.high %v18901_v27, %v18909_v48  ;;  %v7502_v19 = vrot.slane %v18909_v48, 3 }
 0x892   : > { %v18917_v60 = vrot.slane %v7700_v42, %v18789_v13 }
 0x893   : > { %7517 = vrot.lane.b32.xlu0 %v7493_v38, %s10826_s23  ;;  %7519 = vrot.lane.b32.xlu1 %v7494_v50, %s10826_s23 }
 0x897   : > { %7750 = vrot.lane.b32.xlu0 %v18851_v40, %s10823_s20  ;;  %7265 = vrot.lane.b32.xlu1 %v18851_v40, %s10824_s21 }
 0x89b   : > { %7392 = vrot.lane.b32.xlu1 %v18851_v40, %s10825_s22  ;;  %7267 = vrot.lane.b32.xlu0 %v18857_v39, %s10824_s21 }
 0x89f   : > { %7752 = vrot.lane.b32.xlu1 %v18857_v39, %s10823_s20  ;;  %7394 = vrot.lane.b32.xlu0 %v18857_v39, %s10825_s22 }
 0x8a3   : > { %7521 = vrot.lane.b32.xlu0 %v7495_v1, %s10826_s23  ;;  %7523 = vrot.lane.b32.xlu1 %v7496_v8, %s10826_s23 }
 0x8a7   : > { %7754 = vrot.lane.b32.xlu0 %v18865_v32, %s10823_s20  ;;  %7269 = vrot.lane.b32.xlu1 %v18865_v32, %s10824_s21 }
 0x8ab   : > { %7396 = vrot.lane.b32.xlu1 %v18865_v32, %s10825_s22  ;;  %7271 = vrot.lane.b32.xlu0 %v18873_v51, %s10824_s21 }
 0x8af   : > { %7756 = vrot.lane.b32.xlu1 %v18873_v51, %s10823_s20  ;;  %7398 = vrot.lane.b32.xlu0 %v18873_v51, %s10825_s22 }
 0x8b3   : > { %7525 = vrot.lane.b32.xlu0 %v7497_v6, %s10826_s23  ;;  %7527 = vrot.lane.b32.xlu1 %v7498_v28, %s10826_s23 }
 0x8b7   : > { %7758 = vrot.lane.b32.xlu0 %v18887_v35, %s10823_s20  ;;  %7273 = vrot.lane.b32.xlu1 %v18887_v35, %s10824_s21 }
 0x8bb   : > { %7400 = vrot.lane.b32.xlu1 %v18887_v35, %s10825_s22  ;;  %7275 = vrot.lane.b32.xlu0 %v18893_v31, %s10824_s21 }
 0x8bf   : > { %7760 = vrot.lane.b32.xlu1 %v18893_v31, %s10823_s20  ;;  %7402 = vrot.lane.b32.xlu0 %v18893_v31, %s10825_s22 }
 0x8c3   : > { %7529 = vrot.lane.b32.xlu0 %v7499_v37, %s10826_s23  ;;  %7531 = vrot.lane.b32.xlu1 %v7500_v54, %s10826_s23 }
 0x8c7   : > { %7762 = vrot.lane.b32.xlu0 %v18901_v27, %s10823_s20  ;;  %7277 = vrot.lane.b32.xlu1 %v18901_v27, %s10824_s21 }
 0x8c9   : > { %v7735_v25 = vpop.permute.xlu0 %7734  ;;  %v7250_v53 = vpop.permute.xlu1 %7249 }
 0x8cb   : > { %7404 = vrot.lane.b32.xlu1 %v18901_v27, %s10825_s22  ;;  %7279 = vrot.lane.b32.xlu0 %v18909_v48, %s10824_s21 }
 0x8cd   : > { %v7377_v16 = vpop.permute.xlu1 %7376  ;;  %v7252_v0 = vpop.permute.xlu0 %7251 }
 0x8cf   : > { %7764 = vrot.lane.b32.xlu1 %v18909_v48, %s10823_s20  ;;  %7533 = vrot.lane.b32.xlu0 %v7501_v34, %s10826_s23 }
 0x8d1   : > { %v7737_v63 = vpop.permute.xlu1 %7736  ;;  %v7379_v61 = vpop.permute.xlu0 %7378 }
 0x8d2   : > { %v7771_v36 = vsel %vm7770_vm4, %v7735_v25, %v7737_v63 }
 0x8d3   : > { %7535 = vrot.lane.b32.xlu1 %v7502_v19, %s10826_s23 }
 0x8d5   : > { %v7506_v41 = vpop.permute.xlu0 %7505  ;;  %v7508_v33 = vpop.permute.xlu1 %7507 }
 0x8d6   : > { %v7560_v12 = vsel %vm7541_vm3, 0.0, %v7506_v41  ;;  %v7542_v17 = vsel %vm7541_vm3, %v7506_v41, %v7508_v33  ;;  %v7322_v41 = vrot.slane %v18772_v58, 1 }
 0x8d7   : > { %v7562_v26 = vcombine.low %v7560_v12, %v7542_v17  ;;  %v7323_v17 = vrot.slane %v18778_v11, 1  ;;  %v19030_v11 = vsub.s32 2, %v18780_v45 }
 0x8d9   : > { %v7739_v47 = vpop.permute.xlu0 %7738  ;;  %v7254_v23 = vpop.permute.xlu1 %7253  ;;  %v7570_v50 = vrot.slane %v7562_v26, %v18789_v13  ;;  %v7324_v26 = vrot.slane %v18793_v44, 1  ;;  %v7286_v44 = vsel %vm7285_vm6, %v7250_v53, %v7252_v0 }
 0x8da   : > { %v7772_v62 = vsel %vm7770_vm4, %v7737_v63, %v7739_v47  ;;  %v7226_v63 = vld [vmem:[%s19338_s10] sm:$0xff] }
 0x8db   : > { %v7791_v42 = vcombine.high %v7771_v36, %v7772_v62 }
 0x8dd   : > { %v7381_v46 = vpop.permute.xlu1 %7380  ;;  %v18987_v21 = vpop.permute.xlu0 %7255  ;;  %v7799_v25 = vrot.slane %v7791_v42, %v18789_v13  ;;  %v19027_v42 = vsub.s32 0, %v18780_v45 }
 0x8de   : > { %v7414_v36 = vsel %vm7412_vm5, %v7379_v61, %v7381_v46 }
 0x8e1   : > { %v7741_v7 = vpop.permute.xlu1 %7740  ;;  %v7383_v52 = vpop.permute.xlu0 %7382 }
 0x8e2   : > { %v7773_v8 = vsel %vm7770_vm4, %v7739_v47, %v7741_v7  ;;  %v7415_v62 = vsel %vm7412_vm5, %v7381_v46, %v7383_v52 }
 0x8e5   : > { %v7510_v5 = vpop.permute.xlu0 %7509  ;;  %v18993_v43 = vpop.permute.xlu1 %7511 }
 0x8e6   : > { %v7543_v9 = vsel %vm7541_vm3, %v7508_v33, %v7510_v5  ;;  %v7544_v38 = vsel %vm7541_vm3, %v7510_v5, %v18993_v43 }
 0x8e7   : > { %v7563_v1 = vcombine.low %v7543_v9, %v7544_v38  ;;  %v7321_v38 = vsel %vm7285_vm6, 0.0, %v7250_v53  ;;  %v19042_v53 = vsub.s32 4, %v18780_v45 }
 0x8e9   : > { %v7577_v6 = vrot.slane %v7563_v1, %v18789_v13  ;;  %v19001_v28 = vpop.permute.xlu0 %7742  ;;  %v19003_v37 = vpop.permute.xlu1 %7257 }
 0x8ea   : > { %v7774_v54 = vsel %vm7770_vm4, %v7741_v7, %v19001_v28  ;;  %v7413_v7 = vsel %vm7412_vm5, %v7377_v16, %v7379_v61  ;;  %v7287_v16 = vsel %vm7285_vm6, %v7252_v0, %v7254_v23  ;;  %v7288_v61 = vsel %vm7285_vm6, %v7254_v23, %v18987_v21 }
 0x8eb   : > { %v7578_v34 = vcombine.low %v7570_v50, %v7577_v6  ;;  %v7792_v19 = vcombine.high %v7773_v8, %v7774_v54  ;;  %v7325_v50 = vrot.slane %v18801_v49, 1  ;;  %v7433_v8 = vrot.slane %v7413_v7, 2 }
 0x8ec   : > { %v7434_v6 = vrot.slane %v7414_v36, 2  ;;  %v7435_v49 = vrot.slane %v7415_v62, 2  ;;  %v19045_v0 = vsub.s32 6, %v18780_v45  ;;  %v7358_v23 = vadd.f32 %v7322_v41, %v7321_v38 }
 0x8ed   : > { %v7806_v33 = vrot.slane %v7792_v19, %v18789_v13  ;;  %v19013_v47 = vpop.permute.xlu1 %7384  ;;  %v19015_v12 = vpop.permute.xlu0 %7259  ;;  %v7643_v5 = vmul.f32 %v7578_v34, %v7226_v63  ;;  %v7359_v19 = vadd.f32 %v7323_v17, %v7286_v44 }
 0x8ee   : > { %v7416_v58 = vsel %vm7412_vm5, %v7383_v52, %v19013_v47  ;;  %v7469_v62 = vadd.f32 %v7433_v8, %v7358_v23 }
 0x8ef   : > { %v7807_v9 = vcombine.low %v7799_v25, %v7806_v33  ;;  %v7436_v54 = vrot.slane %v7416_v58, 2  ;;  %v7729_v25 = vadd.f32 %v7664_v14, %v7643_v5  ;;  %v7361_v33 = vadd.f32 %v7325_v50, %v7288_v61 }
 0x8f0   : > { %v7470_v58 = vadd.f32 %v7434_v6, %v7359_v19 }
 0x8f1   : > { %v7872_v46 = vmul.f32 %v7807_v9, %v7226_v63  ;;  %v7745_v1 = vpop.permute.xlu1 %7744  ;;  %v19036_v52 = vpop.permute.xlu0 %7386  ;;  %v7360_v63 = vadd.f32 %v7324_v26, %v7287_v16  ;;  %v7472_v3 = vadd.f32 %v7436_v54, %v7361_v33 }
 0x8f3   : > { %v8261_v34 = vrot.slane %v7872_v46, 9  ;;  %v7471_v20 = vadd.f32 %v7435_v49, %v7360_v63 }
 0x8f5   : > { %v7897_v9 = vadd.f32 %v8261_v34, %v7729_v25  ;;  %v7514_v7 = vpop.permute.xlu0 %7513  ;;  %v7516_v36 = vpop.permute.xlu1 %7515 }
 0x8f6   : > { %v7545_v19 = vsel %vm7541_vm3, %v18993_v43, %v7514_v7  ;;  %v7546_v63 = vsel %vm7541_vm3, %v7514_v7, %v7516_v36 }
 0x8f7   : > { %v7910_v56 = vrot.slane %v7897_v9, %v19027_v42  ;;  %v7914_v14 = vrot.slane %v7897_v9, %v19030_v11  ;;  %v7918_v45 = vrot.slane %v7897_v9, %v19042_v53  ;;  %v7922_v41 = vrot.slane %v7897_v9, %v19045_v0 }
 0x8f9   : > { %v7998_v17 = vsel %vm7997_vm7, %v7469_v62, %v7910_v56  ;;  %v7999_v26 = vsel %vm7997_vm7, %v7470_v58, %v7914_v14  ;;  %v8000_v5 = vsel %vm7997_vm7, %v7471_v20, %v7918_v45  ;;  %v8001_v38 = vsel %vm7997_vm7, %v7472_v3, %v7922_v41  ;;  %v7747_v50 = vpop.permute.xlu0 %7746  ;;  %v7262_v44 = vpop.permute.xlu1 %7261 }
 0x8fa   : > { %v8022_v16 = vadd.f32 %v18971_v2, %v7998_v17  ;;  %v8023_v61 = vadd.f32 %v18971_v2, %v7999_v26  ;;  %v8024_v46 = vadd.f32 %v18971_v2, %v8000_v5  ;;  %v8025_v8 = vadd.f32 %v18971_v2, %v8001_v38 }
 0x8fb   : > { %v7579_v62 = vcombine.low %v7545_v19, %v7546_v63  ;;  %v7775_v58 = vsel %vm7770_vm4, %v19001_v28, %v7745_v1  ;;  %v7776_v3 = vsel %vm7770_vm4, %v7745_v1, %v7747_v50 }
 0x8fc   : > { %v8058_v6 = vcombine.low %v8022_v16, %v8023_v61  ;;  %v8059_v49 = vcombine.low %v8024_v46, %v8025_v8  ;;  %v7808_v7 = vcombine.high %v7775_v58, %v7776_v3  ;;  %v7227_v46 = vld [vmem:[%s19338_s10 + $0x8] sm:$0xff]  ;;  %v7328_v58 = vrot.slane %v18829_v15, 1 }
 0x8fd   : > { %v7389_v54 = vpop.permute.xlu1 %7388  ;;  %v19060_v25 = vpop.permute.xlu0 %7263  ;;  %v7587_v43 = vrot.slane %v7579_v62, %v18789_v13  ;;  %v7289_v62 = vsel %vm7285_vm6, %v18987_v21, %v19003_v37 }
 0x8fe   : > { %v8066_v20 = vrot.slane %v8058_v6, %v18789_v13  ;;  %v8073_v34 = vrot.slane %v8059_v49, %v18789_v13  ;;  %v7326_v49 = vrot.slane %v18815_v57, 1  ;;  %v7327_v57 = vrot.slane %v18821_v22, 1 }
 0x900   : > { %v8074_v23 = vcombine.low %v8066_v20, %v8073_v34  ;;  %v7417_v20 = vsel %vm7412_vm5, %v19013_v47, %v19036_v52  ;;  %v7418_v34 = vsel %vm7412_vm5, %v19036_v52, %v7389_v54  ;;  %v7329_v47 = vrot.slane %v18837_v10, 1 }
 0x901   : > { %v7749_v33 = vpop.permute.xlu1 %7748  ;;  %v7391_v9 = vpop.permute.xlu0 %7390  ;;  %v7290_v52 = vsel %vm7285_vm6, %v19003_v37, %v19015_v12  ;;  %v7437_v21 = vrot.slane %v7417_v20, 2  ;;  %v7438_v22 = vrot.slane %v7418_v34, 2  ;;  %v7362_v37 = vadd.f32 %v7326_v49, %v7289_v62 }
 0x902   : > { %8139 = vst [vmem:[%s19067_s29] sm:$0xff] %v8074_v23  ;;  %v7777_v26 = vsel %vm7770_vm4, %v7747_v50, %v7749_v33  ;;  %v7419_v23 = vsel %vm7412_vm5, %v7389_v54, %v7391_v9  ;;  %v7291_v54 = vsel %vm7285_vm6, %v19015_v12, %v7262_v44 }
 0x905   : > { %v7518_v56 = vpop.permute.xlu0 %7517  ;;  %v19076_v14 = vpop.permute.xlu1 %7519 }
 0x906   : > { %v7547_v45 = vsel %vm7541_vm3, %v7516_v36, %v7518_v56  ;;  %v7548_v41 = vsel %vm7541_vm3, %v7518_v56, %v19076_v14  ;;  %v7816_v36 = vrot.slane %v7808_v7, %v18789_v13  ;;  %v7363_v7 = vadd.f32 %v7327_v57, %v7290_v52 }
 0x907   : > { %v7580_v17 = vcombine.low %v7547_v45, %v7548_v41  ;;  %v7439_v41 = vrot.slane %v7419_v23, 2 }
 0x909   : > { %v7594_v5 = vrot.slane %v7580_v17, %v18789_v13  ;;  %v19084_v38 = vpop.permute.xlu0 %7750  ;;  %v19086_v28 = vpop.permute.xlu1 %7265  ;;  %v7364_v17 = vadd.f32 %v7328_v58, %v7291_v54 }
 0x90a   : > { %v7778_v1 = vsel %vm7770_vm4, %v7749_v33, %v19084_v38 }
 0x90b   : > { %v7595_v16 = vcombine.low %v7587_v43, %v7594_v5  ;;  %v7809_v61 = vcombine.high %v7777_v26, %v7778_v1  ;;  %v7473_v1 = vadd.f32 %v7437_v21, %v7362_v37 }
 0x90d   : > { %v7823_v8 = vrot.slane %v7809_v61, %v18789_v13  ;;  %v19095_v50 = vpop.permute.xlu1 %7392  ;;  %v19097_v6 = vpop.permute.xlu0 %7267  ;;  %v7644_v19 = vmul.f32 %v7595_v16, %v7227_v46  ;;  %v7475_v16 = vadd.f32 %v7439_v41, %v7364_v17 }
 0x90e   : > { %v7420_v33 = vsel %vm7412_vm5, %v7391_v9, %v19095_v50  ;;  %v7292_v9 = vsel %vm7285_vm6, %v7262_v44, %v19060_v25 }
 0x90f   : > { %v7824_v63 = vcombine.low %v7816_v36, %v7823_v8  ;;  %v7440_v15 = vrot.slane %v7420_v33, 2  ;;  %v7730_v10 = vadd.f32 %v7681_v55, %v7644_v19  ;;  %v7365_v12 = vadd.f32 %v7329_v47, %v7292_v9 }
 0x910   : > { %v7474_v36 = vadd.f32 %v7438_v22, %v7363_v7 }
 0x911   : > { %v7873_v3 = vmul.f32 %v7824_v63, %v7227_v46  ;;  %v7753_v56 = vpop.permute.xlu1 %7752  ;;  %v19121_v45 = vpop.permute.xlu0 %7394  ;;  %v7476_v61 = vadd.f32 %v7440_v15, %v7365_v12 }
 0x912   : > { %v7779_v37 = vsel %vm7770_vm4, %v19084_v38, %v7753_v56 }
 0x913   : > { %v8262_v43 = vrot.slane %v7873_v3, 9 }
 0x915   : > { %v7898_v26 = vadd.f32 %v8262_v43, %v7730_v10  ;;  %v7522_v5 = vpop.permute.xlu0 %7521  ;;  %v7524_v44 = vpop.permute.xlu1 %7523 }
 0x916   : > { %v7549_v22 = vsel %vm7541_vm3, %v19076_v14, %v7522_v5  ;;  %v7550_v41 = vsel %vm7541_vm3, %v7522_v5, %v7524_v44 }
 0x917   : > { %v7926_v46 = vrot.slane %v7898_v26, %v19027_v42  ;;  %v7930_v8 = vrot.slane %v7898_v26, %v19030_v11  ;;  %v7934_v20 = vrot.slane %v7898_v26, %v19042_v53  ;;  %v7938_v59 = vrot.slane %v7898_v26, %v19045_v0 }
 0x918   : > { %v7596_v43 = vcombine.low %v7549_v22, %v7550_v41 }
 0x919   : > { %v8002_v4 = vsel %vm7997_vm7, %v7473_v1, %v7926_v46  ;;  %v8003_v55 = vsel %vm7997_vm7, %v7474_v36, %v7930_v8  ;;  %v8004_v49 = vsel %vm7997_vm7, %v7475_v16, %v7934_v20  ;;  %v8005_v34 = vsel %vm7997_vm7, %v7476_v61, %v7938_v59  ;;  %v7755_v23 = vpop.permute.xlu0 %7754  ;;  %v19134_v19 = vpop.permute.xlu1 %7269 }
 0x91a   : > { %v8026_v63 = vadd.f32 %v18971_v2, %v8002_v4  ;;  %v8027_v33 = vadd.f32 %v18971_v2, %v8003_v55  ;;  %v8028_v62 = vadd.f32 %v18971_v2, %v8004_v49  ;;  %v8029_v57 = vadd.f32 %v18971_v2, %v8005_v34 }
 0x91b   : > { %v7780_v7 = vsel %vm7770_vm4, %v7753_v56, %v7755_v23  ;;  %v7604_v14 = vrot.slane %v7596_v43, %v18789_v13  ;;  %v7334_v56 = vrot.slane %v18887_v35, 1  ;;  %v7330_v49 = vrot.slane %v18851_v40, 1 }
 0x91c   : > { %v8075_v58 = vcombine.low %v8026_v63, %v8027_v33  ;;  %v8076_v47 = vcombine.low %v8028_v62, %v8029_v57  ;;  %v7825_v5 = vcombine.high %v7779_v37, %v7780_v7  ;;  %v7331_v34 = vrot.slane %v18857_v39, 1 }
 0x91d   : > { %v7397_v52 = vpop.permute.xlu1 %7396  ;;  %v7272_v54 = vpop.permute.xlu0 %7271  ;;  %v7421_v35 = vsel %vm7412_vm5, %v19095_v50, %v19121_v45  ;;  %v7332_v63 = vrot.slane %v18865_v32, 1  ;;  %v7293_v40 = vsel %vm7285_vm6, %v19060_v25, %v19086_v28 }
 0x91e   : > { %v8083_v9 = vrot.slane %v8075_v58, %v18789_v13  ;;  %v8090_v3 = vrot.slane %v8076_v47, %v18789_v13  ;;  %v7833_v20 = vrot.slane %v7825_v5, %v18789_v13  ;;  %v7335_v58 = vrot.slane %v18893_v31, 1 }
 0x91f   : > { %v7422_v39 = vsel %vm7412_vm5, %v19121_v45, %v7397_v52  ;;  %v7294_v31 = vsel %vm7285_vm6, %v19086_v28, %v19097_v6  ;;  %v7441_v25 = vrot.slane %v7421_v35, 2  ;;  %v7295_v45 = vsel %vm7285_vm6, %v19097_v6, %v19134_v19 }
 0x920   : > { %v8091_v21 = vcombine.low %v8083_v9, %v8090_v3  ;;  %v7366_v6 = vadd.f32 %v7330_v49, %v7293_v40  ;;  %v7368_v5 = vadd.f32 %v7332_v63, %v7295_v45 }
 0x921   : > { %v7757_v15 = vpop.permute.xlu1 %7756  ;;  %v7399_v10 = vpop.permute.xlu0 %7398 }
 0x922   : > { %8140 = vst [vmem:[%s19067_s29 + $0x8] sm:$0xff] %v8091_v21  ;;  %v7781_v16 = vsel %vm7770_vm4, %v7755_v23, %v7757_v15  ;;  %v7228_v23 = vld [vmem:[%s19338_s10 + $0x10] sm:$0xff]  ;;  %v7423_v47 = vsel %vm7412_vm5, %v7397_v52, %v7399_v10  ;;  %v7333_v52 = vrot.slane %v18873_v51, 1 }
 0x923   : > { %v7443_v7 = vrot.slane %v7423_v47, 2 }
 0x925   : > { %v7526_v17 = vpop.permute.xlu0 %7525  ;;  %v19149_v12 = vpop.permute.xlu1 %7527 }
 0x926   : > { %v7551_v26 = vsel %vm7541_vm3, %v7524_v44, %v7526_v17  ;;  %v7552_v1 = vsel %vm7541_vm3, %v7526_v17, %v19149_v12 }
 0x927   : > { %v7597_v36 = vcombine.low %v7551_v26, %v7552_v1  ;;  %v7367_v1 = vadd.f32 %v7331_v34, %v7294_v31 }
 0x929   : > { %v7611_v61 = vrot.slane %v7597_v36, %v18789_v13  ;;  %v19157_v46 = vpop.permute.xlu0 %7758  ;;  %v7274_v38 = vpop.permute.xlu1 %7273 }
 0x92a   : > { %v7782_v8 = vsel %vm7770_vm4, %v7757_v15, %v19157_v46  ;;  %v7297_v44 = vsel %vm7285_vm6, %v7272_v54, %v7274_v38  ;;  %v7442_v15 = vrot.slane %v7422_v39, 2 }
 0x92b   : > { %v7612_v59 = vcombine.low %v7604_v14, %v7611_v61  ;;  %v7826_v4 = vcombine.high %v7781_v16, %v7782_v8  ;;  %v7370_v55 = vadd.f32 %v7334_v56, %v7297_v44  ;;  %v7477_v16 = vadd.f32 %v7441_v25, %v7366_v6 }
 0x92c   : > { %v7478_v61 = vadd.f32 %v7442_v15, %v7367_v1 }
 0x92d   : > { %v7840_v33 = vrot.slane %v7826_v4, %v18789_v13  ;;  %v7401_v62 = vpop.permute.xlu1 %7400  ;;  %v19174_v57 = vpop.permute.xlu0 %7275  ;;  %v7645_v32 = vmul.f32 %v7612_v59, %v7228_v23 }
 0x92e   : > { %v7298_v50 = vsel %vm7285_vm6, %v7274_v38, %v19174_v57  ;;  %v7424_v3 = vsel %vm7412_vm5, %v7399_v10, %v7401_v62  ;;  %v7296_v10 = vsel %vm7285_vm6, %v19134_v19, %v7272_v54 }
 0x92f   : > { %v7841_v9 = vcombine.low %v7833_v20, %v7840_v33  ;;  %v19186_v21 = vadd.f32 %v7335_v58, %v7298_v50  ;;  %v19188_v22 = vpop.f32.mrb[122].mxu1  ;;  %v7444_v17 = vrot.slane %v7424_v3, 2  ;;  %v7731_v14 = vadd.f32 %v7698_v29, %v7645_v32 }
 0x930   : > { %7766 = vrot.lane.b32.xlu0 %v19188_v22, %s10823_s20  ;;  %7281 = vrot.lane.b32.xlu1 %v19188_v22, %s10824_s21  ;;  %v19201_v41 = vpop.f32.mrb[123].mxu1  ;;  %v7369_v36 = vadd.f32 %v7333_v52, %v7296_v10  ;;  %v7479_v20 = vadd.f32 %v7443_v7, %v7368_v5  ;;  %v7503_v24 = vrot.slane %v19188_v22, 3 }
 0x931   : > { %v7874_v28 = vmul.f32 %v7841_v9, %v7228_v23  ;;  %v19205_v43 = vpop.permute.xlu1 %7760  ;;  %v19207_v37 = vpop.permute.xlu0 %7402  ;;  %v7716_v51 = vcombine.high %v19188_v22, %v19201_v41  ;;  %v7504_v29 = vrot.slane %v19201_v41, 3 }
 0x932   : > { %v7425_v26 = vsel %vm7412_vm5, %v7401_v62, %v19207_v37  ;;  %v7480_v18 = vadd.f32 %v7444_v17, %v7369_v36  ;;  %v19437_v36 = vcombine.low %v18914_v30, %v18917_v60 }
 0x933   : > { %v8263_v19 = vrot.slane %v7874_v28, 9  ;;  %v7445_v54 = vrot.slane %v7425_v26, 2 }
 0x934   : > { %7768 = vrot.lane.b32.xlu1 %v19201_v41, %s10823_s20  ;;  %7283 = vrot.lane.b32.xlu0 %v19201_v41, %s10824_s21 }
 0x935   : > { %v7899_v38 = vadd.f32 %v8263_v19, %v7731_v14  ;;  %v19220_v56 = vadd.f32 %v7445_v54, %v7370_v55  ;;  %v7530_v8 = vpop.permute.xlu0 %7529  ;;  %v7532_v44 = vpop.permute.xlu1 %7531 }
 0x936   : > { %v7553_v52 = vsel %vm7541_vm3, %v19149_v12, %v7530_v8  ;;  %v7554_v15 = vsel %vm7541_vm3, %v7530_v8, %v7532_v44  ;;  %v7229_v12 = vld [vmem:[%s19338_s10 + $0x18] sm:$0xff] }
 0x937   : > { %v7942_v59 = vrot.slane %v7899_v38, %v19027_v42  ;;  %v7946_v4 = vrot.slane %v7899_v38, %v19030_v11  ;;  %v7950_v49 = vrot.slane %v7899_v38, %v19042_v53  ;;  %v7954_v34 = vrot.slane %v7899_v38, %v19045_v0 }
 0x938   : > { %7537 = vrot.lane.b32.xlu1 %v7503_v24, %s10826_s23  ;;  %7539 = vrot.lane.b32.xlu0 %v7504_v29, %s10826_s23  ;;  %v7613_v6 = vcombine.low %v7553_v52, %v7554_v15  ;;  %v7339_v15 = vrot.slane %v19201_v41, 1 }
 0x939   : > { %v8006_v55 = vsel %vm7997_vm7, %v7477_v16, %v7942_v59  ;;  %v8007_v23 = vsel %vm7997_vm7, %v7478_v61, %v7946_v4  ;;  %v8008_v35 = vsel %vm7997_vm7, %v7479_v20, %v7950_v49  ;;  %v8009_v63 = vsel %vm7997_vm7, %v7480_v18, %v7954_v34  ;;  %v7763_v33 = vpop.permute.xlu0 %7762  ;;  %v7278_v62 = vpop.permute.xlu1 %7277 }
 0x93a   : > { %v8030_v58 = vadd.f32 %v18971_v2, %v8006_v55  ;;  %v8031_v40 = vadd.f32 %v18971_v2, %v8007_v23  ;;  %v8032_v39 = vadd.f32 %v18971_v2, %v8008_v35  ;;  %v8033_v47 = vadd.f32 %v18971_v2, %v8009_v63  ;;  %v7230_v35 = vld [vmem:[%s19338_s10 + $0x20] sm:$0xf] }
 0x93b   : > { %v7621_v1 = vrot.slane %v7613_v6, %v18789_v13  ;;  %v7783_v61 = vsel %vm7770_vm4, %v19157_v46, %v19205_v43  ;;  %v7784_v38 = vsel %vm7770_vm4, %v19205_v43, %v7763_v33  ;;  %v7336_v23 = vrot.slane %v18901_v27, 1 }
 0x93c   : > { %v8092_v50 = vcombine.low %v8030_v58, %v8031_v40  ;;  %v8093_v32 = vcombine.low %v8032_v39, %v8033_v47  ;;  %7406 = vrot.lane.b32.xlu1 %v18909_v48, %s10825_s22  ;;  %7408 = vrot.lane.b32.xlu0 %v19188_v22, %s10825_s22  ;;  %v7842_v8 = vcombine.high %v7783_v61, %v7784_v38 }
 0x93d   : > { %v19242_v9 = vpop.permute.xlu1 %7404  ;;  %v7280_v3 = vpop.permute.xlu0 %7279  ;;  %v7299_v63 = vsel %vm7285_vm6, %v19174_v57, %v7278_v62  ;;  %v7338_v57 = vrot.slane %v19188_v22, 1 }
 0x93e   : > { %v8100_v31 = vrot.slane %v8092_v50, %v18789_v13  ;;  %v8107_v25 = vrot.slane %v8093_v32, %v18789_v13  ;;  %v7850_v59 = vrot.slane %v7842_v8, %v18789_v13  ;;  %v7426_v43 = vsel %vm7412_vm5, %v19207_v37, %v19242_v9 }
 0x93f   : > { %v7446_v50 = vrot.slane %v7426_v43, 2  ;;  %v7300_v37 = vsel %vm7285_vm6, %v7278_v62, %v7280_v3 }
 0x940   : > { %v8108_v45 = vcombine.low %v8100_v31, %v8107_v25  ;;  %7410 = vrot.lane.b32.xlu1 %v19201_v41, %s10825_s22 }
 0x941   : > { %v7765_v10 = vpop.permute.xlu1 %7764  ;;  %v7534_v28 = vpop.permute.xlu0 %7533 }
 0x942   : > { %8141 = vst [vmem:[%s19067_s29 + $0x10] sm:$0xff] %v8108_v45  ;;  %v7555_v7 = vsel %vm7541_vm3, %v7532_v44, %v7534_v28  ;;  %v7785_v18 = vsel %vm7770_vm4, %v7763_v33, %v7765_v10  ;;  %v7337_v33 = vrot.slane %v18909_v48, 1  ;;  %v7723_v48 = vrot.slane %v7716_v51, %v18789_v13 }
 0x944   : > { %v7373_v62 = vadd.f32 %v7337_v33, %v7300_v37 }
 0x945   : > { %v7536_v17 = vpop.permute.xlu1 %7535 }
 0x946   : > { %v7556_v26 = vsel %vm7541_vm3, %v7534_v28, %v7536_v17 }
 0x947   : > { %v7614_v14 = vcombine.low %v7555_v7, %v7556_v26 }
 0x949   : > { %v7628_v19 = vrot.slane %v7614_v14, %v18789_v13 }
 0x94b   : > { %v7629_v54 = vcombine.low %v7621_v1, %v7628_v19 }
 0x94d   : > { %v7646_v5 = vmul.f32 %v7629_v54, %v7229_v12 }
 0x94f   : > { %v7732_v16 = vadd.f32 %v19437_v36, %v7646_v5 }
 0x9a2   : > { %v7767_v44 = vpop.permute.xlu0 %7766  ;;  %v7282_v20 = vpop.permute.xlu1 %7281 }
 0x9a3   : > { %v7786_v24 = vsel %vm7770_vm4, %v7765_v10, %v7767_v44  ;;  %v7301_v25 = vsel %vm7285_vm6, %v7280_v3, %v7282_v20  ;;  %v7372_v10 = vadd.f32 %v7336_v23, %v7299_v63 }
 0x9a4   : > { %v7843_v29 = vcombine.high %v7785_v18, %v7786_v24  ;;  %v7374_v3 = vadd.f32 %v7338_v57, %v7301_v25 }
 0x9a6   : > { %v7857_v30 = vrot.slane %v7843_v29, %v18789_v13  ;;  %v7769_v60 = vpop.permute.xlu1 %7768  ;;  %v7284_v4 = vpop.permute.xlu0 %7283 }
 0x9a7   : > { %v7787_v49 = vsel %vm7770_vm4, %v7767_v44, %v7769_v60  ;;  %v7789_v46 = vsel %vm7770_vm4, %v7769_v60, 0.0  ;;  %v7302_v26 = vsel %vm7285_vm6, %v7282_v20, %v7284_v4 }
 0x9a8   : > { %v7858_v34 = vcombine.low %v7850_v59, %v7857_v30  ;;  %v7859_v55 = vcombine.high %v7787_v49, %v7789_v46  ;;  %v7375_v59 = vadd.f32 %v7339_v15, %v7302_v26 }
 0x9aa   : > { %v7875_v58 = vmul.f32 %v7858_v34, %v7229_v12  ;;  %v7866_v40 = vrot.slane %v7859_v55, %v18789_v13  ;;  %v7538_v39 = vpop.permute.xlu1 %7537  ;;  %v7540_v47 = vpop.permute.xlu0 %7539 }
 0x9ab   : > { %v7557_v32 = vsel %vm7541_vm3, %v7536_v17, %v7538_v39  ;;  %v7558_v27 = vsel %vm7541_vm3, %v7538_v39, %v7540_v47  ;;  %v7482_v17 = vadd.f32 %v7446_v50, %v19186_v21 }
 0x9ac   : > { %v8264_v31 = vrot.slane %v7875_v58, 9  ;;  %v7876_v45 = vmul.f32 %v7866_v40, %v7230_v35  ;;  %v7630_v52 = vcombine.low %v7557_v32, %v7558_v27 }
 0x9ae   : > { %v7900_v28 = vadd.f32 %v8264_v31, %v7732_v16  ;;  %v7637_v6 = vrot.slane %v7630_v52, %v18789_v13  ;;  %v7407_v7 = vpop.permute.xlu1 %7406  ;;  %v7409_v14 = vpop.permute.xlu0 %7408  ;;  %v8265_v41 = vrot.slane %v7876_v45, 9 }
 0x9af   : > { %v7427_v1 = vsel %vm7412_vm5, %v19242_v9, %v7407_v7  ;;  %v7428_v21 = vsel %vm7412_vm5, %v7407_v7, %v7409_v14 }
 0x9b0   : > { %v7958_v51 = vrot.slane %v7900_v28, %v19027_v42  ;;  %v7962_v22 = vrot.slane %v7900_v28, %v19030_v11  ;;  %v7647_v19 = vmul.f32 %v7637_v6, %v7230_v35  ;;  %v7966_v12 = vrot.slane %v7900_v28, %v19042_v53 }
 0x9b1   : > { %v7447_v54 = vrot.slane %v7427_v1, 2  ;;  %v7970_v5 = vrot.slane %v7900_v28, %v19045_v0  ;;  %v7448_v61 = vrot.slane %v7428_v21, 2 }
 0x9b2   : > { %v7733_v36 = vadd.f32 %v7723_v48, %v7647_v19  ;;  %v8010_v16 = vsel %vm7997_vm7, %v19220_v56, %v7958_v51  ;;  %v8011_v9 = vsel %vm7997_vm7, %v7482_v17, %v7962_v22  ;;  %v7411_v38 = vpop.permute.xlu1 %7410 }
 0x9b3   : > { %v7483_v8 = vadd.f32 %v7447_v54, %v7372_v10  ;;  %v8034_v44 = vadd.f32 %v18971_v2, %v8010_v16  ;;  %v8035_v20 = vadd.f32 %v18971_v2, %v8011_v9  ;;  %v7429_v53 = vsel %vm7412_vm5, %v7409_v14, %v7411_v38 }
 0x9b4   : > { %v7901_v18 = vadd.f32 %v8265_v41, %v7733_v36  ;;  %v7484_v24 = vadd.f32 %v7448_v61, %v7373_v62  ;;  %v7431_v0 = vsel %vm7412_vm5, %v7411_v38, 0.0  ;;  %v7449_v29 = vrot.slane %v7429_v53, 2 }
 0x9b5   : > { %v8012_v30 = vsel %vm7997_vm7, %v7483_v8, %v7966_v12  ;;  %v8109_v56 = vcombine.low %v8034_v44, %v8035_v20  ;;  %v7450_v60 = vrot.slane %v7431_v0, 2 }
 0x9b6   : > { %v7974_v4 = vrot.slane %v7901_v18, %v19027_v42  ;;  %v8036_v49 = vadd.f32 %v18971_v2, %v8012_v30  ;;  %v8013_v46 = vsel %vm7997_vm7, %v7484_v24, %v7970_v5  ;;  %v7485_v43 = vadd.f32 %v7449_v29, %v7374_v3 }
 0x9b7   : > { %v8037_v34 = vadd.f32 %v18971_v2, %v8013_v46  ;;  %v7486_v55 = vadd.f32 %v7450_v60, %v7375_v59  ;;  %v7978_v23 = vrot.slane %v7901_v18, %v19030_v11  ;;  %v8117_v40 = vrot.slane %v8109_v56, %v18789_v13 }
 0x9b8   : > { %v8014_v35 = vsel %vm7997_vm7, %v7485_v43, %v7974_v4 }
 0x9b9   : > { %v8110_v63 = vcombine.low %v8036_v49, %v8037_v34  ;;  %v8015_v33 = vsel %vm7997_vm7, %v7486_v55, %v7978_v23  ;;  %v8038_v58 = vadd.f32 %v18971_v2, %v8014_v35 }
 0x9ba   : > { %v8039_v42 = vadd.f32 %v18971_v2, %v8015_v33 }
 0x9bb   : > { %v8124_v39 = vrot.slane %v8110_v63, %v18789_v13 }
 0x9bc   : > { %v8126_v47 = vcombine.low %v8038_v58, %v8039_v42 }
 0x9bd   : > { %v8125_v50 = vcombine.low %v8117_v40, %v8124_v39 }
 0x9be   : > { %8266 = vst.sshfl [vmem:[%s19067_s29 + $0x20] sm:$0x33 pattern:$0x76325410] %v8126_v47 }
 0x9bf   : > { %8142 = vst [vmem:[%s19067_s29 + $0x18] sm:$0xff] %v8125_v50 }
 0x9c0 PF: > { %s21_s17 = sadd.s32 1, %s10818_s17  }
 0x9c1   : > { %p18_p4 = scmp.ge.s32.totalorder %s21_s17, 4  }
 0x9c3   :  { %20 = sbr.rel (!%p18_p4) target bundleno = 1 (0x1), region = 94 }

</bundles_post_ra>
